<compile_context>
chip_gen: v7x
topology: tpu7x:2x2x1
jax: 0.10.0
libtpu: 0.0.40
codegen_flags: <defaults>
</compile_context>

<pallas_src>
import functools

import jax
import jax.numpy as jnp
import numpy as np
from jax import lax
from jax.experimental import pallas as pl
from jax.experimental.pallas import tpu as pltpu


def _round_up(x, m):
    return ((x + m - 1) // m) * m


def _largest_aligned_divisor(n, target, lane=128):
    """Largest multiple of `lane` that divides n and is <= target (None if n % lane)."""
    if n % lane != 0:
        return None
    m = n // lane
    limit = max(int(target) // lane, 1)
    best = 1
    d = 1
    while d * d <= m:
        if m % d == 0:
            for cand in (d, m // d):
                if cand <= limit and cand > best:
                    best = cand
        d += 1
    return best * lane


def _scatter_kernel(blk_ref, starts_ref, *refs, n_chunks, k_sub, ts_inner,
                    p_tile, num_batch_tiles, s_fold, cdtype):
    """Writes one (C, ts_out) output tile for grid point (spatial tile t, batch b).

    blk_ref    : SMEM (B, T) int32 -- first pillar chunk (block idx) of the tile.
    starts_ref : SMEM (B*T*k_sub + 1,) int32 -- sorted-pillar span boundaries of
                 every spatial sub-tile (exact searchsorted results).
    refs       : n_chunks x (1, p_tile) int32 sorted cell indices,
                 n_chunks x (C, p_tile) sorted features, out (C, ts_out),
                 acc scratch (C, ts_inner) f32.
    """
    g_refs = refs[:n_chunks]
    f_refs = refs[n_chunks:2 * n_chunks]
    out_ref = refs[2 * n_chunks]
    acc_ref = refs[2 * n_chunks + 1]

    t = pl.program_id(0)                      # spatial out-tile (outermost -> v7x TC sharding)
    b = pl.program_id(1)                      # batch sample
    ts_out = k_sub * ts_inner
    m0 = (b * num_batch_tiles + t) * k_sub    # flat index of the first sub-tile
    blk0 = blk_ref[b, t]                      # first pillar chunk needed by this tile
    tile_base = b * s_fold + t * ts_out       # first global cell covered by this tile

    # Hoisted, small iota: (ts_inner, 1).  The `==` below broadcasts it against
    # the (1, p_tile) local indices -- no (ts, p_tile) int32 iota is built.
    row = lax.broadcasted_iota(jnp.int32, (ts_inner, 1), 0)

    for j in range(k_sub):                    # static, unrolled
        sub_lo = starts_ref[m0 + j]           # pillar run of this sub-tile
        sub_hi = starts_ref[m0 + j + 1]
        base = tile_base + j * ts_inner
        acc_ref[...] = jnp.zeros_like(acc_ref)

        for c in range(n_chunks):             # static, unrolled
            chunk_lo = (blk0 + c) * p_tile
            live = ((sub_lo < sub_hi)
                    & (chunk_lo < sub_hi)
                    & (chunk_lo + p_tile > sub_lo))

            @pl.when(live)
            def _(c=c, base=base):
                local = g_refs[c][...] - base                 # (1, p_tile) int32
                onehot_t = (row == local).astype(cdtype)      # (ts_inner, p_tile)
                # (C, ts_inner) = feats (C, p_tile) contracted over pillars.
                acc_ref[...] += lax.dot_general(
                    f_refs[c][...], onehot_t,
                    dimension_numbers=(((1,), (1,)), ((), ())),
                    preferred_element_type=jnp.float32)

        out_ref[:, j * ts_inner:(j + 1) * ts_inner] = acc_ref[...].astype(out_ref.dtype)


def pointpillar_scatter(pillar_features, coords, batch_size, grid_size,
                        num_bev_features=64, *, compute_dtype=jnp.bfloat16,
                        out_dtype=None, p_tile=256, ts_inner_target=256,
                        max_out_tile=2048):
    """JAX/Pallas equivalent of PointPillarScatter.forward (eval branch).

    compute_dtype=jnp.bfloat16 (default) feeds the MXU bf16 (features rounded to
    bf16, ~0.4% rel err); pass jnp.float32 for bit-level parity with PyTorch f32.
    out_dtype=jnp.bfloat16 halves output writeback bytes (useful on v5e) if the
    downstream BEV backbone accepts a bf16 canvas.
    """
    nx, ny, nz = grid_size
    assert nz == 1
    P, C = pillar_features.shape
    assert C == num_bev_features, "NUM_BEV_FEATURES must match pillar feature dim"
    S = nz * ny * nx
    B = int(batch_size)
    out_dtype = pillar_features.dtype if out_dtype is None else out_dtype

    # --- static tiling: prefer s_pad == S (kills the post-kernel crop copy) ---
    p_tile = max(128, _round_up(int(p_tile), 128))
    ts_out = _largest_aligned_divisor(S, max(int(max_out_tile), 128))
    if ts_out is None:
        # Odd grid (S % 128 != 0): pad the canvas + crop afterwards (slow path).
        ts_out = min(_round_up(S, 128), max(128, (int(max_out_tile) // 128) * 128))
    s_pad = _round_up(S, ts_out)
    ts_inner = _largest_aligned_divisor(ts_out, max(int(ts_inner_target), 128))
    k_sub = ts_out // ts_inner
    num_batch_tiles = s_pad // ts_out
    n_chunks = -(-ts_out // p_tile) + 1       # static coverage of <= ts_out pillars
    s_fold = s_pad                            # batch fold stride (== S on fast path)

    # --- wrapper prologue: sort pillars by batch-folded cell index -----------
    coords = coords.astype(jnp.int32)
    flat = coords[:, 1] + coords[:, 2] * nx + coords[:, 3]        # z + y*nx + x
    g = coords[:, 0] * s_fold + flat
    order = jnp.argsort(g)
    g_sorted = jnp.take(g, order)

    num_blocks = -(-P // p_tile) + n_chunks   # sentinel tail => blk0+c always valid
    p_pad = num_blocks * p_tile
    sentinel = jnp.int32(B * s_fold)          # maps into no tile / no row
    g_padded = jnp.concatenate(
        [g_sorted, jnp.full((p_pad - P,), sentinel, jnp.int32)])
    g_chunks = g_padded.reshape(num_blocks, 1, p_tile)            # lane-major

    # Gather sorted features directly into a lane-major (C, P_pad) slab
    # (cast first so the transpose moves half the bytes in the bf16 path).
    feats_t = jnp.take(pillar_features.astype(compute_dtype), order, axis=0).T
    feats_t = jnp.pad(feats_t, ((0, 0), (0, p_pad - P)))

    # --- exact per-sub-tile pillar spans + first chunk per tile (SMEM) -------
    num_sub = num_batch_tiles * k_sub
    bnd = (jnp.arange(B, dtype=jnp.int32)[:, None] * s_fold
           + jnp.arange(num_sub, dtype=jnp.int32)[None, :] * ts_inner).reshape(-1)
    bnd = jnp.concatenate([bnd, jnp.asarray([B * s_fold], jnp.int32)])
    starts = jnp.searchsorted(g_padded, bnd, side='left').astype(jnp.int32)
    blk_tbl = jnp.minimum(
        starts[:-1].reshape(B, num_batch_tiles, k_sub)[:, :, 0] // p_tile,
        num_blocks - n_chunks).astype(jnp.int32)

    kernel = functools.partial(
        _scatter_kernel, n_chunks=n_chunks, k_sub=k_sub, ts_inner=ts_inner,
        p_tile=p_tile, num_batch_tiles=num_batch_tiles, s_fold=s_fold,
        cdtype=compute_dtype)

    # VMEM budget sized from the actual working set (tiny), with headroom;
    # stays well under v7x's 64 MiB/TC.
    csz = jnp.dtype(compute_dtype).itemsize
    osz = jnp.dtype(out_dtype).itemsize
    work = (2 * n_chunks * (C * p_tile * csz + p_tile * 4)
            + 2 * C * ts_out * osz + C * ts_inner * 4)
    vmem_limit = int(min(max(4 * work, 16 << 20), 32 << 20))

    def _g_map(c):
        return lambda t, b, blk, st: (blk[b, t] + c, 0, 0)

    def _f_map(c):
        return lambda t, b, blk, st: (0, blk[b, t] + c)

    out = pl.pallas_call(
        kernel,
        out_shape=jax.ShapeDtypeStruct((B, C, s_pad), out_dtype),
        grid_spec=pltpu.PrefetchScalarGridSpec(
            num_scalar_prefetch=2,
            grid=(num_batch_tiles, B),
            in_specs=(
                [pl.BlockSpec((None, 1, p_tile), _g_map(c)) for c in range(n_chunks)]
                + [pl.BlockSpec((C, p_tile), _f_map(c)) for c in range(n_chunks)]),
            out_specs=pl.BlockSpec((None, C, ts_out),
                                   lambda t, b, blk, st: (b, 0, t)),
            scratch_shapes=[pltpu.VMEM((C, ts_inner), jnp.float32)]),
        compiler_params=pltpu.CompilerParams(
            dimension_semantics=("parallel", "parallel"),
            vmem_limit_bytes=vmem_limit),
    )(blk_tbl, starts, *([g_chunks] * n_chunks), *([feats_t] * n_chunks))

    if s_pad != S:                 # only the odd-grid fallback pays a crop copy
        out = out[:, :, :S]
    # (B, C, S) row-major == (B, C*nz, ny, nx): free view, matching torch .view()
    return out.reshape(B, num_bev_features * nz, ny, nx)


if __name__ == "__main__":
    key = jax.random.PRNGKey(0)

    def make_inputs(key, B, nx, ny, P_per, C):
        S = nx * ny
        k_feat, k_coord = jax.random.split(key)
        feats = jax.random.normal(k_feat, (B * P_per, C), dtype=jnp.float32)
        coords = []
        for b in range(B):
            kb = jax.random.fold_in(k_coord, b)
            flat = jax.random.permutation(kb, jnp.arange(S, dtype=jnp.int32))[:P_per]
            y = flat // nx
            x = flat % nx
            z = jnp.zeros_like(x)
            coords.append(jnp.stack([jnp.full_like(x, b), z, y, x], axis=1))
        return feats, jnp.concatenate(coords, 0).astype(jnp.int32)

    def reference(feats, coords, B, nx, ny, nz, C):
        feats = np.asarray(feats)
        coords = np.asarray(coords)
        S = nz * nx * ny
        out = []
        for b in range(B):
            canvas = np.zeros((C, S), np.float32)
            m = coords[:, 0] == b
            tc = coords[m]
            idx = (tc[:, 1] + tc[:, 2] * nx + tc[:, 3]).astype(np.int64)
            canvas[:, idx] = feats[m].T
            out.append(canvas)
        return np.stack(out, 0).reshape(B, C * nz, ny, nx)

    # --- main config: S = 768 (divisible by 128 -> no crop), default bf16 ----
    B, nx, ny, nz, C, P_per = 2, 16, 48, 1, 64, 96
    feats, coords = make_inputs(key, B, nx, ny, P_per, C)
    ref = reference(feats, coords, B, nx, ny, nz, C)

    out = pointpillar_scatter(feats, coords, B, (nx, ny, nz), num_bev_features=C)
    out = jax.block_until_ready(out)
    assert out.shape == (B, C, ny, nx) and out.dtype == feats.dtype
    np.testing.assert_allclose(np.asarray(out), ref, rtol=2e-2, atol=2e-2)

    # --- f32 parity path ------------------------------------------------------
    out32 = jax.block_until_ready(
        pointpillar_scatter(feats, coords, B, (nx, ny, nz), num_bev_features=C,
                            compute_dtype=jnp.float32))
    np.testing.assert_allclose(np.asarray(out32), ref, rtol=1e-5, atol=1e-5)

    # --- finer tiling (T>1, small chunks) + bf16 canvas (v5e bandwidth option)
    out_b = jax.block_until_ready(
        pointpillar_scatter(feats, coords, B, (nx, ny, nz), num_bev_features=C,
                            p_tile=128, ts_inner_target=128, max_out_tile=256,
                            out_dtype=jnp.bfloat16))
    np.testing.assert_allclose(np.asarray(out_b, dtype=np.float32), ref,
                               rtol=2e-2, atol=2e-2)

    # --- odd grid (S % 128 != 0) exercises the pad+crop fallback -------------
    B2, nx2, ny2, P2 = 2, 10, 10, 12
    feats2, coords2 = make_inputs(jax.random.PRNGKey(1), B2, nx2, ny2, P2, C)
    ref2 = reference(feats2, coords2, B2, nx2, ny2, 1, C)
    out2 = jax.block_until_ready(
        pointpillar_scatter(feats2, coords2, B2, (nx2, ny2, 1),
                            num_bev_features=C, compute_dtype=jnp.float32))
    np.testing.assert_allclose(np.asarray(out2), ref2, rtol=1e-5, atol=1e-5)

    print("KERNEL_OK")
</pallas_src>

<mosaic_0001>
module attributes {stable_mosaic.version = 11 : i64} {
  func.func @_scatter_kernel(%arg0: i32, %arg1: i32, %arg2: memref<2x1xi32, #tpu.memory_space<smem>>, %arg3: memref<7xi32, #tpu.memory_space<smem>>, %arg4: memref<1x1x256xi32, #tpu.memory_space<vmem>>, %arg5: memref<1x1x256xi32, #tpu.memory_space<vmem>>, %arg6: memref<1x1x256xi32, #tpu.memory_space<vmem>>, %arg7: memref<1x1x256xi32, #tpu.memory_space<vmem>>, %arg8: memref<64x256xbf16, #tpu.memory_space<vmem>>, %arg9: memref<64x256xbf16, #tpu.memory_space<vmem>>, %arg10: memref<64x256xbf16, #tpu.memory_space<vmem>>, %arg11: memref<64x256xbf16, #tpu.memory_space<vmem>>, %arg12: memref<1x64x768xf32, #tpu.memory_space<vmem>>, %arg13: memref<64x256xf32, #tpu.memory_space<vmem>>) attributes {dimension_semantics = [#tpu.dimension_semantics<parallel>, #tpu.dimension_semantics<parallel>], iteration_bounds = array<i64: 1, 2>, scalar_prefetch = 2 : i64, scratch_operands = 1 : i64, tpu.core_type = #tpu.core_type<tc>, window_params = [{transform_indices = @transform_0, window_bounds = array<i64: 1, 1, 256>}, {transform_indices = @transform_1, window_bounds = array<i64: 1, 1, 256>}, {transform_indices = @transform_2, window_bounds = array<i64: 1, 1, 256>}, {transform_indices = @transform_3, window_bounds = array<i64: 1, 1, 256>}, {transform_indices = @transform_4, window_bounds = array<i64: 64, 256>}, {transform_indices = @transform_5, window_bounds = array<i64: 64, 256>}, {transform_indices = @transform_6, window_bounds = array<i64: 64, 256>}, {transform_indices = @transform_7, window_bounds = array<i64: 64, 256>}, {transform_indices = @transform_8, window_bounds = array<i64: 1, 64, 768>}]} {
    %c1_i32 = arith.constant 1 : i32
    %0 = arith.muli %arg1, %c1_i32 : i32
    %1 = arith.addi %0, %arg0 : i32
    %c3_i32 = arith.constant 3 : i32
    %2 = arith.muli %1, %c3_i32 : i32
    %3 = arith.index_cast %arg1 : i32 to index
    %4 = arith.index_cast %arg0 : i32 to index
    %5 = memref.load %arg2[%3, %4] : memref<2x1xi32, #tpu.memory_space<smem>>
    %c768_i32 = arith.constant 768 : i32
    %6 = arith.muli %arg1, %c768_i32 : i32
    %c768_i32_0 = arith.constant 768 : i32
    %7 = arith.muli %arg0, %c768_i32_0 : i32
    %8 = arith.addi %6, %7 : i32
    %9 = tpu.iota {dimensions = array<i32: 0>} : vector<256x1xi32>
    %c0_i32 = arith.constant 0 : i32
    %10 = arith.addi %2, %c0_i32 : i32
    %11 = arith.index_cast %10 : i32 to index
    %12 = memref.load %arg3[%11] : memref<7xi32, #tpu.memory_space<smem>>
    %c0_i32_1 = arith.constant 0 : i32
    %13 = arith.addi %2, %c0_i32_1 : i32
    %c1_i32_2 = arith.constant 1 : i32
    %14 = arith.addi %13, %c1_i32_2 : i32
    %15 = arith.index_cast %14 : i32 to index
    %16 = memref.load %arg3[%15] : memref<7xi32, #tpu.memory_space<smem>>
    %c0_i32_3 = arith.constant 0 : i32
    %17 = arith.addi %8, %c0_i32_3 : i32
    %cst = arith.constant 0.000000e+00 : f32
    %18 = vector.broadcast %cst : f32 to vector<64x256xf32>
    %c0 = arith.constant 0 : index
    %c0_4 = arith.constant 0 : index
    %19 = vector.load %arg13[%c0, %c0_4] : memref<64x256xf32, #tpu.memory_space<vmem>>, vector<64x256xf32>
    tpu.vector_store %arg13[%c0, %c0_4], %18 {strides = array<i32>} : memref<64x256xf32, #tpu.memory_space<vmem>>, vector<64x256xf32>,
    %c0_i32_5 = arith.constant 0 : i32
    %20 = arith.addi %5, %c0_i32_5 : i32
    %c256_i32 = arith.constant 256 : i32
    %21 = arith.muli %20, %c256_i32 : i32
    %22 = arith.cmpi slt, %12, %16 : i32
    %23 = arith.cmpi slt, %21, %16 : i32
    %24 = arith.andi %22, %23 : i1
    %c256_i32_6 = arith.constant 256 : i32
    %25 = arith.addi %21, %c256_i32_6 : i32
    %26 = arith.cmpi sgt, %25, %12 : i32
    %27 = arith.andi %24, %26 : i1
    %28 = arith.extui %27 : i1 to i32
    %c0_i32_7 = arith.constant 0 : i32
    %29 = arith.cmpi ne, %28, %c0_i32_7 : i32
    scf.if %29 {
      %c0_77 = arith.constant 0 : index
      %c0_78 = arith.constant 0 : index
      %c0_79 = arith.constant 0 : index
      %172 = vector.load %arg4[%c0_77, %c0_78, %c0_79] : memref<1x1x256xi32, #tpu.memory_space<vmem>>, vector<1x1x256xi32>
      %173 = vector.shape_cast %172 : vector<1x1x256xi32> to vector<1x256xi32>
      %174 = vector.broadcast %17 : i32 to vector<1x256xi32>
      %175 = arith.subi %173, %174 : vector<1x256xi32>
      %176 = vector.broadcast %9 : vector<256x1xi32> to vector<256x256xi32>
      %177 = vector.broadcast %175 : vector<1x256xi32> to vector<256x256xi32>
      %178 = arith.cmpi eq, %176, %177 : vector<256x256xi32>
      %179 = arith.extui %178 : vector<256x256xi1> to vector<256x256xi32>
      %180 = arith.sitofp %179 : vector<256x256xi32> to vector<256x256xf32>
      %181 = arith.truncf %180 : vector<256x256xf32> to vector<256x256xbf16>
      %c0_80 = arith.constant 0 : index
      %c0_81 = arith.constant 0 : index
      %182 = vector.load %arg13[%c0_80, %c0_81] : memref<64x256xf32, #tpu.memory_space<vmem>>, vector<64x256xf32>
      %c0_82 = arith.constant 0 : index
      %c0_83 = arith.constant 0 : index
      %183 = vector.load %arg8[%c0_82, %c0_83] : memref<64x256xbf16, #tpu.memory_space<vmem>>, vector<64x256xbf16>
      %cst_84 = arith.constant dense<0.000000e+00> : vector<64x256xf32>
      %184 = tpu.matmul %183, %181, %cst_84 {dimension_numbers = #tpu.dot_dimension_numbers<[1], [1], [0], [0], [0, 0, 1, 0], [], []>} : vector<64x256xbf16>, vector<256x256xbf16>, vector<64x256xf32> -> vector<64x256xf32>
      %185 = arith.addf %182, %184 : vector<64x256xf32>
      %c0_85 = arith.constant 0 : index
      %c0_86 = arith.constant 0 : index
      %186 = vector.load %arg13[%c0_85, %c0_86] : memref<64x256xf32, #tpu.memory_space<vmem>>, vector<64x256xf32>
      tpu.vector_store %arg13[%c0_85, %c0_86], %185 {strides = array<i32>} : memref<64x256xf32, #tpu.memory_space<vmem>>, vector<64x256xf32>,
    } else {
    }
    %c1_i32_8 = arith.constant 1 : i32
    %30 = arith.addi %5, %c1_i32_8 : i32
    %c256_i32_9 = arith.constant 256 : i32
    %31 = arith.muli %30, %c256_i32_9 : i32
    %32 = arith.cmpi slt, %12, %16 : i32
    %33 = arith.cmpi slt, %31, %16 : i32
    %34 = arith.andi %32, %33 : i1
    %c256_i32_10 = arith.constant 256 : i32
    %35 = arith.addi %31, %c256_i32_10 : i32
    %36 = arith.cmpi sgt, %35, %12 : i32
    %37 = arith.andi %34, %36 : i1
    %38 = arith.extui %37 : i1 to i32
    %c0_i32_11 = arith.constant 0 : i32
    %39 = arith.cmpi ne, %38, %c0_i32_11 : i32
    scf.if %39 {
      %c0_77 = arith.constant 0 : index
      %c0_78 = arith.constant 0 : index
      %c0_79 = arith.constant 0 : index
      %172 = vector.load %arg5[%c0_77, %c0_78, %c0_79] : memref<1x1x256xi32, #tpu.memory_space<vmem>>, vector<1x1x256xi32>
      %173 = vector.shape_cast %172 : vector<1x1x256xi32> to vector<1x256xi32>
      %174 = vector.broadcast %17 : i32 to vector<1x256xi32>
      %175 = arith.subi %173, %174 : vector<1x256xi32>
      %176 = vector.broadcast %9 : vector<256x1xi32> to vector<256x256xi32>
      %177 = vector.broadcast %175 : vector<1x256xi32> to vector<256x256xi32>
      %178 = arith.cmpi eq, %176, %177 : vector<256x256xi32>
      %179 = arith.extui %178 : vector<256x256xi1> to vector<256x256xi32>
      %180 = arith.sitofp %179 : vector<256x256xi32> to vector<256x256xf32>
      %181 = arith.truncf %180 : vector<256x256xf32> to vector<256x256xbf16>
      %c0_80 = arith.constant 0 : index
      %c0_81 = arith.constant 0 : index
      %182 = vector.load %arg13[%c0_80, %c0_81] : memref<64x256xf32, #tpu.memory_space<vmem>>, vector<64x256xf32>
      %c0_82 = arith.constant 0 : index
      %c0_83 = arith.constant 0 : index
      %183 = vector.load %arg9[%c0_82, %c0_83] : memref<64x256xbf16, #tpu.memory_space<vmem>>, vector<64x256xbf16>
      %cst_84 = arith.constant dense<0.000000e+00> : vector<64x256xf32>
      %184 = tpu.matmul %183, %181, %cst_84 {dimension_numbers = #tpu.dot_dimension_numbers<[1], [1], [0], [0], [0, 0, 1, 0], [], []>} : vector<64x256xbf16>, vector<256x256xbf16>, vector<64x256xf32> -> vector<64x256xf32>
      %185 = arith.addf %182, %184 : vector<64x256xf32>
      %c0_85 = arith.constant 0 : index
      %c0_86 = arith.constant 0 : index
      %186 = vector.load %arg13[%c0_85, %c0_86] : memref<64x256xf32, #tpu.memory_space<vmem>>, vector<64x256xf32>
      tpu.vector_store %arg13[%c0_85, %c0_86], %185 {strides = array<i32>} : memref<64x256xf32, #tpu.memory_space<vmem>>, vector<64x256xf32>,
    } else {
    }
    %c2_i32 = arith.constant 2 : i32
    %40 = arith.addi %5, %c2_i32 : i32
    %c256_i32_12 = arith.constant 256 : i32
    %41 = arith.muli %40, %c256_i32_12 : i32
    %42 = arith.cmpi slt, %12, %16 : i32
    %43 = arith.cmpi slt, %41, %16 : i32
    %44 = arith.andi %42, %43 : i1
    %c256_i32_13 = arith.constant 256 : i32
    %45 = arith.addi %41, %c256_i32_13 : i32
    %46 = arith.cmpi sgt, %45, %12 : i32
    %47 = arith.andi %44, %46 : i1
    %48 = arith.extui %47 : i1 to i32
    %c0_i32_14 = arith.constant 0 : i32
    %49 = arith.cmpi ne, %48, %c0_i32_14 : i32
    scf.if %49 {
      %c0_77 = arith.constant 0 : index
      %c0_78 = arith.constant 0 : index
      %c0_79 = arith.constant 0 : index
      %172 = vector.load %arg6[%c0_77, %c0_78, %c0_79] : memref<1x1x256xi32, #tpu.memory_space<vmem>>, vector<1x1x256xi32>
      %173 = vector.shape_cast %172 : vector<1x1x256xi32> to vector<1x256xi32>
      %174 = vector.broadcast %17 : i32 to vector<1x256xi32>
      %175 = arith.subi %173, %174 : vector<1x256xi32>
      %176 = vector.broadcast %9 : vector<256x1xi32> to vector<256x256xi32>
      %177 = vector.broadcast %175 : vector<1x256xi32> to vector<256x256xi32>
      %178 = arith.cmpi eq, %176, %177 : vector<256x256xi32>
      %179 = arith.extui %178 : vector<256x256xi1> to vector<256x256xi32>
      %180 = arith.sitofp %179 : vector<256x256xi32> to vector<256x256xf32>
      %181 = arith.truncf %180 : vector<256x256xf32> to vector<256x256xbf16>
      %c0_80 = arith.constant 0 : index
      %c0_81 = arith.constant 0 : index
      %182 = vector.load %arg13[%c0_80, %c0_81] : memref<64x256xf32, #tpu.memory_space<vmem>>, vector<64x256xf32>
      %c0_82 = arith.constant 0 : index
      %c0_83 = arith.constant 0 : index
      %183 = vector.load %arg10[%c0_82, %c0_83] : memref<64x256xbf16, #tpu.memory_space<vmem>>, vector<64x256xbf16>
      %cst_84 = arith.constant dense<0.000000e+00> : vector<64x256xf32>
      %184 = tpu.matmul %183, %181, %cst_84 {dimension_numbers = #tpu.dot_dimension_numbers<[1], [1], [0], [0], [0, 0, 1, 0], [], []>} : vector<64x256xbf16>, vector<256x256xbf16>, vector<64x256xf32> -> vector<64x256xf32>
      %185 = arith.addf %182, %184 : vector<64x256xf32>
      %c0_85 = arith.constant 0 : index
      %c0_86 = arith.constant 0 : index
      %186 = vector.load %arg13[%c0_85, %c0_86] : memref<64x256xf32, #tpu.memory_space<vmem>>, vector<64x256xf32>
      tpu.vector_store %arg13[%c0_85, %c0_86], %185 {strides = array<i32>} : memref<64x256xf32, #tpu.memory_space<vmem>>, vector<64x256xf32>,
    } else {
    }
    %c3_i32_15 = arith.constant 3 : i32
    %50 = arith.addi %5, %c3_i32_15 : i32
    %c256_i32_16 = arith.constant 256 : i32
    %51 = arith.muli %50, %c256_i32_16 : i32
    %52 = arith.cmpi slt, %12, %16 : i32
    %53 = arith.cmpi slt, %51, %16 : i32
    %54 = arith.andi %52, %53 : i1
    %c256_i32_17 = arith.constant 256 : i32
    %55 = arith.addi %51, %c256_i32_17 : i32
    %56 = arith.cmpi sgt, %55, %12 : i32
    %57 = arith.andi %54, %56 : i1
    %58 = arith.extui %57 : i1 to i32
    %c0_i32_18 = arith.constant 0 : i32
    %59 = arith.cmpi ne, %58, %c0_i32_18 : i32
    scf.if %59 {
      %c0_77 = arith.constant 0 : index
      %c0_78 = arith.constant 0 : index
      %c0_79 = arith.constant 0 : index
      %172 = vector.load %arg7[%c0_77, %c0_78, %c0_79] : memref<1x1x256xi32, #tpu.memory_space<vmem>>, vector<1x1x256xi32>
      %173 = vector.shape_cast %172 : vector<1x1x256xi32> to vector<1x256xi32>
      %174 = vector.broadcast %17 : i32 to vector<1x256xi32>
      %175 = arith.subi %173, %174 : vector<1x256xi32>
      %176 = vector.broadcast %9 : vector<256x1xi32> to vector<256x256xi32>
      %177 = vector.broadcast %175 : vector<1x256xi32> to vector<256x256xi32>
      %178 = arith.cmpi eq, %176, %177 : vector<256x256xi32>
      %179 = arith.extui %178 : vector<256x256xi1> to vector<256x256xi32>
      %180 = arith.sitofp %179 : vector<256x256xi32> to vector<256x256xf32>
      %181 = arith.truncf %180 : vector<256x256xf32> to vector<256x256xbf16>
      %c0_80 = arith.constant 0 : index
      %c0_81 = arith.constant 0 : index
      %182 = vector.load %arg13[%c0_80, %c0_81] : memref<64x256xf32, #tpu.memory_space<vmem>>, vector<64x256xf32>
      %c0_82 = arith.constant 0 : index
      %c0_83 = arith.constant 0 : index
      %183 = vector.load %arg11[%c0_82, %c0_83] : memref<64x256xbf16, #tpu.memory_space<vmem>>, vector<64x256xbf16>
      %cst_84 = arith.constant dense<0.000000e+00> : vector<64x256xf32>
      %184 = tpu.matmul %183, %181, %cst_84 {dimension_numbers = #tpu.dot_dimension_numbers<[1], [1], [0], [0], [0, 0, 1, 0], [], []>} : vector<64x256xbf16>, vector<256x256xbf16>, vector<64x256xf32> -> vector<64x256xf32>
      %185 = arith.addf %182, %184 : vector<64x256xf32>
      %c0_85 = arith.constant 0 : index
      %c0_86 = arith.constant 0 : index
      %186 = vector.load %arg13[%c0_85, %c0_86] : memref<64x256xf32, #tpu.memory_space<vmem>>, vector<64x256xf32>
      tpu.vector_store %arg13[%c0_85, %c0_86], %185 {strides = array<i32>} : memref<64x256xf32, #tpu.memory_space<vmem>>, vector<64x256xf32>,
    } else {
    }
    %c0_19 = arith.constant 0 : index
    %c0_20 = arith.constant 0 : index
    %60 = vector.load %arg13[%c0_19, %c0_20] : memref<64x256xf32, #tpu.memory_space<vmem>>, vector<64x256xf32>
    %c0_21 = arith.constant 0 : index
    %c0_22 = arith.constant 0 : index
    %c0_23 = arith.constant 0 : index
    %61 = vector.load %arg12[%c0_21, %c0_22, %c0_23] : memref<1x64x768xf32, #tpu.memory_space<vmem>>, vector<1x64x256xf32>
    %62 = vector.shape_cast %61 : vector<1x64x256xf32> to vector<64x256xf32>
    %63 = vector.shape_cast %60 : vector<64x256xf32> to vector<1x64x256xf32>
    tpu.vector_store %arg12[%c0_21, %c0_22, %c0_23], %63 {strides = array<i32>} : memref<1x64x768xf32, #tpu.memory_space<vmem>>, vector<1x64x256xf32>,
    %c1_i32_24 = arith.constant 1 : i32
    %64 = arith.addi %2, %c1_i32_24 : i32
    %65 = arith.index_cast %64 : i32 to index
    %66 = memref.load %arg3[%65] : memref<7xi32, #tpu.memory_space<smem>>
    %c1_i32_25 = arith.constant 1 : i32
    %67 = arith.addi %2, %c1_i32_25 : i32
    %c1_i32_26 = arith.constant 1 : i32
    %68 = arith.addi %67, %c1_i32_26 : i32
    %69 = arith.index_cast %68 : i32 to index
    %70 = memref.load %arg3[%69] : memref<7xi32, #tpu.memory_space<smem>>
    %c256_i32_27 = arith.constant 256 : i32
    %71 = arith.addi %8, %c256_i32_27 : i32
    %cst_28 = arith.constant 0.000000e+00 : f32
    %72 = vector.broadcast %cst_28 : f32 to vector<64x256xf32>
    %c0_29 = arith.constant 0 : index
    %c0_30 = arith.constant 0 : index
    %73 = vector.load %arg13[%c0_29, %c0_30] : memref<64x256xf32, #tpu.memory_space<vmem>>, vector<64x256xf32>
    tpu.vector_store %arg13[%c0_29, %c0_30], %72 {strides = array<i32>} : memref<64x256xf32, #tpu.memory_space<vmem>>, vector<64x256xf32>,
    %c0_i32_31 = arith.constant 0 : i32
    %74 = arith.addi %5, %c0_i32_31 : i32
    %c256_i32_32 = arith.constant 256 : i32
    %75 = arith.muli %74, %c256_i32_32 : i32
    %76 = arith.cmpi slt, %66, %70 : i32
    %77 = arith.cmpi slt, %75, %70 : i32
    %78 = arith.andi %76, %77 : i1
    %c256_i32_33 = arith.constant 256 : i32
    %79 = arith.addi %75, %c256_i32_33 : i32
    %80 = arith.cmpi sgt, %79, %66 : i32
    %81 = arith.andi %78, %80 : i1
    %82 = arith.extui %81 : i1 to i32
    %c0_i32_34 = arith.constant 0 : i32
    %83 = arith.cmpi ne, %82, %c0_i32_34 : i32
    scf.if %83 {
      %c0_77 = arith.constant 0 : index
      %c0_78 = arith.constant 0 : index
      %c0_79 = arith.constant 0 : index
      %172 = vector.load %arg4[%c0_77, %c0_78, %c0_79] : memref<1x1x256xi32, #tpu.memory_space<vmem>>, vector<1x1x256xi32>
      %173 = vector.shape_cast %172 : vector<1x1x256xi32> to vector<1x256xi32>
      %174 = vector.broadcast %71 : i32 to vector<1x256xi32>
      %175 = arith.subi %173, %174 : vector<1x256xi32>
      %176 = vector.broadcast %9 : vector<256x1xi32> to vector<256x256xi32>
      %177 = vector.broadcast %175 : vector<1x256xi32> to vector<256x256xi32>
      %178 = arith.cmpi eq, %176, %177 : vector<256x256xi32>
      %179 = arith.extui %178 : vector<256x256xi1> to vector<256x256xi32>
      %180 = arith.sitofp %179 : vector<256x256xi32> to vector<256x256xf32>
      %181 = arith.truncf %180 : vector<256x256xf32> to vector<256x256xbf16>
      %c0_80 = arith.constant 0 : index
      %c0_81 = arith.constant 0 : index
      %182 = vector.load %arg13[%c0_80, %c0_81] : memref<64x256xf32, #tpu.memory_space<vmem>>, vector<64x256xf32>
      %c0_82 = arith.constant 0 : index
      %c0_83 = arith.constant 0 : index
      %183 = vector.load %arg8[%c0_82, %c0_83] : memref<64x256xbf16, #tpu.memory_space<vmem>>, vector<64x256xbf16>
      %cst_84 = arith.constant dense<0.000000e+00> : vector<64x256xf32>
      %184 = tpu.matmul %183, %181, %cst_84 {dimension_numbers = #tpu.dot_dimension_numbers<[1], [1], [0], [0], [0, 0, 1, 0], [], []>} : vector<64x256xbf16>, vector<256x256xbf16>, vector<64x256xf32> -> vector<64x256xf32>
      %185 = arith.addf %182, %184 : vector<64x256xf32>
      %c0_85 = arith.constant 0 : index
      %c0_86 = arith.constant 0 : index
      %186 = vector.load %arg13[%c0_85, %c0_86] : memref<64x256xf32, #tpu.memory_space<vmem>>, vector<64x256xf32>
      tpu.vector_store %arg13[%c0_85, %c0_86], %185 {strides = array<i32>} : memref<64x256xf32, #tpu.memory_space<vmem>>, vector<64x256xf32>,
    } else {
    }
    %c1_i32_35 = arith.constant 1 : i32
    %84 = arith.addi %5, %c1_i32_35 : i32
    %c256_i32_36 = arith.constant 256 : i32
    %85 = arith.muli %84, %c256_i32_36 : i32
    %86 = arith.cmpi slt, %66, %70 : i32
    %87 = arith.cmpi slt, %85, %70 : i32
    %88 = arith.andi %86, %87 : i1
    %c256_i32_37 = arith.constant 256 : i32
    %89 = arith.addi %85, %c256_i32_37 : i32
    %90 = arith.cmpi sgt, %89, %66 : i32
    %91 = arith.andi %88, %90 : i1
    %92 = arith.extui %91 : i1 to i32
    %c0_i32_38 = arith.constant 0 : i32
    %93 = arith.cmpi ne, %92, %c0_i32_38 : i32
    scf.if %93 {
      %c0_77 = arith.constant 0 : index
      %c0_78 = arith.constant 0 : index
      %c0_79 = arith.constant 0 : index
      %172 = vector.load %arg5[%c0_77, %c0_78, %c0_79] : memref<1x1x256xi32, #tpu.memory_space<vmem>>, vector<1x1x256xi32>
      %173 = vector.shape_cast %172 : vector<1x1x256xi32> to vector<1x256xi32>
      %174 = vector.broadcast %71 : i32 to vector<1x256xi32>
      %175 = arith.subi %173, %174 : vector<1x256xi32>
      %176 = vector.broadcast %9 : vector<256x1xi32> to vector<256x256xi32>
      %177 = vector.broadcast %175 : vector<1x256xi32> to vector<256x256xi32>
      %178 = arith.cmpi eq, %176, %177 : vector<256x256xi32>
      %179 = arith.extui %178 : vector<256x256xi1> to vector<256x256xi32>
      %180 = arith.sitofp %179 : vector<256x256xi32> to vector<256x256xf32>
      %181 = arith.truncf %180 : vector<256x256xf32> to vector<256x256xbf16>
      %c0_80 = arith.constant 0 : index
      %c0_81 = arith.constant 0 : index
      %182 = vector.load %arg13[%c0_80, %c0_81] : memref<64x256xf32, #tpu.memory_space<vmem>>, vector<64x256xf32>
      %c0_82 = arith.constant 0 : index
      %c0_83 = arith.constant 0 : index
      %183 = vector.load %arg9[%c0_82, %c0_83] : memref<64x256xbf16, #tpu.memory_space<vmem>>, vector<64x256xbf16>
      %cst_84 = arith.constant dense<0.000000e+00> : vector<64x256xf32>
      %184 = tpu.matmul %183, %181, %cst_84 {dimension_numbers = #tpu.dot_dimension_numbers<[1], [1], [0], [0], [0, 0, 1, 0], [], []>} : vector<64x256xbf16>, vector<256x256xbf16>, vector<64x256xf32> -> vector<64x256xf32>
      %185 = arith.addf %182, %184 : vector<64x256xf32>
      %c0_85 = arith.constant 0 : index
      %c0_86 = arith.constant 0 : index
      %186 = vector.load %arg13[%c0_85, %c0_86] : memref<64x256xf32, #tpu.memory_space<vmem>>, vector<64x256xf32>
      tpu.vector_store %arg13[%c0_85, %c0_86], %185 {strides = array<i32>} : memref<64x256xf32, #tpu.memory_space<vmem>>, vector<64x256xf32>,
    } else {
    }
    %c2_i32_39 = arith.constant 2 : i32
    %94 = arith.addi %5, %c2_i32_39 : i32
    %c256_i32_40 = arith.constant 256 : i32
    %95 = arith.muli %94, %c256_i32_40 : i32
    %96 = arith.cmpi slt, %66, %70 : i32
    %97 = arith.cmpi slt, %95, %70 : i32
    %98 = arith.andi %96, %97 : i1
    %c256_i32_41 = arith.constant 256 : i32
    %99 = arith.addi %95, %c256_i32_41 : i32
    %100 = arith.cmpi sgt, %99, %66 : i32
    %101 = arith.andi %98, %100 : i1
    %102 = arith.extui %101 : i1 to i32
    %c0_i32_42 = arith.constant 0 : i32
    %103 = arith.cmpi ne, %102, %c0_i32_42 : i32
    scf.if %103 {
      %c0_77 = arith.constant 0 : index
      %c0_78 = arith.constant 0 : index
      %c0_79 = arith.constant 0 : index
      %172 = vector.load %arg6[%c0_77, %c0_78, %c0_79] : memref<1x1x256xi32, #tpu.memory_space<vmem>>, vector<1x1x256xi32>
      %173 = vector.shape_cast %172 : vector<1x1x256xi32> to vector<1x256xi32>
      %174 = vector.broadcast %71 : i32 to vector<1x256xi32>
      %175 = arith.subi %173, %174 : vector<1x256xi32>
      %176 = vector.broadcast %9 : vector<256x1xi32> to vector<256x256xi32>
      %177 = vector.broadcast %175 : vector<1x256xi32> to vector<256x256xi32>
      %178 = arith.cmpi eq, %176, %177 : vector<256x256xi32>
      %179 = arith.extui %178 : vector<256x256xi1> to vector<256x256xi32>
      %180 = arith.sitofp %179 : vector<256x256xi32> to vector<256x256xf32>
      %181 = arith.truncf %180 : vector<256x256xf32> to vector<256x256xbf16>
      %c0_80 = arith.constant 0 : index
      %c0_81 = arith.constant 0 : index
      %182 = vector.load %arg13[%c0_80, %c0_81] : memref<64x256xf32, #tpu.memory_space<vmem>>, vector<64x256xf32>
      %c0_82 = arith.constant 0 : index
      %c0_83 = arith.constant 0 : index
      %183 = vector.load %arg10[%c0_82, %c0_83] : memref<64x256xbf16, #tpu.memory_space<vmem>>, vector<64x256xbf16>
      %cst_84 = arith.constant dense<0.000000e+00> : vector<64x256xf32>
      %184 = tpu.matmul %183, %181, %cst_84 {dimension_numbers = #tpu.dot_dimension_numbers<[1], [1], [0], [0], [0, 0, 1, 0], [], []>} : vector<64x256xbf16>, vector<256x256xbf16>, vector<64x256xf32> -> vector<64x256xf32>
      %185 = arith.addf %182, %184 : vector<64x256xf32>
      %c0_85 = arith.constant 0 : index
      %c0_86 = arith.constant 0 : index
      %186 = vector.load %arg13[%c0_85, %c0_86] : memref<64x256xf32, #tpu.memory_space<vmem>>, vector<64x256xf32>
      tpu.vector_store %arg13[%c0_85, %c0_86], %185 {strides = array<i32>} : memref<64x256xf32, #tpu.memory_space<vmem>>, vector<64x256xf32>,
    } else {
    }
    %c3_i32_43 = arith.constant 3 : i32
    %104 = arith.addi %5, %c3_i32_43 : i32
    %c256_i32_44 = arith.constant 256 : i32
    %105 = arith.muli %104, %c256_i32_44 : i32
    %106 = arith.cmpi slt, %66, %70 : i32
    %107 = arith.cmpi slt, %105, %70 : i32
    %108 = arith.andi %106, %107 : i1
    %c256_i32_45 = arith.constant 256 : i32
    %109 = arith.addi %105, %c256_i32_45 : i32
    %110 = arith.cmpi sgt, %109, %66 : i32
    %111 = arith.andi %108, %110 : i1
    %112 = arith.extui %111 : i1 to i32
    %c0_i32_46 = arith.constant 0 : i32
    %113 = arith.cmpi ne, %112, %c0_i32_46 : i32
    scf.if %113 {
      %c0_77 = arith.constant 0 : index
      %c0_78 = arith.constant 0 : index
      %c0_79 = arith.constant 0 : index
      %172 = vector.load %arg7[%c0_77, %c0_78, %c0_79] : memref<1x1x256xi32, #tpu.memory_space<vmem>>, vector<1x1x256xi32>
      %173 = vector.shape_cast %172 : vector<1x1x256xi32> to vector<1x256xi32>
      %174 = vector.broadcast %71 : i32 to vector<1x256xi32>
      %175 = arith.subi %173, %174 : vector<1x256xi32>
      %176 = vector.broadcast %9 : vector<256x1xi32> to vector<256x256xi32>
      %177 = vector.broadcast %175 : vector<1x256xi32> to vector<256x256xi32>
      %178 = arith.cmpi eq, %176, %177 : vector<256x256xi32>
      %179 = arith.extui %178 : vector<256x256xi1> to vector<256x256xi32>
      %180 = arith.sitofp %179 : vector<256x256xi32> to vector<256x256xf32>
      %181 = arith.truncf %180 : vector<256x256xf32> to vector<256x256xbf16>
      %c0_80 = arith.constant 0 : index
      %c0_81 = arith.constant 0 : index
      %182 = vector.load %arg13[%c0_80, %c0_81] : memref<64x256xf32, #tpu.memory_space<vmem>>, vector<64x256xf32>
      %c0_82 = arith.constant 0 : index
      %c0_83 = arith.constant 0 : index
      %183 = vector.load %arg11[%c0_82, %c0_83] : memref<64x256xbf16, #tpu.memory_space<vmem>>, vector<64x256xbf16>
      %cst_84 = arith.constant dense<0.000000e+00> : vector<64x256xf32>
      %184 = tpu.matmul %183, %181, %cst_84 {dimension_numbers = #tpu.dot_dimension_numbers<[1], [1], [0], [0], [0, 0, 1, 0], [], []>} : vector<64x256xbf16>, vector<256x256xbf16>, vector<64x256xf32> -> vector<64x256xf32>
      %185 = arith.addf %182, %184 : vector<64x256xf32>
      %c0_85 = arith.constant 0 : index
      %c0_86 = arith.constant 0 : index
      %186 = vector.load %arg13[%c0_85, %c0_86] : memref<64x256xf32, #tpu.memory_space<vmem>>, vector<64x256xf32>
      tpu.vector_store %arg13[%c0_85, %c0_86], %185 {strides = array<i32>} : memref<64x256xf32, #tpu.memory_space<vmem>>, vector<64x256xf32>,
    } else {
    }
    %c0_47 = arith.constant 0 : index
    %c0_48 = arith.constant 0 : index
    %114 = vector.load %arg13[%c0_47, %c0_48] : memref<64x256xf32, #tpu.memory_space<vmem>>, vector<64x256xf32>
    %c0_49 = arith.constant 0 : index
    %c0_50 = arith.constant 0 : index
    %c256 = arith.constant 256 : index
    %115 = vector.load %arg12[%c0_49, %c0_50, %c256] : memref<1x64x768xf32, #tpu.memory_space<vmem>>, vector<1x64x256xf32>
    %116 = vector.shape_cast %115 : vector<1x64x256xf32> to vector<64x256xf32>
    %117 = vector.shape_cast %114 : vector<64x256xf32> to vector<1x64x256xf32>
    tpu.vector_store %arg12[%c0_49, %c0_50, %c256], %117 {strides = array<i32>} : memref<1x64x768xf32, #tpu.memory_space<vmem>>, vector<1x64x256xf32>,
    %c2_i32_51 = arith.constant 2 : i32
    %118 = arith.addi %2, %c2_i32_51 : i32
    %119 = arith.index_cast %118 : i32 to index
    %120 = memref.load %arg3[%119] : memref<7xi32, #tpu.memory_space<smem>>
    %c2_i32_52 = arith.constant 2 : i32
    %121 = arith.addi %2, %c2_i32_52 : i32
    %c1_i32_53 = arith.constant 1 : i32
    %122 = arith.addi %121, %c1_i32_53 : i32
    %123 = arith.index_cast %122 : i32 to index
    %124 = memref.load %arg3[%123] : memref<7xi32, #tpu.memory_space<smem>>
    %c512_i32 = arith.constant 512 : i32
    %125 = arith.addi %8, %c512_i32 : i32
    %cst_54 = arith.constant 0.000000e+00 : f32
    %126 = vector.broadcast %cst_54 : f32 to vector<64x256xf32>
    %c0_55 = arith.constant 0 : index
    %c0_56 = arith.constant 0 : index
    %127 = vector.load %arg13[%c0_55, %c0_56] : memref<64x256xf32, #tpu.memory_space<vmem>>, vector<64x256xf32>
    tpu.vector_store %arg13[%c0_55, %c0_56], %126 {strides = array<i32>} : memref<64x256xf32, #tpu.memory_space<vmem>>, vector<64x256xf32>,
    %c0_i32_57 = arith.constant 0 : i32
    %128 = arith.addi %5, %c0_i32_57 : i32
    %c256_i32_58 = arith.constant 256 : i32
    %129 = arith.muli %128, %c256_i32_58 : i32
    %130 = arith.cmpi slt, %120, %124 : i32
    %131 = arith.cmpi slt, %129, %124 : i32
    %132 = arith.andi %130, %131 : i1
    %c256_i32_59 = arith.constant 256 : i32
    %133 = arith.addi %129, %c256_i32_59 : i32
    %134 = arith.cmpi sgt, %133, %120 : i32
    %135 = arith.andi %132, %134 : i1
    %136 = arith.extui %135 : i1 to i32
    %c0_i32_60 = arith.constant 0 : i32
    %137 = arith.cmpi ne, %136, %c0_i32_60 : i32
    scf.if %137 {
      %c0_77 = arith.constant 0 : index
      %c0_78 = arith.constant 0 : index
      %c0_79 = arith.constant 0 : index
      %172 = vector.load %arg4[%c0_77, %c0_78, %c0_79] : memref<1x1x256xi32, #tpu.memory_space<vmem>>, vector<1x1x256xi32>
      %173 = vector.shape_cast %172 : vector<1x1x256xi32> to vector<1x256xi32>
      %174 = vector.broadcast %125 : i32 to vector<1x256xi32>
      %175 = arith.subi %173, %174 : vector<1x256xi32>
      %176 = vector.broadcast %9 : vector<256x1xi32> to vector<256x256xi32>
      %177 = vector.broadcast %175 : vector<1x256xi32> to vector<256x256xi32>
      %178 = arith.cmpi eq, %176, %177 : vector<256x256xi32>
      %179 = arith.extui %178 : vector<256x256xi1> to vector<256x256xi32>
      %180 = arith.sitofp %179 : vector<256x256xi32> to vector<256x256xf32>
      %181 = arith.truncf %180 : vector<256x256xf32> to vector<256x256xbf16>
      %c0_80 = arith.constant 0 : index
      %c0_81 = arith.constant 0 : index
      %182 = vector.load %arg13[%c0_80, %c0_81] : memref<64x256xf32, #tpu.memory_space<vmem>>, vector<64x256xf32>
      %c0_82 = arith.constant 0 : index
      %c0_83 = arith.constant 0 : index
      %183 = vector.load %arg8[%c0_82, %c0_83] : memref<64x256xbf16, #tpu.memory_space<vmem>>, vector<64x256xbf16>
      %cst_84 = arith.constant dense<0.000000e+00> : vector<64x256xf32>
      %184 = tpu.matmul %183, %181, %cst_84 {dimension_numbers = #tpu.dot_dimension_numbers<[1], [1], [0], [0], [0, 0, 1, 0], [], []>} : vector<64x256xbf16>, vector<256x256xbf16>, vector<64x256xf32> -> vector<64x256xf32>
      %185 = arith.addf %182, %184 : vector<64x256xf32>
      %c0_85 = arith.constant 0 : index
      %c0_86 = arith.constant 0 : index
      %186 = vector.load %arg13[%c0_85, %c0_86] : memref<64x256xf32, #tpu.memory_space<vmem>>, vector<64x256xf32>
      tpu.vector_store %arg13[%c0_85, %c0_86], %185 {strides = array<i32>} : memref<64x256xf32, #tpu.memory_space<vmem>>, vector<64x256xf32>,
    } else {
    }
    %c1_i32_61 = arith.constant 1 : i32
    %138 = arith.addi %5, %c1_i32_61 : i32
    %c256_i32_62 = arith.constant 256 : i32
    %139 = arith.muli %138, %c256_i32_62 : i32
    %140 = arith.cmpi slt, %120, %124 : i32
    %141 = arith.cmpi slt, %139, %124 : i32
    %142 = arith.andi %140, %141 : i1
    %c256_i32_63 = arith.constant 256 : i32
    %143 = arith.addi %139, %c256_i32_63 : i32
    %144 = arith.cmpi sgt, %143, %120 : i32
    %145 = arith.andi %142, %144 : i1
    %146 = arith.extui %145 : i1 to i32
    %c0_i32_64 = arith.constant 0 : i32
    %147 = arith.cmpi ne, %146, %c0_i32_64 : i32
    scf.if %147 {
      %c0_77 = arith.constant 0 : index
      %c0_78 = arith.constant 0 : index
      %c0_79 = arith.constant 0 : index
      %172 = vector.load %arg5[%c0_77, %c0_78, %c0_79] : memref<1x1x256xi32, #tpu.memory_space<vmem>>, vector<1x1x256xi32>
      %173 = vector.shape_cast %172 : vector<1x1x256xi32> to vector<1x256xi32>
      %174 = vector.broadcast %125 : i32 to vector<1x256xi32>
      %175 = arith.subi %173, %174 : vector<1x256xi32>
      %176 = vector.broadcast %9 : vector<256x1xi32> to vector<256x256xi32>
      %177 = vector.broadcast %175 : vector<1x256xi32> to vector<256x256xi32>
      %178 = arith.cmpi eq, %176, %177 : vector<256x256xi32>
      %179 = arith.extui %178 : vector<256x256xi1> to vector<256x256xi32>
      %180 = arith.sitofp %179 : vector<256x256xi32> to vector<256x256xf32>
      %181 = arith.truncf %180 : vector<256x256xf32> to vector<256x256xbf16>
      %c0_80 = arith.constant 0 : index
      %c0_81 = arith.constant 0 : index
      %182 = vector.load %arg13[%c0_80, %c0_81] : memref<64x256xf32, #tpu.memory_space<vmem>>, vector<64x256xf32>
      %c0_82 = arith.constant 0 : index
      %c0_83 = arith.constant 0 : index
      %183 = vector.load %arg9[%c0_82, %c0_83] : memref<64x256xbf16, #tpu.memory_space<vmem>>, vector<64x256xbf16>
      %cst_84 = arith.constant dense<0.000000e+00> : vector<64x256xf32>
      %184 = tpu.matmul %183, %181, %cst_84 {dimension_numbers = #tpu.dot_dimension_numbers<[1], [1], [0], [0], [0, 0, 1, 0], [], []>} : vector<64x256xbf16>, vector<256x256xbf16>, vector<64x256xf32> -> vector<64x256xf32>
      %185 = arith.addf %182, %184 : vector<64x256xf32>
      %c0_85 = arith.constant 0 : index
      %c0_86 = arith.constant 0 : index
      %186 = vector.load %arg13[%c0_85, %c0_86] : memref<64x256xf32, #tpu.memory_space<vmem>>, vector<64x256xf32>
      tpu.vector_store %arg13[%c0_85, %c0_86], %185 {strides = array<i32>} : memref<64x256xf32, #tpu.memory_space<vmem>>, vector<64x256xf32>,
    } else {
    }
    %c2_i32_65 = arith.constant 2 : i32
    %148 = arith.addi %5, %c2_i32_65 : i32
    %c256_i32_66 = arith.constant 256 : i32
    %149 = arith.muli %148, %c256_i32_66 : i32
    %150 = arith.cmpi slt, %120, %124 : i32
    %151 = arith.cmpi slt, %149, %124 : i32
    %152 = arith.andi %150, %151 : i1
    %c256_i32_67 = arith.constant 256 : i32
    %153 = arith.addi %149, %c256_i32_67 : i32
    %154 = arith.cmpi sgt, %153, %120 : i32
    %155 = arith.andi %152, %154 : i1
    %156 = arith.extui %155 : i1 to i32
    %c0_i32_68 = arith.constant 0 : i32
    %157 = arith.cmpi ne, %156, %c0_i32_68 : i32
    scf.if %157 {
      %c0_77 = arith.constant 0 : index
      %c0_78 = arith.constant 0 : index
      %c0_79 = arith.constant 0 : index
      %172 = vector.load %arg6[%c0_77, %c0_78, %c0_79] : memref<1x1x256xi32, #tpu.memory_space<vmem>>, vector<1x1x256xi32>
      %173 = vector.shape_cast %172 : vector<1x1x256xi32> to vector<1x256xi32>
      %174 = vector.broadcast %125 : i32 to vector<1x256xi32>
      %175 = arith.subi %173, %174 : vector<1x256xi32>
      %176 = vector.broadcast %9 : vector<256x1xi32> to vector<256x256xi32>
      %177 = vector.broadcast %175 : vector<1x256xi32> to vector<256x256xi32>
      %178 = arith.cmpi eq, %176, %177 : vector<256x256xi32>
      %179 = arith.extui %178 : vector<256x256xi1> to vector<256x256xi32>
      %180 = arith.sitofp %179 : vector<256x256xi32> to vector<256x256xf32>
      %181 = arith.truncf %180 : vector<256x256xf32> to vector<256x256xbf16>
      %c0_80 = arith.constant 0 : index
      %c0_81 = arith.constant 0 : index
      %182 = vector.load %arg13[%c0_80, %c0_81] : memref<64x256xf32, #tpu.memory_space<vmem>>, vector<64x256xf32>
      %c0_82 = arith.constant 0 : index
      %c0_83 = arith.constant 0 : index
      %183 = vector.load %arg10[%c0_82, %c0_83] : memref<64x256xbf16, #tpu.memory_space<vmem>>, vector<64x256xbf16>
      %cst_84 = arith.constant dense<0.000000e+00> : vector<64x256xf32>
      %184 = tpu.matmul %183, %181, %cst_84 {dimension_numbers = #tpu.dot_dimension_numbers<[1], [1], [0], [0], [0, 0, 1, 0], [], []>} : vector<64x256xbf16>, vector<256x256xbf16>, vector<64x256xf32> -> vector<64x256xf32>
      %185 = arith.addf %182, %184 : vector<64x256xf32>
      %c0_85 = arith.constant 0 : index
      %c0_86 = arith.constant 0 : index
      %186 = vector.load %arg13[%c0_85, %c0_86] : memref<64x256xf32, #tpu.memory_space<vmem>>, vector<64x256xf32>
      tpu.vector_store %arg13[%c0_85, %c0_86], %185 {strides = array<i32>} : memref<64x256xf32, #tpu.memory_space<vmem>>, vector<64x256xf32>,
    } else {
    }
    %c3_i32_69 = arith.constant 3 : i32
    %158 = arith.addi %5, %c3_i32_69 : i32
    %c256_i32_70 = arith.constant 256 : i32
    %159 = arith.muli %158, %c256_i32_70 : i32
    %160 = arith.cmpi slt, %120, %124 : i32
    %161 = arith.cmpi slt, %159, %124 : i32
    %162 = arith.andi %160, %161 : i1
    %c256_i32_71 = arith.constant 256 : i32
    %163 = arith.addi %159, %c256_i32_71 : i32
    %164 = arith.cmpi sgt, %163, %120 : i32
    %165 = arith.andi %162, %164 : i1
    %166 = arith.extui %165 : i1 to i32
    %c0_i32_72 = arith.constant 0 : i32
    %167 = arith.cmpi ne, %166, %c0_i32_72 : i32
    scf.if %167 {
      %c0_77 = arith.constant 0 : index
      %c0_78 = arith.constant 0 : index
      %c0_79 = arith.constant 0 : index
      %172 = vector.load %arg7[%c0_77, %c0_78, %c0_79] : memref<1x1x256xi32, #tpu.memory_space<vmem>>, vector<1x1x256xi32>
      %173 = vector.shape_cast %172 : vector<1x1x256xi32> to vector<1x256xi32>
      %174 = vector.broadcast %125 : i32 to vector<1x256xi32>
      %175 = arith.subi %173, %174 : vector<1x256xi32>
      %176 = vector.broadcast %9 : vector<256x1xi32> to vector<256x256xi32>
      %177 = vector.broadcast %175 : vector<1x256xi32> to vector<256x256xi32>
      %178 = arith.cmpi eq, %176, %177 : vector<256x256xi32>
      %179 = arith.extui %178 : vector<256x256xi1> to vector<256x256xi32>
      %180 = arith.sitofp %179 : vector<256x256xi32> to vector<256x256xf32>
      %181 = arith.truncf %180 : vector<256x256xf32> to vector<256x256xbf16>
      %c0_80 = arith.constant 0 : index
      %c0_81 = arith.constant 0 : index
      %182 = vector.load %arg13[%c0_80, %c0_81] : memref<64x256xf32, #tpu.memory_space<vmem>>, vector<64x256xf32>
      %c0_82 = arith.constant 0 : index
      %c0_83 = arith.constant 0 : index
      %183 = vector.load %arg11[%c0_82, %c0_83] : memref<64x256xbf16, #tpu.memory_space<vmem>>, vector<64x256xbf16>
      %cst_84 = arith.constant dense<0.000000e+00> : vector<64x256xf32>
      %184 = tpu.matmul %183, %181, %cst_84 {dimension_numbers = #tpu.dot_dimension_numbers<[1], [1], [0], [0], [0, 0, 1, 0], [], []>} : vector<64x256xbf16>, vector<256x256xbf16>, vector<64x256xf32> -> vector<64x256xf32>
      %185 = arith.addf %182, %184 : vector<64x256xf32>
      %c0_85 = arith.constant 0 : index
      %c0_86 = arith.constant 0 : index
      %186 = vector.load %arg13[%c0_85, %c0_86] : memref<64x256xf32, #tpu.memory_space<vmem>>, vector<64x256xf32>
      tpu.vector_store %arg13[%c0_85, %c0_86], %185 {strides = array<i32>} : memref<64x256xf32, #tpu.memory_space<vmem>>, vector<64x256xf32>,
    } else {
    }
    %c0_73 = arith.constant 0 : index
    %c0_74 = arith.constant 0 : index
    %168 = vector.load %arg13[%c0_73, %c0_74] : memref<64x256xf32, #tpu.memory_space<vmem>>, vector<64x256xf32>
    %c0_75 = arith.constant 0 : index
    %c0_76 = arith.constant 0 : index
    %c512 = arith.constant 512 : index
    %169 = vector.load %arg12[%c0_75, %c0_76, %c512] : memref<1x64x768xf32, #tpu.memory_space<vmem>>, vector<1x64x256xf32>
    %170 = vector.shape_cast %169 : vector<1x64x256xf32> to vector<64x256xf32>
    %171 = vector.shape_cast %168 : vector<64x256xf32> to vector<1x64x256xf32>
    tpu.vector_store %arg12[%c0_75, %c0_76, %c512], %171 {strides = array<i32>} : memref<1x64x768xf32, #tpu.memory_space<vmem>>, vector<1x64x256xf32>,
    return
  }
  func.func @transform_0(%arg0: i32, %arg1: i32, %arg2: memref<2x1xi32, #tpu.memory_space<smem>>, %arg3: memref<7xi32, #tpu.memory_space<smem>>) -> (i32, i32, i32) {
    %0 = arith.index_cast %arg1 : i32 to index
    %1 = arith.index_cast %arg0 : i32 to index
    %2 = memref.load %arg2[%0, %1] : memref<2x1xi32, #tpu.memory_space<smem>>
    %c0_i32 = arith.constant 0 : i32
    %3 = arith.addi %2, %c0_i32 : i32
    %c0_i32_0 = arith.constant 0 : i32
    %c0_i32_1 = arith.constant 0 : i32
    %c0_i32_2 = arith.constant 0 : i32
    return %3, %c0_i32_0, %c0_i32_1 : i32, i32, i32
  }
  func.func @transform_1(%arg0: i32, %arg1: i32, %arg2: memref<2x1xi32, #tpu.memory_space<smem>>, %arg3: memref<7xi32, #tpu.memory_space<smem>>) -> (i32, i32, i32) {
    %0 = arith.index_cast %arg1 : i32 to index
    %1 = arith.index_cast %arg0 : i32 to index
    %2 = memref.load %arg2[%0, %1] : memref<2x1xi32, #tpu.memory_space<smem>>
    %c1_i32 = arith.constant 1 : i32
    %3 = arith.addi %2, %c1_i32 : i32
    %c0_i32 = arith.constant 0 : i32
    %c0_i32_0 = arith.constant 0 : i32
    %c0_i32_1 = arith.constant 0 : i32
    return %3, %c0_i32, %c0_i32_0 : i32, i32, i32
  }
  func.func @transform_2(%arg0: i32, %arg1: i32, %arg2: memref<2x1xi32, #tpu.memory_space<smem>>, %arg3: memref<7xi32, #tpu.memory_space<smem>>) -> (i32, i32, i32) {
    %0 = arith.index_cast %arg1 : i32 to index
    %1 = arith.index_cast %arg0 : i32 to index
    %2 = memref.load %arg2[%0, %1] : memref<2x1xi32, #tpu.memory_space<smem>>
    %c2_i32 = arith.constant 2 : i32
    %3 = arith.addi %2, %c2_i32 : i32
    %c0_i32 = arith.constant 0 : i32
    %c0_i32_0 = arith.constant 0 : i32
    %c0_i32_1 = arith.constant 0 : i32
    return %3, %c0_i32, %c0_i32_0 : i32, i32, i32
  }
  func.func @transform_3(%arg0: i32, %arg1: i32, %arg2: memref<2x1xi32, #tpu.memory_space<smem>>, %arg3: memref<7xi32, #tpu.memory_space<smem>>) -> (i32, i32, i32) {
    %0 = arith.index_cast %arg1 : i32 to index
    %1 = arith.index_cast %arg0 : i32 to index
    %2 = memref.load %arg2[%0, %1] : memref<2x1xi32, #tpu.memory_space<smem>>
    %c3_i32 = arith.constant 3 : i32
    %3 = arith.addi %2, %c3_i32 : i32
    %c0_i32 = arith.constant 0 : i32
    %c0_i32_0 = arith.constant 0 : i32
    %c0_i32_1 = arith.constant 0 : i32
    return %3, %c0_i32, %c0_i32_0 : i32, i32, i32
  }
  func.func @transform_4(%arg0: i32, %arg1: i32, %arg2: memref<2x1xi32, #tpu.memory_space<smem>>, %arg3: memref<7xi32, #tpu.memory_space<smem>>) -> (i32, i32) {
    %0 = arith.index_cast %arg1 : i32 to index
    %1 = arith.index_cast %arg0 : i32 to index
    %2 = memref.load %arg2[%0, %1] : memref<2x1xi32, #tpu.memory_space<smem>>
    %c0_i32 = arith.constant 0 : i32
    %3 = arith.addi %2, %c0_i32 : i32
    %c0_i32_0 = arith.constant 0 : i32
    %c0_i32_1 = arith.constant 0 : i32
    return %c0_i32_0, %3 : i32, i32
  }
  func.func @transform_5(%arg0: i32, %arg1: i32, %arg2: memref<2x1xi32, #tpu.memory_space<smem>>, %arg3: memref<7xi32, #tpu.memory_space<smem>>) -> (i32, i32) {
    %0 = arith.index_cast %arg1 : i32 to index
    %1 = arith.index_cast %arg0 : i32 to index
    %2 = memref.load %arg2[%0, %1] : memref<2x1xi32, #tpu.memory_space<smem>>
    %c1_i32 = arith.constant 1 : i32
    %3 = arith.addi %2, %c1_i32 : i32
    %c0_i32 = arith.constant 0 : i32
    %c0_i32_0 = arith.constant 0 : i32
    return %c0_i32, %3 : i32, i32
  }
  func.func @transform_6(%arg0: i32, %arg1: i32, %arg2: memref<2x1xi32, #tpu.memory_space<smem>>, %arg3: memref<7xi32, #tpu.memory_space<smem>>) -> (i32, i32) {
    %0 = arith.index_cast %arg1 : i32 to index
    %1 = arith.index_cast %arg0 : i32 to index
    %2 = memref.load %arg2[%0, %1] : memref<2x1xi32, #tpu.memory_space<smem>>
    %c2_i32 = arith.constant 2 : i32
    %3 = arith.addi %2, %c2_i32 : i32
    %c0_i32 = arith.constant 0 : i32
    %c0_i32_0 = arith.constant 0 : i32
    return %c0_i32, %3 : i32, i32
  }
  func.func @transform_7(%arg0: i32, %arg1: i32, %arg2: memref<2x1xi32, #tpu.memory_space<smem>>, %arg3: memref<7xi32, #tpu.memory_space<smem>>) -> (i32, i32) {
    %0 = arith.index_cast %arg1 : i32 to index
    %1 = arith.index_cast %arg0 : i32 to index
    %2 = memref.load %arg2[%0, %1] : memref<2x1xi32, #tpu.memory_space<smem>>
    %c3_i32 = arith.constant 3 : i32
    %3 = arith.addi %2, %c3_i32 : i32
    %c0_i32 = arith.constant 0 : i32
    %c0_i32_0 = arith.constant 0 : i32
    return %c0_i32, %3 : i32, i32
  }
  func.func @transform_8(%arg0: i32, %arg1: i32, %arg2: memref<2x1xi32, #tpu.memory_space<smem>>, %arg3: memref<7xi32, #tpu.memory_space<smem>>) -> (i32, i32, i32) {
    %c0_i32 = arith.constant 0 : i32
    %c0_i32_0 = arith.constant 0 : i32
    return %arg1, %c0_i32, %arg0 : i32, i32, i32
  }
}

</mosaic_0001>

<bundles_post_ra>
// kernel: tpu_custom_call.1
= control target key start
LH: loop header
LB: loop body
LE: loop exit
PB: predicated region body
PF: predicated region fallthrough
CT: control target
= control target key end

     0   :  { %s13024_s0 = inlined_call_operand.vmem [shape: s32[2,1], index: 0, kind: input, shape index: {}]   ;;  %s13025_s2 = inlined_call_operand.vmem [shape: s32[5,1,256], index: 2, kind: input, shape index: {}]   ;;  %s13026_s3 = inlined_call_operand.hbm [shape: s32[5,1,256], index: 3, kind: input, shape index: {}]   ;;  %s13027_s4 = inlined_call_operand.hbm [shape: s32[5,1,256], index: 4, kind: input, shape index: {}]   ;;  %s13028_s5 = inlined_call_operand.vmem [shape: s32[5,1,256], index: 5, kind: input, shape index: {}]   ;;  %s13029_s6 = inlined_call_operand.hbm [shape: bf16[64,1280], index: 6, kind: input, shape index: {}]   ;;  %s13030_s7 = inlined_call_operand.hbm [shape: bf16[64,1280], index: 7, kind: input, shape index: {}]   ;;  %s13031_s8 = inlined_call_operand.hbm [shape: bf16[64,1280], index: 8, kind: input, shape index: {}]   ;;  %s13032_s9 = inlined_call_operand.hbm [shape: bf16[64,1280], index: 9, kind: input, shape index: {}]   ;;  %s13033_s10 = inlined_call_operand.hbm [shape: f32[2,64,768], index: 10, kind: output, shape index: {}]   ;;  %s13034_s1 = inlined_call_operand.vmem [shape: s32[7], index: 1, kind: input, shape index: {}]  }
   0x1   :  { %13090 = sst [smem:[#allocation68_spill]] %s13025_s2  ;;  %s15_s15 = sshll.u32 %s13024_s0, 4  ;;  %s16_s15 = int_to_ptr.vmem [resolvable:$true] %s15_s15 }
   0x2   :  { %13091 = sst [smem:[#allocation69_spill]] %s13026_s3  ;;  %s19_s18 = sshll.u32 %s13034_s1, 4  ;;  %s20_s18 = int_to_ptr.vmem [resolvable:$true] %s19_s18 }
   0x3   :  { %13092 = sst [smem:[#allocation70_spill]] %s13027_s4  ;;  %s8809_s19 = scalar_lea.vmem %s16_s15, 32 }
   0x4   :  { %13093 = sst [smem:[#allocation71_spill]] %s13028_s5  ;;  %p8810_p0 = scmp.ne.s32.totalorder %s16_s15, %s8809_s19 }
   0x5   :  { %13094 = sst [smem:[#allocation72_spill]] %s13029_s6  ;;  %p8814_p1 = scmp.lt.s32.totalorder %s16_s15, %s16_s15 }
   0x6   :  { %13095 = sst [smem:[#allocation73_spill]] %s13030_s7  ;;  %p8815_p2 = scmp.lt.s32.totalorder %s8809_s19, %s8809_s19 }
   0x7   :  { %13096 = sst [smem:[#allocation74_spill]] %s13031_s8 }
   0x8   :  { %13097 = sst [smem:[#allocation75_spill]] %s13032_s9  ;;  %p8816_p3 = por %p8815_p2, %p8814_p1 }
   0x9   :  { %13098 = sst [smem:[#allocation76_spill]] %s13033_s10 }
   0xa   :  { %p8817_p4 = pnand %p8816_p3, %p8810_p0 }
   0xc   :  { %8820 = shalt.err (!%p8817_p4)  }
   0xd   :  { %s9268_s20 = smov [#allocation4]   ;;  %s8821_s21 = scalar_lea.vmem %s20_s18, 16 }
   0xe   :  { %18 = dma.vmem_to_smem %s16_s15, 32, %s9268_s20, [#allocation3] }
   0xf   :  { %p8822_p5 = scmp.ne.s32.totalorder %s20_s18, %s8821_s21  ;;  %p8826_p6 = scmp.lt.s32.totalorder %s20_s18, %s20_s18 }
  0x10   :  { %p8827_p7 = scmp.lt.s32.totalorder %s8821_s21, %s8821_s21 }
  0x12   :  { %p8828_p8 = por %p8827_p7, %p8826_p6 }
  0x14   :  { %p8829_p9 = pnand %p8828_p8, %p8822_p5 }
  0x16   :  { %8832 = shalt.err (!%p8829_p9)  }
  0x17   :  { %s9269_s0 = smov [#allocation5]  }
  0x18   :  { %22 = dma.vmem_to_smem %s20_s18, 16, %s9269_s0, [#allocation3] }
  0x19   :  { %9142 = dma.done.wait [#allocation3], 48 }
  0x1a   :  { %9143 = vsyncadd [#allocation3], 4294967248 }
  0x1b   :  { %24 = sfence }
  0x1c   :  { %25 = vsyncpa [#allocation7], 0 }
  0x1d   :  { %27 = vsyncpa [#allocation7 + $0x1], 0 }
  0x1e   :  { %28 = vsyncpa [#allocation10], 0 }
  0x1f   :  { %30 = vsyncpa [#allocation10 + $0x1], 0 }
  0x20   :  { %31 = vsyncpa [#allocation13], 0 }
  0x21   :  { %33 = vsyncpa [#allocation13 + $0x1], 0 }
  0x22   :  { %34 = vsyncpa [#allocation16], 0 }
  0x23   :  { %36 = vsyncpa [#allocation16 + $0x1], 0 }
  0x24   :  { %37 = vsyncpa [#allocation8], 0 }
  0x25   :  { %39 = vsyncpa [#allocation8 + $0x1], 0  ;;  %s9356_s1 = smov 0   ;;  %s9358_s22 = smov 0  }
  0x26   :  { %s9360_s23 = smov 0   ;;  %s9362_s24 = smov 0  }
  0x27   :  { %s9364_s25 = smov 0   ;;  %s9366_s26 = smov 0  }
  0x28   :  { %s9368_s27 = smov 0   ;;  %s9370_s28 = smov 0  }
  0x29   :  { %s9372_s29 = smov 0   ;;  %s9374_s30 = smov 0  }
  0x2a   :  { %s9376_s11 = smov 0   ;;  %s9378_s12 = smov 0  }
  0x2b   :  { %s9380_s13 = smov 0   ;;  %s9382_s14 = smov 0  }
  0x2c   :  { %s9384_s15 = smov 0   ;;  %s9386_s16 = smov 0  }
  0x2d   :  { %s9388_s17 = smov 0   ;;  %s9390_s18 = smov 0  }
  0x2e   :  { %s9392_s19 = smov 0   ;;  %s9394_s20 = smov 0  }
  0x2f   :  { %s9396_s21 = smov 0   ;;  %s9398_s0 = smov 0  }
  0x30   :  { %s9400_s10 = smov 0   ;;  %s9402_s5 = smov 0  }
  0x31 LB: > { %13099 = sst [smem:[#allocation38_spill]] %s9174_s1  ;;  %s9475_s2 = sadd.s32 4294967295, %s9266_s5   ;;  %s9266_s5 = sphi %s9402_s5, %s45_s5   ;;  %s9262_s10 = sphi %s9400_s10, %s13262_s10   ;;  %s9258_s0 = sphi %s9398_s0, %s13253_s0   ;;  %s9254_s21 = sphi %s9396_s21, %s13251_s21   ;;  %s9250_s20 = sphi %s9394_s20, %s13261_s20   ;;  %s9246_s19 = sphi %s9392_s19, %s13260_s19   ;;  %s9242_s18 = sphi %s9390_s18, %s13249_s18   ;;  %s9238_s17 = sphi %s9388_s17, %s13259_s17   ;;  %s9234_s16 = sphi %s9386_s16, %s13258_s16   ;;  %s9230_s15 = sphi %s9384_s15, %s13246_s15   ;;  %s9226_s14 = sphi %s9382_s14, %s13257_s14   ;;  %s9222_s13 = sphi %s9380_s13, %s13256_s13   ;;  %s9218_s12 = sphi %s9378_s12, %s13244_s12   ;;  %s9214_s11 = sphi %s9376_s11, %s13243_s11   ;;  %s9210_s30 = sphi %s9374_s30, %s13242_s30   ;;  %s9206_s29 = sphi %s9372_s29, %s13241_s29   ;;  %s9202_s28 = sphi %s9370_s28, %s13240_s28   ;;  %s9198_s27 = sphi %s9368_s27, %s13254_s27   ;;  %s9194_s26 = sphi %s9366_s26, %s13252_s26   ;;  %s9190_s25 = sphi %s9364_s25, %s13238_s25   ;;  %s9186_s24 = sphi %s9362_s24, %s13237_s24   ;;  %s9182_s23 = sphi %s9360_s23, %s13236_s23   ;;  %s9178_s22 = sphi %s9358_s22, %s13235_s22   ;;  %s9174_s1 = sphi %s9356_s1, %s13234_s1  }
  0x32   : > { %13100 = sst [smem:[#allocation39_spill]] %s9178_s22  ;;  %s6308_s9 = sadd.s32 4294967294, %s9266_s5  }
  0x33   : > { %13101 = sst [smem:[#allocation40_spill]] %s9182_s23  ;;  %s54_s8 = sadd.s32 1, %s9262_s10 }
  0x34   : > { %13102 = sst [smem:[#allocation41_spill]] %s9186_s24  ;;  %p55_p10 = scmp.ge.s32.totalorder %s54_s8, 2 }
  0x35   : > { %13103 = sst [smem:[#allocation42_spill]] %s9190_s25  ;;  %s9480_s25 = sshll.u32 %s9262_s10, 7 }
  0x36   : > { %13104 = sst [smem:[#allocation43_spill]] %s9194_s26  ;;  %p13062_p11 = scmp.eq.s32.totalorder %s9266_s5, 0 }
  0x37   : > { %13105 = sst [smem:[#allocation44_spill]] %s9198_s27  ;;  %p13061_p12 = scmp.eq.s32.totalorder %s9475_s2, 0 }
  0x38   : > { %13106 = sst [smem:[#allocation45_spill]] %s9202_s28  ;;  %s13264_s8 = smov (%p55_p10, %s54_s8), 0 }
  0x39   : > { %13107 = sst [smem:[#allocation46_spill]] %s9206_s29  ;;  %s168_s24 = sadd.s32 1, %s9242_s18 }
  0x3a   : > { %13108 = sst [smem:[#allocation47_spill]] %s9214_s11  ;;  %p175_p13 = scmp.ne.s32.totalorder %s9242_s18, %s9238_s17 }
  0x3b   : > { %13109 = sst [smem:[#allocation48_spill]] %s9218_s12  ;;  %s9491_s26 = sshll.u32 %s13264_s8, 7 }
  0x3c   : > { %13110 = sst [smem:[#allocation49_spill]] %s9230_s15  ;;  %p181_p0 = scmp.ne.s32.totalorder %s9238_s17, %s9234_s16 }
  0x3d   : > { %13111 = sst [smem:[#allocation50_spill]] %s9238_s17  ;;  %p9497_p1 = por %p175_p13, %p13062_p11 }
  0x3e   : > { %13112 = sst [smem:[#allocation51_spill]] %s9242_s18  ;;  %p9503_p2 = por %p181_p0, %p13061_p12 }
  0x3f   : > { %13113 = sst [smem:[#allocation52_spill]] %s9254_s21  ;;  %s409_s29 = ssub.s32 %s9262_s10, %s13264_s8 }
  0x40   : > { %13114 = sst [smem:[#allocation53_spill]] %s9258_s0  ;;  %p412_p3 = scmp.eq.s32.totalorder %s409_s29, 0 }
  0x41   : > { %13115 = sst [smem:[#allocation54_spill]] %s9262_s10  ;;  %s414_s16 = sadd.s32 1, %s9182_s23 }
  0x42   : > { %13116 = sst [smem:[#allocation55_spill]] %s9475_s2  ;;  %p424_p4 = scmp.ne.s32.totalorder %s9182_s23, %s9178_s22 }
  0x43   : > { %s154_s0 = sld [smem:[#allocation4 + %s9480_s25]]  ;;  %p425_p5 = scmp.eq.s32.totalorder %s9475_s2, 1 }
  0x44   : > { %13117 = sst [smem:[#allocation56_spill]] %s13264_s8  ;;  %p430_p6 = scmp.ne.s32.totalorder %s9178_s22, %s9174_s1 }
  0x45   : > { %s163_s6 = sld [smem:[#allocation4 + %s9491_s26]]  ;;  %p431_p7 = scmp.eq.s32.totalorder %s6308_s9, 1 }
  0x46   : > { %s13119_s28 = scalar_select %p9503_p2, 1, 0 }
  0x47   : > { %s9513_s17 = scalar_select %p412_p3, %s9182_s23, %s414_s16  }
  0x48   : > { %13120 = sst [smem:[#allocation57_spill]] %s13119_s28  ;;  %p9518_p8 = por %p425_p5, %p424_p4 }
  0x49   : > { %s155_s3 = sadd.s32 2, %s154_s0  ;;  %13121 = sst [smem:[#allocation58_spill]] %s9513_s17 }
  0x4a   : > { %s13122_s0 = scalar_select %p9518_p8, 1, 0 }
  0x4b   : > { %s164_s28 = sadd.s32 2, %s163_s6  ;;  %p9522_p10 = por %p431_p7, %p430_p6 }
  0x4c   : > { %s165_s8 = ssub.s32 %s155_s3, %s164_s28  ;;  %13123 = sst [smem:[#allocation59_spill]] %s13122_s0 }
  0x4d   : > { %p166_p9 = scmp.eq.s32.totalorder %s165_s8, 0  ;;  %p13060_p0 = scmp.lt.s32.totalorder %s9266_s5, 2 }
  0x4e   : > { %s13124_s29 = scalar_select %p9522_p10, 1, 0 }
  0x4f   : > { %s9529_s16 = scalar_select %p166_p9, %s9242_s18, %s168_s24  }
  0x50   : > { %13125 = sst [smem:[#allocation60_spill]] %s13124_s29  ;;  %s504_s6 = sand.u32 1, %s9242_s18  }
  0x51   : > { %13126 = sst [smem:[#allocation61_spill]] %s9529_s16  ;;  %s6330_s9 = sshll.u32 %s504_s6, 1 }
  0x52   : > { %p9537_p3 = pnand %p13060_p0, %p9497_p1  ;;  %s506_s24 = scalar_lea.vmem [#allocation9], %s6330_s9 }
  0x53   : > { %s8393_s8 = scalar_select %p9497_p1, [#allocation4], [#allocation19] }
  0x54   : > { %s8394_s28 = scalar_select %p9497_p1, %s9480_s25, 0 }
  0x55   : > { %s13266_s8 = smov (!%p13060_p0, %s8393_s8), [#allocation25]  ;;  %s523_s6 = sshll.u32 %s506_s24, 4  ;;  %s9550_s6 = int_to_ptr.vmem [resolvable:$true] %s523_s6 }
  0x56   : > { %s13268_s28 = smov (!%p13060_p0, %s8394_s28), 0  ;;  %p6346_p4 = scmp.ge.s32.totalorder %s9266_s5, 1 }
  0x57   : > { %s514_s10 = sld [smem:[%s13266_s8 + %s13268_s28]]  ;;  %p672_p5 = scmp.lt.s32.totalorder %s9266_s5, 3 }
  0x58   : > { %s9559_s18 = sld [smem:[#allocation4 + %s9480_s25]]  ;;  %s298_s8 = sadd.s32 1, %s9218_s12 }
  0x59   : > { %p9554_p6 = pnand %p6346_p4, %p672_p5  ;;  %s13129_s4 = sld [smem:[#allocation70_spill]] }
  0x5a   : > { %s9565_s9 = sld [smem:[#allocation4 + %s9491_s26]]  ;;  %s13130_s28 = sand.u32 1, %s9266_s5  }
  0x5b   : > { %s13128_s16 = scalar_select %p9554_p6, 1, 0 }
  0x5c   : > { %s9572_s1 = scalar_lea.sflag [#allocation10], %s13130_s28  ;;  %p8835_p7 = pneg %p9537_p3 }
  0x5d   : > { %s6332_s27 = sshll.u32 %s514_s10, 5 }
  0x5f   : > { %s6133_s29 = scalar_lea.hbm %s13129_s4, %s6332_s27  ;;  %s8838_s17 = scalar_lea.hbm %s13129_s4, 160 }
  0x60   : > { %s9567_s24 = scalar_lea.hbm %s6133_s29, 64  ;;  %s8863_s0 = scalar_lea.hbm %s6133_s29, 96 }
  0x61   : > { %p8834_p1 = scmp.ne.s32.totalorder %s9567_s24, %s8863_s0  ;;  %p8839_p5 = scmp.lt.u32.totalorder %s9567_s24, %s13129_s4 }
  0x62   : > { %p8840_p13 = scmp.lt.u32.totalorder %s8838_s17, %s8863_s0  ;;  %p8842_p12 = scmp.lt.u32.totalorder %s8863_s0, %s9567_s24 }
  0x63   : > { %p8836_p9 = pnand %p8835_p7, %p8834_p1 }
  0x64   : > { %p8841_p0 = por %p8840_p13, %p8839_p5 }
  0x65   : > { %p8837_p4 = pneg %p8836_p9 }
  0x66   : > { %p8843_p11 = por %p8842_p12, %p8841_p0 }
  0x68   : > { %p8844_p10 = pnand %p8843_p11, %p8837_p4 }
  0x6a   : > { %8847 = shalt.err (!%p8844_p10)
}
  0x6b   : > { %s8848_s29 = scalar_lea.vmem %s9550_s6, 32  ;;  %s9270_s28 = smov [#allocation9]  }
  0x6c   : > { %p8849_p1 = scmp.ne.s32.totalorder %s9550_s6, %s8848_s29  ;;  %s8853_s10 = sshll.u32 %s9270_s28, 4  ;;  %s8854_s10 = int_to_ptr.vmem [resolvable:$false] %s8853_s10 }
  0x6d   : > { %s8855_s22 = scalar_lea.vmem %s8854_s10, 64  ;;  %p8856_p2 = scmp.lt.s32.totalorder %s9550_s6, %s8854_s10 }
  0x6e   : > { %p8851_p9 = pnand %p8849_p1, %p8835_p7  ;;  %p8857_p13 = scmp.lt.s32.totalorder %s8855_s22, %s8848_s29 }
  0x70   : > { %p8852_p8 = pneg %p8851_p9  ;;  %p8858_p5 = por %p8857_p13, %p8856_p2 }
  0x72   : > { %p8859_p12 = pnand %p8858_p5, %p8852_p8 }
  0x74   : > { %8862 = shalt.err (!%p8859_p12)
}
  0x75   : > { %8426 = dma.hbm_to_vmem [thread:$0]  (!%p9537_p3), %s9567_s24, 32, %s9550_s6, %s9572_s1  }
  0x76   : > { %p305_p11 = scmp.ne.s32.totalorder %s9218_s12, %s9214_s11  ;;  %p311_p2 = scmp.ne.s32.totalorder %s9214_s11, %s9210_s30 }
  0x77   : > { %s285_s0 = sadd.s32 1, %s9559_s18  ;;  %p13131_p8 = scmp.eq.s32.totalorder %s9266_s5, 0 }
  0x78   : > { %s294_s3 = sadd.s32 1, %s9565_s9  ;;  %p13132_p0 = scmp.eq.s32.totalorder %s9475_s2, 0 }
  0x79   : > { %p307_p10 = por %p305_p11, %p13131_p8  ;;  %s295_s17 = ssub.s32 %s285_s0, %s294_s3 }
  0x7a   : > { %p9609_p7 = por %p311_p2, %p13132_p0  ;;  %p296_p4 = scmp.eq.s32.totalorder %s295_s17, 0 }
  0x7b   : > { %s586_s27 = sand.u32 1, %s9218_s12   ;;  %p13135_p3 = scmp.lt.s32.totalorder %s9266_s5, 2 }
  0x7c   : > { %s13133_s23 = scalar_select %p9609_p7, 1, 0 }
  0x7d   : > { %s6337_s6 = sshll.u32 %s586_s27, 6  ;;  %p9616_p1 = pnand %p13135_p3, %p307_p10 }
  0x7e   : > { %13134 = sst [smem:[#allocation62_spill]] %s13133_s23  ;;  %p13138_p9 = pmov %p13135_p3 }
  0x7f   : > { %s9623_s18 = scalar_select %p296_p4, %s9218_s12, %s298_s8  }
  0x80   : > { %s8399_s9 = scalar_select %p307_p10, [#allocation4], [#allocation21] }
  0x81   : > { %13137 = sst [smem:[#allocation63_spill]] %s9623_s18  ;;  %p13139_p13 = pmov %p13135_p3 }
  0x82   : > { %s8400_s24 = scalar_select %p307_p10, %s9480_s25, 0 }
  0x83   : > { %s13270_s9 = smov (!%p13138_p9, %s8399_s9), [#allocation27]  ;;  %s588_s29 = scalar_lea.vmem [#allocation12], %s6337_s6 }
  0x84   : > { %s13272_s24 = smov (!%p13139_p13, %s8400_s24), 0  ;;  %s604_s28 = sshll.u32 %s588_s29, 4  ;;  %s9630_s28 = int_to_ptr.vmem [resolvable:$true] %s604_s28 }
  0x85   : > { %s596_s10 = sld [smem:[%s13270_s9 + %s13272_s24]]  ;;  %p131_p5 = scmp.ne.s32.totalorder %s9254_s21, %s9250_s20 }
  0x86   : > { %s9633_s22 = sld [smem:[#allocation4 + %s9480_s25]]  ;;  %p13141_p11 = pmov %p13131_p8 }
  0x87   : > { %s9636_s0 = sld [smem:[#allocation4 + %s9491_s26]]  ;;  %s13143_s9 = sand.u32 1, %s9266_s5  }
  0x88   : > { %s13140_s7 = sld [smem:[#allocation73_spill]]  ;;  %p9650_p2 = por %p13141_p11, %p131_p5 }
  0x89   : > { %s9656_s24 = scalar_lea.sflag [#allocation13], %s13143_s9  ;;  %p8866_p10 = pneg %p9616_p1 }
  0x8b   : > { %s6339_s3 = sshll.u32 %s596_s10, 7 }
  0x8e   : > { %s6146_s4 = scalar_lea.hbm %s13140_s7, %s6339_s3  ;;  %s8869_s17 = scalar_lea.hbm %s13140_s7, 5120 }
  0x8f   : > { %s9646_s18 = scalar_lea.hbm %s6146_s4, 128  ;;  %s8894_s29 = scalar_lea.hbm %s6146_s4, 1152 }
  0x90   : > { %p8865_p8 = scmp.ne.s32.totalorder %s9646_s18, %s8894_s29  ;;  %p8870_p3 = scmp.lt.u32.totalorder %s9646_s18, %s13140_s7 }
  0x91   : > { %p8871_p9 = scmp.lt.u32.totalorder %s8869_s17, %s8894_s29  ;;  %p8873_p5 = scmp.lt.u32.totalorder %s8894_s29, %s9646_s18 }
  0x92   : > { %p8867_p0 = pnand %p8866_p10, %p8865_p8 }
  0x93   : > { %p8872_p13 = por %p8871_p9, %p8870_p3 }
  0x94   : > { %p8868_p4 = pneg %p8867_p0 }
  0x95   : > { %p8874_p11 = por %p8873_p5, %p8872_p13 }
  0x97   : > { %p8875_p12 = pnand %p8874_p11, %p8868_p4 }
  0x99   : > { %8878 = shalt.err (!%p8875_p12)
}
  0x9a   : > { %s8879_s4 = scalar_lea.vmem %s9630_s28, 1024  ;;  %s9271_s9 = smov [#allocation12]  }
  0x9b   : > { %p8880_p8 = scmp.ne.s32.totalorder %s9630_s28, %s8879_s4  ;;  %s8884_s10 = sshll.u32 %s9271_s9, 4  ;;  %s8885_s10 = int_to_ptr.vmem [resolvable:$false] %s8884_s10 }
  0x9c   : > { %s8886_s8 = scalar_lea.vmem %s8885_s10, 2048  ;;  %p8887_p6 = scmp.lt.s32.totalorder %s9630_s28, %s8885_s10 }
  0x9d   : > { %p8882_p0 = pnand %p8880_p8, %p8866_p10  ;;  %p8888_p3 = scmp.lt.s32.totalorder %s8886_s8, %s8879_s4 }
  0x9f   : > { %p8883_p7 = pneg %p8882_p0  ;;  %p8889_p9 = por %p8888_p3, %p8887_p6 }
  0xa1   : > { %p8890_p13 = pnand %p8889_p9, %p8883_p7 }
  0xa3   : > { %8893 = shalt.err (!%p8890_p13)
}
  0xa4   : > { %s13066_s29 = smov 640   ;;  %s13068_s3 = smov 128  }
  0xa5   : > { %s13070_s17 = smov 8   ;;  %s111_s27 = sadd.s32 1, %s9633_s22 }
  0xa6   : > { %8436 = dma.hbm_to_vmem [thread:$0]  (!%p9616_p1), %s9646_s18, 1024, %s9630_s28, %s9656_s24, %s13066_s29, %s13068_s3, %s13070_s17  }
  0xa7   : > { %p13144_p6 = scmp.ne.s32.totalorder %s9250_s20, %s9246_s19  ;;  %p13145_p7 = scmp.eq.s32.totalorder %s9475_s2, 0 }
  0xa8   : > { %s120_s9 = sadd.s32 1, %s9636_s0  ;;  %s474_s10 = sand.u32 1, %s9254_s21  }
  0xa9   : > { %p9692_p12 = por %p13145_p7, %p13144_p6  ;;  %s121_s8 = ssub.s32 %s111_s27, %s120_s9 }
  0xaa   : > { %p122_p10 = scmp.eq.s32.totalorder %s121_s8, 0  ;;  %s6327_s30 = sshll.u32 %s474_s10, 1 }
  0xab   : > { %s13146_s4 = scalar_select %p9692_p12, 1, 0 }
  0xac   : > { %p13148_p4 = scmp.lt.s32.totalorder %s9266_s5, 2  ;;  %s13150_s18 = sadd.s32 1, %s9254_s21 }
  0xad   : > { %13147 = sst [smem:[#allocation64_spill]] %s13146_s4  ;;  %s478_s27 = scalar_lea.vmem [#allocation6], %s6327_s30 }
  0xae   : > { %p9702_p1 = pnand %p13148_p4, %p9650_p2  ;;  %p13152_p5 = pmov %p13148_p4 }
  0xaf   : > { %s9709_s28 = scalar_select %p122_p10, %s9254_s21, %s13150_s18  }
  0xb0   : > { %s8390_s22 = scalar_select %p9650_p2, [#allocation4], [#allocation18] }
  0xb1   : > { %13151 = sst [smem:[#allocation65_spill]] %s9709_s28  ;;  %p13153_p11 = pmov %p13148_p4 }
  0xb2   : > { %s8391_s0 = scalar_select %p9650_p2, %s9480_s25, 0 }
  0xb3   : > { %s13274_s22 = smov (!%p13152_p5, %s8390_s22), [#allocation24]  ;;  %s495_s9 = sshll.u32 %s478_s27, 4  ;;  %s9720_s9 = int_to_ptr.vmem [resolvable:$true] %s495_s9 }
  0xb4   : > { %s13276_s0 = smov (!%p13153_p11, %s8391_s0), 0  ;;  %s9723_s29 = sld [smem:[#allocation4 + %s9480_s25]] }
  0xb5   : > { %s486_s8 = sld [smem:[%s13274_s22 + %s13276_s0]]  ;;  %s254_s3 = sadd.s32 1, %s9230_s15 }
  0xb6   : > { %s9726_s18 = sld [smem:[#allocation4 + %s9491_s26]]  ;;  %p261_p8 = scmp.ne.s32.totalorder %s9230_s15, %s9226_s14 }
  0xb7   : > { %p267_p2 = scmp.ne.s32.totalorder %s9226_s14, %s9222_s13  ;;  %s13154_s28 = sld [smem:[#allocation69_spill]] }
  0xb8   : > { %p13156_p0 = scmp.eq.s32.totalorder %s9266_s5, 0  ;;  %p13158_p9 = pmov %p13145_p7 }
  0xb9   : > { %s475_s13 = scalar_lea.sflag [#allocation7], %s474_s10  ;;  %p8897_p7 = pneg %p9702_p1 }
  0xba   : > { %p9738_p3 = por %p261_p8, %p13156_p0  ;;  %p9746_p13 = por %p267_p2, %p13158_p9 }
  0xbb   : > { %s6329_s6 = sshll.u32 %s486_s8, 5 }
  0xbc   : > { %s13159_s0 = scalar_select %p9746_p13, 1, 0 }
  0xbd   : > { %s13155_s4 = smov %s13154_s28  ;;  %s6127_s21 = scalar_lea.hbm %s13154_s28, %s6329_s6 }
  0xbe   : > { %s9742_s22 = scalar_lea.hbm %s6127_s21, 32  ;;  %s8925_s27 = scalar_lea.hbm %s6127_s21, 64 }
  0xbf   : > { %p8896_p6 = scmp.ne.s32.totalorder %s9742_s22, %s8925_s27  ;;  %s8900_s28 = scalar_lea.hbm %s13155_s4, 160 }
  0xc0   : > { %p8901_p5 = scmp.lt.u32.totalorder %s9742_s22, %s13155_s4  ;;  %p8902_p11 = scmp.lt.u32.totalorder %s8900_s28, %s8925_s27 }
  0xc1   : > { %p8898_p10 = pnand %p8897_p7, %p8896_p6  ;;  %p8904_p2 = scmp.lt.u32.totalorder %s8925_s27, %s9742_s22 }
  0xc2   : > { %p8903_p8 = por %p8902_p11, %p8901_p5 }
  0xc3   : > { %p8899_p4 = pneg %p8898_p10 }
  0xc4   : > { %p8905_p0 = por %p8904_p2, %p8903_p8 }
  0xc6   : > { %p8906_p9 = pnand %p8905_p0, %p8899_p4 }
  0xc8   : > { %8909 = shalt.err (!%p8906_p9)
}
  0xc9   : > { %s8910_s21 = scalar_lea.vmem %s9720_s9, 32  ;;  %s9275_s10 = smov [#allocation6]  }
  0xca   : > { %p8911_p6 = scmp.ne.s32.totalorder %s9720_s9, %s8910_s21  ;;  %s8915_s7 = sshll.u32 %s9275_s10, 4  ;;  %s8916_s7 = int_to_ptr.vmem [resolvable:$false] %s8915_s7 }
  0xcb   : > { %s8917_s17 = scalar_lea.vmem %s8916_s7, 64  ;;  %p8918_p12 = scmp.lt.s32.totalorder %s9720_s9, %s8916_s7 }
  0xcc   : > { %p8913_p10 = pnand %p8911_p6, %p8897_p7  ;;  %p8919_p5 = scmp.lt.s32.totalorder %s8917_s17, %s8910_s21 }
  0xce   : > { %p8914_p13 = pneg %p8913_p10  ;;  %p8920_p11 = por %p8919_p5, %p8918_p12 }
  0xd0   : > { %p8921_p8 = pnand %p8920_p11, %p8914_p13 }
  0xd2   : > { %8924 = shalt.err (!%p8921_p8)
}
  0xd3   : > { %8421 = dma.hbm_to_vmem [thread:$0]  (!%p9702_p1), %s9742_s22, 32, %s9720_s9, %s475_s13  }
  0xd4   : > { %s251_s27 = ssub.s32 %s9723_s29, %s9726_s18  ;;  %s13160_s28 = sld [smem:[#allocation46_spill]] }
  0xd5   : > { %s557_s19 = sand.u32 1, %s9230_s15   ;;  %s13161_s8 = sld [smem:[#allocation45_spill]] }
  0xd6   : > { %p252_p12 = scmp.eq.s32.totalorder %s251_s27, 0  ;;  %s6333_s6 = sshll.u32 %s557_s19, 6 }
  0xd7   : > { %p13162_p13 = scmp.lt.s32.totalorder %s9266_s5, 2  ;;  %s13163_s21 = sld [smem:[#allocation44_spill]] }
  0xd8   : > { %s9788_s7 = scalar_select %p252_p12, %s9230_s15, %s254_s3  }
  0xd9   : > { %p9781_p7 = pnand %p13162_p13, %p9738_p3  ;;  %p13166_p1 = pmov %p13162_p13 }
  0xda   : > { %13165 = sst [smem:[#allocation66_spill]] %s9788_s7  ;;  %s559_s18 = scalar_lea.vmem [#allocation11], %s6333_s6 }
  0xdb   : > { %s8396_s29 = scalar_select %p9738_p3, [#allocation4], [#allocation20] }
  0xdc   : > { %s8397_s9 = scalar_select %p9738_p3, %s9480_s25, 0 }
  0xdd   : > { %s13278_s29 = smov (!%p13166_p1, %s8396_s29), [#allocation26]  ;;  %p13167_p4 = pmov %p13166_p1 }
  0xde   : > { %s574_s22 = sshll.u32 %s559_s18, 4  ;;  %s9802_s17 = sld [smem:[#allocation4 + %s9480_s25]]  ;;  %s9799_s22 = int_to_ptr.vmem [resolvable:$true] %s574_s22 }
  0xdf   : > { %s13280_s9 = smov (!%p13167_p4, %s8397_s9), 0  ;;  %s9805_s3 = sld [smem:[#allocation4 + %s9491_s26]] }
  0xe0   : > { %s567_s13 = sld [smem:[%s13278_s29 + %s13280_s9]]  ;;  %p349_p2 = scmp.ne.s32.totalorder %s13160_s28, %s13161_s8 }
  0xe1   : > { %s13168_s7 = sld [smem:[#allocation72_spill]]  ;;  %p13169_p3 = scmp.eq.s32.totalorder %s9266_s5, 0 }
  0xe2   : > { %p8928_p10 = pneg %p9781_p7 }
  0xe3   : > { %p9819_p9 = por %p349_p2, %p13169_p3 }
  0xe6   : > { %s7997_s19 = sshll.u32 %s567_s13, 7 }
  0xe7   : > { %s9815_s15 = scalar_lea.hbm %s13168_s7, %s7997_s19  ;;  %s8931_s18 = scalar_lea.hbm %s13168_s7, 5120 }
  0xe8   : > { %s8926_s29 = scalar_lea.hbm %s9815_s15, 1024  ;;  %p8932_p8 = scmp.lt.u32.totalorder %s9815_s15, %s13168_s7 }
  0xe9   : > { %p8927_p6 = scmp.ne.s32.totalorder %s9815_s15, %s8926_s29  ;;  %p8933_p12 = scmp.lt.u32.totalorder %s8931_s18, %s8926_s29 }
  0xea   : > { %p8935_p1 = scmp.lt.u32.totalorder %s8926_s29, %s9815_s15 }
  0xeb   : > { %p8929_p5 = pnand %p8928_p10, %p8927_p6  ;;  %p8934_p13 = por %p8933_p12, %p8932_p8 }
  0xed   : > { %p8930_p11 = pneg %p8929_p5  ;;  %p8936_p4 = por %p8935_p1, %p8934_p13 }
  0xef   : > { %p8937_p2 = pnand %p8936_p4, %p8930_p11 }
  0xf1   : > { %8940 = shalt.err (!%p8937_p2)
}
  0xf2   : > { %s8941_s30 = scalar_lea.vmem %s9799_s22, 1024  ;;  %s9276_s4 = smov [#allocation11]  }
  0xf3   : > { %p8942_p3 = scmp.ne.s32.totalorder %s9799_s22, %s8941_s30  ;;  %s8946_s9 = sshll.u32 %s9276_s4, 4  ;;  %s8947_s9 = int_to_ptr.vmem [resolvable:$false] %s8946_s9 }
  0xf4   : > { %s8948_s13 = scalar_lea.vmem %s8947_s9, 2048  ;;  %p8949_p0 = scmp.lt.s32.totalorder %s9799_s22, %s8947_s9 }
  0xf5   : > { %p8944_p6 = pnand %p8942_p3, %p8928_p10  ;;  %p8950_p8 = scmp.lt.s32.totalorder %s8948_s13, %s8941_s30 }
  0xf7   : > { %p8945_p5 = pneg %p8944_p6  ;;  %p8951_p12 = por %p8950_p8, %p8949_p0 }
  0xf9   : > { %p8952_p13 = pnand %p8951_p12, %p8945_p5 }
  0xfb   : > { %8955 = shalt.err (!%p8952_p13)
}
  0xfc   : > { %s13171_s29 = smov 8   ;;  %s13172_s18 = smov 128  }
  0xfd   : > { %s13173_s19 = smov 640   ;;  %p13174_p0 = scmp.eq.s32.totalorder %s9475_s2, 0 }
  0xfe   : > { %8431 = dma.hbm_to_vmem [thread:$0]  (!%p9781_p7), %s9815_s15, 1024, %s9799_s22, %s9572_s1, %s13173_s19, %s13172_s18, %s13171_s29  }
  0xff   : > { %p13175_p10 = scmp.ne.s32.totalorder %s13161_s8, %s13163_s21  ;;  %s616_s30 = sand.u32 1, %s13160_s28  }
 0x100   : > { %s329_s4 = sadd.s32 2, %s9802_s17  ;;  %s338_s9 = sadd.s32 2, %s9805_s3 }
 0x101   : > { %p9857_p11 = por %p13175_p10, %p13174_p0  ;;  %s339_s13 = ssub.s32 %s329_s4, %s338_s9 }
 0x102   : > { %s13178_s27 = sld [smem:[#allocation43_spill]]  ;;  %s6340_s7 = sshll.u32 %s616_s30, 6 }
 0x103   : > { %s13176_s10 = scalar_select %p9857_p11, 1, 0 }
 0x104   : > { %p340_p1 = scmp.eq.s32.totalorder %s339_s13, 0  ;;  %s13179_s12 = sld [smem:[#allocation41_spill]] }
 0x105   : > { %13177 = sst [smem:[#allocation44_spill]] %s13176_s10  ;;  %s13180_s23 = sld [smem:[#allocation42_spill]] }
 0x106   : > { %s8402_s11 = scalar_select %p9819_p9, [#allocation4], [#allocation22] }
 0x107   : > { %s13181_s1 = sadd.s32 1, %s13160_s28  ;;  %p13183_p7 = scmp.lt.s32.totalorder %s9266_s5, 2 }
 0x108   : > { %s13282_s28 = smov (!%p340_p1, %s13160_s28), %s13181_s1  ;;  %s618_s22 = scalar_lea.vmem [#allocation14], %s6340_s7 }
 0x109   : > { %13182 = sst [smem:[#allocation67_spill]] %s13282_s28  ;;  %s13284_s11 = smov (!%p13183_p7, %s8402_s11), [#allocation28] }
 0x10a   : > { %s8403_s15 = scalar_select %p9819_p9, %s9480_s25, 0 }
 0x10b   : > { %p13184_p4 = pmov %p13183_p7  ;;  %s634_s17 = sshll.u32 %s618_s22, 4  ;;  %s9886_s17 = int_to_ptr.vmem [resolvable:$true] %s634_s17 }
 0x10c   : > { %s9889_s3 = sld [smem:[#allocation4 + %s9480_s25]]  ;;  %s386_s9 = sadd.s32 1, %s13178_s27 }
 0x10d   : > { %s13286_s15 = smov (!%p13184_p4, %s8403_s15), 0  ;;  %p13185_p2 = pmov %p13184_p4 }
 0x10e   : > { %s626_s21 = sld [smem:[%s13284_s11 + %s13286_s15]] }
 0x10f   : > { %p9882_p3 = pnand %p13185_p2, %p9819_p9  ;;  %s9892_s30 = sld [smem:[#allocation4 + %s9491_s26]] }
 0x110   : > { %s13187_s1 = sld [smem:[#allocation74_spill]] }
 0x111   : > { %p8958_p8 = pneg %p9882_p3 }
 0x114   : > { %s6342_s4 = sshll.u32 %s626_s21, 7 }
 0x116   : > { %s13188_s2 = smov %s13187_s1  ;;  %s6152_s28 = scalar_lea.hbm %s13187_s1, %s6342_s4 }
 0x117   : > { %s9900_s10 = scalar_lea.hbm %s6152_s28, 256  ;;  %s8986_s11 = scalar_lea.hbm %s6152_s28, 1280 }
 0x118   : > { %p8957_p5 = scmp.ne.s32.totalorder %s9900_s10, %s8986_s11  ;;  %s8961_s15 = scalar_lea.hbm %s13188_s2, 5120 }
 0x119   : > { %p8962_p0 = scmp.lt.u32.totalorder %s9900_s10, %s13188_s2  ;;  %p8963_p10 = scmp.lt.u32.totalorder %s8961_s15, %s8986_s11 }
 0x11a   : > { %p8959_p12 = pnand %p8958_p8, %p8957_p5  ;;  %p8965_p7 = scmp.lt.u32.totalorder %s8986_s11, %s9900_s10 }
 0x11b   : > { %p8964_p1 = por %p8963_p10, %p8962_p0 }
 0x11c   : > { %p8960_p13 = pneg %p8959_p12 }
 0x11d   : > { %p8966_p4 = por %p8965_p7, %p8964_p1 }
 0x11f   : > { %p8967_p2 = pnand %p8966_p4, %p8960_p13 }
 0x121   : > { %8970 = shalt.err (!%p8967_p2)
}
 0x122   : > { %s8971_s28 = scalar_lea.vmem %s9886_s17, 1024  ;;  %s9277_s4 = smov [#allocation14]  }
 0x123   : > { %p8972_p5 = scmp.ne.s32.totalorder %s9886_s17, %s8971_s28  ;;  %s8976_s13 = sshll.u32 %s9277_s4, 4  ;;  %s8977_s13 = int_to_ptr.vmem [resolvable:$false] %s8976_s13 }
 0x124   : > { %s8978_s6 = scalar_lea.vmem %s8977_s13, 2048  ;;  %p8979_p9 = scmp.lt.s32.totalorder %s9886_s17, %s8977_s13 }
 0x125   : > { %p8974_p12 = pnand %p8972_p5, %p8958_p8  ;;  %p8980_p0 = scmp.lt.s32.totalorder %s8978_s6, %s8971_s28 }
 0x127   : > { %p8975_p6 = pneg %p8974_p12  ;;  %p8981_p10 = por %p8980_p0, %p8979_p9 }
 0x129   : > { %p8982_p1 = pnand %p8981_p10, %p8975_p6 }
 0x12b   : > { %8985 = shalt.err (!%p8982_p1)
}
 0x12c   : > { %s13189_s1 = sld [smem:[#allocation55_spill]]  ;;  %s373_s8 = sadd.s32 3, %s9889_s3 }
 0x12d   : > { %8441 = dma.hbm_to_vmem [thread:$0]  (!%p9882_p3), %s9900_s10, 1024, %s9886_s17, %s9656_s24, %s13173_s19, %s13172_s18, %s13171_s29  }
 0x12e   : > { %p13191_p6 = scmp.ne.s32.totalorder %s13180_s23, %s13179_s12  ;;  %s382_s26 = sadd.s32 3, %s9892_s30 }
 0x12f   : > { %s644_s7 = sand.u32 1, %s13178_s27   ;;  %s383_s15 = ssub.s32 %s373_s8, %s382_s26 }
 0x130   : > { %p13193_p13 = scmp.eq.s32.totalorder %s9266_s5, 0  ;;  %p13194_p7 = scmp.ne.s32.totalorder %s13178_s27, %s13180_s23 }
 0x131   : > { %p384_p2 = scmp.eq.s32.totalorder %s383_s15, 0  ;;  %s6343_s21 = sshll.u32 %s644_s7, 6 }
 0x132   : > { %p13190_p9 = scmp.eq.s32.totalorder %s13189_s1, 0  ;;  %p395_p4 = por %p13194_p7, %p13193_p13 }
 0x133   : > { %p13195_p5 = scmp.lt.s32.totalorder %s9266_s5, 2  ;;  %s13288_s27 = smov (!%p384_p2, %s13178_s27), %s386_s9 }
 0x134   : > { %p9938_p8 = por %p13191_p6, %p13190_p9  ;;  %s13290_s25 = smov (!%p395_p4, %s9480_s25), 0 }
 0x135   : > { %p9951_p12 = pnand %p13195_p5, %p395_p4  ;;  %p13197_p3 = pmov %p13195_p5 }
 0x136   : > { %s13192_s11 = scalar_select %p9938_p8, 1, 0 }
 0x137   : > { %s8405_s12 = scalar_select %p395_p4, [#allocation4], [#allocation23] }
 0x138   : > { %p13198_p0 = pmov %p13197_p3  ;;  %s648_s24 = scalar_lea.vmem [#allocation15], %s6343_s21 }
 0x139   : > { %s13292_s12 = smov (!%p13197_p3, %s8405_s12), [#allocation29]  ;;  %s664_s10 = sshll.u32 %s648_s24, 4  ;;  %s9965_s10 = int_to_ptr.vmem [resolvable:$true] %s664_s10 }
 0x13a   : > { %s13294_s25 = smov (!%p13198_p0, %s13290_s25), 0  ;;  %s13199_s28 = sld [smem:[#allocation75_spill]] }
 0x13b   : > { %s656_s23 = sld [smem:[%s13292_s12 + %s13294_s25]]  ;;  %s9972_s9 = scalar_lea.sflag [#allocation16], %s644_s7 }
 0x13c   : > { %p8989_p1 = pneg %p9951_p12 }
 0x140   : > { %s13200_s4 = smov %s13199_s28 }
 0x141   : > { %s6345_s17 = sshll.u32 %s656_s23, 7  ;;  %s8992_s26 = scalar_lea.hbm %s13200_s4, 5120 }
 0x142   : > { %s6158_s13 = scalar_lea.hbm %s13199_s28, %s6345_s17 }
 0x143   : > { %s9970_s6 = scalar_lea.hbm %s6158_s13, 384  ;;  %s9017_s1 = scalar_lea.hbm %s6158_s13, 1408 }
 0x144   : > { %p8988_p10 = scmp.ne.s32.totalorder %s9970_s6, %s9017_s1  ;;  %p8993_p13 = scmp.lt.u32.totalorder %s9970_s6, %s13200_s4 }
 0x145   : > { %p8994_p7 = scmp.lt.u32.totalorder %s8992_s26, %s9017_s1  ;;  %p8996_p2 = scmp.lt.u32.totalorder %s9017_s1, %s9970_s6 }
 0x146   : > { %p8990_p9 = pnand %p8989_p1, %p8988_p10 }
 0x147   : > { %p8995_p4 = por %p8994_p7, %p8993_p13 }
 0x148   : > { %p8991_p6 = pneg %p8990_p9 }
 0x149   : > { %p8997_p5 = por %p8996_p2, %p8995_p4 }
 0x14b   : > { %p8998_p3 = pnand %p8997_p5, %p8991_p6 }
 0x14d   : > { %9001 = shalt.err (!%p8998_p3)
}
 0x14e   : > { %s9002_s7 = scalar_lea.vmem %s9965_s10, 1024  ;;  %s9278_s12 = smov [#allocation15]  }
 0x14f   : > { %p9003_p0 = scmp.ne.s32.totalorder %s9965_s10, %s9002_s7  ;;  %s9007_s23 = sshll.u32 %s9278_s12, 4  ;;  %s9008_s23 = int_to_ptr.vmem [resolvable:$false] %s9007_s23 }
 0x150   : > { %s9009_s24 = scalar_lea.vmem %s9008_s23, 2048  ;;  %p9010_p8 = scmp.lt.s32.totalorder %s9965_s10, %s9008_s23 }
 0x151   : > { %p9005_p10 = pnand %p9003_p0, %p8989_p1  ;;  %p9011_p13 = scmp.lt.s32.totalorder %s9009_s24, %s9002_s7 }
 0x153   : > { %p9006_p9 = pneg %p9005_p10  ;;  %p9012_p7 = por %p9011_p13, %p9010_p8 }
 0x155   : > { %p9013_p4 = pnand %p9012_p7, %p9006_p9 }
 0x157   : > { %9016 = shalt.err (!%p9013_p4)
}
 0x158   : > { %8446 = dma.hbm_to_vmem [thread:$0]  (!%p9951_p12), %s9970_s6, 1024, %s9965_s10, %s9972_s9, %s13173_s19, %s13172_s18, %s13171_s29  }
 0x159   : > { %p13201_p1 = scmp.ne.s32.totalorder %s13128_s16, 0 }
 0x15a   : > { %s13202_s17 = sld [smem:[#allocation64_spill]] (!%p13201_p1)  ;;  %s678_s3 = sand.u32 (!%p13201_p1), 1, %s9250_s20  }
 0x15b   : > { %676 = sbr.rel (%p13201_p1) target bundleno = 4883 (0x1313), region = 52  ;;  %s6347_s30 = sshll.u32 (!%p13201_p1), %s678_s3, 1 }
 0x15c   : > { %s679_s28 = scalar_lea.sflag (!%p13201_p1), [#allocation7], %s678_s3  ;;  %s10005_s13 = scalar_lea.vmem (!%p13201_p1), [#allocation6], %s6347_s30 }
 0x160   : > { %p13203_p8 = scmp.ne.s32.totalorder (!%p13201_p1), %s13202_s17, 0 }
 0x162   : > { %9145 = dma.done.wait (%p13203_p8), %s679_s28, 32  }
 0x163   : > { %9147 = vsyncadd (%p13203_p8), %s679_s28, 4294967264  ;;  %s13204_s22 = sld [smem:[#allocation55_spill]]  ;;  %s13205_s1 = sld [smem:[#allocation50_spill]] }
 0x164   : > { %s13206_s25 = sld [smem:[#allocation57_spill]] }
 0x169   : > { %s687_s8 = sand.u32 1, %s13204_s22   ;;  %s689_s29 = sand.u32 1, %s13205_s1  }
 0x16a   : > { %s6348_s18 = sshll.u32 %s689_s29, 1  ;;  %s688_s16 = scalar_lea.sflag [#allocation10], %s687_s8 }
 0x16b   : > { %s10013_s19 = scalar_lea.vmem [#allocation9], %s6348_s18  ;;  %p13207_p12 = scmp.ne.s32.totalorder %s13206_s25, 0 }
 0x16d   : > { %9149 = dma.done.wait (%p13207_p12), %s688_s16, 32  }
 0x16e   : > { %9151 = vsyncadd (%p13207_p12), %s688_s16, 4294967264  ;;  %s698_s10 = sand.u32 1, %s9226_s14   ;;  %p13208_p6 = scmp.ne.s32.totalorder %s13159_s0, 0 }
 0x16f   : > { %s6349_s6 = sshll.u32 %s698_s10, 6 }
 0x170   : > { %s10020_s9 = scalar_lea.vmem [#allocation11], %s6349_s6 }
 0x171   : > { %9153 = dma.done.wait (%p13208_p6), %s688_s16, 1024  }
 0x172   : > { %9155 = vsyncadd (%p13208_p6), %s688_s16, 4294966272  ;;  %s13209_s26 = sld [smem:[#allocation47_spill]]  ;;  %s13210_s15 = sld [smem:[#allocation62_spill]] }
 0x173   : > { %s706_s12 = scalar_lea.sflag [#allocation13], %s687_s8 }
 0x178   : > { %s707_s21 = sand.u32 1, %s13209_s26   ;;  %p13211_p2 = scmp.ne.s32.totalorder %s13210_s15, 0 }
 0x179   : > { %s6350_s7 = sshll.u32 %s707_s21, 6 }
 0x17a   : > { %s10027_s23 = scalar_lea.vmem [#allocation12], %s6350_s7 }
 0x17b   : > { %9157 = dma.done.wait (%p13211_p2), %s706_s12, 1024  }
 0x17c   : > { %9159 = vsyncadd (%p13211_p2), %s706_s12, 4294966272  ;;  %s13212_s24 = sld [smem:[#allocation45_spill]] }
 0x182   : > { %s716_s3 = sand.u32 1, %s13212_s24  }
 0x183   : > { %s6351_s30 = sshll.u32 %s716_s3, 6 }
 0x184   : > { %s10034_s28 = scalar_lea.vmem [#allocation14], %s6351_s30 }
 0x185   : > { %9161 = dma.done.wait (%p9857_p11), %s706_s12, 1024  }
 0x186   : > { %9163 = vsyncadd (%p9857_p11), %s706_s12, 4294966272  ;;  %s13214_s0 = sld [smem:[#allocation42_spill]]  ;;  %p13215_p5 = scmp.ne.s32.totalorder %s13192_s11, 0 }
 0x18c   : > { %s723_s22 = sand.u32 1, %s13214_s0  }
 0x18d   : > { %s6352_s1 = sshll.u32 %s723_s22, 6  ;;  %s724_s25 = scalar_lea.sflag [#allocation16], %s723_s22 }
 0x18e   : > { %s10041_s8 = scalar_lea.vmem [#allocation15], %s6352_s1 }
 0x18f   : > { %9165 = dma.done.wait (%p13215_p5), %s724_s25, 1024  }
 0x190   : > { %9167 = vsyncadd (%p13215_p5), %s724_s25, 4294966272  ;;  %s13216_s29 = sld [smem:[#allocation53_spill]]  ;;  %v923_v0 = vlaneseq  ;;  %v9279_v1 = vmov 0.0   ;;  %s13217_s11 = sld [smem:[#allocation39_spill]] }
 0x191   : > { %959 = vst [vmem:[#allocation2] sm:$0xff] %v9279_v1  ;;  %960 = vst [vmem:[#allocation2 + $0x8] sm:$0xff] %v9279_v1  ;;  %s13218_s25 = sld [smem:[#allocation68_spill]] }
 0x192   : > { %961 = vst [vmem:[#allocation2 + $0x10] sm:$0xff] %v9279_v1  ;;  %962 = vst [vmem:[#allocation2 + $0x18] sm:$0xff] %v9279_v1  ;;  %v10074_v2 = vshrl.u32 %v923_v0, 7 }
 0x193   : > { %963 = vst [vmem:[#allocation2 + $0x20] sm:$0xff] %v9279_v1  ;;  %964 = vst [vmem:[#allocation2 + $0x28] sm:$0xff] %v9279_v1 }
 0x194   : > { %965 = vst [vmem:[#allocation2 + $0x30] sm:$0xff] %v9279_v1  ;;  %966 = vst [vmem:[#allocation2 + $0x38] sm:$0xff] %v9279_v1  ;;  %v10087_v3 = vadd.s32 8, %v10074_v2  ;;  %v10090_v4 = vadd.s32 16, %v10074_v2  ;;  %v10093_v5 = vadd.s32 24, %v10074_v2  ;;  %v10096_v6 = vadd.s32 32, %v10074_v2 }
 0x195   : > { %967 = vst [vmem:[#allocation2 + $0x40] sm:$0xff] %v9279_v1  ;;  %968 = vst [vmem:[#allocation2 + $0x48] sm:$0xff] %v9279_v1  ;;  %v10102_v7 = vadd.s32 40, %v10074_v2  ;;  %v10105_v8 = vadd.s32 48, %v10074_v2  ;;  %v10108_v9 = vadd.s32 56, %v10074_v2  ;;  %v10111_v10 = vadd.s32 64, %v10074_v2 }
 0x196   : > { %s6353_s18 = sshll.u32 %s13216_s29, 7  ;;  %s10049_s16 = smul.u32 3, %s13216_s29  ;;  %969 = vst [vmem:[#allocation2 + $0x50] sm:$0xff] %v9279_v1  ;;  %970 = vst [vmem:[#allocation2 + $0x58] sm:$0xff] %v9279_v1  ;;  %v10114_v11 = vadd.s32 72, %v10074_v2  ;;  %v10117_v12 = vadd.s32 80, %v10074_v2 }
 0x197   : > { %s10051_s10 = sld [smem:[#allocation4 + %s6353_s18]]  ;;  %971 = vst [vmem:[#allocation2 + $0x60] sm:$0xff] %v9279_v1  ;;  %972 = vst [vmem:[#allocation2 + $0x68] sm:$0xff] %v9279_v1  ;;  %s13088_s7 = sand.u32 1, %s13217_s11   ;;  %v10120_v13 = vadd.s32 88, %v10074_v2  ;;  %v10123_v14 = vadd.s32 96, %v10074_v2 }
 0x198   : > { %s10053_s6 = sld [smem:[#allocation4 + %s6353_s18]]  ;;  %973 = vst [vmem:[#allocation2 + $0x70] sm:$0xff] %v9279_v1  ;;  %974 = vst [vmem:[#allocation2 + $0x78] sm:$0xff] %v9279_v1  ;;  %s13089_s21 = sadd.s32 1, %s10049_s16  ;;  %v10128_v15 = vadd.s32 104, %v10074_v2  ;;  %v10131_v16 = vadd.s32 112, %v10074_v2 }
 0x199   : > { %s919_s26 = sld [smem:[#allocation4 + %s6353_s18]]  ;;  %s10084_s24 = smul.u32 384, %s13088_s7  ;;  %v10134_v17 = vadd.s32 120, %v10074_v2  ;;  %v10137_v18 = vadd.s32 128, %v10074_v2  ;;  %v10142_v19 = vadd.s32 136, %v10074_v2  ;;  %v10145_v20 = vadd.s32 144, %v10074_v2 }
 0x19a   : > { %s10072_s15 = sld [smem:[#allocation5 + %s10049_s16]]  ;;  %s10099_s17 = smul.u32 768, %s13216_s29  ;;  %v10148_v21 = vadd.s32 152, %v10074_v2  ;;  %v10151_v22 = vadd.s32 160, %v10074_v2  ;;  %v10155_v23 = vadd.s32 168, %v10074_v2  ;;  %v10158_v24 = vadd.s32 176, %v10074_v2 }
 0x19b   : > { %s10080_s12 = sld [smem:[#allocation5 + %s13089_s21]]  ;;  %v10161_v25 = vadd.s32 184, %v10074_v2  ;;  %v10164_v26 = vadd.s32 192, %v10074_v2  ;;  %v10167_v27 = vadd.s32 200, %v10074_v2  ;;  %v10170_v28 = vadd.s32 208, %v10074_v2  ;;  %s10210_s21 = scalar_lea.vmem [#allocation17], %s10084_s24 }
 0x19c   : > { %v10173_v29 = vadd.s32 216, %v10074_v2  ;;  %v10176_v30 = vadd.s32 224, %v10074_v2  ;;  %v10181_v31 = vadd.s32 232, %v10074_v2  ;;  %v10184_v32 = vadd.s32 240, %v10074_v2 }
 0x19d   : > { %p818_p11 = scmp.lt.s32.totalorder %s10051_s10, 4  ;;  %v10187_v33 = vadd.s32 248, %v10074_v2 }
 0x19e   : > { %s856_s3 = sadd.s32 3, %s10053_s6 }
 0x19f   : > { %p857_p3 = scmp.lt.s32.totalorder %s856_s3, 4  ;;  %s10139_s30 = sshll.u32 %s919_s26, 8 }
 0x1a0   : > { %s13296_s10 = smov (!%p818_p11, %s10051_s10), 4  ;;  %s13219_s26 = sld [smem:[#allocation71_spill]] }
 0x1a1   : > { %s13298_s3 = smov (!%p857_p3, %s856_s3), 4  ;;  %s6354_s0 = sshll.u32 %s13296_s10, 1 }
 0x1a2   : > { %p976_p0 = scmp.lt.s32.totalorder %s10072_s15, %s10080_s12  ;;  %s10192_s29 = scalar_lea.vmem %s13218_s25, %s6354_s0 }
 0x1a3   : > { %s6356_s18 = sshll.u32 %s13298_s3, 1  ;;  %p977_p10 = scmp.lt.s32.totalorder %s10139_s30, %s10080_s12 }
 0x1a4   : > { %s10202_s7 = sadd.s32 256, %s10139_s30 }
 0x1a5   : > { %p978_p9 = pnand %p977_p10, %p976_p0  ;;  %p981_p13 = scmp.gt.s32.totalorder %s10202_s7, %s10072_s15 }
 0x1a6   : > { %s10197_s10 = scalar_lea.vmem %s13219_s26, %s6356_s18 }
 0x1a7   : > { %p979_p7 = pneg %p978_p9 }
 0x1a9   : > { %p982_p4 = pnand %p981_p13, %p979_p7 }
 0x1aa   : > { %v986_v34 = vld [vmem:[%s10192_s29] sm:$0x3] (!%p982_p4)  ;;  %v987_v35 = vstv (!%p982_p4), %s10099_s17  ;;  %v995_v36 = vsub.s32 (!%p982_p4), 1, %v10074_v2  ;;  %v991_v37 = vsub.s32 (!%p982_p4), 0, %v10074_v2  ;;  %v8667_v39 = vld [vmem:[%s10020_s9 + $0x4] ss:$8 sps:$4 sm:$0xff] (!%p982_p4)  }
 0x1ab   : > { %985 = sbr.rel (%p982_p4) target bundleno = 787 (0x313), region = 80  ;;  %v988_v38 = vsub.s32 (!%p982_p4), %v986_v34, %v987_v35  ;;  %v8670_v42 = vld [vmem:[%s10020_s9 + $0x24] ss:$8 sps:$4 sm:$0xff] (!%p982_p4)   ;;  %1317 = vmatprep.mubr.bf16.mxu0 (!%p982_p4), %v8667_v39  ;;  %v9280_v43 = vmov (!%p982_p4), 1.0|1.0   ;;  %v1221_v50 = vld [vmem:[#allocation2] sm:$0xff] (!%p982_p4) }
 0x1ac   : > { %1337 = vmatprep.mubr.bf16.mxu1 (!%p982_p4), %v8670_v42  ;;  %v8665_v44 = vld [vmem:[%s10020_s9] ss:$8 sps:$4 sm:$0xff] (!%p982_p4)   ;;  %v8671_v46 = vld [vmem:[%s10020_s9 + $0x14] ss:$8 sps:$4 sm:$0xff] (!%p982_p4)   ;;  %v8675_v48 = vld [vmem:[%s10020_s9 + $0x10] ss:$8 sps:$4 sm:$0xff] (!%p982_p4)  }
 0x1ad   : > { %v10217_v40 = vrot.slane (!%p982_p4), %v988_v38, %v995_v36  ;;  %v10219_v41 = vrot.slane (!%p982_p4), %v988_v38, %v991_v37  ;;  %v8668_v45 = vld [vmem:[%s10020_s9 + $0x20] ss:$8 sps:$4 sm:$0xff] (!%p982_p4)   ;;  %v8673_v47 = vld [vmem:[%s10020_s9 + $0x34] ss:$8 sps:$4 sm:$0xff] (!%p982_p4)   ;;  %v8676_v49 = vld [vmem:[%s10020_s9 + $0x30] ss:$8 sps:$4 sm:$0xff] (!%p982_p4)  }
 0x1ae   : > { %v1229_v51 = vld [vmem:[#allocation2 + $0x40] sm:$0xff] (!%p982_p4)  ;;  %v1222_v52 = vld [vmem:[#allocation2 + $0x8] sm:$0xff] (!%p982_p4)  ;;  %v1223_v56 = vld [vmem:[#allocation2 + $0x10] sm:$0xff] (!%p982_p4) }
 0x1af   : > { %vm998_vm0 = vcmp.eq.s32.totalorder (!%p982_p4), %v10074_v2, %v10217_v40  ;;  %vm1000_vm1 = vcmp.eq.s32.totalorder (!%p982_p4), %v10087_v3, %v10217_v40  ;;  %vm997_vm2 = vcmp.eq.s32.totalorder (!%p982_p4), %v10074_v2, %v10219_v41  ;;  %vm999_vm3 = vcmp.eq.s32.totalorder (!%p982_p4), %v10087_v3, %v10219_v41  ;;  %v1230_v53 = vld [vmem:[#allocation2 + $0x48] sm:$0xff] (!%p982_p4)  ;;  %v1231_v57 = vld [vmem:[#allocation2 + $0x50] sm:$0xff] (!%p982_p4)  ;;  %v1224_v62 = vld [vmem:[#allocation2 + $0x18] sm:$0xff] (!%p982_p4) }
 0x1b0   : > { %vm6431_vm4 = vmpackc.low (!%p982_p4), %vm1000_vm1, %vm998_vm0  ;;  %vm1002_vm5 = vcmp.eq.s32.totalorder (!%p982_p4), %v10090_v4, %v10217_v40  ;;  %vm1004_vm6 = vcmp.eq.s32.totalorder (!%p982_p4), %v10093_v5, %v10217_v40  ;;  %vm1001_vm9 = vcmp.eq.s32.totalorder (!%p982_p4), %v10090_v4, %v10219_v41  ;;  %vm1003_vm10 = vcmp.eq.s32.totalorder (!%p982_p4), %v10093_v5, %v10219_v41  ;;  %v1232_v63 = vld [vmem:[#allocation2 + $0x58] sm:$0xff] (!%p982_p4) }
 0x1b1   : > { %6432 = vmatprep.subr.msk.bf16.mxu0 (!%p982_p4), %vm6431_vm4, %v9280_v43  ;;  %8004 = vmatprep.subr.msk.bf16.mxu1 (!%p982_p4), %vm6431_vm4, %v9280_v43  ;;  %vm6433_vm7 = vmpackc.low (!%p982_p4), %vm999_vm3, %vm997_vm2  ;;  %vm1006_vm11 = vcmp.eq.s32.totalorder (!%p982_p4), %v10096_v6, %v10217_v40  ;;  %vm1008_vm12 = vcmp.eq.s32.totalorder (!%p982_p4), %v10102_v7, %v10217_v40  ;;  %vm1005_vm15 = vcmp.eq.s32.totalorder (!%p982_p4), %v10096_v6, %v10219_v41 }
 0x1b2   : > { %6434 = vmatpush1.bf16.xpose.msk.msra.mxu0 %vm6433_vm7, %v9280_v43  ;;  %8020 = vmatpush1.bf16.xpose.msk.msra.mxu1 %vm6433_vm7, %v9280_v43  ;;  %vm6435_vm8 = vmpackc.low %vm1004_vm6, %vm1002_vm5  ;;  %vm1007_vm0 = vcmp.eq.s32.totalorder %v10102_v7, %v10219_v41  ;;  %vm1010_vm1 = vcmp.eq.s32.totalorder %v10105_v8, %v10217_v40  ;;  %vm1012_vm2 = vcmp.eq.s32.totalorder %v10108_v9, %v10217_v40 }
 0x1b3   : > { %6436 = vmatprep.subr.msk.bf16.mxu0 %vm6435_vm8, %v9280_v43  ;;  %8005 = vmatprep.subr.msk.bf16.mxu1 %vm6435_vm8, %v9280_v43  ;;  %vm6437_vm13 = vmpackc.low %vm1003_vm10, %vm1001_vm9  ;;  %vm1009_vm5 = vcmp.eq.s32.totalorder %v10105_v8, %v10219_v41  ;;  %vm1011_vm6 = vcmp.eq.s32.totalorder %v10108_v9, %v10219_v41  ;;  %vm1014_vm7 = vcmp.eq.s32.totalorder %v10111_v10, %v10217_v40 }
 0x1b4   : > { %vm6439_vm14 = vmpackc.low %vm1008_vm12, %vm1006_vm11  ;;  %vm1016_vm8 = vcmp.eq.s32.totalorder %v10114_v11, %v10217_v40  ;;  %vm1013_vm11 = vcmp.eq.s32.totalorder %v10111_v10, %v10219_v41  ;;  %vm1015_vm12 = vcmp.eq.s32.totalorder %v10114_v11, %v10219_v41 }
 0x1b5   : > { %vm6441_vm3 = vmpackc.low %vm1007_vm0, %vm1005_vm15 }
 0x1b6   : > { %vm6443_vm4 = vmpackc.low %vm1012_vm2, %vm1010_vm1  ;;  %vm1017_vm1 = vcmp.eq.s32.totalorder %v10117_v12, %v10219_v41  ;;  %vm1019_vm2 = vcmp.eq.s32.totalorder %v10120_v13, %v10219_v41 }
 0x1b7   : > { %vm6445_vm9 = vmpackc.low %vm1011_vm6, %vm1009_vm5 }
 0x1b8   : > { %vm6447_vm10 = vmpackc.low %vm1016_vm8, %vm1014_vm7  ;;  %vm1021_vm7 = vcmp.eq.s32.totalorder %v10123_v14, %v10219_v41  ;;  %vm1023_vm8 = vcmp.eq.s32.totalorder %v10128_v15, %v10219_v41 }
 0x1b9   : > { %vm6449_vm15 = vmpackc.low %vm1015_vm12, %vm1013_vm11 }
 0x1ba   : > { %6438 = vmatpush1.bf16.xpose.msk.msra.mxu0 %vm6437_vm13, %v9280_v43  ;;  %8021 = vmatpush1.bf16.xpose.msk.msra.mxu1 %vm6437_vm13, %v9280_v43  ;;  %vm1018_vm13 = vcmp.eq.s32.totalorder %v10117_v12, %v10217_v40  ;;  %vm6453_vm5 = vmpackc.low %vm1019_vm2, %vm1017_vm1 }
 0x1bb   : > { %6440 = vmatprep.subr.msk.bf16.mxu0 %vm6439_vm14, %v9280_v43  ;;  %8006 = vmatprep.subr.msk.bf16.mxu1 %vm6439_vm14, %v9280_v43  ;;  %vm1020_vm14 = vcmp.eq.s32.totalorder %v10120_v13, %v10217_v40  ;;  %vm6457_vm11 = vmpackc.low %vm1023_vm8, %vm1021_vm7 }
 0x1bc   : > { %vm6451_vm0 = vmpackc.low %vm1020_vm14, %vm1018_vm13  ;;  %vm1025_vm13 = vcmp.eq.s32.totalorder %v10131_v16, %v10219_v41  ;;  %vm1027_vm14 = vcmp.eq.s32.totalorder %v10134_v17, %v10219_v41 }
 0x1bd   : > { %vm6461_vm1 = vmpackc.low %vm1027_vm14, %vm1025_vm13 }
 0x1c2   : > { %6442 = vmatpush1.bf16.xpose.msk.msra.mxu0 %vm6441_vm3, %v9280_v43  ;;  %8022 = vmatpush1.bf16.xpose.msk.msra.mxu1 %vm6441_vm3, %v9280_v43  ;;  %vm1022_vm3 = vcmp.eq.s32.totalorder %v10123_v14, %v10217_v40 }
 0x1c3   : > { %6444 = vmatprep.subr.msk.bf16.mxu0 %vm6443_vm4, %v9280_v43  ;;  %8007 = vmatprep.subr.msk.bf16.mxu1 %vm6443_vm4, %v9280_v43  ;;  %vm1024_vm4 = vcmp.eq.s32.totalorder %v10128_v15, %v10217_v40 }
 0x1c4   : > { %vm6455_vm6 = vmpackc.low %vm1024_vm4, %vm1022_vm3  ;;  %vm1029_vm3 = vcmp.eq.s32.totalorder %v10137_v18, %v10219_v41  ;;  %vm1031_vm4 = vcmp.eq.s32.totalorder %v10142_v19, %v10219_v41 }
 0x1c5   : > { %vm6465_vm7 = vmpackc.low %vm1031_vm4, %vm1029_vm3 }
 0x1ca   : > { %6446 = vmatpush1.bf16.xpose.msk.msra.mxu0 %vm6445_vm9, %v9280_v43  ;;  %8023 = vmatpush1.bf16.xpose.msk.msra.mxu1 %vm6445_vm9, %v9280_v43  ;;  %vm1026_vm9 = vcmp.eq.s32.totalorder %v10131_v16, %v10217_v40 }
 0x1cb   : > { %6448 = vmatprep.subr.msk.bf16.mxu0 %vm6447_vm10, %v9280_v43  ;;  %8008 = vmatprep.subr.msk.bf16.mxu1 %vm6447_vm10, %v9280_v43  ;;  %vm1028_vm10 = vcmp.eq.s32.totalorder %v10134_v17, %v10217_v40 }
 0x1cc   : > { %vm6459_vm12 = vmpackc.low %vm1028_vm10, %vm1026_vm9  ;;  %vm1033_vm9 = vcmp.eq.s32.totalorder %v10145_v20, %v10219_v41  ;;  %vm1035_vm10 = vcmp.eq.s32.totalorder %v10148_v21, %v10219_v41 }
 0x1cd   : > { %vm6469_vm13 = vmpackc.low %vm1035_vm10, %vm1033_vm9 }
 0x1d2   : > { %6450 = vmatpush1.bf16.xpose.msk.msra.mxu0 %vm6449_vm15, %v9280_v43  ;;  %8024 = vmatpush1.bf16.xpose.msk.msra.mxu1 %vm6449_vm15, %v9280_v43  ;;  %vm1030_vm15 = vcmp.eq.s32.totalorder %v10137_v18, %v10217_v40 }
 0x1d3   : > { %6452 = vmatprep.subr.msk.bf16.mxu0 %vm6451_vm0, %v9280_v43  ;;  %8009 = vmatprep.subr.msk.bf16.mxu1 %vm6451_vm0, %v9280_v43  ;;  %vm1032_vm0 = vcmp.eq.s32.totalorder %v10142_v19, %v10217_v40 }
 0x1d4   : > { %vm6463_vm2 = vmpackc.low %vm1032_vm0, %vm1030_vm15  ;;  %vm1037_vm15 = vcmp.eq.s32.totalorder %v10151_v22, %v10219_v41  ;;  %vm1039_vm0 = vcmp.eq.s32.totalorder %v10155_v23, %v10219_v41 }
 0x1d5   : > { %vm6473_vm3 = vmpackc.low %vm1039_vm0, %vm1037_vm15 }
 0x1da   : > { %6454 = vmatpush1.bf16.xpose.msk.msra.mxu0 %vm6453_vm5, %v9280_v43  ;;  %8025 = vmatpush1.bf16.xpose.msk.msra.mxu1 %vm6453_vm5, %v9280_v43  ;;  %vm1034_vm5 = vcmp.eq.s32.totalorder %v10145_v20, %v10217_v40 }
 0x1db   : > { %6456 = vmatprep.subr.msk.bf16.mxu0 %vm6455_vm6, %v9280_v43  ;;  %8010 = vmatprep.subr.msk.bf16.mxu1 %vm6455_vm6, %v9280_v43  ;;  %vm1036_vm6 = vcmp.eq.s32.totalorder %v10148_v21, %v10217_v40 }
 0x1dc   : > { %vm6467_vm8 = vmpackc.low %vm1036_vm6, %vm1034_vm5  ;;  %vm1041_vm5 = vcmp.eq.s32.totalorder %v10158_v24, %v10219_v41  ;;  %vm1043_vm6 = vcmp.eq.s32.totalorder %v10161_v25, %v10219_v41 }
 0x1dd   : > { %vm6477_vm9 = vmpackc.low %vm1043_vm6, %vm1041_vm5 }
 0x1e2   : > { %6458 = vmatpush1.bf16.xpose.msk.msra.mxu0 %vm6457_vm11, %v9280_v43  ;;  %8026 = vmatpush1.bf16.xpose.msk.msra.mxu1 %vm6457_vm11, %v9280_v43  ;;  %vm1038_vm11 = vcmp.eq.s32.totalorder %v10151_v22, %v10217_v40 }
 0x1e3   : > { %6460 = vmatprep.subr.msk.bf16.mxu0 %vm6459_vm12, %v9280_v43  ;;  %8011 = vmatprep.subr.msk.bf16.mxu1 %vm6459_vm12, %v9280_v43  ;;  %vm1040_vm12 = vcmp.eq.s32.totalorder %v10155_v23, %v10217_v40 }
 0x1e4   : > { %vm6471_vm14 = vmpackc.low %vm1040_vm12, %vm1038_vm11  ;;  %vm1045_vm11 = vcmp.eq.s32.totalorder %v10164_v26, %v10219_v41  ;;  %vm1047_vm12 = vcmp.eq.s32.totalorder %v10167_v27, %v10219_v41 }
 0x1e5   : > { %vm6481_vm15 = vmpackc.low %vm1047_vm12, %vm1045_vm11 }
 0x1ea   : > { %6462 = vmatpush1.bf16.xpose.msk.msra.mxu0 %vm6461_vm1, %v9280_v43  ;;  %8027 = vmatpush1.bf16.xpose.msk.msra.mxu1 %vm6461_vm1, %v9280_v43  ;;  %vm1042_vm1 = vcmp.eq.s32.totalorder %v10158_v24, %v10217_v40 }
 0x1eb   : > { %6464 = vmatprep.subr.msk.bf16.mxu0 %vm6463_vm2, %v9280_v43  ;;  %8012 = vmatprep.subr.msk.bf16.mxu1 %vm6463_vm2, %v9280_v43  ;;  %vm1044_vm2 = vcmp.eq.s32.totalorder %v10161_v25, %v10217_v40 }
 0x1ec   : > { %vm6475_vm4 = vmpackc.low %vm1044_vm2, %vm1042_vm1  ;;  %vm1049_vm1 = vcmp.eq.s32.totalorder %v10170_v28, %v10219_v41  ;;  %vm1051_vm2 = vcmp.eq.s32.totalorder %v10173_v29, %v10219_v41 }
 0x1ed   : > { %vm6485_vm5 = vmpackc.low %vm1051_vm2, %vm1049_vm1 }
 0x1f2   : > { %6466 = vmatpush1.bf16.xpose.msk.msra.mxu0 %vm6465_vm7, %v9280_v43  ;;  %8028 = vmatpush1.bf16.xpose.msk.msra.mxu1 %vm6465_vm7, %v9280_v43  ;;  %vm1046_vm7 = vcmp.eq.s32.totalorder %v10164_v26, %v10217_v40 }
 0x1f3   : > { %6468 = vmatprep.subr.msk.bf16.mxu0 %vm6467_vm8, %v9280_v43  ;;  %8013 = vmatprep.subr.msk.bf16.mxu1 %vm6467_vm8, %v9280_v43  ;;  %vm1048_vm8 = vcmp.eq.s32.totalorder %v10167_v27, %v10217_v40 }
 0x1f4   : > { %vm6479_vm10 = vmpackc.low %vm1048_vm8, %vm1046_vm7  ;;  %vm1053_vm7 = vcmp.eq.s32.totalorder %v10176_v30, %v10219_v41  ;;  %vm1055_vm8 = vcmp.eq.s32.totalorder %v10181_v31, %v10219_v41 }
 0x1f5   : > { %vm6489_vm11 = vmpackc.low %vm1055_vm8, %vm1053_vm7 }
 0x1fa   : > { %6470 = vmatpush1.bf16.xpose.msk.msra.mxu0 %vm6469_vm13, %v9280_v43  ;;  %8029 = vmatpush1.bf16.xpose.msk.msra.mxu1 %vm6469_vm13, %v9280_v43  ;;  %vm1050_vm13 = vcmp.eq.s32.totalorder %v10170_v28, %v10217_v40 }
 0x1fb   : > { %6472 = vmatprep.subr.msk.bf16.mxu0 %vm6471_vm14, %v9280_v43  ;;  %8014 = vmatprep.subr.msk.bf16.mxu1 %vm6471_vm14, %v9280_v43  ;;  %vm1052_vm14 = vcmp.eq.s32.totalorder %v10173_v29, %v10217_v40 }
 0x1fc   : > { %vm6483_vm0 = vmpackc.low %vm1052_vm14, %vm1050_vm13  ;;  %vm1057_vm13 = vcmp.eq.s32.totalorder %v10184_v32, %v10219_v41  ;;  %vm1059_vm14 = vcmp.eq.s32.totalorder %v10187_v33, %v10219_v41 }
 0x202   : > { %6474 = vmatpush1.bf16.xpose.msk.msra.mxu0 %vm6473_vm3, %v9280_v43  ;;  %8030 = vmatpush1.bf16.xpose.msk.msra.mxu1 %vm6473_vm3, %v9280_v43  ;;  %vm1054_vm3 = vcmp.eq.s32.totalorder %v10176_v30, %v10217_v40 }
 0x203   : > { %6476 = vmatprep.subr.msk.bf16.mxu0 %vm6475_vm4, %v9280_v43  ;;  %8015 = vmatprep.subr.msk.bf16.mxu1 %vm6475_vm4, %v9280_v43  ;;  %vm1056_vm4 = vcmp.eq.s32.totalorder %v10181_v31, %v10217_v40 }
 0x204   : > { %vm6487_vm6 = vmpackc.low %vm1056_vm4, %vm1054_vm3 }
 0x20a   : > { %6478 = vmatpush1.bf16.xpose.msk.msra.mxu0 %vm6477_vm9, %v9280_v43  ;;  %8031 = vmatpush1.bf16.xpose.msk.msra.mxu1 %vm6477_vm9, %v9280_v43  ;;  %vm1058_vm9 = vcmp.eq.s32.totalorder %v10184_v32, %v10217_v40 }
 0x20b   : > { %6480 = vmatprep.subr.msk.bf16.mxu0 %vm6479_vm10, %v9280_v43  ;;  %8016 = vmatprep.subr.msk.bf16.mxu1 %vm6479_vm10, %v9280_v43  ;;  %vm1060_vm10 = vcmp.eq.s32.totalorder %v10187_v33, %v10217_v40 }
 0x20c   : > { %vm6491_vm12 = vmpackc.low %vm1060_vm10, %vm1058_vm9 }
 0x212   : > { %6482 = vmatpush1.bf16.xpose.msk.msra.mxu0 %vm6481_vm15, %v9280_v43  ;;  %8032 = vmatpush1.bf16.xpose.msk.msra.mxu1 %vm6481_vm15, %v9280_v43  ;;  %vm6493_vm15 = vmpackc.low %vm1059_vm14, %vm1057_vm13 }
 0x213   : > { %6484 = vmatprep.subr.msk.bf16.mxu0 %vm6483_vm0, %v9280_v43  ;;  %8017 = vmatprep.subr.msk.bf16.mxu1 %vm6483_vm0, %v9280_v43 }
 0x21a   : > { %6486 = vmatpush1.bf16.xpose.msk.msra.mxu0 %vm6485_vm5, %v9280_v43  ;;  %8033 = vmatpush1.bf16.xpose.msk.msra.mxu1 %vm6485_vm5, %v9280_v43 }
 0x21b   : > { %6488 = vmatprep.subr.msk.bf16.mxu0 %vm6487_vm6, %v9280_v43  ;;  %8018 = vmatprep.subr.msk.bf16.mxu1 %vm6487_vm6, %v9280_v43 }
 0x222   : > { %6490 = vmatpush1.bf16.xpose.msk.msra.mxu0 %vm6489_vm11, %v9280_v43  ;;  %8034 = vmatpush1.bf16.xpose.msk.msra.mxu1 %vm6489_vm11, %v9280_v43 }
 0x223   : > { %6492 = vmatprep.subr.msk.bf16.mxu0 %vm6491_vm12, %v9280_v43  ;;  %8019 = vmatprep.subr.msk.bf16.mxu1 %vm6491_vm12, %v9280_v43 }
 0x22a   : > { %6494 = vmatpush1.bf16.xpose.msk.msra.mxu0 %vm6493_vm15, %v9280_v43  ;;  %8035 = vmatpush1.bf16.xpose.msk.msra.mxu1 %vm6493_vm15, %v9280_v43  ;;  %v1225_v43 = vld [vmem:[#allocation2 + $0x20] sm:$0xff] }
 0x231   : > { %1318 = vmatmul.mubr.bf16.vlgmr.msra.gmra.mrb[0].mxu0 %v8665_v44  ;;  %1338 = vmatmul.mubr.bf16.vlgmr.msra.gmra.mrb[0].mxu1 %v8668_v45  ;;  %v1233_v44 = vld [vmem:[#allocation2 + $0x60] sm:$0xff]  ;;  %v1226_v45 = vld [vmem:[#allocation2 + $0x28] sm:$0xff] }
 0x232   : > { %1327 = vmatprep.mubr.bf16.mxu0 %v8671_v46  ;;  %1347 = vmatprep.mubr.bf16.mxu1 %v8673_v47  ;;  %v1234_v46 = vld [vmem:[#allocation2 + $0x68] sm:$0xff] }
 0x239   : > { %1328 = vmatmul.mubr.bf16.gmra.mrb[4].mxu0 %v8675_v48  ;;  %1348 = vmatmul.mubr.bf16.gmra.mrb[4].mxu1 %v8676_v49  ;;  %v1227_v49 = vld [vmem:[#allocation2 + $0x30] sm:$0xff] }
 0x304   : > { %v1319_v54 = vpop.f32.mrb[0].mxu0  ;;  %v1339_v55 = vpop.f32.mrb[0].mxu1 }
 0x305   : > { %v1358_v58 = vadd.f32 %v1319_v54, %v1221_v50  ;;  %v1366_v59 = vadd.f32 %v1339_v55, %v1229_v51  ;;  %v1321_v60 = vpop.f32.mrb[1].mxu0  ;;  %v1341_v61 = vpop.f32.mrb[1].mxu1  ;;  %v1235_v50 = vld [vmem:[#allocation2 + $0x70] sm:$0xff]  ;;  %v1228_v55 = vld [vmem:[#allocation2 + $0x38] sm:$0xff] }
 0x306   : > { %v1359_v0 = vadd.f32 %v1321_v60, %v1222_v52  ;;  %v1367_v34 = vadd.f32 %v1341_v61, %v1230_v53  ;;  %v1323_v35 = vpop.f32.mrb[2].mxu0  ;;  %v1343_v36 = vpop.f32.mrb[2].mxu1 }
 0x307   : > { %1374 = vst [vmem:[#allocation2] sm:$0xff] %v1358_v58  ;;  %1382 = vst [vmem:[#allocation2 + $0x40] sm:$0xff] %v1366_v59  ;;  %v1360_v37 = vadd.f32 %v1323_v35, %v1223_v56  ;;  %v1368_v38 = vadd.f32 %v1343_v36, %v1231_v57  ;;  %v1325_v39 = vpop.f32.mrb[3].mxu0  ;;  %v1345_v40 = vpop.f32.mrb[3].mxu1  ;;  %v1236_v56 = vld [vmem:[#allocation2 + $0x78] sm:$0xff] }
 0x308   : > { %1375 = vst [vmem:[#allocation2 + $0x8] sm:$0xff] %v1359_v0  ;;  %1383 = vst [vmem:[#allocation2 + $0x48] sm:$0xff] %v1367_v34  ;;  %v1361_v41 = vadd.f32 %v1325_v39, %v1224_v62  ;;  %v1369_v42 = vadd.f32 %v1345_v40, %v1232_v63 }
 0x309   : > { %1376 = vst [vmem:[#allocation2 + $0x10] sm:$0xff] %v1360_v37  ;;  %1384 = vst [vmem:[#allocation2 + $0x50] sm:$0xff] %v1368_v38 }
 0x30a   : > { %1377 = vst [vmem:[#allocation2 + $0x18] sm:$0xff] %v1361_v41  ;;  %1385 = vst [vmem:[#allocation2 + $0x58] sm:$0xff] %v1369_v42 }
 0x30c   : > { %v1329_v47 = vpop.f32.mrb[4].mxu0  ;;  %v1349_v48 = vpop.f32.mrb[4].mxu1 }
 0x30d   : > { %v1362_v51 = vadd.f32 %v1329_v47, %v1225_v43  ;;  %v1370_v52 = vadd.f32 %v1349_v48, %v1233_v44  ;;  %v1331_v53 = vpop.f32.mrb[5].mxu0  ;;  %v1351_v54 = vpop.f32.mrb[5].mxu1 }
 0x30e   : > { %v1363_v57 = vadd.f32 %v1331_v53, %v1226_v45  ;;  %v1371_v58 = vadd.f32 %v1351_v54, %v1234_v46  ;;  %v1333_v59 = vpop.f32.mrb[6].mxu0  ;;  %v1353_v60 = vpop.f32.mrb[6].mxu1 }
 0x30f   : > { %1378 = vst [vmem:[#allocation2 + $0x20] sm:$0xff] %v1362_v51  ;;  %1386 = vst [vmem:[#allocation2 + $0x60] sm:$0xff] %v1370_v52  ;;  %v1364_v61 = vadd.f32 %v1333_v59, %v1227_v49  ;;  %v1372_v62 = vadd.f32 %v1353_v60, %v1235_v50  ;;  %v1335_v63 = vpop.f32.mrb[7].mxu0  ;;  %v1355_v0 = vpop.f32.mrb[7].mxu1 }
 0x310   : > { %1379 = vst [vmem:[#allocation2 + $0x28] sm:$0xff] %v1363_v57  ;;  %1387 = vst [vmem:[#allocation2 + $0x68] sm:$0xff] %v1371_v58  ;;  %v1365_v34 = vadd.f32 %v1335_v63, %v1228_v55  ;;  %v1373_v35 = vadd.f32 %v1355_v0, %v1236_v56 }
 0x311   : > { %1380 = vst [vmem:[#allocation2 + $0x30] sm:$0xff] %v1364_v61  ;;  %1388 = vst [vmem:[#allocation2 + $0x70] sm:$0xff] %v1372_v62 }
 0x312   : > { %1381 = vst [vmem:[#allocation2 + $0x38] sm:$0xff] %v1365_v34  ;;  %1389 = vst [vmem:[#allocation2 + $0x78] sm:$0xff] %v1373_v35 }
 0x313 PF: > { %p1392_p1 = scmp.lt.s32.totalorder %s10202_s7, %s10080_s12  ;;  %s10423_s24 = sadd.s32 256, %s10202_s7 }
 0x314   : > { %p1396_p12 = scmp.gt.s32.totalorder %s10423_s24, %s10072_s15 }
 0x315   : > { %p1393_p8 = pnand %p1392_p1, %p976_p0 }
 0x317   : > { %p1394_p6 = pneg %p1393_p8 }
 0x319   : > { %p1397_p2 = pnand %p1396_p12, %p1394_p6 }
 0x31a   : > { %v1401_v36 = vld [vmem:[%s10005_s13] sm:$0x3] (!%p1397_p2)  ;;  %v1402_v37 = vstv (!%p1397_p2), %s10099_s17  ;;  %v1410_v38 = vsub.s32 (!%p1397_p2), 1, %v10074_v2  ;;  %v1406_v39 = vsub.s32 (!%p1397_p2), 0, %v10074_v2  ;;  %v8679_v41 = vld [vmem:[%s10027_s23 + $0x4] ss:$8 sps:$4 sm:$0xff] (!%p1397_p2)  }
 0x31b   : > { %1400 = sbr.rel (%p1397_p2) target bundleno = 1155 (0x483), region = 84  ;;  %v1403_v40 = vsub.s32 (!%p1397_p2), %v1401_v36, %v1402_v37  ;;  %v8682_v44 = vld [vmem:[%s10027_s23 + $0x24] ss:$8 sps:$4 sm:$0xff] (!%p1397_p2)   ;;  %1732 = vmatprep.mubr.bf16.mxu0 (!%p1397_p2), %v8679_v41  ;;  %v9281_v45 = vmov (!%p1397_p2), 1.0|1.0   ;;  %v1636_v52 = vld [vmem:[#allocation2] sm:$0xff] (!%p1397_p2) }
 0x31c   : > { %1752 = vmatprep.mubr.bf16.mxu1 (!%p1397_p2), %v8682_v44  ;;  %v8677_v46 = vld [vmem:[%s10027_s23] ss:$8 sps:$4 sm:$0xff] (!%p1397_p2)   ;;  %v8683_v48 = vld [vmem:[%s10027_s23 + $0x14] ss:$8 sps:$4 sm:$0xff] (!%p1397_p2)   ;;  %v8687_v50 = vld [vmem:[%s10027_s23 + $0x10] ss:$8 sps:$4 sm:$0xff] (!%p1397_p2)  }
 0x31d   : > { %v10435_v42 = vrot.slane (!%p1397_p2), %v1403_v40, %v1410_v38  ;;  %v10437_v43 = vrot.slane (!%p1397_p2), %v1403_v40, %v1406_v39  ;;  %v8680_v47 = vld [vmem:[%s10027_s23 + $0x20] ss:$8 sps:$4 sm:$0xff] (!%p1397_p2)   ;;  %v8685_v49 = vld [vmem:[%s10027_s23 + $0x34] ss:$8 sps:$4 sm:$0xff] (!%p1397_p2)   ;;  %v8688_v51 = vld [vmem:[%s10027_s23 + $0x30] ss:$8 sps:$4 sm:$0xff] (!%p1397_p2)  }
 0x31e   : > { %v1644_v53 = vld [vmem:[#allocation2 + $0x40] sm:$0xff] (!%p1397_p2)  ;;  %v1637_v54 = vld [vmem:[#allocation2 + $0x8] sm:$0xff] (!%p1397_p2)  ;;  %v1638_v58 = vld [vmem:[#allocation2 + $0x10] sm:$0xff] (!%p1397_p2) }
 0x31f   : > { %vm1413_vm0 = vcmp.eq.s32.totalorder (!%p1397_p2), %v10074_v2, %v10435_v42  ;;  %vm1415_vm1 = vcmp.eq.s32.totalorder (!%p1397_p2), %v10087_v3, %v10435_v42  ;;  %vm1412_vm2 = vcmp.eq.s32.totalorder (!%p1397_p2), %v10074_v2, %v10437_v43  ;;  %vm1414_vm3 = vcmp.eq.s32.totalorder (!%p1397_p2), %v10087_v3, %v10437_v43  ;;  %v1645_v55 = vld [vmem:[#allocation2 + $0x48] sm:$0xff] (!%p1397_p2)  ;;  %v1646_v59 = vld [vmem:[#allocation2 + $0x50] sm:$0xff] (!%p1397_p2)  ;;  %v1639_v0 = vld [vmem:[#allocation2 + $0x18] sm:$0xff] (!%p1397_p2) }
 0x320   : > { %vm6568_vm4 = vmpackc.low (!%p1397_p2), %vm1415_vm1, %vm1413_vm0  ;;  %vm1417_vm5 = vcmp.eq.s32.totalorder (!%p1397_p2), %v10090_v4, %v10435_v42  ;;  %vm1419_vm6 = vcmp.eq.s32.totalorder (!%p1397_p2), %v10093_v5, %v10435_v42  ;;  %vm1416_vm9 = vcmp.eq.s32.totalorder (!%p1397_p2), %v10090_v4, %v10437_v43  ;;  %vm1418_vm10 = vcmp.eq.s32.totalorder (!%p1397_p2), %v10093_v5, %v10437_v43  ;;  %v1647_v34 = vld [vmem:[#allocation2 + $0x58] sm:$0xff] (!%p1397_p2) }
 0x321   : > { %6569 = vmatprep.subr.msk.bf16.mxu0 (!%p1397_p2), %vm6568_vm4, %v9281_v45  ;;  %8036 = vmatprep.subr.msk.bf16.mxu1 (!%p1397_p2), %vm6568_vm4, %v9281_v45  ;;  %vm6570_vm7 = vmpackc.low (!%p1397_p2), %vm1414_vm3, %vm1412_vm2  ;;  %vm1421_vm11 = vcmp.eq.s32.totalorder (!%p1397_p2), %v10096_v6, %v10435_v42  ;;  %vm1423_vm12 = vcmp.eq.s32.totalorder (!%p1397_p2), %v10102_v7, %v10435_v42  ;;  %vm1420_vm15 = vcmp.eq.s32.totalorder (!%p1397_p2), %v10096_v6, %v10437_v43 }
 0x322   : > { %6571 = vmatpush1.bf16.xpose.msk.msra.mxu0 %vm6570_vm7, %v9281_v45  ;;  %8052 = vmatpush1.bf16.xpose.msk.msra.mxu1 %vm6570_vm7, %v9281_v45  ;;  %vm6572_vm8 = vmpackc.low %vm1419_vm6, %vm1417_vm5  ;;  %vm1422_vm0 = vcmp.eq.s32.totalorder %v10102_v7, %v10437_v43  ;;  %vm1425_vm1 = vcmp.eq.s32.totalorder %v10105_v8, %v10435_v42  ;;  %vm1427_vm2 = vcmp.eq.s32.totalorder %v10108_v9, %v10435_v42 }
 0x323   : > { %6573 = vmatprep.subr.msk.bf16.mxu0 %vm6572_vm8, %v9281_v45  ;;  %8037 = vmatprep.subr.msk.bf16.mxu1 %vm6572_vm8, %v9281_v45  ;;  %vm6574_vm13 = vmpackc.low %vm1418_vm10, %vm1416_vm9  ;;  %vm1424_vm5 = vcmp.eq.s32.totalorder %v10105_v8, %v10437_v43  ;;  %vm1426_vm6 = vcmp.eq.s32.totalorder %v10108_v9, %v10437_v43  ;;  %vm1429_vm7 = vcmp.eq.s32.totalorder %v10111_v10, %v10435_v42 }
 0x324   : > { %vm6576_vm14 = vmpackc.low %vm1423_vm12, %vm1421_vm11  ;;  %vm1431_vm8 = vcmp.eq.s32.totalorder %v10114_v11, %v10435_v42  ;;  %vm1428_vm11 = vcmp.eq.s32.totalorder %v10111_v10, %v10437_v43  ;;  %vm1430_vm12 = vcmp.eq.s32.totalorder %v10114_v11, %v10437_v43 }
 0x325   : > { %vm6578_vm3 = vmpackc.low %vm1422_vm0, %vm1420_vm15 }
 0x326   : > { %vm6580_vm4 = vmpackc.low %vm1427_vm2, %vm1425_vm1  ;;  %vm1432_vm1 = vcmp.eq.s32.totalorder %v10117_v12, %v10437_v43  ;;  %vm1434_vm2 = vcmp.eq.s32.totalorder %v10120_v13, %v10437_v43 }
 0x327   : > { %vm6582_vm9 = vmpackc.low %vm1426_vm6, %vm1424_vm5 }
 0x328   : > { %vm6584_vm10 = vmpackc.low %vm1431_vm8, %vm1429_vm7  ;;  %vm1436_vm7 = vcmp.eq.s32.totalorder %v10123_v14, %v10437_v43  ;;  %vm1438_vm8 = vcmp.eq.s32.totalorder %v10128_v15, %v10437_v43 }
 0x329   : > { %vm6586_vm15 = vmpackc.low %vm1430_vm12, %vm1428_vm11 }
 0x32a   : > { %6575 = vmatpush1.bf16.xpose.msk.msra.mxu0 %vm6574_vm13, %v9281_v45  ;;  %8053 = vmatpush1.bf16.xpose.msk.msra.mxu1 %vm6574_vm13, %v9281_v45  ;;  %vm1433_vm13 = vcmp.eq.s32.totalorder %v10117_v12, %v10435_v42  ;;  %vm6590_vm5 = vmpackc.low %vm1434_vm2, %vm1432_vm1 }
 0x32b   : > { %6577 = vmatprep.subr.msk.bf16.mxu0 %vm6576_vm14, %v9281_v45  ;;  %8038 = vmatprep.subr.msk.bf16.mxu1 %vm6576_vm14, %v9281_v45  ;;  %vm1435_vm14 = vcmp.eq.s32.totalorder %v10120_v13, %v10435_v42  ;;  %vm6594_vm11 = vmpackc.low %vm1438_vm8, %vm1436_vm7 }
 0x32c   : > { %vm6588_vm0 = vmpackc.low %vm1435_vm14, %vm1433_vm13  ;;  %vm1440_vm13 = vcmp.eq.s32.totalorder %v10131_v16, %v10437_v43  ;;  %vm1442_vm14 = vcmp.eq.s32.totalorder %v10134_v17, %v10437_v43 }
 0x32d   : > { %vm6598_vm1 = vmpackc.low %vm1442_vm14, %vm1440_vm13 }
 0x332   : > { %6579 = vmatpush1.bf16.xpose.msk.msra.mxu0 %vm6578_vm3, %v9281_v45  ;;  %8054 = vmatpush1.bf16.xpose.msk.msra.mxu1 %vm6578_vm3, %v9281_v45  ;;  %vm1437_vm3 = vcmp.eq.s32.totalorder %v10123_v14, %v10435_v42 }
 0x333   : > { %6581 = vmatprep.subr.msk.bf16.mxu0 %vm6580_vm4, %v9281_v45  ;;  %8039 = vmatprep.subr.msk.bf16.mxu1 %vm6580_vm4, %v9281_v45  ;;  %vm1439_vm4 = vcmp.eq.s32.totalorder %v10128_v15, %v10435_v42 }
 0x334   : > { %vm6592_vm6 = vmpackc.low %vm1439_vm4, %vm1437_vm3  ;;  %vm1444_vm3 = vcmp.eq.s32.totalorder %v10137_v18, %v10437_v43  ;;  %vm1446_vm4 = vcmp.eq.s32.totalorder %v10142_v19, %v10437_v43 }
 0x335   : > { %vm6602_vm7 = vmpackc.low %vm1446_vm4, %vm1444_vm3 }
 0x33a   : > { %6583 = vmatpush1.bf16.xpose.msk.msra.mxu0 %vm6582_vm9, %v9281_v45  ;;  %8055 = vmatpush1.bf16.xpose.msk.msra.mxu1 %vm6582_vm9, %v9281_v45  ;;  %vm1441_vm9 = vcmp.eq.s32.totalorder %v10131_v16, %v10435_v42 }
 0x33b   : > { %6585 = vmatprep.subr.msk.bf16.mxu0 %vm6584_vm10, %v9281_v45  ;;  %8040 = vmatprep.subr.msk.bf16.mxu1 %vm6584_vm10, %v9281_v45  ;;  %vm1443_vm10 = vcmp.eq.s32.totalorder %v10134_v17, %v10435_v42 }
 0x33c   : > { %vm6596_vm12 = vmpackc.low %vm1443_vm10, %vm1441_vm9  ;;  %vm1448_vm9 = vcmp.eq.s32.totalorder %v10145_v20, %v10437_v43  ;;  %vm1450_vm10 = vcmp.eq.s32.totalorder %v10148_v21, %v10437_v43 }
 0x33d   : > { %vm6606_vm13 = vmpackc.low %vm1450_vm10, %vm1448_vm9 }
 0x342   : > { %6587 = vmatpush1.bf16.xpose.msk.msra.mxu0 %vm6586_vm15, %v9281_v45  ;;  %8056 = vmatpush1.bf16.xpose.msk.msra.mxu1 %vm6586_vm15, %v9281_v45  ;;  %vm1445_vm15 = vcmp.eq.s32.totalorder %v10137_v18, %v10435_v42 }
 0x343   : > { %6589 = vmatprep.subr.msk.bf16.mxu0 %vm6588_vm0, %v9281_v45  ;;  %8041 = vmatprep.subr.msk.bf16.mxu1 %vm6588_vm0, %v9281_v45  ;;  %vm1447_vm0 = vcmp.eq.s32.totalorder %v10142_v19, %v10435_v42 }
 0x344   : > { %vm6600_vm2 = vmpackc.low %vm1447_vm0, %vm1445_vm15  ;;  %vm1452_vm15 = vcmp.eq.s32.totalorder %v10151_v22, %v10437_v43  ;;  %vm1454_vm0 = vcmp.eq.s32.totalorder %v10155_v23, %v10437_v43 }
 0x345   : > { %vm6610_vm3 = vmpackc.low %vm1454_vm0, %vm1452_vm15 }
 0x34a   : > { %6591 = vmatpush1.bf16.xpose.msk.msra.mxu0 %vm6590_vm5, %v9281_v45  ;;  %8057 = vmatpush1.bf16.xpose.msk.msra.mxu1 %vm6590_vm5, %v9281_v45  ;;  %vm1449_vm5 = vcmp.eq.s32.totalorder %v10145_v20, %v10435_v42 }
 0x34b   : > { %6593 = vmatprep.subr.msk.bf16.mxu0 %vm6592_vm6, %v9281_v45  ;;  %8042 = vmatprep.subr.msk.bf16.mxu1 %vm6592_vm6, %v9281_v45  ;;  %vm1451_vm6 = vcmp.eq.s32.totalorder %v10148_v21, %v10435_v42 }
 0x34c   : > { %vm6604_vm8 = vmpackc.low %vm1451_vm6, %vm1449_vm5  ;;  %vm1456_vm5 = vcmp.eq.s32.totalorder %v10158_v24, %v10437_v43  ;;  %vm1458_vm6 = vcmp.eq.s32.totalorder %v10161_v25, %v10437_v43 }
 0x34d   : > { %vm6614_vm9 = vmpackc.low %vm1458_vm6, %vm1456_vm5 }
 0x352   : > { %6595 = vmatpush1.bf16.xpose.msk.msra.mxu0 %vm6594_vm11, %v9281_v45  ;;  %8058 = vmatpush1.bf16.xpose.msk.msra.mxu1 %vm6594_vm11, %v9281_v45  ;;  %vm1453_vm11 = vcmp.eq.s32.totalorder %v10151_v22, %v10435_v42 }
 0x353   : > { %6597 = vmatprep.subr.msk.bf16.mxu0 %vm6596_vm12, %v9281_v45  ;;  %8043 = vmatprep.subr.msk.bf16.mxu1 %vm6596_vm12, %v9281_v45  ;;  %vm1455_vm12 = vcmp.eq.s32.totalorder %v10155_v23, %v10435_v42 }
 0x354   : > { %vm6608_vm14 = vmpackc.low %vm1455_vm12, %vm1453_vm11  ;;  %vm1460_vm11 = vcmp.eq.s32.totalorder %v10164_v26, %v10437_v43  ;;  %vm1462_vm12 = vcmp.eq.s32.totalorder %v10167_v27, %v10437_v43 }
 0x355   : > { %vm6618_vm15 = vmpackc.low %vm1462_vm12, %vm1460_vm11 }
 0x35a   : > { %6599 = vmatpush1.bf16.xpose.msk.msra.mxu0 %vm6598_vm1, %v9281_v45  ;;  %8059 = vmatpush1.bf16.xpose.msk.msra.mxu1 %vm6598_vm1, %v9281_v45  ;;  %vm1457_vm1 = vcmp.eq.s32.totalorder %v10158_v24, %v10435_v42 }
 0x35b   : > { %6601 = vmatprep.subr.msk.bf16.mxu0 %vm6600_vm2, %v9281_v45  ;;  %8044 = vmatprep.subr.msk.bf16.mxu1 %vm6600_vm2, %v9281_v45  ;;  %vm1459_vm2 = vcmp.eq.s32.totalorder %v10161_v25, %v10435_v42 }
 0x35c   : > { %vm6612_vm4 = vmpackc.low %vm1459_vm2, %vm1457_vm1  ;;  %vm1464_vm1 = vcmp.eq.s32.totalorder %v10170_v28, %v10437_v43  ;;  %vm1466_vm2 = vcmp.eq.s32.totalorder %v10173_v29, %v10437_v43 }
 0x35d   : > { %vm6622_vm5 = vmpackc.low %vm1466_vm2, %vm1464_vm1 }
 0x362   : > { %6603 = vmatpush1.bf16.xpose.msk.msra.mxu0 %vm6602_vm7, %v9281_v45  ;;  %8060 = vmatpush1.bf16.xpose.msk.msra.mxu1 %vm6602_vm7, %v9281_v45  ;;  %vm1461_vm7 = vcmp.eq.s32.totalorder %v10164_v26, %v10435_v42 }
 0x363   : > { %6605 = vmatprep.subr.msk.bf16.mxu0 %vm6604_vm8, %v9281_v45  ;;  %8045 = vmatprep.subr.msk.bf16.mxu1 %vm6604_vm8, %v9281_v45  ;;  %vm1463_vm8 = vcmp.eq.s32.totalorder %v10167_v27, %v10435_v42 }
 0x364   : > { %vm6616_vm10 = vmpackc.low %vm1463_vm8, %vm1461_vm7  ;;  %vm1468_vm7 = vcmp.eq.s32.totalorder %v10176_v30, %v10437_v43  ;;  %vm1470_vm8 = vcmp.eq.s32.totalorder %v10181_v31, %v10437_v43 }
 0x365   : > { %vm6626_vm11 = vmpackc.low %vm1470_vm8, %vm1468_vm7 }
 0x36a   : > { %6607 = vmatpush1.bf16.xpose.msk.msra.mxu0 %vm6606_vm13, %v9281_v45  ;;  %8061 = vmatpush1.bf16.xpose.msk.msra.mxu1 %vm6606_vm13, %v9281_v45  ;;  %vm1465_vm13 = vcmp.eq.s32.totalorder %v10170_v28, %v10435_v42 }
 0x36b   : > { %6609 = vmatprep.subr.msk.bf16.mxu0 %vm6608_vm14, %v9281_v45  ;;  %8046 = vmatprep.subr.msk.bf16.mxu1 %vm6608_vm14, %v9281_v45  ;;  %vm1467_vm14 = vcmp.eq.s32.totalorder %v10173_v29, %v10435_v42 }
 0x36c   : > { %vm6620_vm0 = vmpackc.low %vm1467_vm14, %vm1465_vm13  ;;  %vm1472_vm13 = vcmp.eq.s32.totalorder %v10184_v32, %v10437_v43  ;;  %vm1474_vm14 = vcmp.eq.s32.totalorder %v10187_v33, %v10437_v43 }
 0x372   : > { %6611 = vmatpush1.bf16.xpose.msk.msra.mxu0 %vm6610_vm3, %v9281_v45  ;;  %8062 = vmatpush1.bf16.xpose.msk.msra.mxu1 %vm6610_vm3, %v9281_v45  ;;  %vm1469_vm3 = vcmp.eq.s32.totalorder %v10176_v30, %v10435_v42 }
 0x373   : > { %6613 = vmatprep.subr.msk.bf16.mxu0 %vm6612_vm4, %v9281_v45  ;;  %8047 = vmatprep.subr.msk.bf16.mxu1 %vm6612_vm4, %v9281_v45  ;;  %vm1471_vm4 = vcmp.eq.s32.totalorder %v10181_v31, %v10435_v42 }
 0x374   : > { %vm6624_vm6 = vmpackc.low %vm1471_vm4, %vm1469_vm3 }
 0x37a   : > { %6615 = vmatpush1.bf16.xpose.msk.msra.mxu0 %vm6614_vm9, %v9281_v45  ;;  %8063 = vmatpush1.bf16.xpose.msk.msra.mxu1 %vm6614_vm9, %v9281_v45  ;;  %vm1473_vm9 = vcmp.eq.s32.totalorder %v10184_v32, %v10435_v42 }
 0x37b   : > { %6617 = vmatprep.subr.msk.bf16.mxu0 %vm6616_vm10, %v9281_v45  ;;  %8048 = vmatprep.subr.msk.bf16.mxu1 %vm6616_vm10, %v9281_v45  ;;  %vm1475_vm10 = vcmp.eq.s32.totalorder %v10187_v33, %v10435_v42 }
 0x37c   : > { %vm6628_vm12 = vmpackc.low %vm1475_vm10, %vm1473_vm9 }
 0x382   : > { %6619 = vmatpush1.bf16.xpose.msk.msra.mxu0 %vm6618_vm15, %v9281_v45  ;;  %8064 = vmatpush1.bf16.xpose.msk.msra.mxu1 %vm6618_vm15, %v9281_v45  ;;  %vm6630_vm15 = vmpackc.low %vm1474_vm14, %vm1472_vm13 }
 0x383   : > { %6621 = vmatprep.subr.msk.bf16.mxu0 %vm6620_vm0, %v9281_v45  ;;  %8049 = vmatprep.subr.msk.bf16.mxu1 %vm6620_vm0, %v9281_v45 }
 0x38a   : > { %6623 = vmatpush1.bf16.xpose.msk.msra.mxu0 %vm6622_vm5, %v9281_v45  ;;  %8065 = vmatpush1.bf16.xpose.msk.msra.mxu1 %vm6622_vm5, %v9281_v45 }
 0x38b   : > { %6625 = vmatprep.subr.msk.bf16.mxu0 %vm6624_vm6, %v9281_v45  ;;  %8050 = vmatprep.subr.msk.bf16.mxu1 %vm6624_vm6, %v9281_v45 }
 0x392   : > { %6627 = vmatpush1.bf16.xpose.msk.msra.mxu0 %vm6626_vm11, %v9281_v45  ;;  %8066 = vmatpush1.bf16.xpose.msk.msra.mxu1 %vm6626_vm11, %v9281_v45 }
 0x393   : > { %6629 = vmatprep.subr.msk.bf16.mxu0 %vm6628_vm12, %v9281_v45  ;;  %8051 = vmatprep.subr.msk.bf16.mxu1 %vm6628_vm12, %v9281_v45 }
 0x39a   : > { %6631 = vmatpush1.bf16.xpose.msk.msra.mxu0 %vm6630_vm15, %v9281_v45  ;;  %8067 = vmatpush1.bf16.xpose.msk.msra.mxu1 %vm6630_vm15, %v9281_v45  ;;  %v1640_v45 = vld [vmem:[#allocation2 + $0x20] sm:$0xff] }
 0x3a1   : > { %1733 = vmatmul.mubr.bf16.vlgmr.msra.gmra.mrb[0].mxu0 %v8677_v46  ;;  %1753 = vmatmul.mubr.bf16.vlgmr.msra.gmra.mrb[0].mxu1 %v8680_v47  ;;  %v1648_v46 = vld [vmem:[#allocation2 + $0x60] sm:$0xff]  ;;  %v1641_v47 = vld [vmem:[#allocation2 + $0x28] sm:$0xff] }
 0x3a2   : > { %1742 = vmatprep.mubr.bf16.mxu0 %v8683_v48  ;;  %1762 = vmatprep.mubr.bf16.mxu1 %v8685_v49  ;;  %v1649_v48 = vld [vmem:[#allocation2 + $0x68] sm:$0xff] }
 0x3a9   : > { %1743 = vmatmul.mubr.bf16.gmra.mrb[4].mxu0 %v8687_v50  ;;  %1763 = vmatmul.mubr.bf16.gmra.mrb[4].mxu1 %v8688_v51  ;;  %v1642_v51 = vld [vmem:[#allocation2 + $0x30] sm:$0xff] }
 0x474   : > { %v1734_v56 = vpop.f32.mrb[0].mxu0  ;;  %v1754_v57 = vpop.f32.mrb[0].mxu1 }
 0x475   : > { %v1773_v60 = vadd.f32 %v1734_v56, %v1636_v52  ;;  %v1781_v61 = vadd.f32 %v1754_v57, %v1644_v53  ;;  %v1736_v62 = vpop.f32.mrb[1].mxu0  ;;  %v1756_v63 = vpop.f32.mrb[1].mxu1  ;;  %v1650_v52 = vld [vmem:[#allocation2 + $0x70] sm:$0xff]  ;;  %v1643_v57 = vld [vmem:[#allocation2 + $0x38] sm:$0xff] }
 0x476   : > { %v1774_v35 = vadd.f32 %v1736_v62, %v1637_v54  ;;  %v1782_v36 = vadd.f32 %v1756_v63, %v1645_v55  ;;  %v1738_v37 = vpop.f32.mrb[2].mxu0  ;;  %v1758_v38 = vpop.f32.mrb[2].mxu1 }
 0x477   : > { %1789 = vst [vmem:[#allocation2] sm:$0xff] %v1773_v60  ;;  %1797 = vst [vmem:[#allocation2 + $0x40] sm:$0xff] %v1781_v61  ;;  %v1775_v39 = vadd.f32 %v1738_v37, %v1638_v58  ;;  %v1783_v40 = vadd.f32 %v1758_v38, %v1646_v59  ;;  %v1740_v41 = vpop.f32.mrb[3].mxu0  ;;  %v1760_v42 = vpop.f32.mrb[3].mxu1  ;;  %v1651_v58 = vld [vmem:[#allocation2 + $0x78] sm:$0xff] }
 0x478   : > { %1790 = vst [vmem:[#allocation2 + $0x8] sm:$0xff] %v1774_v35  ;;  %1798 = vst [vmem:[#allocation2 + $0x48] sm:$0xff] %v1782_v36  ;;  %v1776_v43 = vadd.f32 %v1740_v41, %v1639_v0  ;;  %v1784_v44 = vadd.f32 %v1760_v42, %v1647_v34 }
 0x479   : > { %1791 = vst [vmem:[#allocation2 + $0x10] sm:$0xff] %v1775_v39  ;;  %1799 = vst [vmem:[#allocation2 + $0x50] sm:$0xff] %v1783_v40 }
 0x47a   : > { %1792 = vst [vmem:[#allocation2 + $0x18] sm:$0xff] %v1776_v43  ;;  %1800 = vst [vmem:[#allocation2 + $0x58] sm:$0xff] %v1784_v44 }
 0x47c   : > { %v1744_v49 = vpop.f32.mrb[4].mxu0  ;;  %v1764_v50 = vpop.f32.mrb[4].mxu1 }
 0x47d   : > { %v1777_v53 = vadd.f32 %v1744_v49, %v1640_v45  ;;  %v1785_v54 = vadd.f32 %v1764_v50, %v1648_v46  ;;  %v1746_v55 = vpop.f32.mrb[5].mxu0  ;;  %v1766_v56 = vpop.f32.mrb[5].mxu1 }
 0x47e   : > { %v1778_v59 = vadd.f32 %v1746_v55, %v1641_v47  ;;  %v1786_v60 = vadd.f32 %v1766_v56, %v1649_v48  ;;  %v1748_v61 = vpop.f32.mrb[6].mxu0  ;;  %v1768_v62 = vpop.f32.mrb[6].mxu1 }
 0x47f   : > { %1793 = vst [vmem:[#allocation2 + $0x20] sm:$0xff] %v1777_v53  ;;  %1801 = vst [vmem:[#allocation2 + $0x60] sm:$0xff] %v1785_v54  ;;  %v1779_v63 = vadd.f32 %v1748_v61, %v1642_v51  ;;  %v1787_v0 = vadd.f32 %v1768_v62, %v1650_v52  ;;  %v1750_v34 = vpop.f32.mrb[7].mxu0  ;;  %v1770_v35 = vpop.f32.mrb[7].mxu1 }
 0x480   : > { %1794 = vst [vmem:[#allocation2 + $0x28] sm:$0xff] %v1778_v59  ;;  %1802 = vst [vmem:[#allocation2 + $0x68] sm:$0xff] %v1786_v60  ;;  %v1780_v36 = vadd.f32 %v1750_v34, %v1643_v57  ;;  %v1788_v37 = vadd.f32 %v1770_v35, %v1651_v58 }
 0x481   : > { %1795 = vst [vmem:[#allocation2 + $0x30] sm:$0xff] %v1779_v63  ;;  %1803 = vst [vmem:[#allocation2 + $0x70] sm:$0xff] %v1787_v0 }
 0x482   : > { %1796 = vst [vmem:[#allocation2 + $0x38] sm:$0xff] %v1780_v36  ;;  %1804 = vst [vmem:[#allocation2 + $0x78] sm:$0xff] %v1788_v37 }
 0x483 PF: > { %s10639_s3 = sadd.s32 512, %s10139_s30 }
 0x484   : > { %p1807_p5 = scmp.lt.s32.totalorder %s10639_s3, %s10080_s12  ;;  %s10644_s0 = sadd.s32 256, %s10639_s3 }
 0x485   : > { %p1811_p3 = scmp.gt.s32.totalorder %s10644_s0, %s10072_s15 }
 0x486   : > { %p1808_p11 = pnand %p1807_p5, %p976_p0 }
 0x488   : > { %p1809_p10 = pneg %p1808_p11 }
 0x48a   : > { %p1812_p9 = pnand %p1811_p3, %p1809_p10 }
 0x48b   : > { %v1816_v38 = vld [vmem:[%s10013_s19] sm:$0x3] (!%p1812_p9)  ;;  %v1817_v39 = vstv (!%p1812_p9), %s10099_s17  ;;  %v1825_v40 = vsub.s32 (!%p1812_p9), 1, %v10074_v2  ;;  %v1821_v41 = vsub.s32 (!%p1812_p9), 0, %v10074_v2  ;;  %v8691_v43 = vld [vmem:[%s10034_s28 + $0x4] ss:$8 sps:$4 sm:$0xff] (!%p1812_p9)  }
 0x48c   : > { %1815 = sbr.rel (%p1812_p9) target bundleno = 1524 (0x5f4), region = 88  ;;  %v1818_v42 = vsub.s32 (!%p1812_p9), %v1816_v38, %v1817_v39  ;;  %v8694_v46 = vld [vmem:[%s10034_s28 + $0x24] ss:$8 sps:$4 sm:$0xff] (!%p1812_p9)   ;;  %2147 = vmatprep.mubr.bf16.mxu0 (!%p1812_p9), %v8691_v43  ;;  %v9282_v47 = vmov (!%p1812_p9), 1.0|1.0   ;;  %v2051_v54 = vld [vmem:[#allocation2] sm:$0xff] (!%p1812_p9) }
 0x48d   : > { %2167 = vmatprep.mubr.bf16.mxu1 (!%p1812_p9), %v8694_v46  ;;  %v8689_v48 = vld [vmem:[%s10034_s28] ss:$8 sps:$4 sm:$0xff] (!%p1812_p9)   ;;  %v8695_v50 = vld [vmem:[%s10034_s28 + $0x14] ss:$8 sps:$4 sm:$0xff] (!%p1812_p9)   ;;  %v8699_v52 = vld [vmem:[%s10034_s28 + $0x10] ss:$8 sps:$4 sm:$0xff] (!%p1812_p9)  }
 0x48e   : > { %v10656_v44 = vrot.slane (!%p1812_p9), %v1818_v42, %v1825_v40  ;;  %v10658_v45 = vrot.slane (!%p1812_p9), %v1818_v42, %v1821_v41  ;;  %v8692_v49 = vld [vmem:[%s10034_s28 + $0x20] ss:$8 sps:$4 sm:$0xff] (!%p1812_p9)   ;;  %v8697_v51 = vld [vmem:[%s10034_s28 + $0x34] ss:$8 sps:$4 sm:$0xff] (!%p1812_p9)   ;;  %v8700_v53 = vld [vmem:[%s10034_s28 + $0x30] ss:$8 sps:$4 sm:$0xff] (!%p1812_p9)  }
 0x48f   : > { %v2059_v55 = vld [vmem:[#allocation2 + $0x40] sm:$0xff] (!%p1812_p9)  ;;  %v2052_v56 = vld [vmem:[#allocation2 + $0x8] sm:$0xff] (!%p1812_p9)  ;;  %v2053_v60 = vld [vmem:[#allocation2 + $0x10] sm:$0xff] (!%p1812_p9) }
 0x490   : > { %vm1828_vm0 = vcmp.eq.s32.totalorder (!%p1812_p9), %v10074_v2, %v10656_v44  ;;  %vm1830_vm1 = vcmp.eq.s32.totalorder (!%p1812_p9), %v10087_v3, %v10656_v44  ;;  %vm1827_vm2 = vcmp.eq.s32.totalorder (!%p1812_p9), %v10074_v2, %v10658_v45  ;;  %vm1829_vm3 = vcmp.eq.s32.totalorder (!%p1812_p9), %v10087_v3, %v10658_v45  ;;  %v2060_v57 = vld [vmem:[#allocation2 + $0x48] sm:$0xff] (!%p1812_p9)  ;;  %v2061_v61 = vld [vmem:[#allocation2 + $0x50] sm:$0xff] (!%p1812_p9)  ;;  %v2054_v35 = vld [vmem:[#allocation2 + $0x18] sm:$0xff] (!%p1812_p9) }
 0x491   : > { %vm6705_vm4 = vmpackc.low (!%p1812_p9), %vm1830_vm1, %vm1828_vm0  ;;  %vm1832_vm5 = vcmp.eq.s32.totalorder (!%p1812_p9), %v10090_v4, %v10656_v44  ;;  %vm1834_vm6 = vcmp.eq.s32.totalorder (!%p1812_p9), %v10093_v5, %v10656_v44  ;;  %vm1831_vm9 = vcmp.eq.s32.totalorder (!%p1812_p9), %v10090_v4, %v10658_v45  ;;  %vm1833_vm10 = vcmp.eq.s32.totalorder (!%p1812_p9), %v10093_v5, %v10658_v45  ;;  %v2062_v36 = vld [vmem:[#allocation2 + $0x58] sm:$0xff] (!%p1812_p9) }
 0x492   : > { %6706 = vmatprep.subr.msk.bf16.mxu0 (!%p1812_p9), %vm6705_vm4, %v9282_v47  ;;  %8068 = vmatprep.subr.msk.bf16.mxu1 (!%p1812_p9), %vm6705_vm4, %v9282_v47  ;;  %vm6707_vm7 = vmpackc.low (!%p1812_p9), %vm1829_vm3, %vm1827_vm2  ;;  %vm1836_vm11 = vcmp.eq.s32.totalorder (!%p1812_p9), %v10096_v6, %v10656_v44  ;;  %vm1838_vm12 = vcmp.eq.s32.totalorder (!%p1812_p9), %v10102_v7, %v10656_v44  ;;  %vm1835_vm15 = vcmp.eq.s32.totalorder (!%p1812_p9), %v10096_v6, %v10658_v45 }
 0x493   : > { %6708 = vmatpush1.bf16.xpose.msk.msra.mxu0 %vm6707_vm7, %v9282_v47  ;;  %8084 = vmatpush1.bf16.xpose.msk.msra.mxu1 %vm6707_vm7, %v9282_v47  ;;  %vm6709_vm8 = vmpackc.low %vm1834_vm6, %vm1832_vm5  ;;  %vm1837_vm0 = vcmp.eq.s32.totalorder %v10102_v7, %v10658_v45  ;;  %vm1840_vm1 = vcmp.eq.s32.totalorder %v10105_v8, %v10656_v44  ;;  %vm1842_vm2 = vcmp.eq.s32.totalorder %v10108_v9, %v10656_v44 }
 0x494   : > { %6710 = vmatprep.subr.msk.bf16.mxu0 %vm6709_vm8, %v9282_v47  ;;  %8069 = vmatprep.subr.msk.bf16.mxu1 %vm6709_vm8, %v9282_v47  ;;  %vm6711_vm13 = vmpackc.low %vm1833_vm10, %vm1831_vm9  ;;  %vm1839_vm5 = vcmp.eq.s32.totalorder %v10105_v8, %v10658_v45  ;;  %vm1841_vm6 = vcmp.eq.s32.totalorder %v10108_v9, %v10658_v45  ;;  %vm1844_vm7 = vcmp.eq.s32.totalorder %v10111_v10, %v10656_v44 }
 0x495   : > { %vm6713_vm14 = vmpackc.low %vm1838_vm12, %vm1836_vm11  ;;  %vm1846_vm8 = vcmp.eq.s32.totalorder %v10114_v11, %v10656_v44  ;;  %vm1843_vm11 = vcmp.eq.s32.totalorder %v10111_v10, %v10658_v45  ;;  %vm1845_vm12 = vcmp.eq.s32.totalorder %v10114_v11, %v10658_v45 }
 0x496   : > { %vm6715_vm3 = vmpackc.low %vm1837_vm0, %vm1835_vm15 }
 0x497   : > { %vm6717_vm4 = vmpackc.low %vm1842_vm2, %vm1840_vm1  ;;  %vm1847_vm1 = vcmp.eq.s32.totalorder %v10117_v12, %v10658_v45  ;;  %vm1849_vm2 = vcmp.eq.s32.totalorder %v10120_v13, %v10658_v45 }
 0x498   : > { %vm6719_vm9 = vmpackc.low %vm1841_vm6, %vm1839_vm5 }
 0x499   : > { %vm6721_vm10 = vmpackc.low %vm1846_vm8, %vm1844_vm7  ;;  %vm1851_vm7 = vcmp.eq.s32.totalorder %v10123_v14, %v10658_v45  ;;  %vm1853_vm8 = vcmp.eq.s32.totalorder %v10128_v15, %v10658_v45 }
 0x49a   : > { %vm6723_vm15 = vmpackc.low %vm1845_vm12, %vm1843_vm11 }
 0x49b   : > { %6712 = vmatpush1.bf16.xpose.msk.msra.mxu0 %vm6711_vm13, %v9282_v47  ;;  %8085 = vmatpush1.bf16.xpose.msk.msra.mxu1 %vm6711_vm13, %v9282_v47  ;;  %vm1848_vm13 = vcmp.eq.s32.totalorder %v10117_v12, %v10656_v44  ;;  %vm6727_vm5 = vmpackc.low %vm1849_vm2, %vm1847_vm1 }
 0x49c   : > { %6714 = vmatprep.subr.msk.bf16.mxu0 %vm6713_vm14, %v9282_v47  ;;  %8070 = vmatprep.subr.msk.bf16.mxu1 %vm6713_vm14, %v9282_v47  ;;  %vm1850_vm14 = vcmp.eq.s32.totalorder %v10120_v13, %v10656_v44  ;;  %vm6731_vm11 = vmpackc.low %vm1853_vm8, %vm1851_vm7 }
 0x49d   : > { %vm6725_vm0 = vmpackc.low %vm1850_vm14, %vm1848_vm13  ;;  %vm1855_vm13 = vcmp.eq.s32.totalorder %v10131_v16, %v10658_v45  ;;  %vm1857_vm14 = vcmp.eq.s32.totalorder %v10134_v17, %v10658_v45 }
 0x49e   : > { %vm6735_vm1 = vmpackc.low %vm1857_vm14, %vm1855_vm13 }
 0x4a3   : > { %6716 = vmatpush1.bf16.xpose.msk.msra.mxu0 %vm6715_vm3, %v9282_v47  ;;  %8086 = vmatpush1.bf16.xpose.msk.msra.mxu1 %vm6715_vm3, %v9282_v47  ;;  %vm1852_vm3 = vcmp.eq.s32.totalorder %v10123_v14, %v10656_v44 }
 0x4a4   : > { %6718 = vmatprep.subr.msk.bf16.mxu0 %vm6717_vm4, %v9282_v47  ;;  %8071 = vmatprep.subr.msk.bf16.mxu1 %vm6717_vm4, %v9282_v47  ;;  %vm1854_vm4 = vcmp.eq.s32.totalorder %v10128_v15, %v10656_v44 }
 0x4a5   : > { %vm6729_vm6 = vmpackc.low %vm1854_vm4, %vm1852_vm3  ;;  %vm1859_vm3 = vcmp.eq.s32.totalorder %v10137_v18, %v10658_v45  ;;  %vm1861_vm4 = vcmp.eq.s32.totalorder %v10142_v19, %v10658_v45 }
 0x4a6   : > { %vm6739_vm7 = vmpackc.low %vm1861_vm4, %vm1859_vm3 }
 0x4ab   : > { %6720 = vmatpush1.bf16.xpose.msk.msra.mxu0 %vm6719_vm9, %v9282_v47  ;;  %8087 = vmatpush1.bf16.xpose.msk.msra.mxu1 %vm6719_vm9, %v9282_v47  ;;  %vm1856_vm9 = vcmp.eq.s32.totalorder %v10131_v16, %v10656_v44 }
 0x4ac   : > { %6722 = vmatprep.subr.msk.bf16.mxu0 %vm6721_vm10, %v9282_v47  ;;  %8072 = vmatprep.subr.msk.bf16.mxu1 %vm6721_vm10, %v9282_v47  ;;  %vm1858_vm10 = vcmp.eq.s32.totalorder %v10134_v17, %v10656_v44 }
 0x4ad   : > { %vm6733_vm12 = vmpackc.low %vm1858_vm10, %vm1856_vm9  ;;  %vm1863_vm9 = vcmp.eq.s32.totalorder %v10145_v20, %v10658_v45  ;;  %vm1865_vm10 = vcmp.eq.s32.totalorder %v10148_v21, %v10658_v45 }
 0x4ae   : > { %vm6743_vm13 = vmpackc.low %vm1865_vm10, %vm1863_vm9 }
 0x4b3   : > { %6724 = vmatpush1.bf16.xpose.msk.msra.mxu0 %vm6723_vm15, %v9282_v47  ;;  %8088 = vmatpush1.bf16.xpose.msk.msra.mxu1 %vm6723_vm15, %v9282_v47  ;;  %vm1860_vm15 = vcmp.eq.s32.totalorder %v10137_v18, %v10656_v44 }
 0x4b4   : > { %6726 = vmatprep.subr.msk.bf16.mxu0 %vm6725_vm0, %v9282_v47  ;;  %8073 = vmatprep.subr.msk.bf16.mxu1 %vm6725_vm0, %v9282_v47  ;;  %vm1862_vm0 = vcmp.eq.s32.totalorder %v10142_v19, %v10656_v44 }
 0x4b5   : > { %vm6737_vm2 = vmpackc.low %vm1862_vm0, %vm1860_vm15  ;;  %vm1867_vm15 = vcmp.eq.s32.totalorder %v10151_v22, %v10658_v45  ;;  %vm1869_vm0 = vcmp.eq.s32.totalorder %v10155_v23, %v10658_v45 }
 0x4b6   : > { %vm6747_vm3 = vmpackc.low %vm1869_vm0, %vm1867_vm15 }
 0x4bb   : > { %6728 = vmatpush1.bf16.xpose.msk.msra.mxu0 %vm6727_vm5, %v9282_v47  ;;  %8089 = vmatpush1.bf16.xpose.msk.msra.mxu1 %vm6727_vm5, %v9282_v47  ;;  %vm1864_vm5 = vcmp.eq.s32.totalorder %v10145_v20, %v10656_v44 }
 0x4bc   : > { %6730 = vmatprep.subr.msk.bf16.mxu0 %vm6729_vm6, %v9282_v47  ;;  %8074 = vmatprep.subr.msk.bf16.mxu1 %vm6729_vm6, %v9282_v47  ;;  %vm1866_vm6 = vcmp.eq.s32.totalorder %v10148_v21, %v10656_v44 }
 0x4bd   : > { %vm6741_vm8 = vmpackc.low %vm1866_vm6, %vm1864_vm5  ;;  %vm1871_vm5 = vcmp.eq.s32.totalorder %v10158_v24, %v10658_v45  ;;  %vm1873_vm6 = vcmp.eq.s32.totalorder %v10161_v25, %v10658_v45 }
 0x4be   : > { %vm6751_vm9 = vmpackc.low %vm1873_vm6, %vm1871_vm5 }
 0x4c3   : > { %6732 = vmatpush1.bf16.xpose.msk.msra.mxu0 %vm6731_vm11, %v9282_v47  ;;  %8090 = vmatpush1.bf16.xpose.msk.msra.mxu1 %vm6731_vm11, %v9282_v47  ;;  %vm1868_vm11 = vcmp.eq.s32.totalorder %v10151_v22, %v10656_v44 }
 0x4c4   : > { %6734 = vmatprep.subr.msk.bf16.mxu0 %vm6733_vm12, %v9282_v47  ;;  %8075 = vmatprep.subr.msk.bf16.mxu1 %vm6733_vm12, %v9282_v47  ;;  %vm1870_vm12 = vcmp.eq.s32.totalorder %v10155_v23, %v10656_v44 }
 0x4c5   : > { %vm6745_vm14 = vmpackc.low %vm1870_vm12, %vm1868_vm11  ;;  %vm1875_vm11 = vcmp.eq.s32.totalorder %v10164_v26, %v10658_v45  ;;  %vm1877_vm12 = vcmp.eq.s32.totalorder %v10167_v27, %v10658_v45 }
 0x4c6   : > { %vm6755_vm15 = vmpackc.low %vm1877_vm12, %vm1875_vm11 }
 0x4cb   : > { %6736 = vmatpush1.bf16.xpose.msk.msra.mxu0 %vm6735_vm1, %v9282_v47  ;;  %8091 = vmatpush1.bf16.xpose.msk.msra.mxu1 %vm6735_vm1, %v9282_v47  ;;  %vm1872_vm1 = vcmp.eq.s32.totalorder %v10158_v24, %v10656_v44 }
 0x4cc   : > { %6738 = vmatprep.subr.msk.bf16.mxu0 %vm6737_vm2, %v9282_v47  ;;  %8076 = vmatprep.subr.msk.bf16.mxu1 %vm6737_vm2, %v9282_v47  ;;  %vm1874_vm2 = vcmp.eq.s32.totalorder %v10161_v25, %v10656_v44 }
 0x4cd   : > { %vm6749_vm4 = vmpackc.low %vm1874_vm2, %vm1872_vm1  ;;  %vm1879_vm1 = vcmp.eq.s32.totalorder %v10170_v28, %v10658_v45  ;;  %vm1881_vm2 = vcmp.eq.s32.totalorder %v10173_v29, %v10658_v45 }
 0x4ce   : > { %vm6759_vm5 = vmpackc.low %vm1881_vm2, %vm1879_vm1 }
 0x4d3   : > { %6740 = vmatpush1.bf16.xpose.msk.msra.mxu0 %vm6739_vm7, %v9282_v47  ;;  %8092 = vmatpush1.bf16.xpose.msk.msra.mxu1 %vm6739_vm7, %v9282_v47  ;;  %vm1876_vm7 = vcmp.eq.s32.totalorder %v10164_v26, %v10656_v44 }
 0x4d4   : > { %6742 = vmatprep.subr.msk.bf16.mxu0 %vm6741_vm8, %v9282_v47  ;;  %8077 = vmatprep.subr.msk.bf16.mxu1 %vm6741_vm8, %v9282_v47  ;;  %vm1878_vm8 = vcmp.eq.s32.totalorder %v10167_v27, %v10656_v44 }
 0x4d5   : > { %vm6753_vm10 = vmpackc.low %vm1878_vm8, %vm1876_vm7  ;;  %vm1883_vm7 = vcmp.eq.s32.totalorder %v10176_v30, %v10658_v45  ;;  %vm1885_vm8 = vcmp.eq.s32.totalorder %v10181_v31, %v10658_v45 }
 0x4d6   : > { %vm6763_vm11 = vmpackc.low %vm1885_vm8, %vm1883_vm7 }
 0x4db   : > { %6744 = vmatpush1.bf16.xpose.msk.msra.mxu0 %vm6743_vm13, %v9282_v47  ;;  %8093 = vmatpush1.bf16.xpose.msk.msra.mxu1 %vm6743_vm13, %v9282_v47  ;;  %vm1880_vm13 = vcmp.eq.s32.totalorder %v10170_v28, %v10656_v44 }
 0x4dc   : > { %6746 = vmatprep.subr.msk.bf16.mxu0 %vm6745_vm14, %v9282_v47  ;;  %8078 = vmatprep.subr.msk.bf16.mxu1 %vm6745_vm14, %v9282_v47  ;;  %vm1882_vm14 = vcmp.eq.s32.totalorder %v10173_v29, %v10656_v44 }
 0x4dd   : > { %vm6757_vm0 = vmpackc.low %vm1882_vm14, %vm1880_vm13  ;;  %vm1887_vm13 = vcmp.eq.s32.totalorder %v10184_v32, %v10658_v45  ;;  %vm1889_vm14 = vcmp.eq.s32.totalorder %v10187_v33, %v10658_v45 }
 0x4e3   : > { %6748 = vmatpush1.bf16.xpose.msk.msra.mxu0 %vm6747_vm3, %v9282_v47  ;;  %8094 = vmatpush1.bf16.xpose.msk.msra.mxu1 %vm6747_vm3, %v9282_v47  ;;  %vm1884_vm3 = vcmp.eq.s32.totalorder %v10176_v30, %v10656_v44 }
 0x4e4   : > { %6750 = vmatprep.subr.msk.bf16.mxu0 %vm6749_vm4, %v9282_v47  ;;  %8079 = vmatprep.subr.msk.bf16.mxu1 %vm6749_vm4, %v9282_v47  ;;  %vm1886_vm4 = vcmp.eq.s32.totalorder %v10181_v31, %v10656_v44 }
 0x4e5   : > { %vm6761_vm6 = vmpackc.low %vm1886_vm4, %vm1884_vm3 }
 0x4eb   : > { %6752 = vmatpush1.bf16.xpose.msk.msra.mxu0 %vm6751_vm9, %v9282_v47  ;;  %8095 = vmatpush1.bf16.xpose.msk.msra.mxu1 %vm6751_vm9, %v9282_v47  ;;  %vm1888_vm9 = vcmp.eq.s32.totalorder %v10184_v32, %v10656_v44 }
 0x4ec   : > { %6754 = vmatprep.subr.msk.bf16.mxu0 %vm6753_vm10, %v9282_v47  ;;  %8080 = vmatprep.subr.msk.bf16.mxu1 %vm6753_vm10, %v9282_v47  ;;  %vm1890_vm10 = vcmp.eq.s32.totalorder %v10187_v33, %v10656_v44 }
 0x4ed   : > { %vm6765_vm12 = vmpackc.low %vm1890_vm10, %vm1888_vm9 }
 0x4f3   : > { %6756 = vmatpush1.bf16.xpose.msk.msra.mxu0 %vm6755_vm15, %v9282_v47  ;;  %8096 = vmatpush1.bf16.xpose.msk.msra.mxu1 %vm6755_vm15, %v9282_v47  ;;  %vm6767_vm15 = vmpackc.low %vm1889_vm14, %vm1887_vm13 }
 0x4f4   : > { %6758 = vmatprep.subr.msk.bf16.mxu0 %vm6757_vm0, %v9282_v47  ;;  %8081 = vmatprep.subr.msk.bf16.mxu1 %vm6757_vm0, %v9282_v47 }
 0x4fb   : > { %6760 = vmatpush1.bf16.xpose.msk.msra.mxu0 %vm6759_vm5, %v9282_v47  ;;  %8097 = vmatpush1.bf16.xpose.msk.msra.mxu1 %vm6759_vm5, %v9282_v47 }
 0x4fc   : > { %6762 = vmatprep.subr.msk.bf16.mxu0 %vm6761_vm6, %v9282_v47  ;;  %8082 = vmatprep.subr.msk.bf16.mxu1 %vm6761_vm6, %v9282_v47 }
 0x503   : > { %6764 = vmatpush1.bf16.xpose.msk.msra.mxu0 %vm6763_vm11, %v9282_v47  ;;  %8098 = vmatpush1.bf16.xpose.msk.msra.mxu1 %vm6763_vm11, %v9282_v47 }
 0x504   : > { %6766 = vmatprep.subr.msk.bf16.mxu0 %vm6765_vm12, %v9282_v47  ;;  %8083 = vmatprep.subr.msk.bf16.mxu1 %vm6765_vm12, %v9282_v47 }
 0x50b   : > { %6768 = vmatpush1.bf16.xpose.msk.msra.mxu0 %vm6767_vm15, %v9282_v47  ;;  %8099 = vmatpush1.bf16.xpose.msk.msra.mxu1 %vm6767_vm15, %v9282_v47  ;;  %v2055_v47 = vld [vmem:[#allocation2 + $0x20] sm:$0xff] }
 0x512   : > { %2148 = vmatmul.mubr.bf16.vlgmr.msra.gmra.mrb[0].mxu0 %v8689_v48  ;;  %2168 = vmatmul.mubr.bf16.vlgmr.msra.gmra.mrb[0].mxu1 %v8692_v49  ;;  %v2063_v48 = vld [vmem:[#allocation2 + $0x60] sm:$0xff]  ;;  %v2056_v49 = vld [vmem:[#allocation2 + $0x28] sm:$0xff] }
 0x513   : > { %2157 = vmatprep.mubr.bf16.mxu0 %v8695_v50  ;;  %2177 = vmatprep.mubr.bf16.mxu1 %v8697_v51  ;;  %v2064_v50 = vld [vmem:[#allocation2 + $0x68] sm:$0xff] }
 0x51a   : > { %2158 = vmatmul.mubr.bf16.gmra.mrb[4].mxu0 %v8699_v52  ;;  %2178 = vmatmul.mubr.bf16.gmra.mrb[4].mxu1 %v8700_v53  ;;  %v2057_v53 = vld [vmem:[#allocation2 + $0x30] sm:$0xff] }
 0x5e5   : > { %v2149_v58 = vpop.f32.mrb[0].mxu0  ;;  %v2169_v59 = vpop.f32.mrb[0].mxu1 }
 0x5e6   : > { %v2188_v62 = vadd.f32 %v2149_v58, %v2051_v54  ;;  %v2196_v63 = vadd.f32 %v2169_v59, %v2059_v55  ;;  %v2151_v0 = vpop.f32.mrb[1].mxu0  ;;  %v2171_v34 = vpop.f32.mrb[1].mxu1  ;;  %v2065_v54 = vld [vmem:[#allocation2 + $0x70] sm:$0xff]  ;;  %v2058_v59 = vld [vmem:[#allocation2 + $0x38] sm:$0xff] }
 0x5e7   : > { %v2189_v37 = vadd.f32 %v2151_v0, %v2052_v56  ;;  %v2197_v38 = vadd.f32 %v2171_v34, %v2060_v57  ;;  %v2153_v39 = vpop.f32.mrb[2].mxu0  ;;  %v2173_v40 = vpop.f32.mrb[2].mxu1 }
 0x5e8   : > { %2204 = vst [vmem:[#allocation2] sm:$0xff] %v2188_v62  ;;  %2212 = vst [vmem:[#allocation2 + $0x40] sm:$0xff] %v2196_v63  ;;  %v2190_v41 = vadd.f32 %v2153_v39, %v2053_v60  ;;  %v2198_v42 = vadd.f32 %v2173_v40, %v2061_v61  ;;  %v2155_v43 = vpop.f32.mrb[3].mxu0  ;;  %v2175_v44 = vpop.f32.mrb[3].mxu1  ;;  %v2066_v60 = vld [vmem:[#allocation2 + $0x78] sm:$0xff] }
 0x5e9   : > { %2205 = vst [vmem:[#allocation2 + $0x8] sm:$0xff] %v2189_v37  ;;  %2213 = vst [vmem:[#allocation2 + $0x48] sm:$0xff] %v2197_v38  ;;  %v2191_v45 = vadd.f32 %v2155_v43, %v2054_v35  ;;  %v2199_v46 = vadd.f32 %v2175_v44, %v2062_v36 }
 0x5ea   : > { %2206 = vst [vmem:[#allocation2 + $0x10] sm:$0xff] %v2190_v41  ;;  %2214 = vst [vmem:[#allocation2 + $0x50] sm:$0xff] %v2198_v42 }
 0x5eb   : > { %2207 = vst [vmem:[#allocation2 + $0x18] sm:$0xff] %v2191_v45  ;;  %2215 = vst [vmem:[#allocation2 + $0x58] sm:$0xff] %v2199_v46 }
 0x5ed   : > { %v2159_v51 = vpop.f32.mrb[4].mxu0  ;;  %v2179_v52 = vpop.f32.mrb[4].mxu1 }
 0x5ee   : > { %v2192_v55 = vadd.f32 %v2159_v51, %v2055_v47  ;;  %v2200_v56 = vadd.f32 %v2179_v52, %v2063_v48  ;;  %v2161_v57 = vpop.f32.mrb[5].mxu0  ;;  %v2181_v58 = vpop.f32.mrb[5].mxu1 }
 0x5ef   : > { %v2193_v61 = vadd.f32 %v2161_v57, %v2056_v49  ;;  %v2201_v62 = vadd.f32 %v2181_v58, %v2064_v50  ;;  %v2163_v63 = vpop.f32.mrb[6].mxu0  ;;  %v2183_v0 = vpop.f32.mrb[6].mxu1 }
 0x5f0   : > { %2208 = vst [vmem:[#allocation2 + $0x20] sm:$0xff] %v2192_v55  ;;  %2216 = vst [vmem:[#allocation2 + $0x60] sm:$0xff] %v2200_v56  ;;  %v2194_v34 = vadd.f32 %v2163_v63, %v2057_v53  ;;  %v2202_v35 = vadd.f32 %v2183_v0, %v2065_v54  ;;  %v2165_v36 = vpop.f32.mrb[7].mxu0  ;;  %v2185_v37 = vpop.f32.mrb[7].mxu1 }
 0x5f1   : > { %2209 = vst [vmem:[#allocation2 + $0x28] sm:$0xff] %v2193_v61  ;;  %2217 = vst [vmem:[#allocation2 + $0x68] sm:$0xff] %v2201_v62  ;;  %v2195_v38 = vadd.f32 %v2165_v36, %v2058_v59  ;;  %v2203_v39 = vadd.f32 %v2185_v37, %v2066_v60 }
 0x5f2   : > { %2210 = vst [vmem:[#allocation2 + $0x30] sm:$0xff] %v2194_v34  ;;  %2218 = vst [vmem:[#allocation2 + $0x70] sm:$0xff] %v2202_v35 }
 0x5f3   : > { %2211 = vst [vmem:[#allocation2 + $0x38] sm:$0xff] %v2195_v38  ;;  %2219 = vst [vmem:[#allocation2 + $0x78] sm:$0xff] %v2203_v39 }
 0x5f4 PF: > { %s10860_s22 = sadd.s32 768, %s10139_s30 }
 0x5f5   : > { %p2222_p13 = scmp.lt.s32.totalorder %s10860_s22, %s10080_s12  ;;  %s10865_s1 = sadd.s32 256, %s10860_s22 }
 0x5f6   : > { %p2226_p4 = scmp.gt.s32.totalorder %s10865_s1, %s10072_s15 }
 0x5f7   : > { %p2223_p7 = pnand %p2222_p13, %p976_p0 }
 0x5f9   : > { %p2224_p1 = pneg %p2223_p7 }
 0x5fb   : > { %p2227_p8 = pnand %p2226_p4, %p2224_p1 }
 0x5fc   : > { %v2231_v40 = vld [vmem:[%s10197_s10] sm:$0x3] (!%p2227_p8)  ;;  %v2232_v41 = vstv (!%p2227_p8), %s10099_s17  ;;  %v2240_v42 = vsub.s32 (!%p2227_p8), 1, %v10074_v2  ;;  %v2236_v43 = vsub.s32 (!%p2227_p8), 0, %v10074_v2  ;;  %v8703_v45 = vld [vmem:[%s10041_s8 + $0x4] ss:$8 sps:$4 sm:$0xff] (!%p2227_p8)  }
 0x5fd   : > { %2230 = sbr.rel (%p2227_p8) target bundleno = 1893 (0x765), region = 92  ;;  %v2233_v44 = vsub.s32 (!%p2227_p8), %v2231_v40, %v2232_v41  ;;  %v8706_v48 = vld [vmem:[%s10041_s8 + $0x24] ss:$8 sps:$4 sm:$0xff] (!%p2227_p8)   ;;  %2562 = vmatprep.mubr.bf16.mxu0 (!%p2227_p8), %v8703_v45  ;;  %v9283_v49 = vmov (!%p2227_p8), 1.0|1.0   ;;  %v2466_v56 = vld [vmem:[#allocation2] sm:$0xff] (!%p2227_p8) }
 0x5fe   : > { %2582 = vmatprep.mubr.bf16.mxu1 (!%p2227_p8), %v8706_v48  ;;  %v8701_v50 = vld [vmem:[%s10041_s8] ss:$8 sps:$4 sm:$0xff] (!%p2227_p8)   ;;  %v8707_v52 = vld [vmem:[%s10041_s8 + $0x14] ss:$8 sps:$4 sm:$0xff] (!%p2227_p8)   ;;  %v8711_v54 = vld [vmem:[%s10041_s8 + $0x10] ss:$8 sps:$4 sm:$0xff] (!%p2227_p8)  }
 0x5ff   : > { %v10877_v46 = vrot.slane (!%p2227_p8), %v2233_v44, %v2240_v42  ;;  %v10879_v47 = vrot.slane (!%p2227_p8), %v2233_v44, %v2236_v43  ;;  %v8704_v51 = vld [vmem:[%s10041_s8 + $0x20] ss:$8 sps:$4 sm:$0xff] (!%p2227_p8)   ;;  %v8709_v53 = vld [vmem:[%s10041_s8 + $0x34] ss:$8 sps:$4 sm:$0xff] (!%p2227_p8)   ;;  %v8712_v55 = vld [vmem:[%s10041_s8 + $0x30] ss:$8 sps:$4 sm:$0xff] (!%p2227_p8)  }
 0x600   : > { %v2474_v57 = vld [vmem:[#allocation2 + $0x40] sm:$0xff] (!%p2227_p8)  ;;  %v2467_v58 = vld [vmem:[#allocation2 + $0x8] sm:$0xff] (!%p2227_p8)  ;;  %v2468_v62 = vld [vmem:[#allocation2 + $0x10] sm:$0xff] (!%p2227_p8) }
 0x601   : > { %vm2243_vm0 = vcmp.eq.s32.totalorder (!%p2227_p8), %v10074_v2, %v10877_v46  ;;  %vm2245_vm1 = vcmp.eq.s32.totalorder (!%p2227_p8), %v10087_v3, %v10877_v46  ;;  %vm2242_vm2 = vcmp.eq.s32.totalorder (!%p2227_p8), %v10074_v2, %v10879_v47  ;;  %vm2244_vm3 = vcmp.eq.s32.totalorder (!%p2227_p8), %v10087_v3, %v10879_v47  ;;  %v2475_v59 = vld [vmem:[#allocation2 + $0x48] sm:$0xff] (!%p2227_p8)  ;;  %v2476_v63 = vld [vmem:[#allocation2 + $0x50] sm:$0xff] (!%p2227_p8)  ;;  %v2469_v37 = vld [vmem:[#allocation2 + $0x18] sm:$0xff] (!%p2227_p8) }
 0x602   : > { %vm6842_vm4 = vmpackc.low (!%p2227_p8), %vm2245_vm1, %vm2243_vm0  ;;  %vm2247_vm5 = vcmp.eq.s32.totalorder (!%p2227_p8), %v10090_v4, %v10877_v46  ;;  %vm2249_vm6 = vcmp.eq.s32.totalorder (!%p2227_p8), %v10093_v5, %v10877_v46  ;;  %vm2246_vm9 = vcmp.eq.s32.totalorder (!%p2227_p8), %v10090_v4, %v10879_v47  ;;  %vm2248_vm10 = vcmp.eq.s32.totalorder (!%p2227_p8), %v10093_v5, %v10879_v47  ;;  %v2477_v38 = vld [vmem:[#allocation2 + $0x58] sm:$0xff] (!%p2227_p8) }
 0x603   : > { %6843 = vmatprep.subr.msk.bf16.mxu0 (!%p2227_p8), %vm6842_vm4, %v9283_v49  ;;  %8100 = vmatprep.subr.msk.bf16.mxu1 (!%p2227_p8), %vm6842_vm4, %v9283_v49  ;;  %vm6844_vm7 = vmpackc.low (!%p2227_p8), %vm2244_vm3, %vm2242_vm2  ;;  %vm2251_vm11 = vcmp.eq.s32.totalorder (!%p2227_p8), %v10096_v6, %v10877_v46  ;;  %vm2253_vm12 = vcmp.eq.s32.totalorder (!%p2227_p8), %v10102_v7, %v10877_v46  ;;  %vm2250_vm15 = vcmp.eq.s32.totalorder (!%p2227_p8), %v10096_v6, %v10879_v47 }
 0x604   : > { %6845 = vmatpush1.bf16.xpose.msk.msra.mxu0 %vm6844_vm7, %v9283_v49  ;;  %8116 = vmatpush1.bf16.xpose.msk.msra.mxu1 %vm6844_vm7, %v9283_v49  ;;  %vm6846_vm8 = vmpackc.low %vm2249_vm6, %vm2247_vm5  ;;  %vm2252_vm0 = vcmp.eq.s32.totalorder %v10102_v7, %v10879_v47  ;;  %vm2255_vm1 = vcmp.eq.s32.totalorder %v10105_v8, %v10877_v46  ;;  %vm2257_vm2 = vcmp.eq.s32.totalorder %v10108_v9, %v10877_v46 }
 0x605   : > { %6847 = vmatprep.subr.msk.bf16.mxu0 %vm6846_vm8, %v9283_v49  ;;  %8101 = vmatprep.subr.msk.bf16.mxu1 %vm6846_vm8, %v9283_v49  ;;  %vm6848_vm13 = vmpackc.low %vm2248_vm10, %vm2246_vm9  ;;  %vm2254_vm5 = vcmp.eq.s32.totalorder %v10105_v8, %v10879_v47  ;;  %vm2256_vm6 = vcmp.eq.s32.totalorder %v10108_v9, %v10879_v47  ;;  %vm2259_vm7 = vcmp.eq.s32.totalorder %v10111_v10, %v10877_v46 }
 0x606   : > { %vm6850_vm14 = vmpackc.low %vm2253_vm12, %vm2251_vm11  ;;  %vm2261_vm8 = vcmp.eq.s32.totalorder %v10114_v11, %v10877_v46  ;;  %vm2258_vm11 = vcmp.eq.s32.totalorder %v10111_v10, %v10879_v47  ;;  %vm2260_vm12 = vcmp.eq.s32.totalorder %v10114_v11, %v10879_v47 }
 0x607   : > { %vm6852_vm3 = vmpackc.low %vm2252_vm0, %vm2250_vm15 }
 0x608   : > { %vm6854_vm4 = vmpackc.low %vm2257_vm2, %vm2255_vm1  ;;  %vm2262_vm1 = vcmp.eq.s32.totalorder %v10117_v12, %v10879_v47  ;;  %vm2264_vm2 = vcmp.eq.s32.totalorder %v10120_v13, %v10879_v47 }
 0x609   : > { %vm6856_vm9 = vmpackc.low %vm2256_vm6, %vm2254_vm5 }
 0x60a   : > { %vm6858_vm10 = vmpackc.low %vm2261_vm8, %vm2259_vm7  ;;  %vm2266_vm7 = vcmp.eq.s32.totalorder %v10123_v14, %v10879_v47  ;;  %vm2268_vm8 = vcmp.eq.s32.totalorder %v10128_v15, %v10879_v47 }
 0x60b   : > { %vm6860_vm15 = vmpackc.low %vm2260_vm12, %vm2258_vm11 }
 0x60c   : > { %6849 = vmatpush1.bf16.xpose.msk.msra.mxu0 %vm6848_vm13, %v9283_v49  ;;  %8117 = vmatpush1.bf16.xpose.msk.msra.mxu1 %vm6848_vm13, %v9283_v49  ;;  %vm2263_vm13 = vcmp.eq.s32.totalorder %v10117_v12, %v10877_v46  ;;  %vm6864_vm5 = vmpackc.low %vm2264_vm2, %vm2262_vm1 }
 0x60d   : > { %6851 = vmatprep.subr.msk.bf16.mxu0 %vm6850_vm14, %v9283_v49  ;;  %8102 = vmatprep.subr.msk.bf16.mxu1 %vm6850_vm14, %v9283_v49  ;;  %vm2265_vm14 = vcmp.eq.s32.totalorder %v10120_v13, %v10877_v46  ;;  %vm6868_vm11 = vmpackc.low %vm2268_vm8, %vm2266_vm7 }
 0x60e   : > { %vm6862_vm0 = vmpackc.low %vm2265_vm14, %vm2263_vm13  ;;  %vm2270_vm13 = vcmp.eq.s32.totalorder %v10131_v16, %v10879_v47  ;;  %vm2272_vm14 = vcmp.eq.s32.totalorder %v10134_v17, %v10879_v47 }
 0x60f   : > { %vm6872_vm1 = vmpackc.low %vm2272_vm14, %vm2270_vm13 }
 0x614   : > { %6853 = vmatpush1.bf16.xpose.msk.msra.mxu0 %vm6852_vm3, %v9283_v49  ;;  %8118 = vmatpush1.bf16.xpose.msk.msra.mxu1 %vm6852_vm3, %v9283_v49  ;;  %vm2267_vm3 = vcmp.eq.s32.totalorder %v10123_v14, %v10877_v46 }
 0x615   : > { %6855 = vmatprep.subr.msk.bf16.mxu0 %vm6854_vm4, %v9283_v49  ;;  %8103 = vmatprep.subr.msk.bf16.mxu1 %vm6854_vm4, %v9283_v49  ;;  %vm2269_vm4 = vcmp.eq.s32.totalorder %v10128_v15, %v10877_v46 }
 0x616   : > { %vm6866_vm6 = vmpackc.low %vm2269_vm4, %vm2267_vm3  ;;  %vm2274_vm3 = vcmp.eq.s32.totalorder %v10137_v18, %v10879_v47  ;;  %vm2276_vm4 = vcmp.eq.s32.totalorder %v10142_v19, %v10879_v47 }
 0x617   : > { %vm6876_vm7 = vmpackc.low %vm2276_vm4, %vm2274_vm3 }
 0x61c   : > { %6857 = vmatpush1.bf16.xpose.msk.msra.mxu0 %vm6856_vm9, %v9283_v49  ;;  %8119 = vmatpush1.bf16.xpose.msk.msra.mxu1 %vm6856_vm9, %v9283_v49  ;;  %vm2271_vm9 = vcmp.eq.s32.totalorder %v10131_v16, %v10877_v46 }
 0x61d   : > { %6859 = vmatprep.subr.msk.bf16.mxu0 %vm6858_vm10, %v9283_v49  ;;  %8104 = vmatprep.subr.msk.bf16.mxu1 %vm6858_vm10, %v9283_v49  ;;  %vm2273_vm10 = vcmp.eq.s32.totalorder %v10134_v17, %v10877_v46 }
 0x61e   : > { %vm6870_vm12 = vmpackc.low %vm2273_vm10, %vm2271_vm9  ;;  %vm2278_vm9 = vcmp.eq.s32.totalorder %v10145_v20, %v10879_v47  ;;  %vm2280_vm10 = vcmp.eq.s32.totalorder %v10148_v21, %v10879_v47 }
 0x61f   : > { %vm6880_vm13 = vmpackc.low %vm2280_vm10, %vm2278_vm9 }
 0x624   : > { %6861 = vmatpush1.bf16.xpose.msk.msra.mxu0 %vm6860_vm15, %v9283_v49  ;;  %8120 = vmatpush1.bf16.xpose.msk.msra.mxu1 %vm6860_vm15, %v9283_v49  ;;  %vm2275_vm15 = vcmp.eq.s32.totalorder %v10137_v18, %v10877_v46 }
 0x625   : > { %6863 = vmatprep.subr.msk.bf16.mxu0 %vm6862_vm0, %v9283_v49  ;;  %8105 = vmatprep.subr.msk.bf16.mxu1 %vm6862_vm0, %v9283_v49  ;;  %vm2277_vm0 = vcmp.eq.s32.totalorder %v10142_v19, %v10877_v46 }
 0x626   : > { %vm6874_vm2 = vmpackc.low %vm2277_vm0, %vm2275_vm15  ;;  %vm2282_vm15 = vcmp.eq.s32.totalorder %v10151_v22, %v10879_v47  ;;  %vm2284_vm0 = vcmp.eq.s32.totalorder %v10155_v23, %v10879_v47 }
 0x627   : > { %vm6884_vm3 = vmpackc.low %vm2284_vm0, %vm2282_vm15 }
 0x62c   : > { %6865 = vmatpush1.bf16.xpose.msk.msra.mxu0 %vm6864_vm5, %v9283_v49  ;;  %8121 = vmatpush1.bf16.xpose.msk.msra.mxu1 %vm6864_vm5, %v9283_v49  ;;  %vm2279_vm5 = vcmp.eq.s32.totalorder %v10145_v20, %v10877_v46 }
 0x62d   : > { %6867 = vmatprep.subr.msk.bf16.mxu0 %vm6866_vm6, %v9283_v49  ;;  %8106 = vmatprep.subr.msk.bf16.mxu1 %vm6866_vm6, %v9283_v49  ;;  %vm2281_vm6 = vcmp.eq.s32.totalorder %v10148_v21, %v10877_v46 }
 0x62e   : > { %vm6878_vm8 = vmpackc.low %vm2281_vm6, %vm2279_vm5  ;;  %vm2286_vm5 = vcmp.eq.s32.totalorder %v10158_v24, %v10879_v47  ;;  %vm2288_vm6 = vcmp.eq.s32.totalorder %v10161_v25, %v10879_v47 }
 0x62f   : > { %vm6888_vm9 = vmpackc.low %vm2288_vm6, %vm2286_vm5 }
 0x634   : > { %6869 = vmatpush1.bf16.xpose.msk.msra.mxu0 %vm6868_vm11, %v9283_v49  ;;  %8122 = vmatpush1.bf16.xpose.msk.msra.mxu1 %vm6868_vm11, %v9283_v49  ;;  %vm2283_vm11 = vcmp.eq.s32.totalorder %v10151_v22, %v10877_v46 }
 0x635   : > { %6871 = vmatprep.subr.msk.bf16.mxu0 %vm6870_vm12, %v9283_v49  ;;  %8107 = vmatprep.subr.msk.bf16.mxu1 %vm6870_vm12, %v9283_v49  ;;  %vm2285_vm12 = vcmp.eq.s32.totalorder %v10155_v23, %v10877_v46 }
 0x636   : > { %vm6882_vm14 = vmpackc.low %vm2285_vm12, %vm2283_vm11  ;;  %vm2290_vm11 = vcmp.eq.s32.totalorder %v10164_v26, %v10879_v47  ;;  %vm2292_vm12 = vcmp.eq.s32.totalorder %v10167_v27, %v10879_v47 }
 0x637   : > { %vm6892_vm15 = vmpackc.low %vm2292_vm12, %vm2290_vm11 }
 0x63c   : > { %6873 = vmatpush1.bf16.xpose.msk.msra.mxu0 %vm6872_vm1, %v9283_v49  ;;  %8123 = vmatpush1.bf16.xpose.msk.msra.mxu1 %vm6872_vm1, %v9283_v49  ;;  %vm2287_vm1 = vcmp.eq.s32.totalorder %v10158_v24, %v10877_v46 }
 0x63d   : > { %6875 = vmatprep.subr.msk.bf16.mxu0 %vm6874_vm2, %v9283_v49  ;;  %8108 = vmatprep.subr.msk.bf16.mxu1 %vm6874_vm2, %v9283_v49  ;;  %vm2289_vm2 = vcmp.eq.s32.totalorder %v10161_v25, %v10877_v46 }
 0x63e   : > { %vm6886_vm4 = vmpackc.low %vm2289_vm2, %vm2287_vm1  ;;  %vm2294_vm1 = vcmp.eq.s32.totalorder %v10170_v28, %v10879_v47  ;;  %vm2296_vm2 = vcmp.eq.s32.totalorder %v10173_v29, %v10879_v47 }
 0x63f   : > { %vm6896_vm5 = vmpackc.low %vm2296_vm2, %vm2294_vm1 }
 0x644   : > { %6877 = vmatpush1.bf16.xpose.msk.msra.mxu0 %vm6876_vm7, %v9283_v49  ;;  %8124 = vmatpush1.bf16.xpose.msk.msra.mxu1 %vm6876_vm7, %v9283_v49  ;;  %vm2291_vm7 = vcmp.eq.s32.totalorder %v10164_v26, %v10877_v46 }
 0x645   : > { %6879 = vmatprep.subr.msk.bf16.mxu0 %vm6878_vm8, %v9283_v49  ;;  %8109 = vmatprep.subr.msk.bf16.mxu1 %vm6878_vm8, %v9283_v49  ;;  %vm2293_vm8 = vcmp.eq.s32.totalorder %v10167_v27, %v10877_v46 }
 0x646   : > { %vm6890_vm10 = vmpackc.low %vm2293_vm8, %vm2291_vm7  ;;  %vm2298_vm7 = vcmp.eq.s32.totalorder %v10176_v30, %v10879_v47  ;;  %vm2300_vm8 = vcmp.eq.s32.totalorder %v10181_v31, %v10879_v47 }
 0x647   : > { %vm6900_vm11 = vmpackc.low %vm2300_vm8, %vm2298_vm7 }
 0x64c   : > { %6881 = vmatpush1.bf16.xpose.msk.msra.mxu0 %vm6880_vm13, %v9283_v49  ;;  %8125 = vmatpush1.bf16.xpose.msk.msra.mxu1 %vm6880_vm13, %v9283_v49  ;;  %vm2295_vm13 = vcmp.eq.s32.totalorder %v10170_v28, %v10877_v46 }
 0x64d   : > { %6883 = vmatprep.subr.msk.bf16.mxu0 %vm6882_vm14, %v9283_v49  ;;  %8110 = vmatprep.subr.msk.bf16.mxu1 %vm6882_vm14, %v9283_v49  ;;  %vm2297_vm14 = vcmp.eq.s32.totalorder %v10173_v29, %v10877_v46 }
 0x64e   : > { %vm6894_vm0 = vmpackc.low %vm2297_vm14, %vm2295_vm13  ;;  %vm2302_vm13 = vcmp.eq.s32.totalorder %v10184_v32, %v10879_v47  ;;  %vm2304_vm14 = vcmp.eq.s32.totalorder %v10187_v33, %v10879_v47 }
 0x654   : > { %6885 = vmatpush1.bf16.xpose.msk.msra.mxu0 %vm6884_vm3, %v9283_v49  ;;  %8126 = vmatpush1.bf16.xpose.msk.msra.mxu1 %vm6884_vm3, %v9283_v49  ;;  %vm2299_vm3 = vcmp.eq.s32.totalorder %v10176_v30, %v10877_v46 }
 0x655   : > { %6887 = vmatprep.subr.msk.bf16.mxu0 %vm6886_vm4, %v9283_v49  ;;  %8111 = vmatprep.subr.msk.bf16.mxu1 %vm6886_vm4, %v9283_v49  ;;  %vm2301_vm4 = vcmp.eq.s32.totalorder %v10181_v31, %v10877_v46 }
 0x656   : > { %vm6898_vm6 = vmpackc.low %vm2301_vm4, %vm2299_vm3 }
 0x65c   : > { %6889 = vmatpush1.bf16.xpose.msk.msra.mxu0 %vm6888_vm9, %v9283_v49  ;;  %8127 = vmatpush1.bf16.xpose.msk.msra.mxu1 %vm6888_vm9, %v9283_v49  ;;  %vm2303_vm9 = vcmp.eq.s32.totalorder %v10184_v32, %v10877_v46 }
 0x65d   : > { %6891 = vmatprep.subr.msk.bf16.mxu0 %vm6890_vm10, %v9283_v49  ;;  %8112 = vmatprep.subr.msk.bf16.mxu1 %vm6890_vm10, %v9283_v49  ;;  %vm2305_vm10 = vcmp.eq.s32.totalorder %v10187_v33, %v10877_v46 }
 0x65e   : > { %vm6902_vm12 = vmpackc.low %vm2305_vm10, %vm2303_vm9 }
 0x664   : > { %6893 = vmatpush1.bf16.xpose.msk.msra.mxu0 %vm6892_vm15, %v9283_v49  ;;  %8128 = vmatpush1.bf16.xpose.msk.msra.mxu1 %vm6892_vm15, %v9283_v49  ;;  %vm6904_vm15 = vmpackc.low %vm2304_vm14, %vm2302_vm13 }
 0x665   : > { %6895 = vmatprep.subr.msk.bf16.mxu0 %vm6894_vm0, %v9283_v49  ;;  %8113 = vmatprep.subr.msk.bf16.mxu1 %vm6894_vm0, %v9283_v49 }
 0x66c   : > { %6897 = vmatpush1.bf16.xpose.msk.msra.mxu0 %vm6896_vm5, %v9283_v49  ;;  %8129 = vmatpush1.bf16.xpose.msk.msra.mxu1 %vm6896_vm5, %v9283_v49 }
 0x66d   : > { %6899 = vmatprep.subr.msk.bf16.mxu0 %vm6898_vm6, %v9283_v49  ;;  %8114 = vmatprep.subr.msk.bf16.mxu1 %vm6898_vm6, %v9283_v49 }
 0x674   : > { %6901 = vmatpush1.bf16.xpose.msk.msra.mxu0 %vm6900_vm11, %v9283_v49  ;;  %8130 = vmatpush1.bf16.xpose.msk.msra.mxu1 %vm6900_vm11, %v9283_v49 }
 0x675   : > { %6903 = vmatprep.subr.msk.bf16.mxu0 %vm6902_vm12, %v9283_v49  ;;  %8115 = vmatprep.subr.msk.bf16.mxu1 %vm6902_vm12, %v9283_v49 }
 0x67c   : > { %6905 = vmatpush1.bf16.xpose.msk.msra.mxu0 %vm6904_vm15, %v9283_v49  ;;  %8131 = vmatpush1.bf16.xpose.msk.msra.mxu1 %vm6904_vm15, %v9283_v49  ;;  %v2470_v49 = vld [vmem:[#allocation2 + $0x20] sm:$0xff] }
 0x683   : > { %2563 = vmatmul.mubr.bf16.vlgmr.msra.gmra.mrb[0].mxu0 %v8701_v50  ;;  %2583 = vmatmul.mubr.bf16.vlgmr.msra.gmra.mrb[0].mxu1 %v8704_v51  ;;  %v2478_v50 = vld [vmem:[#allocation2 + $0x60] sm:$0xff]  ;;  %v2471_v51 = vld [vmem:[#allocation2 + $0x28] sm:$0xff] }
 0x684   : > { %2572 = vmatprep.mubr.bf16.mxu0 %v8707_v52  ;;  %2592 = vmatprep.mubr.bf16.mxu1 %v8709_v53  ;;  %v2479_v52 = vld [vmem:[#allocation2 + $0x68] sm:$0xff] }
 0x68b   : > { %2573 = vmatmul.mubr.bf16.gmra.mrb[4].mxu0 %v8711_v54  ;;  %2593 = vmatmul.mubr.bf16.gmra.mrb[4].mxu1 %v8712_v55  ;;  %v2472_v55 = vld [vmem:[#allocation2 + $0x30] sm:$0xff] }
 0x756   : > { %v2564_v60 = vpop.f32.mrb[0].mxu0  ;;  %v2584_v61 = vpop.f32.mrb[0].mxu1 }
 0x757   : > { %v2603_v0 = vadd.f32 %v2564_v60, %v2466_v56  ;;  %v2611_v34 = vadd.f32 %v2584_v61, %v2474_v57  ;;  %v2566_v35 = vpop.f32.mrb[1].mxu0  ;;  %v2586_v36 = vpop.f32.mrb[1].mxu1  ;;  %v2480_v56 = vld [vmem:[#allocation2 + $0x70] sm:$0xff]  ;;  %v2473_v61 = vld [vmem:[#allocation2 + $0x38] sm:$0xff] }
 0x758   : > { %v2604_v39 = vadd.f32 %v2566_v35, %v2467_v58  ;;  %v2612_v40 = vadd.f32 %v2586_v36, %v2475_v59  ;;  %v2568_v41 = vpop.f32.mrb[2].mxu0  ;;  %v2588_v42 = vpop.f32.mrb[2].mxu1 }
 0x759   : > { %2619 = vst [vmem:[#allocation2] sm:$0xff] %v2603_v0  ;;  %2627 = vst [vmem:[#allocation2 + $0x40] sm:$0xff] %v2611_v34  ;;  %v2605_v43 = vadd.f32 %v2568_v41, %v2468_v62  ;;  %v2613_v44 = vadd.f32 %v2588_v42, %v2476_v63  ;;  %v2570_v45 = vpop.f32.mrb[3].mxu0  ;;  %v2590_v46 = vpop.f32.mrb[3].mxu1  ;;  %v2481_v62 = vld [vmem:[#allocation2 + $0x78] sm:$0xff] }
 0x75a   : > { %2620 = vst [vmem:[#allocation2 + $0x8] sm:$0xff] %v2604_v39  ;;  %2628 = vst [vmem:[#allocation2 + $0x48] sm:$0xff] %v2612_v40  ;;  %v2606_v47 = vadd.f32 %v2570_v45, %v2469_v37  ;;  %v2614_v48 = vadd.f32 %v2590_v46, %v2477_v38 }
 0x75b   : > { %2621 = vst [vmem:[#allocation2 + $0x10] sm:$0xff] %v2605_v43  ;;  %2629 = vst [vmem:[#allocation2 + $0x50] sm:$0xff] %v2613_v44 }
 0x75c   : > { %2622 = vst [vmem:[#allocation2 + $0x18] sm:$0xff] %v2606_v47  ;;  %2630 = vst [vmem:[#allocation2 + $0x58] sm:$0xff] %v2614_v48 }
 0x75e   : > { %v2574_v53 = vpop.f32.mrb[4].mxu0  ;;  %v2594_v54 = vpop.f32.mrb[4].mxu1 }
 0x75f   : > { %v2607_v57 = vadd.f32 %v2574_v53, %v2470_v49  ;;  %v2615_v58 = vadd.f32 %v2594_v54, %v2478_v50  ;;  %v2576_v59 = vpop.f32.mrb[5].mxu0  ;;  %v2596_v60 = vpop.f32.mrb[5].mxu1 }
 0x760   : > { %v2608_v63 = vadd.f32 %v2576_v59, %v2471_v51  ;;  %v2616_v0 = vadd.f32 %v2596_v60, %v2479_v52  ;;  %v2578_v34 = vpop.f32.mrb[6].mxu0  ;;  %v2598_v35 = vpop.f32.mrb[6].mxu1 }
 0x761   : > { %2623 = vst [vmem:[#allocation2 + $0x20] sm:$0xff] %v2607_v57  ;;  %2631 = vst [vmem:[#allocation2 + $0x60] sm:$0xff] %v2615_v58  ;;  %v2609_v36 = vadd.f32 %v2578_v34, %v2472_v55  ;;  %v2617_v37 = vadd.f32 %v2598_v35, %v2480_v56  ;;  %v2580_v38 = vpop.f32.mrb[7].mxu0  ;;  %v2600_v39 = vpop.f32.mrb[7].mxu1 }
 0x762   : > { %2624 = vst [vmem:[#allocation2 + $0x28] sm:$0xff] %v2608_v63  ;;  %2632 = vst [vmem:[#allocation2 + $0x68] sm:$0xff] %v2616_v0  ;;  %v2610_v40 = vadd.f32 %v2580_v38, %v2473_v61  ;;  %v2618_v41 = vadd.f32 %v2600_v39, %v2481_v62 }
 0x763   : > { %2625 = vst [vmem:[#allocation2 + $0x30] sm:$0xff] %v2609_v36  ;;  %2633 = vst [vmem:[#allocation2 + $0x70] sm:$0xff] %v2617_v37 }
 0x764   : > { %2626 = vst [vmem:[#allocation2 + $0x38] sm:$0xff] %v2610_v40  ;;  %2634 = vst [vmem:[#allocation2 + $0x78] sm:$0xff] %v2618_v41 }
 0x765 PF: > { %v2635_v42 = vld [vmem:[#allocation2] sm:$0xff]  ;;  %v2636_v43 = vld [vmem:[#allocation2 + $0x8] sm:$0xff]  ;;  %v2637_v44 = vld [vmem:[#allocation2 + $0x10] sm:$0xff]  ;;  %s13220_s15 = sadd.s32 1, %s10049_s16  ;;  %s2668_s25 = sadd.s32 2, %s10049_s16 }
 0x766   : > { %s11082_s12 = sld [smem:[#allocation5 + %s13220_s15]]  ;;  %2651 = vst [vmem:[%s10210_s21] sm:$0xff] %v2635_v42  ;;  %2671 = vst [vmem:[#allocation2] sm:$0xff] %v9279_v1  ;;  %v2638_v45 = vld [vmem:[#allocation2 + $0x18] sm:$0xff]  ;;  %s11096_s6 = sadd.s32 256, %s10099_s17  ;;  %v2643_v50 = vld [vmem:[#allocation2 + $0x40] sm:$0xff] }
 0x767   : > { %2652 = vst [vmem:[%s10210_s21 + $0x8] sm:$0xff] %v2636_v43  ;;  %2672 = vst [vmem:[#allocation2 + $0x8] sm:$0xff] %v9279_v1  ;;  %s11093_s18 = sld [smem:[#allocation5 + %s2668_s25]]  ;;  %v2644_v51 = vld [vmem:[#allocation2 + $0x48] sm:$0xff]  ;;  %v2645_v52 = vld [vmem:[#allocation2 + $0x50] sm:$0xff] }
 0x768   : > { %2653 = vst [vmem:[%s10210_s21 + $0x30] sm:$0xff] %v2637_v44  ;;  %2673 = vst [vmem:[#allocation2 + $0x10] sm:$0xff] %v9279_v1  ;;  %v2639_v46 = vld [vmem:[#allocation2 + $0x20] sm:$0xff]  ;;  %v2646_v53 = vld [vmem:[#allocation2 + $0x58] sm:$0xff] }
 0x769   : > { %v2640_v47 = vld [vmem:[#allocation2 + $0x28] sm:$0xff]  ;;  %2654 = vst [vmem:[%s10210_s21 + $0x38] sm:$0xff] %v2638_v45  ;;  %2674 = vst [vmem:[#allocation2 + $0x18] sm:$0xff] %v9279_v1  ;;  %v2647_v54 = vld [vmem:[#allocation2 + $0x60] sm:$0xff] }
 0x76a   : > { %2655 = vst [vmem:[%s10210_s21 + $0x60] sm:$0xff] %v2639_v46  ;;  %2675 = vst [vmem:[#allocation2 + $0x20] sm:$0xff] %v9279_v1  ;;  %v2641_v48 = vld [vmem:[#allocation2 + $0x30] sm:$0xff]  ;;  %v2648_v55 = vld [vmem:[#allocation2 + $0x68] sm:$0xff] }
 0x76b   : > { %2656 = vst [vmem:[%s10210_s21 + $0x68] sm:$0xff] %v2640_v47  ;;  %2676 = vst [vmem:[#allocation2 + $0x28] sm:$0xff] %v9279_v1  ;;  %v2642_v49 = vld [vmem:[#allocation2 + $0x38] sm:$0xff]  ;;  %v2649_v56 = vld [vmem:[#allocation2 + $0x70] sm:$0xff] }
 0x76c   : > { %2657 = vst [vmem:[%s10210_s21 + $0x90] sm:$0xff] %v2641_v48  ;;  %2677 = vst [vmem:[#allocation2 + $0x30] sm:$0xff] %v9279_v1  ;;  %v2650_v57 = vld [vmem:[#allocation2 + $0x78] sm:$0xff]  ;;  %p2691_p2 = scmp.gt.s32.totalorder %s10202_s7, %s11082_s12 }
 0x76d   : > { %2658 = vst [vmem:[%s10210_s21 + $0x98] sm:$0xff] %v2642_v49  ;;  %2678 = vst [vmem:[#allocation2 + $0x38] sm:$0xff] %v9279_v1  ;;  %p2687_p0 = scmp.lt.s32.totalorder %s11082_s12, %s11093_s18  ;;  %p2688_p12 = scmp.lt.s32.totalorder %s10139_s30, %s11093_s18 }
 0x76e   : > { %2659 = vst [vmem:[%s10210_s21 + $0xc0] sm:$0xff] %v2643_v50  ;;  %2679 = vst [vmem:[#allocation2 + $0x40] sm:$0xff] %v9279_v1 }
 0x76f   : > { %2660 = vst [vmem:[%s10210_s21 + $0xc8] sm:$0xff] %v2644_v51  ;;  %2680 = vst [vmem:[#allocation2 + $0x48] sm:$0xff] %v9279_v1  ;;  %p2689_p6 = pnand %p2688_p12, %p2687_p0 }
 0x770   : > { %2661 = vst [vmem:[%s10210_s21 + $0xf0] sm:$0xff] %v2645_v52  ;;  %2681 = vst [vmem:[#allocation2 + $0x50] sm:$0xff] %v9279_v1 }
 0x771   : > { %2662 = vst [vmem:[%s10210_s21 + $0xf8] sm:$0xff] %v2646_v53  ;;  %2682 = vst [vmem:[#allocation2 + $0x58] sm:$0xff] %v9279_v1  ;;  %p2690_p5 = pneg %p2689_p6 }
 0x772   : > { %2663 = vst [vmem:[%s10210_s21 + $0x120] sm:$0xff] %v2647_v54  ;;  %2683 = vst [vmem:[#allocation2 + $0x60] sm:$0xff] %v9279_v1 }
 0x773   : > { %2664 = vst [vmem:[%s10210_s21 + $0x128] sm:$0xff] %v2648_v55  ;;  %2684 = vst [vmem:[#allocation2 + $0x68] sm:$0xff] %v9279_v1  ;;  %p2692_p11 = pnand %p2691_p2, %p2690_p5 }
 0x774   : > { %2665 = vst [vmem:[%s10210_s21 + $0x150] sm:$0xff] %v2649_v56  ;;  %2685 = vst [vmem:[#allocation2 + $0x70] sm:$0xff] %v9279_v1  ;;  %v2696_v58 = vld [vmem:[%s10192_s29] sm:$0x3] (!%p2692_p11)  ;;  %v2697_v59 = vstv (!%p2692_p11), %s11096_s6  ;;  %v2705_v60 = vsub.s32 (!%p2692_p11), 1, %v10074_v2  ;;  %v2701_v61 = vsub.s32 (!%p2692_p11), 0, %v10074_v2 }
 0x775   : > { %2666 = vst [vmem:[%s10210_s21 + $0x158] sm:$0xff] %v2650_v57  ;;  %2686 = vst [vmem:[#allocation2 + $0x78] sm:$0xff] %v9279_v1  ;;  %2695 = sbr.rel (%p2692_p11) target bundleno = 2269 (0x8dd), region = 96  ;;  %v2698_v62 = vsub.s32 (!%p2692_p11), %v2696_v58, %v2697_v59  ;;  %v8715_v63 = vld [vmem:[%s10020_s9 + $0x4] ss:$8 sps:$4 sm:$0xff] (!%p2692_p11)   ;;  %v2931_v43 = vld [vmem:[#allocation2] sm:$0xff] (!%p2692_p11) }
 0x776   : > { %v8718_v35 = vld [vmem:[%s10020_s9 + $0x24] ss:$8 sps:$4 sm:$0xff] (!%p2692_p11)   ;;  %3027 = vmatprep.mubr.bf16.mxu0 (!%p2692_p11), %v8715_v63  ;;  %v9284_v36 = vmov (!%p2692_p11), 1.0|1.0   ;;  %v8713_v37 = vld [vmem:[%s10020_s9] ss:$8 sps:$4 sm:$0xff] (!%p2692_p11)  }
 0x777   : > { %v11138_v0 = vrot.slane (!%p2692_p11), %v2698_v62, %v2705_v60  ;;  %v11140_v34 = vrot.slane (!%p2692_p11), %v2698_v62, %v2701_v61  ;;  %3047 = vmatprep.mubr.bf16.mxu1 (!%p2692_p11), %v8718_v35  ;;  %v8716_v38 = vld [vmem:[%s10020_s9 + $0x20] ss:$8 sps:$4 sm:$0xff] (!%p2692_p11)   ;;  %v8719_v39 = vld [vmem:[%s10020_s9 + $0x14] ss:$8 sps:$4 sm:$0xff] (!%p2692_p11)   ;;  %v8723_v41 = vld [vmem:[%s10020_s9 + $0x10] ss:$8 sps:$4 sm:$0xff] (!%p2692_p11)  }
 0x778   : > { %v8721_v40 = vld [vmem:[%s10020_s9 + $0x34] ss:$8 sps:$4 sm:$0xff] (!%p2692_p11)   ;;  %v8724_v42 = vld [vmem:[%s10020_s9 + $0x30] ss:$8 sps:$4 sm:$0xff] (!%p2692_p11)   ;;  %v2932_v45 = vld [vmem:[#allocation2 + $0x8] sm:$0xff] (!%p2692_p11) }
 0x779   : > { %vm2708_vm0 = vcmp.eq.s32.totalorder (!%p2692_p11), %v10074_v2, %v11138_v0  ;;  %vm2710_vm1 = vcmp.eq.s32.totalorder (!%p2692_p11), %v10087_v3, %v11138_v0  ;;  %vm2707_vm2 = vcmp.eq.s32.totalorder (!%p2692_p11), %v10074_v2, %v11140_v34  ;;  %vm2709_vm3 = vcmp.eq.s32.totalorder (!%p2692_p11), %v10087_v3, %v11140_v34  ;;  %v2939_v44 = vld [vmem:[#allocation2 + $0x40] sm:$0xff] (!%p2692_p11)  ;;  %v2940_v46 = vld [vmem:[#allocation2 + $0x48] sm:$0xff] (!%p2692_p11)  ;;  %v2933_v49 = vld [vmem:[#allocation2 + $0x10] sm:$0xff] (!%p2692_p11) }
 0x77a   : > { %vm6978_vm4 = vmpackc.low (!%p2692_p11), %vm2710_vm1, %vm2708_vm0  ;;  %vm2712_vm5 = vcmp.eq.s32.totalorder (!%p2692_p11), %v10090_v4, %v11138_v0  ;;  %vm2714_vm6 = vcmp.eq.s32.totalorder (!%p2692_p11), %v10093_v5, %v11138_v0  ;;  %vm2711_vm9 = vcmp.eq.s32.totalorder (!%p2692_p11), %v10090_v4, %v11140_v34  ;;  %vm2713_vm10 = vcmp.eq.s32.totalorder (!%p2692_p11), %v10093_v5, %v11140_v34  ;;  %v2941_v50 = vld [vmem:[#allocation2 + $0x50] sm:$0xff] (!%p2692_p11)  ;;  %v2934_v55 = vld [vmem:[#allocation2 + $0x18] sm:$0xff] (!%p2692_p11) }
 0x77b   : > { %6979 = vmatprep.subr.msk.bf16.mxu0 (!%p2692_p11), %vm6978_vm4, %v9284_v36  ;;  %8132 = vmatprep.subr.msk.bf16.mxu1 (!%p2692_p11), %vm6978_vm4, %v9284_v36  ;;  %vm6980_vm7 = vmpackc.low (!%p2692_p11), %vm2709_vm3, %vm2707_vm2  ;;  %vm2716_vm11 = vcmp.eq.s32.totalorder (!%p2692_p11), %v10096_v6, %v11138_v0  ;;  %vm2718_vm12 = vcmp.eq.s32.totalorder (!%p2692_p11), %v10102_v7, %v11138_v0  ;;  %vm2715_vm15 = vcmp.eq.s32.totalorder (!%p2692_p11), %v10096_v6, %v11140_v34  ;;  %v2942_v56 = vld [vmem:[#allocation2 + $0x58] sm:$0xff] (!%p2692_p11) }
 0x77c   : > { %6981 = vmatpush1.bf16.xpose.msk.msra.mxu0 %vm6980_vm7, %v9284_v36  ;;  %8148 = vmatpush1.bf16.xpose.msk.msra.mxu1 %vm6980_vm7, %v9284_v36  ;;  %vm6982_vm8 = vmpackc.low %vm2714_vm6, %vm2712_vm5  ;;  %vm2717_vm0 = vcmp.eq.s32.totalorder %v10102_v7, %v11140_v34  ;;  %vm2720_vm1 = vcmp.eq.s32.totalorder %v10105_v8, %v11138_v0  ;;  %vm2722_vm2 = vcmp.eq.s32.totalorder %v10108_v9, %v11138_v0 }
 0x77d   : > { %6983 = vmatprep.subr.msk.bf16.mxu0 %vm6982_vm8, %v9284_v36  ;;  %8133 = vmatprep.subr.msk.bf16.mxu1 %vm6982_vm8, %v9284_v36  ;;  %vm6984_vm13 = vmpackc.low %vm2713_vm10, %vm2711_vm9  ;;  %vm2719_vm5 = vcmp.eq.s32.totalorder %v10105_v8, %v11140_v34  ;;  %vm2721_vm6 = vcmp.eq.s32.totalorder %v10108_v9, %v11140_v34  ;;  %vm2724_vm7 = vcmp.eq.s32.totalorder %v10111_v10, %v11138_v0 }
 0x77e   : > { %vm6986_vm14 = vmpackc.low %vm2718_vm12, %vm2716_vm11  ;;  %vm2726_vm8 = vcmp.eq.s32.totalorder %v10114_v11, %v11138_v0  ;;  %vm2723_vm11 = vcmp.eq.s32.totalorder %v10111_v10, %v11140_v34  ;;  %vm2725_vm12 = vcmp.eq.s32.totalorder %v10114_v11, %v11140_v34 }
 0x77f   : > { %vm6988_vm3 = vmpackc.low %vm2717_vm0, %vm2715_vm15 }
 0x780   : > { %vm6990_vm4 = vmpackc.low %vm2722_vm2, %vm2720_vm1  ;;  %vm2727_vm1 = vcmp.eq.s32.totalorder %v10117_v12, %v11140_v34  ;;  %vm2729_vm2 = vcmp.eq.s32.totalorder %v10120_v13, %v11140_v34 }
 0x781   : > { %vm6992_vm9 = vmpackc.low %vm2721_vm6, %vm2719_vm5 }
 0x782   : > { %vm6994_vm10 = vmpackc.low %vm2726_vm8, %vm2724_vm7  ;;  %vm2731_vm7 = vcmp.eq.s32.totalorder %v10123_v14, %v11140_v34  ;;  %vm2733_vm8 = vcmp.eq.s32.totalorder %v10128_v15, %v11140_v34 }
 0x783   : > { %vm6996_vm15 = vmpackc.low %vm2725_vm12, %vm2723_vm11 }
 0x784   : > { %6985 = vmatpush1.bf16.xpose.msk.msra.mxu0 %vm6984_vm13, %v9284_v36  ;;  %8149 = vmatpush1.bf16.xpose.msk.msra.mxu1 %vm6984_vm13, %v9284_v36  ;;  %vm2728_vm13 = vcmp.eq.s32.totalorder %v10117_v12, %v11138_v0  ;;  %vm7000_vm5 = vmpackc.low %vm2729_vm2, %vm2727_vm1 }
 0x785   : > { %6987 = vmatprep.subr.msk.bf16.mxu0 %vm6986_vm14, %v9284_v36  ;;  %8134 = vmatprep.subr.msk.bf16.mxu1 %vm6986_vm14, %v9284_v36  ;;  %vm2730_vm14 = vcmp.eq.s32.totalorder %v10120_v13, %v11138_v0  ;;  %vm7004_vm11 = vmpackc.low %vm2733_vm8, %vm2731_vm7 }
 0x786   : > { %vm6998_vm0 = vmpackc.low %vm2730_vm14, %vm2728_vm13  ;;  %vm2735_vm13 = vcmp.eq.s32.totalorder %v10131_v16, %v11140_v34  ;;  %vm2737_vm14 = vcmp.eq.s32.totalorder %v10134_v17, %v11140_v34 }
 0x787   : > { %vm7008_vm1 = vmpackc.low %vm2737_vm14, %vm2735_vm13 }
 0x78c   : > { %6989 = vmatpush1.bf16.xpose.msk.msra.mxu0 %vm6988_vm3, %v9284_v36  ;;  %8150 = vmatpush1.bf16.xpose.msk.msra.mxu1 %vm6988_vm3, %v9284_v36  ;;  %vm2732_vm3 = vcmp.eq.s32.totalorder %v10123_v14, %v11138_v0 }
 0x78d   : > { %6991 = vmatprep.subr.msk.bf16.mxu0 %vm6990_vm4, %v9284_v36  ;;  %8135 = vmatprep.subr.msk.bf16.mxu1 %vm6990_vm4, %v9284_v36  ;;  %vm2734_vm4 = vcmp.eq.s32.totalorder %v10128_v15, %v11138_v0 }
 0x78e   : > { %vm7002_vm6 = vmpackc.low %vm2734_vm4, %vm2732_vm3  ;;  %vm2739_vm3 = vcmp.eq.s32.totalorder %v10137_v18, %v11140_v34  ;;  %vm2741_vm4 = vcmp.eq.s32.totalorder %v10142_v19, %v11140_v34 }
 0x78f   : > { %vm7012_vm7 = vmpackc.low %vm2741_vm4, %vm2739_vm3 }
 0x794   : > { %6993 = vmatpush1.bf16.xpose.msk.msra.mxu0 %vm6992_vm9, %v9284_v36  ;;  %8151 = vmatpush1.bf16.xpose.msk.msra.mxu1 %vm6992_vm9, %v9284_v36  ;;  %vm2736_vm9 = vcmp.eq.s32.totalorder %v10131_v16, %v11138_v0 }
 0x795   : > { %6995 = vmatprep.subr.msk.bf16.mxu0 %vm6994_vm10, %v9284_v36  ;;  %8136 = vmatprep.subr.msk.bf16.mxu1 %vm6994_vm10, %v9284_v36  ;;  %vm2738_vm10 = vcmp.eq.s32.totalorder %v10134_v17, %v11138_v0 }
 0x796   : > { %vm7006_vm12 = vmpackc.low %vm2738_vm10, %vm2736_vm9  ;;  %vm2743_vm9 = vcmp.eq.s32.totalorder %v10145_v20, %v11140_v34  ;;  %vm2745_vm10 = vcmp.eq.s32.totalorder %v10148_v21, %v11140_v34 }
 0x797   : > { %vm7016_vm13 = vmpackc.low %vm2745_vm10, %vm2743_vm9 }
 0x79c   : > { %6997 = vmatpush1.bf16.xpose.msk.msra.mxu0 %vm6996_vm15, %v9284_v36  ;;  %8152 = vmatpush1.bf16.xpose.msk.msra.mxu1 %vm6996_vm15, %v9284_v36  ;;  %vm2740_vm15 = vcmp.eq.s32.totalorder %v10137_v18, %v11138_v0 }
 0x79d   : > { %6999 = vmatprep.subr.msk.bf16.mxu0 %vm6998_vm0, %v9284_v36  ;;  %8137 = vmatprep.subr.msk.bf16.mxu1 %vm6998_vm0, %v9284_v36  ;;  %vm2742_vm0 = vcmp.eq.s32.totalorder %v10142_v19, %v11138_v0 }
 0x79e   : > { %vm7010_vm2 = vmpackc.low %vm2742_vm0, %vm2740_vm15  ;;  %vm2747_vm15 = vcmp.eq.s32.totalorder %v10151_v22, %v11140_v34  ;;  %vm2749_vm0 = vcmp.eq.s32.totalorder %v10155_v23, %v11140_v34 }
 0x79f   : > { %vm7020_vm3 = vmpackc.low %vm2749_vm0, %vm2747_vm15 }
 0x7a4   : > { %7001 = vmatpush1.bf16.xpose.msk.msra.mxu0 %vm7000_vm5, %v9284_v36  ;;  %8153 = vmatpush1.bf16.xpose.msk.msra.mxu1 %vm7000_vm5, %v9284_v36  ;;  %vm2744_vm5 = vcmp.eq.s32.totalorder %v10145_v20, %v11138_v0 }
 0x7a5   : > { %7003 = vmatprep.subr.msk.bf16.mxu0 %vm7002_vm6, %v9284_v36  ;;  %8138 = vmatprep.subr.msk.bf16.mxu1 %vm7002_vm6, %v9284_v36  ;;  %vm2746_vm6 = vcmp.eq.s32.totalorder %v10148_v21, %v11138_v0 }
 0x7a6   : > { %vm7014_vm8 = vmpackc.low %vm2746_vm6, %vm2744_vm5  ;;  %vm2751_vm5 = vcmp.eq.s32.totalorder %v10158_v24, %v11140_v34  ;;  %vm2753_vm6 = vcmp.eq.s32.totalorder %v10161_v25, %v11140_v34 }
 0x7a7   : > { %vm7024_vm9 = vmpackc.low %vm2753_vm6, %vm2751_vm5 }
 0x7ac   : > { %7005 = vmatpush1.bf16.xpose.msk.msra.mxu0 %vm7004_vm11, %v9284_v36  ;;  %8154 = vmatpush1.bf16.xpose.msk.msra.mxu1 %vm7004_vm11, %v9284_v36  ;;  %vm2748_vm11 = vcmp.eq.s32.totalorder %v10151_v22, %v11138_v0 }
 0x7ad   : > { %7007 = vmatprep.subr.msk.bf16.mxu0 %vm7006_vm12, %v9284_v36  ;;  %8139 = vmatprep.subr.msk.bf16.mxu1 %vm7006_vm12, %v9284_v36  ;;  %vm2750_vm12 = vcmp.eq.s32.totalorder %v10155_v23, %v11138_v0 }
 0x7ae   : > { %vm7018_vm14 = vmpackc.low %vm2750_vm12, %vm2748_vm11  ;;  %vm2755_vm11 = vcmp.eq.s32.totalorder %v10164_v26, %v11140_v34  ;;  %vm2757_vm12 = vcmp.eq.s32.totalorder %v10167_v27, %v11140_v34 }
 0x7af   : > { %vm7028_vm15 = vmpackc.low %vm2757_vm12, %vm2755_vm11 }
 0x7b4   : > { %7009 = vmatpush1.bf16.xpose.msk.msra.mxu0 %vm7008_vm1, %v9284_v36  ;;  %8155 = vmatpush1.bf16.xpose.msk.msra.mxu1 %vm7008_vm1, %v9284_v36  ;;  %vm2752_vm1 = vcmp.eq.s32.totalorder %v10158_v24, %v11138_v0 }
 0x7b5   : > { %7011 = vmatprep.subr.msk.bf16.mxu0 %vm7010_vm2, %v9284_v36  ;;  %8140 = vmatprep.subr.msk.bf16.mxu1 %vm7010_vm2, %v9284_v36  ;;  %vm2754_vm2 = vcmp.eq.s32.totalorder %v10161_v25, %v11138_v0 }
 0x7b6   : > { %vm7022_vm4 = vmpackc.low %vm2754_vm2, %vm2752_vm1  ;;  %vm2759_vm1 = vcmp.eq.s32.totalorder %v10170_v28, %v11140_v34  ;;  %vm2761_vm2 = vcmp.eq.s32.totalorder %v10173_v29, %v11140_v34 }
 0x7b7   : > { %vm7032_vm5 = vmpackc.low %vm2761_vm2, %vm2759_vm1 }
 0x7bc   : > { %7013 = vmatpush1.bf16.xpose.msk.msra.mxu0 %vm7012_vm7, %v9284_v36  ;;  %8156 = vmatpush1.bf16.xpose.msk.msra.mxu1 %vm7012_vm7, %v9284_v36  ;;  %vm2756_vm7 = vcmp.eq.s32.totalorder %v10164_v26, %v11138_v0 }
 0x7bd   : > { %7015 = vmatprep.subr.msk.bf16.mxu0 %vm7014_vm8, %v9284_v36  ;;  %8141 = vmatprep.subr.msk.bf16.mxu1 %vm7014_vm8, %v9284_v36  ;;  %vm2758_vm8 = vcmp.eq.s32.totalorder %v10167_v27, %v11138_v0 }
 0x7be   : > { %vm7026_vm10 = vmpackc.low %vm2758_vm8, %vm2756_vm7  ;;  %vm2763_vm7 = vcmp.eq.s32.totalorder %v10176_v30, %v11140_v34  ;;  %vm2765_vm8 = vcmp.eq.s32.totalorder %v10181_v31, %v11140_v34 }
 0x7bf   : > { %vm7036_vm11 = vmpackc.low %vm2765_vm8, %vm2763_vm7 }
 0x7c4   : > { %7017 = vmatpush1.bf16.xpose.msk.msra.mxu0 %vm7016_vm13, %v9284_v36  ;;  %8157 = vmatpush1.bf16.xpose.msk.msra.mxu1 %vm7016_vm13, %v9284_v36  ;;  %vm2760_vm13 = vcmp.eq.s32.totalorder %v10170_v28, %v11138_v0 }
 0x7c5   : > { %7019 = vmatprep.subr.msk.bf16.mxu0 %vm7018_vm14, %v9284_v36  ;;  %8142 = vmatprep.subr.msk.bf16.mxu1 %vm7018_vm14, %v9284_v36  ;;  %vm2762_vm14 = vcmp.eq.s32.totalorder %v10173_v29, %v11138_v0 }
 0x7c6   : > { %vm7030_vm0 = vmpackc.low %vm2762_vm14, %vm2760_vm13  ;;  %vm2767_vm13 = vcmp.eq.s32.totalorder %v10184_v32, %v11140_v34  ;;  %vm2769_vm14 = vcmp.eq.s32.totalorder %v10187_v33, %v11140_v34 }
 0x7cc   : > { %7021 = vmatpush1.bf16.xpose.msk.msra.mxu0 %vm7020_vm3, %v9284_v36  ;;  %8158 = vmatpush1.bf16.xpose.msk.msra.mxu1 %vm7020_vm3, %v9284_v36  ;;  %vm2764_vm3 = vcmp.eq.s32.totalorder %v10176_v30, %v11138_v0 }
 0x7cd   : > { %7023 = vmatprep.subr.msk.bf16.mxu0 %vm7022_vm4, %v9284_v36  ;;  %8143 = vmatprep.subr.msk.bf16.mxu1 %vm7022_vm4, %v9284_v36  ;;  %vm2766_vm4 = vcmp.eq.s32.totalorder %v10181_v31, %v11138_v0 }
 0x7ce   : > { %vm7034_vm6 = vmpackc.low %vm2766_vm4, %vm2764_vm3 }
 0x7d4   : > { %7025 = vmatpush1.bf16.xpose.msk.msra.mxu0 %vm7024_vm9, %v9284_v36  ;;  %8159 = vmatpush1.bf16.xpose.msk.msra.mxu1 %vm7024_vm9, %v9284_v36  ;;  %vm2768_vm9 = vcmp.eq.s32.totalorder %v10184_v32, %v11138_v0 }
 0x7d5   : > { %7027 = vmatprep.subr.msk.bf16.mxu0 %vm7026_vm10, %v9284_v36  ;;  %8144 = vmatprep.subr.msk.bf16.mxu1 %vm7026_vm10, %v9284_v36  ;;  %vm2770_vm10 = vcmp.eq.s32.totalorder %v10187_v33, %v11138_v0 }
 0x7d6   : > { %vm7038_vm12 = vmpackc.low %vm2770_vm10, %vm2768_vm9 }
 0x7dc   : > { %7029 = vmatpush1.bf16.xpose.msk.msra.mxu0 %vm7028_vm15, %v9284_v36  ;;  %8160 = vmatpush1.bf16.xpose.msk.msra.mxu1 %vm7028_vm15, %v9284_v36  ;;  %vm7040_vm15 = vmpackc.low %vm2769_vm14, %vm2767_vm13 }
 0x7dd   : > { %7031 = vmatprep.subr.msk.bf16.mxu0 %vm7030_vm0, %v9284_v36  ;;  %8145 = vmatprep.subr.msk.bf16.mxu1 %vm7030_vm0, %v9284_v36 }
 0x7e4   : > { %7033 = vmatpush1.bf16.xpose.msk.msra.mxu0 %vm7032_vm5, %v9284_v36  ;;  %8161 = vmatpush1.bf16.xpose.msk.msra.mxu1 %vm7032_vm5, %v9284_v36 }
 0x7e5   : > { %7035 = vmatprep.subr.msk.bf16.mxu0 %vm7034_vm6, %v9284_v36  ;;  %8146 = vmatprep.subr.msk.bf16.mxu1 %vm7034_vm6, %v9284_v36 }
 0x7ec   : > { %7037 = vmatpush1.bf16.xpose.msk.msra.mxu0 %vm7036_vm11, %v9284_v36  ;;  %8162 = vmatpush1.bf16.xpose.msk.msra.mxu1 %vm7036_vm11, %v9284_v36 }
 0x7ed   : > { %7039 = vmatprep.subr.msk.bf16.mxu0 %vm7038_vm12, %v9284_v36  ;;  %8147 = vmatprep.subr.msk.bf16.mxu1 %vm7038_vm12, %v9284_v36 }
 0x7f4   : > { %7041 = vmatpush1.bf16.xpose.msk.msra.mxu0 %vm7040_vm15, %v9284_v36  ;;  %8163 = vmatpush1.bf16.xpose.msk.msra.mxu1 %vm7040_vm15, %v9284_v36  ;;  %v2935_v36 = vld [vmem:[#allocation2 + $0x20] sm:$0xff] }
 0x7fb   : > { %3028 = vmatmul.mubr.bf16.vlgmr.msra.gmra.mrb[0].mxu0 %v8713_v37  ;;  %3048 = vmatmul.mubr.bf16.vlgmr.msra.gmra.mrb[0].mxu1 %v8716_v38  ;;  %v2943_v37 = vld [vmem:[#allocation2 + $0x60] sm:$0xff]  ;;  %v2936_v38 = vld [vmem:[#allocation2 + $0x28] sm:$0xff] }
 0x7fc   : > { %3037 = vmatprep.mubr.bf16.mxu0 %v8719_v39  ;;  %3057 = vmatprep.mubr.bf16.mxu1 %v8721_v40  ;;  %v2944_v39 = vld [vmem:[#allocation2 + $0x68] sm:$0xff] }
 0x803   : > { %3038 = vmatmul.mubr.bf16.gmra.mrb[4].mxu0 %v8723_v41  ;;  %3058 = vmatmul.mubr.bf16.gmra.mrb[4].mxu1 %v8724_v42  ;;  %v2937_v42 = vld [vmem:[#allocation2 + $0x30] sm:$0xff] }
 0x8ce   : > { %v3029_v47 = vpop.f32.mrb[0].mxu0  ;;  %v3049_v48 = vpop.f32.mrb[0].mxu1 }
 0x8cf   : > { %v3068_v51 = vadd.f32 %v3029_v47, %v2931_v43  ;;  %v3076_v52 = vadd.f32 %v3049_v48, %v2939_v44  ;;  %v3031_v53 = vpop.f32.mrb[1].mxu0  ;;  %v3051_v54 = vpop.f32.mrb[1].mxu1  ;;  %v2945_v43 = vld [vmem:[#allocation2 + $0x70] sm:$0xff]  ;;  %v2938_v48 = vld [vmem:[#allocation2 + $0x38] sm:$0xff] }
 0x8d0   : > { %v3069_v57 = vadd.f32 %v3031_v53, %v2932_v45  ;;  %v3077_v58 = vadd.f32 %v3051_v54, %v2940_v46  ;;  %v3033_v59 = vpop.f32.mrb[2].mxu0  ;;  %v3053_v60 = vpop.f32.mrb[2].mxu1 }
 0x8d1   : > { %3084 = vst [vmem:[#allocation2] sm:$0xff] %v3068_v51  ;;  %3092 = vst [vmem:[#allocation2 + $0x40] sm:$0xff] %v3076_v52  ;;  %v3070_v61 = vadd.f32 %v3033_v59, %v2933_v49  ;;  %v3078_v62 = vadd.f32 %v3053_v60, %v2941_v50  ;;  %v3035_v63 = vpop.f32.mrb[3].mxu0  ;;  %v3055_v0 = vpop.f32.mrb[3].mxu1  ;;  %v2946_v49 = vld [vmem:[#allocation2 + $0x78] sm:$0xff] }
 0x8d2   : > { %3085 = vst [vmem:[#allocation2 + $0x8] sm:$0xff] %v3069_v57  ;;  %3093 = vst [vmem:[#allocation2 + $0x48] sm:$0xff] %v3077_v58  ;;  %v3071_v34 = vadd.f32 %v3035_v63, %v2934_v55  ;;  %v3079_v35 = vadd.f32 %v3055_v0, %v2942_v56 }
 0x8d3   : > { %3086 = vst [vmem:[#allocation2 + $0x10] sm:$0xff] %v3070_v61  ;;  %3094 = vst [vmem:[#allocation2 + $0x50] sm:$0xff] %v3078_v62 }
 0x8d4   : > { %3087 = vst [vmem:[#allocation2 + $0x18] sm:$0xff] %v3071_v34  ;;  %3095 = vst [vmem:[#allocation2 + $0x58] sm:$0xff] %v3079_v35 }
 0x8d6   : > { %v3039_v40 = vpop.f32.mrb[4].mxu0  ;;  %v3059_v41 = vpop.f32.mrb[4].mxu1 }
 0x8d7   : > { %v3072_v44 = vadd.f32 %v3039_v40, %v2935_v36  ;;  %v3080_v45 = vadd.f32 %v3059_v41, %v2943_v37  ;;  %v3041_v46 = vpop.f32.mrb[5].mxu0  ;;  %v3061_v47 = vpop.f32.mrb[5].mxu1 }
 0x8d8   : > { %v3073_v50 = vadd.f32 %v3041_v46, %v2936_v38  ;;  %v3081_v51 = vadd.f32 %v3061_v47, %v2944_v39  ;;  %v3043_v52 = vpop.f32.mrb[6].mxu0  ;;  %v3063_v53 = vpop.f32.mrb[6].mxu1 }
 0x8d9   : > { %3088 = vst [vmem:[#allocation2 + $0x20] sm:$0xff] %v3072_v44  ;;  %3096 = vst [vmem:[#allocation2 + $0x60] sm:$0xff] %v3080_v45  ;;  %v3074_v54 = vadd.f32 %v3043_v52, %v2937_v42  ;;  %v3082_v55 = vadd.f32 %v3063_v53, %v2945_v43  ;;  %v3045_v56 = vpop.f32.mrb[7].mxu0  ;;  %v3065_v57 = vpop.f32.mrb[7].mxu1 }
 0x8da   : > { %3089 = vst [vmem:[#allocation2 + $0x28] sm:$0xff] %v3073_v50  ;;  %3097 = vst [vmem:[#allocation2 + $0x68] sm:$0xff] %v3081_v51  ;;  %v3075_v58 = vadd.f32 %v3045_v56, %v2938_v48  ;;  %v3083_v59 = vadd.f32 %v3065_v57, %v2946_v49 }
 0x8db   : > { %3090 = vst [vmem:[#allocation2 + $0x30] sm:$0xff] %v3074_v54  ;;  %3098 = vst [vmem:[#allocation2 + $0x70] sm:$0xff] %v3082_v55 }
 0x8dc   : > { %3091 = vst [vmem:[#allocation2 + $0x38] sm:$0xff] %v3075_v58  ;;  %3099 = vst [vmem:[#allocation2 + $0x78] sm:$0xff] %v3083_v59 }
 0x8dd PF: > { %p3100_p3 = scmp.lt.s32.totalorder %s10202_s7, %s11093_s18  ;;  %p3103_p9 = scmp.gt.s32.totalorder %s10423_s24, %s11082_s12 }
 0x8df   : > { %p3101_p10 = pnand %p3100_p3, %p2687_p0 }
 0x8e1   : > { %p3102_p13 = pneg %p3101_p10 }
 0x8e3   : > { %p3104_p7 = pnand %p3103_p9, %p3102_p13 }
 0x8e4   : > { %v3108_v60 = vld [vmem:[%s10005_s13] sm:$0x3] (!%p3104_p7)  ;;  %v3109_v61 = vstv (!%p3104_p7), %s11096_s6  ;;  %v3117_v62 = vsub.s32 (!%p3104_p7), 1, %v10074_v2  ;;  %v3113_v63 = vsub.s32 (!%p3104_p7), 0, %v10074_v2  ;;  %v8727_v34 = vld [vmem:[%s10027_s23 + $0x4] ss:$8 sps:$4 sm:$0xff] (!%p3104_p7)  }
 0x8e5   : > { %3107 = sbr.rel (%p3104_p7) target bundleno = 2637 (0xa4d), region = 100  ;;  %v3110_v0 = vsub.s32 (!%p3104_p7), %v3108_v60, %v3109_v61  ;;  %v8730_v37 = vld [vmem:[%s10027_s23 + $0x24] ss:$8 sps:$4 sm:$0xff] (!%p3104_p7)   ;;  %3439 = vmatprep.mubr.bf16.mxu0 (!%p3104_p7), %v8727_v34  ;;  %v9285_v38 = vmov (!%p3104_p7), 1.0|1.0   ;;  %v3343_v45 = vld [vmem:[#allocation2] sm:$0xff] (!%p3104_p7) }
 0x8e6   : > { %3459 = vmatprep.mubr.bf16.mxu1 (!%p3104_p7), %v8730_v37  ;;  %v8725_v39 = vld [vmem:[%s10027_s23] ss:$8 sps:$4 sm:$0xff] (!%p3104_p7)   ;;  %v8731_v41 = vld [vmem:[%s10027_s23 + $0x14] ss:$8 sps:$4 sm:$0xff] (!%p3104_p7)   ;;  %v8735_v43 = vld [vmem:[%s10027_s23 + $0x10] ss:$8 sps:$4 sm:$0xff] (!%p3104_p7)  }
 0x8e7   : > { %v11353_v35 = vrot.slane (!%p3104_p7), %v3110_v0, %v3117_v62  ;;  %v11355_v36 = vrot.slane (!%p3104_p7), %v3110_v0, %v3113_v63  ;;  %v8728_v40 = vld [vmem:[%s10027_s23 + $0x20] ss:$8 sps:$4 sm:$0xff] (!%p3104_p7)   ;;  %v8733_v42 = vld [vmem:[%s10027_s23 + $0x34] ss:$8 sps:$4 sm:$0xff] (!%p3104_p7)   ;;  %v8736_v44 = vld [vmem:[%s10027_s23 + $0x30] ss:$8 sps:$4 sm:$0xff] (!%p3104_p7)  }
 0x8e8   : > { %v3351_v46 = vld [vmem:[#allocation2 + $0x40] sm:$0xff] (!%p3104_p7)  ;;  %v3344_v47 = vld [vmem:[#allocation2 + $0x8] sm:$0xff] (!%p3104_p7)  ;;  %v3345_v51 = vld [vmem:[#allocation2 + $0x10] sm:$0xff] (!%p3104_p7) }
 0x8e9   : > { %vm3120_vm0 = vcmp.eq.s32.totalorder (!%p3104_p7), %v10074_v2, %v11353_v35  ;;  %vm3122_vm1 = vcmp.eq.s32.totalorder (!%p3104_p7), %v10087_v3, %v11353_v35  ;;  %vm3119_vm2 = vcmp.eq.s32.totalorder (!%p3104_p7), %v10074_v2, %v11355_v36  ;;  %vm3121_vm3 = vcmp.eq.s32.totalorder (!%p3104_p7), %v10087_v3, %v11355_v36  ;;  %v3352_v48 = vld [vmem:[#allocation2 + $0x48] sm:$0xff] (!%p3104_p7)  ;;  %v3353_v52 = vld [vmem:[#allocation2 + $0x50] sm:$0xff] (!%p3104_p7)  ;;  %v3346_v57 = vld [vmem:[#allocation2 + $0x18] sm:$0xff] (!%p3104_p7) }
 0x8ea   : > { %vm7114_vm4 = vmpackc.low (!%p3104_p7), %vm3122_vm1, %vm3120_vm0  ;;  %vm3124_vm5 = vcmp.eq.s32.totalorder (!%p3104_p7), %v10090_v4, %v11353_v35  ;;  %vm3126_vm6 = vcmp.eq.s32.totalorder (!%p3104_p7), %v10093_v5, %v11353_v35  ;;  %vm3123_vm9 = vcmp.eq.s32.totalorder (!%p3104_p7), %v10090_v4, %v11355_v36  ;;  %vm3125_vm10 = vcmp.eq.s32.totalorder (!%p3104_p7), %v10093_v5, %v11355_v36  ;;  %v3354_v58 = vld [vmem:[#allocation2 + $0x58] sm:$0xff] (!%p3104_p7) }
 0x8eb   : > { %7115 = vmatprep.subr.msk.bf16.mxu0 (!%p3104_p7), %vm7114_vm4, %v9285_v38  ;;  %8164 = vmatprep.subr.msk.bf16.mxu1 (!%p3104_p7), %vm7114_vm4, %v9285_v38  ;;  %vm7116_vm7 = vmpackc.low (!%p3104_p7), %vm3121_vm3, %vm3119_vm2  ;;  %vm3128_vm11 = vcmp.eq.s32.totalorder (!%p3104_p7), %v10096_v6, %v11353_v35  ;;  %vm3130_vm12 = vcmp.eq.s32.totalorder (!%p3104_p7), %v10102_v7, %v11353_v35  ;;  %vm3127_vm15 = vcmp.eq.s32.totalorder (!%p3104_p7), %v10096_v6, %v11355_v36 }
 0x8ec   : > { %7117 = vmatpush1.bf16.xpose.msk.msra.mxu0 %vm7116_vm7, %v9285_v38  ;;  %8180 = vmatpush1.bf16.xpose.msk.msra.mxu1 %vm7116_vm7, %v9285_v38  ;;  %vm7118_vm8 = vmpackc.low %vm3126_vm6, %vm3124_vm5  ;;  %vm3129_vm0 = vcmp.eq.s32.totalorder %v10102_v7, %v11355_v36  ;;  %vm3132_vm1 = vcmp.eq.s32.totalorder %v10105_v8, %v11353_v35  ;;  %vm3134_vm2 = vcmp.eq.s32.totalorder %v10108_v9, %v11353_v35 }
 0x8ed   : > { %7119 = vmatprep.subr.msk.bf16.mxu0 %vm7118_vm8, %v9285_v38  ;;  %8165 = vmatprep.subr.msk.bf16.mxu1 %vm7118_vm8, %v9285_v38  ;;  %vm7120_vm13 = vmpackc.low %vm3125_vm10, %vm3123_vm9  ;;  %vm3131_vm5 = vcmp.eq.s32.totalorder %v10105_v8, %v11355_v36  ;;  %vm3133_vm6 = vcmp.eq.s32.totalorder %v10108_v9, %v11355_v36  ;;  %vm3136_vm7 = vcmp.eq.s32.totalorder %v10111_v10, %v11353_v35 }
 0x8ee   : > { %vm7122_vm14 = vmpackc.low %vm3130_vm12, %vm3128_vm11  ;;  %vm3138_vm8 = vcmp.eq.s32.totalorder %v10114_v11, %v11353_v35  ;;  %vm3135_vm11 = vcmp.eq.s32.totalorder %v10111_v10, %v11355_v36  ;;  %vm3137_vm12 = vcmp.eq.s32.totalorder %v10114_v11, %v11355_v36 }
 0x8ef   : > { %vm7124_vm3 = vmpackc.low %vm3129_vm0, %vm3127_vm15 }
 0x8f0   : > { %vm7126_vm4 = vmpackc.low %vm3134_vm2, %vm3132_vm1  ;;  %vm3139_vm1 = vcmp.eq.s32.totalorder %v10117_v12, %v11355_v36  ;;  %vm3141_vm2 = vcmp.eq.s32.totalorder %v10120_v13, %v11355_v36 }
 0x8f1   : > { %vm7128_vm9 = vmpackc.low %vm3133_vm6, %vm3131_vm5 }
 0x8f2   : > { %vm7130_vm10 = vmpackc.low %vm3138_vm8, %vm3136_vm7  ;;  %vm3143_vm7 = vcmp.eq.s32.totalorder %v10123_v14, %v11355_v36  ;;  %vm3145_vm8 = vcmp.eq.s32.totalorder %v10128_v15, %v11355_v36 }
 0x8f3   : > { %vm7132_vm15 = vmpackc.low %vm3137_vm12, %vm3135_vm11 }
 0x8f4   : > { %7121 = vmatpush1.bf16.xpose.msk.msra.mxu0 %vm7120_vm13, %v9285_v38  ;;  %8181 = vmatpush1.bf16.xpose.msk.msra.mxu1 %vm7120_vm13, %v9285_v38  ;;  %vm3140_vm13 = vcmp.eq.s32.totalorder %v10117_v12, %v11353_v35  ;;  %vm7136_vm5 = vmpackc.low %vm3141_vm2, %vm3139_vm1 }
 0x8f5   : > { %7123 = vmatprep.subr.msk.bf16.mxu0 %vm7122_vm14, %v9285_v38  ;;  %8166 = vmatprep.subr.msk.bf16.mxu1 %vm7122_vm14, %v9285_v38  ;;  %vm3142_vm14 = vcmp.eq.s32.totalorder %v10120_v13, %v11353_v35  ;;  %vm7140_vm11 = vmpackc.low %vm3145_vm8, %vm3143_vm7 }
 0x8f6   : > { %vm7134_vm0 = vmpackc.low %vm3142_vm14, %vm3140_vm13  ;;  %vm3147_vm13 = vcmp.eq.s32.totalorder %v10131_v16, %v11355_v36  ;;  %vm3149_vm14 = vcmp.eq.s32.totalorder %v10134_v17, %v11355_v36 }
 0x8f7   : > { %vm7144_vm1 = vmpackc.low %vm3149_vm14, %vm3147_vm13 }
 0x8fc   : > { %7125 = vmatpush1.bf16.xpose.msk.msra.mxu0 %vm7124_vm3, %v9285_v38  ;;  %8182 = vmatpush1.bf16.xpose.msk.msra.mxu1 %vm7124_vm3, %v9285_v38  ;;  %vm3144_vm3 = vcmp.eq.s32.totalorder %v10123_v14, %v11353_v35 }
 0x8fd   : > { %7127 = vmatprep.subr.msk.bf16.mxu0 %vm7126_vm4, %v9285_v38  ;;  %8167 = vmatprep.subr.msk.bf16.mxu1 %vm7126_vm4, %v9285_v38  ;;  %vm3146_vm4 = vcmp.eq.s32.totalorder %v10128_v15, %v11353_v35 }
 0x8fe   : > { %vm7138_vm6 = vmpackc.low %vm3146_vm4, %vm3144_vm3  ;;  %vm3151_vm3 = vcmp.eq.s32.totalorder %v10137_v18, %v11355_v36  ;;  %vm3153_vm4 = vcmp.eq.s32.totalorder %v10142_v19, %v11355_v36 }
 0x8ff   : > { %vm7148_vm7 = vmpackc.low %vm3153_vm4, %vm3151_vm3 }
 0x904   : > { %7129 = vmatpush1.bf16.xpose.msk.msra.mxu0 %vm7128_vm9, %v9285_v38  ;;  %8183 = vmatpush1.bf16.xpose.msk.msra.mxu1 %vm7128_vm9, %v9285_v38  ;;  %vm3148_vm9 = vcmp.eq.s32.totalorder %v10131_v16, %v11353_v35 }
 0x905   : > { %7131 = vmatprep.subr.msk.bf16.mxu0 %vm7130_vm10, %v9285_v38  ;;  %8168 = vmatprep.subr.msk.bf16.mxu1 %vm7130_vm10, %v9285_v38  ;;  %vm3150_vm10 = vcmp.eq.s32.totalorder %v10134_v17, %v11353_v35 }
 0x906   : > { %vm7142_vm12 = vmpackc.low %vm3150_vm10, %vm3148_vm9  ;;  %vm3155_vm9 = vcmp.eq.s32.totalorder %v10145_v20, %v11355_v36  ;;  %vm3157_vm10 = vcmp.eq.s32.totalorder %v10148_v21, %v11355_v36 }
 0x907   : > { %vm7152_vm13 = vmpackc.low %vm3157_vm10, %vm3155_vm9 }
 0x90c   : > { %7133 = vmatpush1.bf16.xpose.msk.msra.mxu0 %vm7132_vm15, %v9285_v38  ;;  %8184 = vmatpush1.bf16.xpose.msk.msra.mxu1 %vm7132_vm15, %v9285_v38  ;;  %vm3152_vm15 = vcmp.eq.s32.totalorder %v10137_v18, %v11353_v35 }
 0x90d   : > { %7135 = vmatprep.subr.msk.bf16.mxu0 %vm7134_vm0, %v9285_v38  ;;  %8169 = vmatprep.subr.msk.bf16.mxu1 %vm7134_vm0, %v9285_v38  ;;  %vm3154_vm0 = vcmp.eq.s32.totalorder %v10142_v19, %v11353_v35 }
 0x90e   : > { %vm7146_vm2 = vmpackc.low %vm3154_vm0, %vm3152_vm15  ;;  %vm3159_vm15 = vcmp.eq.s32.totalorder %v10151_v22, %v11355_v36  ;;  %vm3161_vm0 = vcmp.eq.s32.totalorder %v10155_v23, %v11355_v36 }
 0x90f   : > { %vm7156_vm3 = vmpackc.low %vm3161_vm0, %vm3159_vm15 }
 0x914   : > { %7137 = vmatpush1.bf16.xpose.msk.msra.mxu0 %vm7136_vm5, %v9285_v38  ;;  %8185 = vmatpush1.bf16.xpose.msk.msra.mxu1 %vm7136_vm5, %v9285_v38  ;;  %vm3156_vm5 = vcmp.eq.s32.totalorder %v10145_v20, %v11353_v35 }
 0x915   : > { %7139 = vmatprep.subr.msk.bf16.mxu0 %vm7138_vm6, %v9285_v38  ;;  %8170 = vmatprep.subr.msk.bf16.mxu1 %vm7138_vm6, %v9285_v38  ;;  %vm3158_vm6 = vcmp.eq.s32.totalorder %v10148_v21, %v11353_v35 }
 0x916   : > { %vm7150_vm8 = vmpackc.low %vm3158_vm6, %vm3156_vm5  ;;  %vm3163_vm5 = vcmp.eq.s32.totalorder %v10158_v24, %v11355_v36  ;;  %vm3165_vm6 = vcmp.eq.s32.totalorder %v10161_v25, %v11355_v36 }
 0x917   : > { %vm7160_vm9 = vmpackc.low %vm3165_vm6, %vm3163_vm5 }
 0x91c   : > { %7141 = vmatpush1.bf16.xpose.msk.msra.mxu0 %vm7140_vm11, %v9285_v38  ;;  %8186 = vmatpush1.bf16.xpose.msk.msra.mxu1 %vm7140_vm11, %v9285_v38  ;;  %vm3160_vm11 = vcmp.eq.s32.totalorder %v10151_v22, %v11353_v35 }
 0x91d   : > { %7143 = vmatprep.subr.msk.bf16.mxu0 %vm7142_vm12, %v9285_v38  ;;  %8171 = vmatprep.subr.msk.bf16.mxu1 %vm7142_vm12, %v9285_v38  ;;  %vm3162_vm12 = vcmp.eq.s32.totalorder %v10155_v23, %v11353_v35 }
 0x91e   : > { %vm7154_vm14 = vmpackc.low %vm3162_vm12, %vm3160_vm11  ;;  %vm3167_vm11 = vcmp.eq.s32.totalorder %v10164_v26, %v11355_v36  ;;  %vm3169_vm12 = vcmp.eq.s32.totalorder %v10167_v27, %v11355_v36 }
 0x91f   : > { %vm7164_vm15 = vmpackc.low %vm3169_vm12, %vm3167_vm11 }
 0x924   : > { %7145 = vmatpush1.bf16.xpose.msk.msra.mxu0 %vm7144_vm1, %v9285_v38  ;;  %8187 = vmatpush1.bf16.xpose.msk.msra.mxu1 %vm7144_vm1, %v9285_v38  ;;  %vm3164_vm1 = vcmp.eq.s32.totalorder %v10158_v24, %v11353_v35 }
 0x925   : > { %7147 = vmatprep.subr.msk.bf16.mxu0 %vm7146_vm2, %v9285_v38  ;;  %8172 = vmatprep.subr.msk.bf16.mxu1 %vm7146_vm2, %v9285_v38  ;;  %vm3166_vm2 = vcmp.eq.s32.totalorder %v10161_v25, %v11353_v35 }
 0x926   : > { %vm7158_vm4 = vmpackc.low %vm3166_vm2, %vm3164_vm1  ;;  %vm3171_vm1 = vcmp.eq.s32.totalorder %v10170_v28, %v11355_v36  ;;  %vm3173_vm2 = vcmp.eq.s32.totalorder %v10173_v29, %v11355_v36 }
 0x927   : > { %vm7168_vm5 = vmpackc.low %vm3173_vm2, %vm3171_vm1 }
 0x92c   : > { %7149 = vmatpush1.bf16.xpose.msk.msra.mxu0 %vm7148_vm7, %v9285_v38  ;;  %8188 = vmatpush1.bf16.xpose.msk.msra.mxu1 %vm7148_vm7, %v9285_v38  ;;  %vm3168_vm7 = vcmp.eq.s32.totalorder %v10164_v26, %v11353_v35 }
 0x92d   : > { %7151 = vmatprep.subr.msk.bf16.mxu0 %vm7150_vm8, %v9285_v38  ;;  %8173 = vmatprep.subr.msk.bf16.mxu1 %vm7150_vm8, %v9285_v38  ;;  %vm3170_vm8 = vcmp.eq.s32.totalorder %v10167_v27, %v11353_v35 }
 0x92e   : > { %vm7162_vm10 = vmpackc.low %vm3170_vm8, %vm3168_vm7  ;;  %vm3175_vm7 = vcmp.eq.s32.totalorder %v10176_v30, %v11355_v36  ;;  %vm3177_vm8 = vcmp.eq.s32.totalorder %v10181_v31, %v11355_v36 }
 0x92f   : > { %vm7172_vm11 = vmpackc.low %vm3177_vm8, %vm3175_vm7 }
 0x934   : > { %7153 = vmatpush1.bf16.xpose.msk.msra.mxu0 %vm7152_vm13, %v9285_v38  ;;  %8189 = vmatpush1.bf16.xpose.msk.msra.mxu1 %vm7152_vm13, %v9285_v38  ;;  %vm3172_vm13 = vcmp.eq.s32.totalorder %v10170_v28, %v11353_v35 }
 0x935   : > { %7155 = vmatprep.subr.msk.bf16.mxu0 %vm7154_vm14, %v9285_v38  ;;  %8174 = vmatprep.subr.msk.bf16.mxu1 %vm7154_vm14, %v9285_v38  ;;  %vm3174_vm14 = vcmp.eq.s32.totalorder %v10173_v29, %v11353_v35 }
 0x936   : > { %vm7166_vm0 = vmpackc.low %vm3174_vm14, %vm3172_vm13  ;;  %vm3179_vm13 = vcmp.eq.s32.totalorder %v10184_v32, %v11355_v36  ;;  %vm3181_vm14 = vcmp.eq.s32.totalorder %v10187_v33, %v11355_v36 }
 0x93c   : > { %7157 = vmatpush1.bf16.xpose.msk.msra.mxu0 %vm7156_vm3, %v9285_v38  ;;  %8190 = vmatpush1.bf16.xpose.msk.msra.mxu1 %vm7156_vm3, %v9285_v38  ;;  %vm3176_vm3 = vcmp.eq.s32.totalorder %v10176_v30, %v11353_v35 }
 0x93d   : > { %7159 = vmatprep.subr.msk.bf16.mxu0 %vm7158_vm4, %v9285_v38  ;;  %8175 = vmatprep.subr.msk.bf16.mxu1 %vm7158_vm4, %v9285_v38  ;;  %vm3178_vm4 = vcmp.eq.s32.totalorder %v10181_v31, %v11353_v35 }
 0x93e   : > { %vm7170_vm6 = vmpackc.low %vm3178_vm4, %vm3176_vm3 }
 0x944   : > { %7161 = vmatpush1.bf16.xpose.msk.msra.mxu0 %vm7160_vm9, %v9285_v38  ;;  %8191 = vmatpush1.bf16.xpose.msk.msra.mxu1 %vm7160_vm9, %v9285_v38  ;;  %vm3180_vm9 = vcmp.eq.s32.totalorder %v10184_v32, %v11353_v35 }
 0x945   : > { %7163 = vmatprep.subr.msk.bf16.mxu0 %vm7162_vm10, %v9285_v38  ;;  %8176 = vmatprep.subr.msk.bf16.mxu1 %vm7162_vm10, %v9285_v38  ;;  %vm3182_vm10 = vcmp.eq.s32.totalorder %v10187_v33, %v11353_v35 }
 0x946   : > { %vm7174_vm12 = vmpackc.low %vm3182_vm10, %vm3180_vm9 }
 0x94c   : > { %7165 = vmatpush1.bf16.xpose.msk.msra.mxu0 %vm7164_vm15, %v9285_v38  ;;  %8192 = vmatpush1.bf16.xpose.msk.msra.mxu1 %vm7164_vm15, %v9285_v38  ;;  %vm7176_vm15 = vmpackc.low %vm3181_vm14, %vm3179_vm13 }
 0x94d   : > { %7167 = vmatprep.subr.msk.bf16.mxu0 %vm7166_vm0, %v9285_v38  ;;  %8177 = vmatprep.subr.msk.bf16.mxu1 %vm7166_vm0, %v9285_v38 }
 0x954   : > { %7169 = vmatpush1.bf16.xpose.msk.msra.mxu0 %vm7168_vm5, %v9285_v38  ;;  %8193 = vmatpush1.bf16.xpose.msk.msra.mxu1 %vm7168_vm5, %v9285_v38 }
 0x955   : > { %7171 = vmatprep.subr.msk.bf16.mxu0 %vm7170_vm6, %v9285_v38  ;;  %8178 = vmatprep.subr.msk.bf16.mxu1 %vm7170_vm6, %v9285_v38 }
 0x95c   : > { %7173 = vmatpush1.bf16.xpose.msk.msra.mxu0 %vm7172_vm11, %v9285_v38  ;;  %8194 = vmatpush1.bf16.xpose.msk.msra.mxu1 %vm7172_vm11, %v9285_v38 }
 0x95d   : > { %7175 = vmatprep.subr.msk.bf16.mxu0 %vm7174_vm12, %v9285_v38  ;;  %8179 = vmatprep.subr.msk.bf16.mxu1 %vm7174_vm12, %v9285_v38 }
 0x964   : > { %7177 = vmatpush1.bf16.xpose.msk.msra.mxu0 %vm7176_vm15, %v9285_v38  ;;  %8195 = vmatpush1.bf16.xpose.msk.msra.mxu1 %vm7176_vm15, %v9285_v38  ;;  %v3347_v38 = vld [vmem:[#allocation2 + $0x20] sm:$0xff] }
 0x96b   : > { %3440 = vmatmul.mubr.bf16.vlgmr.msra.gmra.mrb[0].mxu0 %v8725_v39  ;;  %3460 = vmatmul.mubr.bf16.vlgmr.msra.gmra.mrb[0].mxu1 %v8728_v40  ;;  %v3355_v39 = vld [vmem:[#allocation2 + $0x60] sm:$0xff]  ;;  %v3348_v40 = vld [vmem:[#allocation2 + $0x28] sm:$0xff] }
 0x96c   : > { %3449 = vmatprep.mubr.bf16.mxu0 %v8731_v41  ;;  %3469 = vmatprep.mubr.bf16.mxu1 %v8733_v42  ;;  %v3356_v41 = vld [vmem:[#allocation2 + $0x68] sm:$0xff] }
 0x973   : > { %3450 = vmatmul.mubr.bf16.gmra.mrb[4].mxu0 %v8735_v43  ;;  %3470 = vmatmul.mubr.bf16.gmra.mrb[4].mxu1 %v8736_v44  ;;  %v3349_v44 = vld [vmem:[#allocation2 + $0x30] sm:$0xff] }
 0xa3e   : > { %v3441_v49 = vpop.f32.mrb[0].mxu0  ;;  %v3461_v50 = vpop.f32.mrb[0].mxu1 }
 0xa3f   : > { %v3480_v53 = vadd.f32 %v3441_v49, %v3343_v45  ;;  %v3488_v54 = vadd.f32 %v3461_v50, %v3351_v46  ;;  %v3443_v55 = vpop.f32.mrb[1].mxu0  ;;  %v3463_v56 = vpop.f32.mrb[1].mxu1  ;;  %v3357_v45 = vld [vmem:[#allocation2 + $0x70] sm:$0xff]  ;;  %v3350_v50 = vld [vmem:[#allocation2 + $0x38] sm:$0xff] }
 0xa40   : > { %v3481_v59 = vadd.f32 %v3443_v55, %v3344_v47  ;;  %v3489_v60 = vadd.f32 %v3463_v56, %v3352_v48  ;;  %v3445_v61 = vpop.f32.mrb[2].mxu0  ;;  %v3465_v62 = vpop.f32.mrb[2].mxu1 }
 0xa41   : > { %3496 = vst [vmem:[#allocation2] sm:$0xff] %v3480_v53  ;;  %3504 = vst [vmem:[#allocation2 + $0x40] sm:$0xff] %v3488_v54  ;;  %v3482_v63 = vadd.f32 %v3445_v61, %v3345_v51  ;;  %v3490_v0 = vadd.f32 %v3465_v62, %v3353_v52  ;;  %v3447_v34 = vpop.f32.mrb[3].mxu0  ;;  %v3467_v35 = vpop.f32.mrb[3].mxu1  ;;  %v3358_v51 = vld [vmem:[#allocation2 + $0x78] sm:$0xff] }
 0xa42   : > { %3497 = vst [vmem:[#allocation2 + $0x8] sm:$0xff] %v3481_v59  ;;  %3505 = vst [vmem:[#allocation2 + $0x48] sm:$0xff] %v3489_v60  ;;  %v3483_v36 = vadd.f32 %v3447_v34, %v3346_v57  ;;  %v3491_v37 = vadd.f32 %v3467_v35, %v3354_v58 }
 0xa43   : > { %3498 = vst [vmem:[#allocation2 + $0x10] sm:$0xff] %v3482_v63  ;;  %3506 = vst [vmem:[#allocation2 + $0x50] sm:$0xff] %v3490_v0 }
 0xa44   : > { %3499 = vst [vmem:[#allocation2 + $0x18] sm:$0xff] %v3483_v36  ;;  %3507 = vst [vmem:[#allocation2 + $0x58] sm:$0xff] %v3491_v37 }
 0xa46   : > { %v3451_v42 = vpop.f32.mrb[4].mxu0  ;;  %v3471_v43 = vpop.f32.mrb[4].mxu1 }
 0xa47   : > { %v3484_v46 = vadd.f32 %v3451_v42, %v3347_v38  ;;  %v3492_v47 = vadd.f32 %v3471_v43, %v3355_v39  ;;  %v3453_v48 = vpop.f32.mrb[5].mxu0  ;;  %v3473_v49 = vpop.f32.mrb[5].mxu1 }
 0xa48   : > { %v3485_v52 = vadd.f32 %v3453_v48, %v3348_v40  ;;  %v3493_v53 = vadd.f32 %v3473_v49, %v3356_v41  ;;  %v3455_v54 = vpop.f32.mrb[6].mxu0  ;;  %v3475_v55 = vpop.f32.mrb[6].mxu1 }
 0xa49   : > { %3500 = vst [vmem:[#allocation2 + $0x20] sm:$0xff] %v3484_v46  ;;  %3508 = vst [vmem:[#allocation2 + $0x60] sm:$0xff] %v3492_v47  ;;  %v3486_v56 = vadd.f32 %v3455_v54, %v3349_v44  ;;  %v3494_v57 = vadd.f32 %v3475_v55, %v3357_v45  ;;  %v3457_v58 = vpop.f32.mrb[7].mxu0  ;;  %v3477_v59 = vpop.f32.mrb[7].mxu1 }
 0xa4a   : > { %3501 = vst [vmem:[#allocation2 + $0x28] sm:$0xff] %v3485_v52  ;;  %3509 = vst [vmem:[#allocation2 + $0x68] sm:$0xff] %v3493_v53  ;;  %v3487_v60 = vadd.f32 %v3457_v58, %v3350_v50  ;;  %v3495_v61 = vadd.f32 %v3477_v59, %v3358_v51 }
 0xa4b   : > { %3502 = vst [vmem:[#allocation2 + $0x30] sm:$0xff] %v3486_v56  ;;  %3510 = vst [vmem:[#allocation2 + $0x70] sm:$0xff] %v3494_v57 }
 0xa4c   : > { %3503 = vst [vmem:[#allocation2 + $0x38] sm:$0xff] %v3487_v60  ;;  %3511 = vst [vmem:[#allocation2 + $0x78] sm:$0xff] %v3495_v61 }
 0xa4d PF: > { %p3512_p4 = scmp.lt.s32.totalorder %s10639_s3, %s11093_s18  ;;  %p3515_p8 = scmp.gt.s32.totalorder %s10644_s0, %s11082_s12 }
 0xa4f   : > { %p3513_p1 = pnand %p3512_p4, %p2687_p0 }
 0xa51   : > { %p3514_p12 = pneg %p3513_p1 }
 0xa53   : > { %p3516_p6 = pnand %p3515_p8, %p3514_p12 }
 0xa54   : > { %v3520_v62 = vld [vmem:[%s10013_s19] sm:$0x3] (!%p3516_p6)  ;;  %v3521_v63 = vstv (!%p3516_p6), %s11096_s6  ;;  %v3529_v0 = vsub.s32 (!%p3516_p6), 1, %v10074_v2  ;;  %v3525_v34 = vsub.s32 (!%p3516_p6), 0, %v10074_v2  ;;  %v8739_v36 = vld [vmem:[%s10034_s28 + $0x4] ss:$8 sps:$4 sm:$0xff] (!%p3516_p6)  }
 0xa55   : > { %3519 = sbr.rel (%p3516_p6) target bundleno = 3005 (0xbbd), region = 104  ;;  %v3522_v35 = vsub.s32 (!%p3516_p6), %v3520_v62, %v3521_v63  ;;  %v8742_v39 = vld [vmem:[%s10034_s28 + $0x24] ss:$8 sps:$4 sm:$0xff] (!%p3516_p6)   ;;  %3851 = vmatprep.mubr.bf16.mxu0 (!%p3516_p6), %v8739_v36  ;;  %v9286_v40 = vmov (!%p3516_p6), 1.0|1.0   ;;  %v3755_v47 = vld [vmem:[#allocation2] sm:$0xff] (!%p3516_p6) }
 0xa56   : > { %3871 = vmatprep.mubr.bf16.mxu1 (!%p3516_p6), %v8742_v39  ;;  %v8737_v41 = vld [vmem:[%s10034_s28] ss:$8 sps:$4 sm:$0xff] (!%p3516_p6)   ;;  %v8743_v43 = vld [vmem:[%s10034_s28 + $0x14] ss:$8 sps:$4 sm:$0xff] (!%p3516_p6)   ;;  %v8747_v45 = vld [vmem:[%s10034_s28 + $0x10] ss:$8 sps:$4 sm:$0xff] (!%p3516_p6)  }
 0xa57   : > { %v11568_v37 = vrot.slane (!%p3516_p6), %v3522_v35, %v3529_v0  ;;  %v11570_v38 = vrot.slane (!%p3516_p6), %v3522_v35, %v3525_v34  ;;  %v8740_v42 = vld [vmem:[%s10034_s28 + $0x20] ss:$8 sps:$4 sm:$0xff] (!%p3516_p6)   ;;  %v8745_v44 = vld [vmem:[%s10034_s28 + $0x34] ss:$8 sps:$4 sm:$0xff] (!%p3516_p6)   ;;  %v8748_v46 = vld [vmem:[%s10034_s28 + $0x30] ss:$8 sps:$4 sm:$0xff] (!%p3516_p6)  }
 0xa58   : > { %v3763_v48 = vld [vmem:[#allocation2 + $0x40] sm:$0xff] (!%p3516_p6)  ;;  %v3756_v49 = vld [vmem:[#allocation2 + $0x8] sm:$0xff] (!%p3516_p6)  ;;  %v3757_v53 = vld [vmem:[#allocation2 + $0x10] sm:$0xff] (!%p3516_p6) }
 0xa59   : > { %vm3532_vm0 = vcmp.eq.s32.totalorder (!%p3516_p6), %v10074_v2, %v11568_v37  ;;  %vm3534_vm1 = vcmp.eq.s32.totalorder (!%p3516_p6), %v10087_v3, %v11568_v37  ;;  %vm3531_vm2 = vcmp.eq.s32.totalorder (!%p3516_p6), %v10074_v2, %v11570_v38  ;;  %vm3533_vm3 = vcmp.eq.s32.totalorder (!%p3516_p6), %v10087_v3, %v11570_v38  ;;  %v3764_v50 = vld [vmem:[#allocation2 + $0x48] sm:$0xff] (!%p3516_p6)  ;;  %v3765_v54 = vld [vmem:[#allocation2 + $0x50] sm:$0xff] (!%p3516_p6)  ;;  %v3758_v59 = vld [vmem:[#allocation2 + $0x18] sm:$0xff] (!%p3516_p6) }
 0xa5a   : > { %vm7250_vm4 = vmpackc.low (!%p3516_p6), %vm3534_vm1, %vm3532_vm0  ;;  %vm3536_vm5 = vcmp.eq.s32.totalorder (!%p3516_p6), %v10090_v4, %v11568_v37  ;;  %vm3538_vm6 = vcmp.eq.s32.totalorder (!%p3516_p6), %v10093_v5, %v11568_v37  ;;  %vm3535_vm9 = vcmp.eq.s32.totalorder (!%p3516_p6), %v10090_v4, %v11570_v38  ;;  %vm3537_vm10 = vcmp.eq.s32.totalorder (!%p3516_p6), %v10093_v5, %v11570_v38  ;;  %v3766_v60 = vld [vmem:[#allocation2 + $0x58] sm:$0xff] (!%p3516_p6) }
 0xa5b   : > { %7251 = vmatprep.subr.msk.bf16.mxu0 (!%p3516_p6), %vm7250_vm4, %v9286_v40  ;;  %8196 = vmatprep.subr.msk.bf16.mxu1 (!%p3516_p6), %vm7250_vm4, %v9286_v40  ;;  %vm7252_vm7 = vmpackc.low (!%p3516_p6), %vm3533_vm3, %vm3531_vm2  ;;  %vm3540_vm11 = vcmp.eq.s32.totalorder (!%p3516_p6), %v10096_v6, %v11568_v37  ;;  %vm3542_vm12 = vcmp.eq.s32.totalorder (!%p3516_p6), %v10102_v7, %v11568_v37  ;;  %vm3539_vm15 = vcmp.eq.s32.totalorder (!%p3516_p6), %v10096_v6, %v11570_v38 }
 0xa5c   : > { %7253 = vmatpush1.bf16.xpose.msk.msra.mxu0 %vm7252_vm7, %v9286_v40  ;;  %8212 = vmatpush1.bf16.xpose.msk.msra.mxu1 %vm7252_vm7, %v9286_v40  ;;  %vm7254_vm8 = vmpackc.low %vm3538_vm6, %vm3536_vm5  ;;  %vm3541_vm0 = vcmp.eq.s32.totalorder %v10102_v7, %v11570_v38  ;;  %vm3544_vm1 = vcmp.eq.s32.totalorder %v10105_v8, %v11568_v37  ;;  %vm3546_vm2 = vcmp.eq.s32.totalorder %v10108_v9, %v11568_v37 }
 0xa5d   : > { %7255 = vmatprep.subr.msk.bf16.mxu0 %vm7254_vm8, %v9286_v40  ;;  %8197 = vmatprep.subr.msk.bf16.mxu1 %vm7254_vm8, %v9286_v40  ;;  %vm7256_vm13 = vmpackc.low %vm3537_vm10, %vm3535_vm9  ;;  %vm3543_vm5 = vcmp.eq.s32.totalorder %v10105_v8, %v11570_v38  ;;  %vm3545_vm6 = vcmp.eq.s32.totalorder %v10108_v9, %v11570_v38  ;;  %vm3548_vm7 = vcmp.eq.s32.totalorder %v10111_v10, %v11568_v37 }
 0xa5e   : > { %vm7258_vm14 = vmpackc.low %vm3542_vm12, %vm3540_vm11  ;;  %vm3550_vm8 = vcmp.eq.s32.totalorder %v10114_v11, %v11568_v37  ;;  %vm3547_vm11 = vcmp.eq.s32.totalorder %v10111_v10, %v11570_v38  ;;  %vm3549_vm12 = vcmp.eq.s32.totalorder %v10114_v11, %v11570_v38 }
 0xa5f   : > { %vm7260_vm3 = vmpackc.low %vm3541_vm0, %vm3539_vm15 }
 0xa60   : > { %vm7262_vm4 = vmpackc.low %vm3546_vm2, %vm3544_vm1  ;;  %vm3551_vm1 = vcmp.eq.s32.totalorder %v10117_v12, %v11570_v38  ;;  %vm3553_vm2 = vcmp.eq.s32.totalorder %v10120_v13, %v11570_v38 }
 0xa61   : > { %vm7264_vm9 = vmpackc.low %vm3545_vm6, %vm3543_vm5 }
 0xa62   : > { %vm7266_vm10 = vmpackc.low %vm3550_vm8, %vm3548_vm7  ;;  %vm3555_vm7 = vcmp.eq.s32.totalorder %v10123_v14, %v11570_v38  ;;  %vm3557_vm8 = vcmp.eq.s32.totalorder %v10128_v15, %v11570_v38 }
 0xa63   : > { %vm7268_vm15 = vmpackc.low %vm3549_vm12, %vm3547_vm11 }
 0xa64   : > { %7257 = vmatpush1.bf16.xpose.msk.msra.mxu0 %vm7256_vm13, %v9286_v40  ;;  %8213 = vmatpush1.bf16.xpose.msk.msra.mxu1 %vm7256_vm13, %v9286_v40  ;;  %vm3552_vm13 = vcmp.eq.s32.totalorder %v10117_v12, %v11568_v37  ;;  %vm7272_vm5 = vmpackc.low %vm3553_vm2, %vm3551_vm1 }
 0xa65   : > { %7259 = vmatprep.subr.msk.bf16.mxu0 %vm7258_vm14, %v9286_v40  ;;  %8198 = vmatprep.subr.msk.bf16.mxu1 %vm7258_vm14, %v9286_v40  ;;  %vm3554_vm14 = vcmp.eq.s32.totalorder %v10120_v13, %v11568_v37  ;;  %vm7276_vm11 = vmpackc.low %vm3557_vm8, %vm3555_vm7 }
 0xa66   : > { %vm7270_vm0 = vmpackc.low %vm3554_vm14, %vm3552_vm13  ;;  %vm3559_vm13 = vcmp.eq.s32.totalorder %v10131_v16, %v11570_v38  ;;  %vm3561_vm14 = vcmp.eq.s32.totalorder %v10134_v17, %v11570_v38 }
 0xa67   : > { %vm7280_vm1 = vmpackc.low %vm3561_vm14, %vm3559_vm13 }
 0xa6c   : > { %7261 = vmatpush1.bf16.xpose.msk.msra.mxu0 %vm7260_vm3, %v9286_v40  ;;  %8214 = vmatpush1.bf16.xpose.msk.msra.mxu1 %vm7260_vm3, %v9286_v40  ;;  %vm3556_vm3 = vcmp.eq.s32.totalorder %v10123_v14, %v11568_v37 }
 0xa6d   : > { %7263 = vmatprep.subr.msk.bf16.mxu0 %vm7262_vm4, %v9286_v40  ;;  %8199 = vmatprep.subr.msk.bf16.mxu1 %vm7262_vm4, %v9286_v40  ;;  %vm3558_vm4 = vcmp.eq.s32.totalorder %v10128_v15, %v11568_v37 }
 0xa6e   : > { %vm7274_vm6 = vmpackc.low %vm3558_vm4, %vm3556_vm3  ;;  %vm3563_vm3 = vcmp.eq.s32.totalorder %v10137_v18, %v11570_v38  ;;  %vm3565_vm4 = vcmp.eq.s32.totalorder %v10142_v19, %v11570_v38 }
 0xa6f   : > { %vm7284_vm7 = vmpackc.low %vm3565_vm4, %vm3563_vm3 }
 0xa74   : > { %7265 = vmatpush1.bf16.xpose.msk.msra.mxu0 %vm7264_vm9, %v9286_v40  ;;  %8215 = vmatpush1.bf16.xpose.msk.msra.mxu1 %vm7264_vm9, %v9286_v40  ;;  %vm3560_vm9 = vcmp.eq.s32.totalorder %v10131_v16, %v11568_v37 }
 0xa75   : > { %7267 = vmatprep.subr.msk.bf16.mxu0 %vm7266_vm10, %v9286_v40  ;;  %8200 = vmatprep.subr.msk.bf16.mxu1 %vm7266_vm10, %v9286_v40  ;;  %vm3562_vm10 = vcmp.eq.s32.totalorder %v10134_v17, %v11568_v37 }
 0xa76   : > { %vm7278_vm12 = vmpackc.low %vm3562_vm10, %vm3560_vm9  ;;  %vm3567_vm9 = vcmp.eq.s32.totalorder %v10145_v20, %v11570_v38  ;;  %vm3569_vm10 = vcmp.eq.s32.totalorder %v10148_v21, %v11570_v38 }
 0xa77   : > { %vm7288_vm13 = vmpackc.low %vm3569_vm10, %vm3567_vm9 }
 0xa7c   : > { %7269 = vmatpush1.bf16.xpose.msk.msra.mxu0 %vm7268_vm15, %v9286_v40  ;;  %8216 = vmatpush1.bf16.xpose.msk.msra.mxu1 %vm7268_vm15, %v9286_v40  ;;  %vm3564_vm15 = vcmp.eq.s32.totalorder %v10137_v18, %v11568_v37 }
 0xa7d   : > { %7271 = vmatprep.subr.msk.bf16.mxu0 %vm7270_vm0, %v9286_v40  ;;  %8201 = vmatprep.subr.msk.bf16.mxu1 %vm7270_vm0, %v9286_v40  ;;  %vm3566_vm0 = vcmp.eq.s32.totalorder %v10142_v19, %v11568_v37 }
 0xa7e   : > { %vm7282_vm2 = vmpackc.low %vm3566_vm0, %vm3564_vm15  ;;  %vm3571_vm15 = vcmp.eq.s32.totalorder %v10151_v22, %v11570_v38  ;;  %vm3573_vm0 = vcmp.eq.s32.totalorder %v10155_v23, %v11570_v38 }
 0xa7f   : > { %vm7292_vm3 = vmpackc.low %vm3573_vm0, %vm3571_vm15 }
 0xa84   : > { %7273 = vmatpush1.bf16.xpose.msk.msra.mxu0 %vm7272_vm5, %v9286_v40  ;;  %8217 = vmatpush1.bf16.xpose.msk.msra.mxu1 %vm7272_vm5, %v9286_v40  ;;  %vm3568_vm5 = vcmp.eq.s32.totalorder %v10145_v20, %v11568_v37 }
 0xa85   : > { %7275 = vmatprep.subr.msk.bf16.mxu0 %vm7274_vm6, %v9286_v40  ;;  %8202 = vmatprep.subr.msk.bf16.mxu1 %vm7274_vm6, %v9286_v40  ;;  %vm3570_vm6 = vcmp.eq.s32.totalorder %v10148_v21, %v11568_v37 }
 0xa86   : > { %vm7286_vm8 = vmpackc.low %vm3570_vm6, %vm3568_vm5  ;;  %vm3575_vm5 = vcmp.eq.s32.totalorder %v10158_v24, %v11570_v38  ;;  %vm3577_vm6 = vcmp.eq.s32.totalorder %v10161_v25, %v11570_v38 }
 0xa87   : > { %vm7296_vm9 = vmpackc.low %vm3577_vm6, %vm3575_vm5 }
 0xa8c   : > { %7277 = vmatpush1.bf16.xpose.msk.msra.mxu0 %vm7276_vm11, %v9286_v40  ;;  %8218 = vmatpush1.bf16.xpose.msk.msra.mxu1 %vm7276_vm11, %v9286_v40  ;;  %vm3572_vm11 = vcmp.eq.s32.totalorder %v10151_v22, %v11568_v37 }
 0xa8d   : > { %7279 = vmatprep.subr.msk.bf16.mxu0 %vm7278_vm12, %v9286_v40  ;;  %8203 = vmatprep.subr.msk.bf16.mxu1 %vm7278_vm12, %v9286_v40  ;;  %vm3574_vm12 = vcmp.eq.s32.totalorder %v10155_v23, %v11568_v37 }
 0xa8e   : > { %vm7290_vm14 = vmpackc.low %vm3574_vm12, %vm3572_vm11  ;;  %vm3579_vm11 = vcmp.eq.s32.totalorder %v10164_v26, %v11570_v38  ;;  %vm3581_vm12 = vcmp.eq.s32.totalorder %v10167_v27, %v11570_v38 }
 0xa8f   : > { %vm7300_vm15 = vmpackc.low %vm3581_vm12, %vm3579_vm11 }
 0xa94   : > { %7281 = vmatpush1.bf16.xpose.msk.msra.mxu0 %vm7280_vm1, %v9286_v40  ;;  %8219 = vmatpush1.bf16.xpose.msk.msra.mxu1 %vm7280_vm1, %v9286_v40  ;;  %vm3576_vm1 = vcmp.eq.s32.totalorder %v10158_v24, %v11568_v37 }
 0xa95   : > { %7283 = vmatprep.subr.msk.bf16.mxu0 %vm7282_vm2, %v9286_v40  ;;  %8204 = vmatprep.subr.msk.bf16.mxu1 %vm7282_vm2, %v9286_v40  ;;  %vm3578_vm2 = vcmp.eq.s32.totalorder %v10161_v25, %v11568_v37 }
 0xa96   : > { %vm7294_vm4 = vmpackc.low %vm3578_vm2, %vm3576_vm1  ;;  %vm3583_vm1 = vcmp.eq.s32.totalorder %v10170_v28, %v11570_v38  ;;  %vm3585_vm2 = vcmp.eq.s32.totalorder %v10173_v29, %v11570_v38 }
 0xa97   : > { %vm7304_vm5 = vmpackc.low %vm3585_vm2, %vm3583_vm1 }
 0xa9c   : > { %7285 = vmatpush1.bf16.xpose.msk.msra.mxu0 %vm7284_vm7, %v9286_v40  ;;  %8220 = vmatpush1.bf16.xpose.msk.msra.mxu1 %vm7284_vm7, %v9286_v40  ;;  %vm3580_vm7 = vcmp.eq.s32.totalorder %v10164_v26, %v11568_v37 }
 0xa9d   : > { %7287 = vmatprep.subr.msk.bf16.mxu0 %vm7286_vm8, %v9286_v40  ;;  %8205 = vmatprep.subr.msk.bf16.mxu1 %vm7286_vm8, %v9286_v40  ;;  %vm3582_vm8 = vcmp.eq.s32.totalorder %v10167_v27, %v11568_v37 }
 0xa9e   : > { %vm7298_vm10 = vmpackc.low %vm3582_vm8, %vm3580_vm7  ;;  %vm3587_vm7 = vcmp.eq.s32.totalorder %v10176_v30, %v11570_v38  ;;  %vm3589_vm8 = vcmp.eq.s32.totalorder %v10181_v31, %v11570_v38 }
 0xa9f   : > { %vm7308_vm11 = vmpackc.low %vm3589_vm8, %vm3587_vm7 }
 0xaa4   : > { %7289 = vmatpush1.bf16.xpose.msk.msra.mxu0 %vm7288_vm13, %v9286_v40  ;;  %8221 = vmatpush1.bf16.xpose.msk.msra.mxu1 %vm7288_vm13, %v9286_v40  ;;  %vm3584_vm13 = vcmp.eq.s32.totalorder %v10170_v28, %v11568_v37 }
 0xaa5   : > { %7291 = vmatprep.subr.msk.bf16.mxu0 %vm7290_vm14, %v9286_v40  ;;  %8206 = vmatprep.subr.msk.bf16.mxu1 %vm7290_vm14, %v9286_v40  ;;  %vm3586_vm14 = vcmp.eq.s32.totalorder %v10173_v29, %v11568_v37 }
 0xaa6   : > { %vm7302_vm0 = vmpackc.low %vm3586_vm14, %vm3584_vm13  ;;  %vm3591_vm13 = vcmp.eq.s32.totalorder %v10184_v32, %v11570_v38  ;;  %vm3593_vm14 = vcmp.eq.s32.totalorder %v10187_v33, %v11570_v38 }
 0xaac   : > { %7293 = vmatpush1.bf16.xpose.msk.msra.mxu0 %vm7292_vm3, %v9286_v40  ;;  %8222 = vmatpush1.bf16.xpose.msk.msra.mxu1 %vm7292_vm3, %v9286_v40  ;;  %vm3588_vm3 = vcmp.eq.s32.totalorder %v10176_v30, %v11568_v37 }
 0xaad   : > { %7295 = vmatprep.subr.msk.bf16.mxu0 %vm7294_vm4, %v9286_v40  ;;  %8207 = vmatprep.subr.msk.bf16.mxu1 %vm7294_vm4, %v9286_v40  ;;  %vm3590_vm4 = vcmp.eq.s32.totalorder %v10181_v31, %v11568_v37 }
 0xaae   : > { %vm7306_vm6 = vmpackc.low %vm3590_vm4, %vm3588_vm3 }
 0xab4   : > { %7297 = vmatpush1.bf16.xpose.msk.msra.mxu0 %vm7296_vm9, %v9286_v40  ;;  %8223 = vmatpush1.bf16.xpose.msk.msra.mxu1 %vm7296_vm9, %v9286_v40  ;;  %vm3592_vm9 = vcmp.eq.s32.totalorder %v10184_v32, %v11568_v37 }
 0xab5   : > { %7299 = vmatprep.subr.msk.bf16.mxu0 %vm7298_vm10, %v9286_v40  ;;  %8208 = vmatprep.subr.msk.bf16.mxu1 %vm7298_vm10, %v9286_v40  ;;  %vm3594_vm10 = vcmp.eq.s32.totalorder %v10187_v33, %v11568_v37 }
 0xab6   : > { %vm7310_vm12 = vmpackc.low %vm3594_vm10, %vm3592_vm9 }
 0xabc   : > { %7301 = vmatpush1.bf16.xpose.msk.msra.mxu0 %vm7300_vm15, %v9286_v40  ;;  %8224 = vmatpush1.bf16.xpose.msk.msra.mxu1 %vm7300_vm15, %v9286_v40  ;;  %vm7312_vm15 = vmpackc.low %vm3593_vm14, %vm3591_vm13 }
 0xabd   : > { %7303 = vmatprep.subr.msk.bf16.mxu0 %vm7302_vm0, %v9286_v40  ;;  %8209 = vmatprep.subr.msk.bf16.mxu1 %vm7302_vm0, %v9286_v40 }
 0xac4   : > { %7305 = vmatpush1.bf16.xpose.msk.msra.mxu0 %vm7304_vm5, %v9286_v40  ;;  %8225 = vmatpush1.bf16.xpose.msk.msra.mxu1 %vm7304_vm5, %v9286_v40 }
 0xac5   : > { %7307 = vmatprep.subr.msk.bf16.mxu0 %vm7306_vm6, %v9286_v40  ;;  %8210 = vmatprep.subr.msk.bf16.mxu1 %vm7306_vm6, %v9286_v40 }
 0xacc   : > { %7309 = vmatpush1.bf16.xpose.msk.msra.mxu0 %vm7308_vm11, %v9286_v40  ;;  %8226 = vmatpush1.bf16.xpose.msk.msra.mxu1 %vm7308_vm11, %v9286_v40 }
 0xacd   : > { %7311 = vmatprep.subr.msk.bf16.mxu0 %vm7310_vm12, %v9286_v40  ;;  %8211 = vmatprep.subr.msk.bf16.mxu1 %vm7310_vm12, %v9286_v40 }
 0xad4   : > { %7313 = vmatpush1.bf16.xpose.msk.msra.mxu0 %vm7312_vm15, %v9286_v40  ;;  %8227 = vmatpush1.bf16.xpose.msk.msra.mxu1 %vm7312_vm15, %v9286_v40  ;;  %v3759_v40 = vld [vmem:[#allocation2 + $0x20] sm:$0xff] }
 0xadb   : > { %3852 = vmatmul.mubr.bf16.vlgmr.msra.gmra.mrb[0].mxu0 %v8737_v41  ;;  %3872 = vmatmul.mubr.bf16.vlgmr.msra.gmra.mrb[0].mxu1 %v8740_v42  ;;  %v3767_v41 = vld [vmem:[#allocation2 + $0x60] sm:$0xff]  ;;  %v3760_v42 = vld [vmem:[#allocation2 + $0x28] sm:$0xff] }
 0xadc   : > { %3861 = vmatprep.mubr.bf16.mxu0 %v8743_v43  ;;  %3881 = vmatprep.mubr.bf16.mxu1 %v8745_v44  ;;  %v3768_v43 = vld [vmem:[#allocation2 + $0x68] sm:$0xff] }
 0xae3   : > { %3862 = vmatmul.mubr.bf16.gmra.mrb[4].mxu0 %v8747_v45  ;;  %3882 = vmatmul.mubr.bf16.gmra.mrb[4].mxu1 %v8748_v46  ;;  %v3761_v46 = vld [vmem:[#allocation2 + $0x30] sm:$0xff] }
 0xbae   : > { %v3853_v51 = vpop.f32.mrb[0].mxu0  ;;  %v3873_v52 = vpop.f32.mrb[0].mxu1 }
 0xbaf   : > { %v3892_v55 = vadd.f32 %v3853_v51, %v3755_v47  ;;  %v3900_v56 = vadd.f32 %v3873_v52, %v3763_v48  ;;  %v3855_v57 = vpop.f32.mrb[1].mxu0  ;;  %v3875_v58 = vpop.f32.mrb[1].mxu1  ;;  %v3769_v47 = vld [vmem:[#allocation2 + $0x70] sm:$0xff]  ;;  %v3762_v52 = vld [vmem:[#allocation2 + $0x38] sm:$0xff] }
 0xbb0   : > { %v3893_v61 = vadd.f32 %v3855_v57, %v3756_v49  ;;  %v3901_v62 = vadd.f32 %v3875_v58, %v3764_v50  ;;  %v3857_v63 = vpop.f32.mrb[2].mxu0  ;;  %v3877_v0 = vpop.f32.mrb[2].mxu1 }
 0xbb1   : > { %3908 = vst [vmem:[#allocation2] sm:$0xff] %v3892_v55  ;;  %3916 = vst [vmem:[#allocation2 + $0x40] sm:$0xff] %v3900_v56  ;;  %v3894_v34 = vadd.f32 %v3857_v63, %v3757_v53  ;;  %v3902_v35 = vadd.f32 %v3877_v0, %v3765_v54  ;;  %v3859_v36 = vpop.f32.mrb[3].mxu0  ;;  %v3879_v37 = vpop.f32.mrb[3].mxu1  ;;  %v3770_v53 = vld [vmem:[#allocation2 + $0x78] sm:$0xff] }
 0xbb2   : > { %3909 = vst [vmem:[#allocation2 + $0x8] sm:$0xff] %v3893_v61  ;;  %3917 = vst [vmem:[#allocation2 + $0x48] sm:$0xff] %v3901_v62  ;;  %v3895_v38 = vadd.f32 %v3859_v36, %v3758_v59  ;;  %v3903_v39 = vadd.f32 %v3879_v37, %v3766_v60 }
 0xbb3   : > { %3910 = vst [vmem:[#allocation2 + $0x10] sm:$0xff] %v3894_v34  ;;  %3918 = vst [vmem:[#allocation2 + $0x50] sm:$0xff] %v3902_v35 }
 0xbb4   : > { %3911 = vst [vmem:[#allocation2 + $0x18] sm:$0xff] %v3895_v38  ;;  %3919 = vst [vmem:[#allocation2 + $0x58] sm:$0xff] %v3903_v39 }
 0xbb6   : > { %v3863_v44 = vpop.f32.mrb[4].mxu0  ;;  %v3883_v45 = vpop.f32.mrb[4].mxu1 }
 0xbb7   : > { %v3896_v48 = vadd.f32 %v3863_v44, %v3759_v40  ;;  %v3904_v49 = vadd.f32 %v3883_v45, %v3767_v41  ;;  %v3865_v50 = vpop.f32.mrb[5].mxu0  ;;  %v3885_v51 = vpop.f32.mrb[5].mxu1 }
 0xbb8   : > { %v3897_v54 = vadd.f32 %v3865_v50, %v3760_v42  ;;  %v3905_v55 = vadd.f32 %v3885_v51, %v3768_v43  ;;  %v3867_v56 = vpop.f32.mrb[6].mxu0  ;;  %v3887_v57 = vpop.f32.mrb[6].mxu1 }
 0xbb9   : > { %3912 = vst [vmem:[#allocation2 + $0x20] sm:$0xff] %v3896_v48  ;;  %3920 = vst [vmem:[#allocation2 + $0x60] sm:$0xff] %v3904_v49  ;;  %v3898_v58 = vadd.f32 %v3867_v56, %v3761_v46  ;;  %v3906_v59 = vadd.f32 %v3887_v57, %v3769_v47  ;;  %v3869_v60 = vpop.f32.mrb[7].mxu0  ;;  %v3889_v61 = vpop.f32.mrb[7].mxu1 }
 0xbba   : > { %3913 = vst [vmem:[#allocation2 + $0x28] sm:$0xff] %v3897_v54  ;;  %3921 = vst [vmem:[#allocation2 + $0x68] sm:$0xff] %v3905_v55  ;;  %v3899_v62 = vadd.f32 %v3869_v60, %v3762_v52  ;;  %v3907_v63 = vadd.f32 %v3889_v61, %v3770_v53 }
 0xbbb   : > { %3914 = vst [vmem:[#allocation2 + $0x30] sm:$0xff] %v3898_v58  ;;  %3922 = vst [vmem:[#allocation2 + $0x70] sm:$0xff] %v3906_v59 }
 0xbbc   : > { %3915 = vst [vmem:[#allocation2 + $0x38] sm:$0xff] %v3899_v62  ;;  %3923 = vst [vmem:[#allocation2 + $0x78] sm:$0xff] %v3907_v63 }
 0xbbd PF: > { %p3924_p2 = scmp.lt.s32.totalorder %s10860_s22, %s11093_s18  ;;  %p3927_p11 = scmp.gt.s32.totalorder %s10865_s1, %s11082_s12 }
 0xbbf   : > { %p3925_p5 = pnand %p3924_p2, %p2687_p0 }
 0xbc1   : > { %p3926_p3 = pneg %p3925_p5 }
 0xbc3   : > { %p3928_p10 = pnand %p3927_p11, %p3926_p3 }
 0xbc4   : > { %v3932_v0 = vld [vmem:[%s10197_s10] sm:$0x3] (!%p3928_p10)  ;;  %v3933_v34 = vstv (!%p3928_p10), %s11096_s6  ;;  %v3941_v35 = vsub.s32 (!%p3928_p10), 1, %v10074_v2  ;;  %v3937_v36 = vsub.s32 (!%p3928_p10), 0, %v10074_v2  ;;  %v8751_v38 = vld [vmem:[%s10041_s8 + $0x4] ss:$8 sps:$4 sm:$0xff] (!%p3928_p10)  }
 0xbc5   : > { %3931 = sbr.rel (%p3928_p10) target bundleno = 3373 (0xd2d), region = 108  ;;  %v3934_v37 = vsub.s32 (!%p3928_p10), %v3932_v0, %v3933_v34  ;;  %v8754_v41 = vld [vmem:[%s10041_s8 + $0x24] ss:$8 sps:$4 sm:$0xff] (!%p3928_p10)   ;;  %4263 = vmatprep.mubr.bf16.mxu0 (!%p3928_p10), %v8751_v38  ;;  %v9287_v42 = vmov (!%p3928_p10), 1.0|1.0   ;;  %v4167_v49 = vld [vmem:[#allocation2] sm:$0xff] (!%p3928_p10) }
 0xbc6   : > { %4283 = vmatprep.mubr.bf16.mxu1 (!%p3928_p10), %v8754_v41  ;;  %v8749_v43 = vld [vmem:[%s10041_s8] ss:$8 sps:$4 sm:$0xff] (!%p3928_p10)   ;;  %v8755_v45 = vld [vmem:[%s10041_s8 + $0x14] ss:$8 sps:$4 sm:$0xff] (!%p3928_p10)   ;;  %v8759_v47 = vld [vmem:[%s10041_s8 + $0x10] ss:$8 sps:$4 sm:$0xff] (!%p3928_p10)  }
 0xbc7   : > { %v11783_v39 = vrot.slane (!%p3928_p10), %v3934_v37, %v3941_v35  ;;  %v11785_v40 = vrot.slane (!%p3928_p10), %v3934_v37, %v3937_v36  ;;  %v8752_v44 = vld [vmem:[%s10041_s8 + $0x20] ss:$8 sps:$4 sm:$0xff] (!%p3928_p10)   ;;  %v8757_v46 = vld [vmem:[%s10041_s8 + $0x34] ss:$8 sps:$4 sm:$0xff] (!%p3928_p10)   ;;  %v8760_v48 = vld [vmem:[%s10041_s8 + $0x30] ss:$8 sps:$4 sm:$0xff] (!%p3928_p10)  }
 0xbc8   : > { %v4175_v50 = vld [vmem:[#allocation2 + $0x40] sm:$0xff] (!%p3928_p10)  ;;  %v4168_v51 = vld [vmem:[#allocation2 + $0x8] sm:$0xff] (!%p3928_p10)  ;;  %v4169_v55 = vld [vmem:[#allocation2 + $0x10] sm:$0xff] (!%p3928_p10) }
 0xbc9   : > { %vm3944_vm0 = vcmp.eq.s32.totalorder (!%p3928_p10), %v10074_v2, %v11783_v39  ;;  %vm3946_vm1 = vcmp.eq.s32.totalorder (!%p3928_p10), %v10087_v3, %v11783_v39  ;;  %vm3943_vm2 = vcmp.eq.s32.totalorder (!%p3928_p10), %v10074_v2, %v11785_v40  ;;  %vm3945_vm3 = vcmp.eq.s32.totalorder (!%p3928_p10), %v10087_v3, %v11785_v40  ;;  %v4176_v52 = vld [vmem:[#allocation2 + $0x48] sm:$0xff] (!%p3928_p10)  ;;  %v4177_v56 = vld [vmem:[#allocation2 + $0x50] sm:$0xff] (!%p3928_p10)  ;;  %v4170_v61 = vld [vmem:[#allocation2 + $0x18] sm:$0xff] (!%p3928_p10) }
 0xbca   : > { %vm7386_vm4 = vmpackc.low (!%p3928_p10), %vm3946_vm1, %vm3944_vm0  ;;  %vm3948_vm5 = vcmp.eq.s32.totalorder (!%p3928_p10), %v10090_v4, %v11783_v39  ;;  %vm3950_vm6 = vcmp.eq.s32.totalorder (!%p3928_p10), %v10093_v5, %v11783_v39  ;;  %vm3947_vm9 = vcmp.eq.s32.totalorder (!%p3928_p10), %v10090_v4, %v11785_v40  ;;  %vm3949_vm10 = vcmp.eq.s32.totalorder (!%p3928_p10), %v10093_v5, %v11785_v40  ;;  %v4178_v62 = vld [vmem:[#allocation2 + $0x58] sm:$0xff] (!%p3928_p10) }
 0xbcb   : > { %7387 = vmatprep.subr.msk.bf16.mxu0 (!%p3928_p10), %vm7386_vm4, %v9287_v42  ;;  %8228 = vmatprep.subr.msk.bf16.mxu1 (!%p3928_p10), %vm7386_vm4, %v9287_v42  ;;  %vm7388_vm7 = vmpackc.low (!%p3928_p10), %vm3945_vm3, %vm3943_vm2  ;;  %vm3952_vm11 = vcmp.eq.s32.totalorder (!%p3928_p10), %v10096_v6, %v11783_v39  ;;  %vm3954_vm12 = vcmp.eq.s32.totalorder (!%p3928_p10), %v10102_v7, %v11783_v39  ;;  %vm3951_vm15 = vcmp.eq.s32.totalorder (!%p3928_p10), %v10096_v6, %v11785_v40 }
 0xbcc   : > { %7389 = vmatpush1.bf16.xpose.msk.msra.mxu0 %vm7388_vm7, %v9287_v42  ;;  %8244 = vmatpush1.bf16.xpose.msk.msra.mxu1 %vm7388_vm7, %v9287_v42  ;;  %vm7390_vm8 = vmpackc.low %vm3950_vm6, %vm3948_vm5  ;;  %vm3953_vm0 = vcmp.eq.s32.totalorder %v10102_v7, %v11785_v40  ;;  %vm3956_vm1 = vcmp.eq.s32.totalorder %v10105_v8, %v11783_v39  ;;  %vm3958_vm2 = vcmp.eq.s32.totalorder %v10108_v9, %v11783_v39 }
 0xbcd   : > { %7391 = vmatprep.subr.msk.bf16.mxu0 %vm7390_vm8, %v9287_v42  ;;  %8229 = vmatprep.subr.msk.bf16.mxu1 %vm7390_vm8, %v9287_v42  ;;  %vm7392_vm13 = vmpackc.low %vm3949_vm10, %vm3947_vm9  ;;  %vm3955_vm5 = vcmp.eq.s32.totalorder %v10105_v8, %v11785_v40  ;;  %vm3957_vm6 = vcmp.eq.s32.totalorder %v10108_v9, %v11785_v40  ;;  %vm3960_vm7 = vcmp.eq.s32.totalorder %v10111_v10, %v11783_v39 }
 0xbce   : > { %vm7394_vm14 = vmpackc.low %vm3954_vm12, %vm3952_vm11  ;;  %vm3962_vm8 = vcmp.eq.s32.totalorder %v10114_v11, %v11783_v39  ;;  %vm3959_vm11 = vcmp.eq.s32.totalorder %v10111_v10, %v11785_v40  ;;  %vm3961_vm12 = vcmp.eq.s32.totalorder %v10114_v11, %v11785_v40 }
 0xbcf   : > { %vm7396_vm3 = vmpackc.low %vm3953_vm0, %vm3951_vm15 }
 0xbd0   : > { %vm7398_vm4 = vmpackc.low %vm3958_vm2, %vm3956_vm1  ;;  %vm3963_vm1 = vcmp.eq.s32.totalorder %v10117_v12, %v11785_v40  ;;  %vm3965_vm2 = vcmp.eq.s32.totalorder %v10120_v13, %v11785_v40 }
 0xbd1   : > { %vm7400_vm9 = vmpackc.low %vm3957_vm6, %vm3955_vm5 }
 0xbd2   : > { %vm7402_vm10 = vmpackc.low %vm3962_vm8, %vm3960_vm7  ;;  %vm3967_vm7 = vcmp.eq.s32.totalorder %v10123_v14, %v11785_v40  ;;  %vm3969_vm8 = vcmp.eq.s32.totalorder %v10128_v15, %v11785_v40 }
 0xbd3   : > { %vm7404_vm15 = vmpackc.low %vm3961_vm12, %vm3959_vm11 }
 0xbd4   : > { %7393 = vmatpush1.bf16.xpose.msk.msra.mxu0 %vm7392_vm13, %v9287_v42  ;;  %8245 = vmatpush1.bf16.xpose.msk.msra.mxu1 %vm7392_vm13, %v9287_v42  ;;  %vm3964_vm13 = vcmp.eq.s32.totalorder %v10117_v12, %v11783_v39  ;;  %vm7408_vm5 = vmpackc.low %vm3965_vm2, %vm3963_vm1 }
 0xbd5   : > { %7395 = vmatprep.subr.msk.bf16.mxu0 %vm7394_vm14, %v9287_v42  ;;  %8230 = vmatprep.subr.msk.bf16.mxu1 %vm7394_vm14, %v9287_v42  ;;  %vm3966_vm14 = vcmp.eq.s32.totalorder %v10120_v13, %v11783_v39  ;;  %vm7412_vm11 = vmpackc.low %vm3969_vm8, %vm3967_vm7 }
 0xbd6   : > { %vm7406_vm0 = vmpackc.low %vm3966_vm14, %vm3964_vm13  ;;  %vm3971_vm13 = vcmp.eq.s32.totalorder %v10131_v16, %v11785_v40  ;;  %vm3973_vm14 = vcmp.eq.s32.totalorder %v10134_v17, %v11785_v40 }
 0xbd7   : > { %vm7416_vm1 = vmpackc.low %vm3973_vm14, %vm3971_vm13 }
 0xbdc   : > { %7397 = vmatpush1.bf16.xpose.msk.msra.mxu0 %vm7396_vm3, %v9287_v42  ;;  %8246 = vmatpush1.bf16.xpose.msk.msra.mxu1 %vm7396_vm3, %v9287_v42  ;;  %vm3968_vm3 = vcmp.eq.s32.totalorder %v10123_v14, %v11783_v39 }
 0xbdd   : > { %7399 = vmatprep.subr.msk.bf16.mxu0 %vm7398_vm4, %v9287_v42  ;;  %8231 = vmatprep.subr.msk.bf16.mxu1 %vm7398_vm4, %v9287_v42  ;;  %vm3970_vm4 = vcmp.eq.s32.totalorder %v10128_v15, %v11783_v39 }
 0xbde   : > { %vm7410_vm6 = vmpackc.low %vm3970_vm4, %vm3968_vm3  ;;  %vm3975_vm3 = vcmp.eq.s32.totalorder %v10137_v18, %v11785_v40  ;;  %vm3977_vm4 = vcmp.eq.s32.totalorder %v10142_v19, %v11785_v40 }
 0xbdf   : > { %vm7420_vm7 = vmpackc.low %vm3977_vm4, %vm3975_vm3 }
 0xbe4   : > { %7401 = vmatpush1.bf16.xpose.msk.msra.mxu0 %vm7400_vm9, %v9287_v42  ;;  %8247 = vmatpush1.bf16.xpose.msk.msra.mxu1 %vm7400_vm9, %v9287_v42  ;;  %vm3972_vm9 = vcmp.eq.s32.totalorder %v10131_v16, %v11783_v39 }
 0xbe5   : > { %7403 = vmatprep.subr.msk.bf16.mxu0 %vm7402_vm10, %v9287_v42  ;;  %8232 = vmatprep.subr.msk.bf16.mxu1 %vm7402_vm10, %v9287_v42  ;;  %vm3974_vm10 = vcmp.eq.s32.totalorder %v10134_v17, %v11783_v39 }
 0xbe6   : > { %vm7414_vm12 = vmpackc.low %vm3974_vm10, %vm3972_vm9  ;;  %vm3979_vm9 = vcmp.eq.s32.totalorder %v10145_v20, %v11785_v40  ;;  %vm3981_vm10 = vcmp.eq.s32.totalorder %v10148_v21, %v11785_v40 }
 0xbe7   : > { %vm7424_vm13 = vmpackc.low %vm3981_vm10, %vm3979_vm9 }
 0xbec   : > { %7405 = vmatpush1.bf16.xpose.msk.msra.mxu0 %vm7404_vm15, %v9287_v42  ;;  %8248 = vmatpush1.bf16.xpose.msk.msra.mxu1 %vm7404_vm15, %v9287_v42  ;;  %vm3976_vm15 = vcmp.eq.s32.totalorder %v10137_v18, %v11783_v39 }
 0xbed   : > { %7407 = vmatprep.subr.msk.bf16.mxu0 %vm7406_vm0, %v9287_v42  ;;  %8233 = vmatprep.subr.msk.bf16.mxu1 %vm7406_vm0, %v9287_v42  ;;  %vm3978_vm0 = vcmp.eq.s32.totalorder %v10142_v19, %v11783_v39 }
 0xbee   : > { %vm7418_vm2 = vmpackc.low %vm3978_vm0, %vm3976_vm15  ;;  %vm3983_vm15 = vcmp.eq.s32.totalorder %v10151_v22, %v11785_v40  ;;  %vm3985_vm0 = vcmp.eq.s32.totalorder %v10155_v23, %v11785_v40 }
 0xbef   : > { %vm7428_vm3 = vmpackc.low %vm3985_vm0, %vm3983_vm15 }
 0xbf4   : > { %7409 = vmatpush1.bf16.xpose.msk.msra.mxu0 %vm7408_vm5, %v9287_v42  ;;  %8249 = vmatpush1.bf16.xpose.msk.msra.mxu1 %vm7408_vm5, %v9287_v42  ;;  %vm3980_vm5 = vcmp.eq.s32.totalorder %v10145_v20, %v11783_v39 }
 0xbf5   : > { %7411 = vmatprep.subr.msk.bf16.mxu0 %vm7410_vm6, %v9287_v42  ;;  %8234 = vmatprep.subr.msk.bf16.mxu1 %vm7410_vm6, %v9287_v42  ;;  %vm3982_vm6 = vcmp.eq.s32.totalorder %v10148_v21, %v11783_v39 }
 0xbf6   : > { %vm7422_vm8 = vmpackc.low %vm3982_vm6, %vm3980_vm5  ;;  %vm3987_vm5 = vcmp.eq.s32.totalorder %v10158_v24, %v11785_v40  ;;  %vm3989_vm6 = vcmp.eq.s32.totalorder %v10161_v25, %v11785_v40 }
 0xbf7   : > { %vm7432_vm9 = vmpackc.low %vm3989_vm6, %vm3987_vm5 }
 0xbfc   : > { %7413 = vmatpush1.bf16.xpose.msk.msra.mxu0 %vm7412_vm11, %v9287_v42  ;;  %8250 = vmatpush1.bf16.xpose.msk.msra.mxu1 %vm7412_vm11, %v9287_v42  ;;  %vm3984_vm11 = vcmp.eq.s32.totalorder %v10151_v22, %v11783_v39 }
 0xbfd   : > { %7415 = vmatprep.subr.msk.bf16.mxu0 %vm7414_vm12, %v9287_v42  ;;  %8235 = vmatprep.subr.msk.bf16.mxu1 %vm7414_vm12, %v9287_v42  ;;  %vm3986_vm12 = vcmp.eq.s32.totalorder %v10155_v23, %v11783_v39 }
 0xbfe   : > { %vm7426_vm14 = vmpackc.low %vm3986_vm12, %vm3984_vm11  ;;  %vm3991_vm11 = vcmp.eq.s32.totalorder %v10164_v26, %v11785_v40  ;;  %vm3993_vm12 = vcmp.eq.s32.totalorder %v10167_v27, %v11785_v40 }
 0xbff   : > { %vm7436_vm15 = vmpackc.low %vm3993_vm12, %vm3991_vm11 }
 0xc04   : > { %7417 = vmatpush1.bf16.xpose.msk.msra.mxu0 %vm7416_vm1, %v9287_v42  ;;  %8251 = vmatpush1.bf16.xpose.msk.msra.mxu1 %vm7416_vm1, %v9287_v42  ;;  %vm3988_vm1 = vcmp.eq.s32.totalorder %v10158_v24, %v11783_v39 }
 0xc05   : > { %7419 = vmatprep.subr.msk.bf16.mxu0 %vm7418_vm2, %v9287_v42  ;;  %8236 = vmatprep.subr.msk.bf16.mxu1 %vm7418_vm2, %v9287_v42  ;;  %vm3990_vm2 = vcmp.eq.s32.totalorder %v10161_v25, %v11783_v39 }
 0xc06   : > { %vm7430_vm4 = vmpackc.low %vm3990_vm2, %vm3988_vm1  ;;  %vm3995_vm1 = vcmp.eq.s32.totalorder %v10170_v28, %v11785_v40  ;;  %vm3997_vm2 = vcmp.eq.s32.totalorder %v10173_v29, %v11785_v40 }
 0xc07   : > { %vm7440_vm5 = vmpackc.low %vm3997_vm2, %vm3995_vm1 }
 0xc0c   : > { %7421 = vmatpush1.bf16.xpose.msk.msra.mxu0 %vm7420_vm7, %v9287_v42  ;;  %8252 = vmatpush1.bf16.xpose.msk.msra.mxu1 %vm7420_vm7, %v9287_v42  ;;  %vm3992_vm7 = vcmp.eq.s32.totalorder %v10164_v26, %v11783_v39 }
 0xc0d   : > { %7423 = vmatprep.subr.msk.bf16.mxu0 %vm7422_vm8, %v9287_v42  ;;  %8237 = vmatprep.subr.msk.bf16.mxu1 %vm7422_vm8, %v9287_v42  ;;  %vm3994_vm8 = vcmp.eq.s32.totalorder %v10167_v27, %v11783_v39 }
 0xc0e   : > { %vm7434_vm10 = vmpackc.low %vm3994_vm8, %vm3992_vm7  ;;  %vm3999_vm7 = vcmp.eq.s32.totalorder %v10176_v30, %v11785_v40  ;;  %vm4001_vm8 = vcmp.eq.s32.totalorder %v10181_v31, %v11785_v40 }
 0xc0f   : > { %vm7444_vm11 = vmpackc.low %vm4001_vm8, %vm3999_vm7 }
 0xc14   : > { %7425 = vmatpush1.bf16.xpose.msk.msra.mxu0 %vm7424_vm13, %v9287_v42  ;;  %8253 = vmatpush1.bf16.xpose.msk.msra.mxu1 %vm7424_vm13, %v9287_v42  ;;  %vm3996_vm13 = vcmp.eq.s32.totalorder %v10170_v28, %v11783_v39 }
 0xc15   : > { %7427 = vmatprep.subr.msk.bf16.mxu0 %vm7426_vm14, %v9287_v42  ;;  %8238 = vmatprep.subr.msk.bf16.mxu1 %vm7426_vm14, %v9287_v42  ;;  %vm3998_vm14 = vcmp.eq.s32.totalorder %v10173_v29, %v11783_v39 }
 0xc16   : > { %vm7438_vm0 = vmpackc.low %vm3998_vm14, %vm3996_vm13  ;;  %vm4003_vm13 = vcmp.eq.s32.totalorder %v10184_v32, %v11785_v40  ;;  %vm4005_vm14 = vcmp.eq.s32.totalorder %v10187_v33, %v11785_v40 }
 0xc1c   : > { %7429 = vmatpush1.bf16.xpose.msk.msra.mxu0 %vm7428_vm3, %v9287_v42  ;;  %8254 = vmatpush1.bf16.xpose.msk.msra.mxu1 %vm7428_vm3, %v9287_v42  ;;  %vm4000_vm3 = vcmp.eq.s32.totalorder %v10176_v30, %v11783_v39 }
 0xc1d   : > { %7431 = vmatprep.subr.msk.bf16.mxu0 %vm7430_vm4, %v9287_v42  ;;  %8239 = vmatprep.subr.msk.bf16.mxu1 %vm7430_vm4, %v9287_v42  ;;  %vm4002_vm4 = vcmp.eq.s32.totalorder %v10181_v31, %v11783_v39 }
 0xc1e   : > { %vm7442_vm6 = vmpackc.low %vm4002_vm4, %vm4000_vm3 }
 0xc24   : > { %7433 = vmatpush1.bf16.xpose.msk.msra.mxu0 %vm7432_vm9, %v9287_v42  ;;  %8255 = vmatpush1.bf16.xpose.msk.msra.mxu1 %vm7432_vm9, %v9287_v42  ;;  %vm4004_vm9 = vcmp.eq.s32.totalorder %v10184_v32, %v11783_v39 }
 0xc25   : > { %7435 = vmatprep.subr.msk.bf16.mxu0 %vm7434_vm10, %v9287_v42  ;;  %8240 = vmatprep.subr.msk.bf16.mxu1 %vm7434_vm10, %v9287_v42  ;;  %vm4006_vm10 = vcmp.eq.s32.totalorder %v10187_v33, %v11783_v39 }
 0xc26   : > { %vm7446_vm12 = vmpackc.low %vm4006_vm10, %vm4004_vm9 }
 0xc2c   : > { %7437 = vmatpush1.bf16.xpose.msk.msra.mxu0 %vm7436_vm15, %v9287_v42  ;;  %8256 = vmatpush1.bf16.xpose.msk.msra.mxu1 %vm7436_vm15, %v9287_v42  ;;  %vm7448_vm15 = vmpackc.low %vm4005_vm14, %vm4003_vm13 }
 0xc2d   : > { %7439 = vmatprep.subr.msk.bf16.mxu0 %vm7438_vm0, %v9287_v42  ;;  %8241 = vmatprep.subr.msk.bf16.mxu1 %vm7438_vm0, %v9287_v42 }
 0xc34   : > { %7441 = vmatpush1.bf16.xpose.msk.msra.mxu0 %vm7440_vm5, %v9287_v42  ;;  %8257 = vmatpush1.bf16.xpose.msk.msra.mxu1 %vm7440_vm5, %v9287_v42 }
 0xc35   : > { %7443 = vmatprep.subr.msk.bf16.mxu0 %vm7442_vm6, %v9287_v42  ;;  %8242 = vmatprep.subr.msk.bf16.mxu1 %vm7442_vm6, %v9287_v42 }
 0xc3c   : > { %7445 = vmatpush1.bf16.xpose.msk.msra.mxu0 %vm7444_vm11, %v9287_v42  ;;  %8258 = vmatpush1.bf16.xpose.msk.msra.mxu1 %vm7444_vm11, %v9287_v42 }
 0xc3d   : > { %7447 = vmatprep.subr.msk.bf16.mxu0 %vm7446_vm12, %v9287_v42  ;;  %8243 = vmatprep.subr.msk.bf16.mxu1 %vm7446_vm12, %v9287_v42 }
 0xc44   : > { %7449 = vmatpush1.bf16.xpose.msk.msra.mxu0 %vm7448_vm15, %v9287_v42  ;;  %8259 = vmatpush1.bf16.xpose.msk.msra.mxu1 %vm7448_vm15, %v9287_v42  ;;  %v4171_v42 = vld [vmem:[#allocation2 + $0x20] sm:$0xff] }
 0xc4b   : > { %4264 = vmatmul.mubr.bf16.vlgmr.msra.gmra.mrb[0].mxu0 %v8749_v43  ;;  %4284 = vmatmul.mubr.bf16.vlgmr.msra.gmra.mrb[0].mxu1 %v8752_v44  ;;  %v4179_v43 = vld [vmem:[#allocation2 + $0x60] sm:$0xff]  ;;  %v4172_v44 = vld [vmem:[#allocation2 + $0x28] sm:$0xff] }
 0xc4c   : > { %4273 = vmatprep.mubr.bf16.mxu0 %v8755_v45  ;;  %4293 = vmatprep.mubr.bf16.mxu1 %v8757_v46  ;;  %v4180_v45 = vld [vmem:[#allocation2 + $0x68] sm:$0xff] }
 0xc53   : > { %4274 = vmatmul.mubr.bf16.gmra.mrb[4].mxu0 %v8759_v47  ;;  %4294 = vmatmul.mubr.bf16.gmra.mrb[4].mxu1 %v8760_v48  ;;  %v4173_v48 = vld [vmem:[#allocation2 + $0x30] sm:$0xff] }
 0xd1e   : > { %v4265_v53 = vpop.f32.mrb[0].mxu0  ;;  %v4285_v54 = vpop.f32.mrb[0].mxu1 }
 0xd1f   : > { %v4304_v57 = vadd.f32 %v4265_v53, %v4167_v49  ;;  %v4312_v58 = vadd.f32 %v4285_v54, %v4175_v50  ;;  %v4267_v59 = vpop.f32.mrb[1].mxu0  ;;  %v4287_v60 = vpop.f32.mrb[1].mxu1  ;;  %v4181_v49 = vld [vmem:[#allocation2 + $0x70] sm:$0xff]  ;;  %v4174_v54 = vld [vmem:[#allocation2 + $0x38] sm:$0xff] }
 0xd20   : > { %v4305_v63 = vadd.f32 %v4267_v59, %v4168_v51  ;;  %v4313_v0 = vadd.f32 %v4287_v60, %v4176_v52  ;;  %v4269_v34 = vpop.f32.mrb[2].mxu0  ;;  %v4289_v35 = vpop.f32.mrb[2].mxu1 }
 0xd21   : > { %4320 = vst [vmem:[#allocation2] sm:$0xff] %v4304_v57  ;;  %4328 = vst [vmem:[#allocation2 + $0x40] sm:$0xff] %v4312_v58  ;;  %v4306_v36 = vadd.f32 %v4269_v34, %v4169_v55  ;;  %v4314_v37 = vadd.f32 %v4289_v35, %v4177_v56  ;;  %v4271_v38 = vpop.f32.mrb[3].mxu0  ;;  %v4291_v39 = vpop.f32.mrb[3].mxu1  ;;  %v4182_v55 = vld [vmem:[#allocation2 + $0x78] sm:$0xff] }
 0xd22   : > { %4321 = vst [vmem:[#allocation2 + $0x8] sm:$0xff] %v4305_v63  ;;  %4329 = vst [vmem:[#allocation2 + $0x48] sm:$0xff] %v4313_v0  ;;  %v4307_v40 = vadd.f32 %v4271_v38, %v4170_v61  ;;  %v4315_v41 = vadd.f32 %v4291_v39, %v4178_v62 }
 0xd23   : > { %4322 = vst [vmem:[#allocation2 + $0x10] sm:$0xff] %v4306_v36  ;;  %4330 = vst [vmem:[#allocation2 + $0x50] sm:$0xff] %v4314_v37 }
 0xd24   : > { %4323 = vst [vmem:[#allocation2 + $0x18] sm:$0xff] %v4307_v40  ;;  %4331 = vst [vmem:[#allocation2 + $0x58] sm:$0xff] %v4315_v41 }
 0xd26   : > { %v4275_v46 = vpop.f32.mrb[4].mxu0  ;;  %v4295_v47 = vpop.f32.mrb[4].mxu1 }
 0xd27   : > { %v4308_v50 = vadd.f32 %v4275_v46, %v4171_v42  ;;  %v4316_v51 = vadd.f32 %v4295_v47, %v4179_v43  ;;  %v4277_v52 = vpop.f32.mrb[5].mxu0  ;;  %v4297_v53 = vpop.f32.mrb[5].mxu1 }
 0xd28   : > { %v4309_v56 = vadd.f32 %v4277_v52, %v4172_v44  ;;  %v4317_v57 = vadd.f32 %v4297_v53, %v4180_v45  ;;  %v4279_v58 = vpop.f32.mrb[6].mxu0  ;;  %v4299_v59 = vpop.f32.mrb[6].mxu1 }
 0xd29   : > { %4324 = vst [vmem:[#allocation2 + $0x20] sm:$0xff] %v4308_v50  ;;  %4332 = vst [vmem:[#allocation2 + $0x60] sm:$0xff] %v4316_v51  ;;  %v4310_v60 = vadd.f32 %v4279_v58, %v4173_v48  ;;  %v4318_v61 = vadd.f32 %v4299_v59, %v4181_v49  ;;  %v4281_v62 = vpop.f32.mrb[7].mxu0  ;;  %v4301_v63 = vpop.f32.mrb[7].mxu1 }
 0xd2a   : > { %4325 = vst [vmem:[#allocation2 + $0x28] sm:$0xff] %v4309_v56  ;;  %4333 = vst [vmem:[#allocation2 + $0x68] sm:$0xff] %v4317_v57  ;;  %v4311_v0 = vadd.f32 %v4281_v62, %v4174_v54  ;;  %v4319_v34 = vadd.f32 %v4301_v63, %v4182_v55 }
 0xd2b   : > { %4326 = vst [vmem:[#allocation2 + $0x30] sm:$0xff] %v4310_v60  ;;  %4334 = vst [vmem:[#allocation2 + $0x70] sm:$0xff] %v4318_v61 }
 0xd2c   : > { %4327 = vst [vmem:[#allocation2 + $0x38] sm:$0xff] %v4311_v0  ;;  %4335 = vst [vmem:[#allocation2 + $0x78] sm:$0xff] %v4319_v34 }
 0xd2d PF: > { %v4336_v35 = vld [vmem:[#allocation2] sm:$0xff]  ;;  %v4337_v36 = vld [vmem:[#allocation2 + $0x8] sm:$0xff]  ;;  %v4338_v37 = vld [vmem:[#allocation2 + $0x10] sm:$0xff]  ;;  %s11988_s11 = sld [smem:[#allocation5 + %s2668_s25]]  ;;  %s4369_s26 = sadd.s32 3, %s10049_s16 }
 0xd2e   : > { %4352 = vst [vmem:[%s10210_s21 + $0x10] sm:$0xff] %v4336_v35  ;;  %4372 = vst [vmem:[#allocation2] sm:$0xff] %v9279_v1  ;;  %v4339_v38 = vld [vmem:[#allocation2 + $0x18] sm:$0xff]  ;;  %s11997_s15 = sld [smem:[#allocation5 + %s4369_s26]]  ;;  %s12000_s12 = sadd.s32 512, %s10099_s17  ;;  %v4344_v43 = vld [vmem:[#allocation2 + $0x40] sm:$0xff] }
 0xd2f   : > { %4353 = vst [vmem:[%s10210_s21 + $0x18] sm:$0xff] %v4337_v36  ;;  %4373 = vst [vmem:[#allocation2 + $0x8] sm:$0xff] %v9279_v1  ;;  %v4345_v44 = vld [vmem:[#allocation2 + $0x48] sm:$0xff]  ;;  %v4346_v45 = vld [vmem:[#allocation2 + $0x50] sm:$0xff] }
 0xd30   : > { %4354 = vst [vmem:[%s10210_s21 + $0x40] sm:$0xff] %v4338_v37  ;;  %4374 = vst [vmem:[#allocation2 + $0x10] sm:$0xff] %v9279_v1  ;;  %v4340_v39 = vld [vmem:[#allocation2 + $0x20] sm:$0xff]  ;;  %v4347_v46 = vld [vmem:[#allocation2 + $0x58] sm:$0xff] }
 0xd31   : > { %v4341_v40 = vld [vmem:[#allocation2 + $0x28] sm:$0xff]  ;;  %4355 = vst [vmem:[%s10210_s21 + $0x48] sm:$0xff] %v4339_v38  ;;  %4375 = vst [vmem:[#allocation2 + $0x18] sm:$0xff] %v9279_v1  ;;  %v4348_v47 = vld [vmem:[#allocation2 + $0x60] sm:$0xff] }
 0xd32   : > { %4356 = vst [vmem:[%s10210_s21 + $0x70] sm:$0xff] %v4340_v39  ;;  %4376 = vst [vmem:[#allocation2 + $0x20] sm:$0xff] %v9279_v1  ;;  %v4342_v41 = vld [vmem:[#allocation2 + $0x30] sm:$0xff]  ;;  %v4349_v48 = vld [vmem:[#allocation2 + $0x68] sm:$0xff] }
 0xd33   : > { %4357 = vst [vmem:[%s10210_s21 + $0x78] sm:$0xff] %v4341_v40  ;;  %4377 = vst [vmem:[#allocation2 + $0x28] sm:$0xff] %v9279_v1  ;;  %v4343_v42 = vld [vmem:[#allocation2 + $0x38] sm:$0xff]  ;;  %v4350_v49 = vld [vmem:[#allocation2 + $0x70] sm:$0xff]  ;;  %p4392_p7 = scmp.gt.s32.totalorder %s10202_s7, %s11988_s11 }
 0xd34   : > { %4358 = vst [vmem:[%s10210_s21 + $0xa0] sm:$0xff] %v4342_v41  ;;  %4378 = vst [vmem:[#allocation2 + $0x30] sm:$0xff] %v9279_v1  ;;  %v4351_v50 = vld [vmem:[#allocation2 + $0x78] sm:$0xff]  ;;  %p4388_p0 = scmp.lt.s32.totalorder %s11988_s11, %s11997_s15  ;;  %p4389_p9 = scmp.lt.s32.totalorder %s10139_s30, %s11997_s15 }
 0xd35   : > { %4359 = vst [vmem:[%s10210_s21 + $0xa8] sm:$0xff] %v4343_v42  ;;  %4379 = vst [vmem:[#allocation2 + $0x38] sm:$0xff] %v9279_v1 }
 0xd36   : > { %4360 = vst [vmem:[%s10210_s21 + $0xd0] sm:$0xff] %v4344_v43  ;;  %4380 = vst [vmem:[#allocation2 + $0x40] sm:$0xff] %v9279_v1  ;;  %p4390_p13 = pnand %p4389_p9, %p4388_p0 }
 0xd37   : > { %4361 = vst [vmem:[%s10210_s21 + $0xd8] sm:$0xff] %v4345_v44  ;;  %4381 = vst [vmem:[#allocation2 + $0x48] sm:$0xff] %v9279_v1 }
 0xd38   : > { %4362 = vst [vmem:[%s10210_s21 + $0x100] sm:$0xff] %v4346_v45  ;;  %4382 = vst [vmem:[#allocation2 + $0x50] sm:$0xff] %v9279_v1  ;;  %p4391_p4 = pneg %p4390_p13 }
 0xd39   : > { %4363 = vst [vmem:[%s10210_s21 + $0x108] sm:$0xff] %v4347_v46  ;;  %4383 = vst [vmem:[#allocation2 + $0x58] sm:$0xff] %v9279_v1 }
 0xd3a   : > { %4364 = vst [vmem:[%s10210_s21 + $0x130] sm:$0xff] %v4348_v47  ;;  %4384 = vst [vmem:[#allocation2 + $0x60] sm:$0xff] %v9279_v1  ;;  %p4393_p1 = pnand %p4392_p7, %p4391_p4 }
 0xd3b   : > { %4365 = vst [vmem:[%s10210_s21 + $0x138] sm:$0xff] %v4349_v48  ;;  %4385 = vst [vmem:[#allocation2 + $0x68] sm:$0xff] %v9279_v1  ;;  %v4397_v51 = vld [vmem:[%s10192_s29] sm:$0x3] (!%p4393_p1)  ;;  %v4398_v52 = vstv (!%p4393_p1), %s12000_s12  ;;  %v4406_v53 = vsub.s32 (!%p4393_p1), 1, %v10074_v2  ;;  %v4402_v54 = vsub.s32 (!%p4393_p1), 0, %v10074_v2 }
 0xd3c   : > { %4366 = vst [vmem:[%s10210_s21 + $0x160] sm:$0xff] %v4350_v49  ;;  %4386 = vst [vmem:[#allocation2 + $0x70] sm:$0xff] %v9279_v1  ;;  %4396 = sbr.rel (%p4393_p1) target bundleno = 3748 (0xea4), region = 112  ;;  %v4399_v55 = vsub.s32 (!%p4393_p1), %v4397_v51, %v4398_v52  ;;  %v8766_v58 = vld [vmem:[%s10020_s9 + $0x24] ss:$8 sps:$4 sm:$0xff] (!%p4393_p1)   ;;  %v4632_v35 = vld [vmem:[#allocation2] sm:$0xff] (!%p4393_p1) }
 0xd3d   : > { %4367 = vst [vmem:[%s10210_s21 + $0x168] sm:$0xff] %v4351_v50  ;;  %4387 = vst [vmem:[#allocation2 + $0x78] sm:$0xff] %v9279_v1  ;;  %v8763_v1 = vld [vmem:[%s10020_s9 + $0x4] ss:$8 sps:$4 sm:$0xff] (!%p4393_p1)   ;;  %4748 = vmatprep.mubr.bf16.mxu1 (!%p4393_p1), %v8766_v58  ;;  %v9288_v59 = vmov (!%p4393_p1), 1.0|1.0  }
 0xd3e   : > { %v12042_v56 = vrot.slane (!%p4393_p1), %v4399_v55, %v4406_v53  ;;  %v12044_v57 = vrot.slane (!%p4393_p1), %v4399_v55, %v4402_v54  ;;  %4728 = vmatprep.mubr.bf16.mxu0 (!%p4393_p1), %v8763_v1  ;;  %v8761_v60 = vld [vmem:[%s10020_s9] ss:$8 sps:$4 sm:$0xff] (!%p4393_p1)   ;;  %v8767_v62 = vld [vmem:[%s10020_s9 + $0x14] ss:$8 sps:$4 sm:$0xff] (!%p4393_p1)   ;;  %v8771_v0 = vld [vmem:[%s10020_s9 + $0x10] ss:$8 sps:$4 sm:$0xff] (!%p4393_p1)  }
 0xd3f   : > { %v8764_v61 = vld [vmem:[%s10020_s9 + $0x20] ss:$8 sps:$4 sm:$0xff] (!%p4393_p1)   ;;  %v8769_v63 = vld [vmem:[%s10020_s9 + $0x34] ss:$8 sps:$4 sm:$0xff] (!%p4393_p1)   ;;  %v8772_v34 = vld [vmem:[%s10020_s9 + $0x30] ss:$8 sps:$4 sm:$0xff] (!%p4393_p1)  }
 0xd40   : > { %vm4409_vm0 = vcmp.eq.s32.totalorder (!%p4393_p1), %v10074_v2, %v12042_v56  ;;  %vm4411_vm1 = vcmp.eq.s32.totalorder (!%p4393_p1), %v10087_v3, %v12042_v56  ;;  %vm4408_vm2 = vcmp.eq.s32.totalorder (!%p4393_p1), %v10074_v2, %v12044_v57  ;;  %vm4410_vm3 = vcmp.eq.s32.totalorder (!%p4393_p1), %v10087_v3, %v12044_v57  ;;  %v4640_v36 = vld [vmem:[#allocation2 + $0x40] sm:$0xff] (!%p4393_p1)  ;;  %v4633_v37 = vld [vmem:[#allocation2 + $0x8] sm:$0xff] (!%p4393_p1)  ;;  %v4634_v41 = vld [vmem:[#allocation2 + $0x10] sm:$0xff] (!%p4393_p1) }
 0xd41   : > { %vm7522_vm4 = vmpackc.low (!%p4393_p1), %vm4411_vm1, %vm4409_vm0  ;;  %vm4413_vm5 = vcmp.eq.s32.totalorder (!%p4393_p1), %v10090_v4, %v12042_v56  ;;  %vm4415_vm6 = vcmp.eq.s32.totalorder (!%p4393_p1), %v10093_v5, %v12042_v56  ;;  %vm4412_vm9 = vcmp.eq.s32.totalorder (!%p4393_p1), %v10090_v4, %v12044_v57  ;;  %vm4414_vm10 = vcmp.eq.s32.totalorder (!%p4393_p1), %v10093_v5, %v12044_v57  ;;  %v4641_v38 = vld [vmem:[#allocation2 + $0x48] sm:$0xff] (!%p4393_p1)  ;;  %v4642_v42 = vld [vmem:[#allocation2 + $0x50] sm:$0xff] (!%p4393_p1) }
 0xd42   : > { %7523 = vmatprep.subr.msk.bf16.mxu0 (!%p4393_p1), %vm7522_vm4, %v9288_v59  ;;  %8260 = vmatprep.subr.msk.bf16.mxu1 (!%p4393_p1), %vm7522_vm4, %v9288_v59  ;;  %vm7524_vm7 = vmpackc.low (!%p4393_p1), %vm4410_vm3, %vm4408_vm2  ;;  %vm4417_vm11 = vcmp.eq.s32.totalorder (!%p4393_p1), %v10096_v6, %v12042_v56  ;;  %vm4419_vm12 = vcmp.eq.s32.totalorder (!%p4393_p1), %v10102_v7, %v12042_v56  ;;  %vm4416_vm15 = vcmp.eq.s32.totalorder (!%p4393_p1), %v10096_v6, %v12044_v57  ;;  %v4635_v47 = vld [vmem:[#allocation2 + $0x18] sm:$0xff] (!%p4393_p1)  ;;  %v4636_v58 = vld [vmem:[#allocation2 + $0x20] sm:$0xff] (!%p4393_p1) }
 0xd43   : > { %7525 = vmatpush1.bf16.xpose.msk.msra.mxu0 %vm7524_vm7, %v9288_v59  ;;  %8276 = vmatpush1.bf16.xpose.msk.msra.mxu1 %vm7524_vm7, %v9288_v59  ;;  %vm7526_vm8 = vmpackc.low %vm4415_vm6, %vm4413_vm5  ;;  %vm4418_vm0 = vcmp.eq.s32.totalorder %v10102_v7, %v12044_v57  ;;  %vm4421_vm1 = vcmp.eq.s32.totalorder %v10105_v8, %v12042_v56  ;;  %vm4423_vm2 = vcmp.eq.s32.totalorder %v10108_v9, %v12042_v56  ;;  %v4643_v48 = vld [vmem:[#allocation2 + $0x58] sm:$0xff] }
 0xd44   : > { %7527 = vmatprep.subr.msk.bf16.mxu0 %vm7526_vm8, %v9288_v59  ;;  %8261 = vmatprep.subr.msk.bf16.mxu1 %vm7526_vm8, %v9288_v59  ;;  %vm7528_vm13 = vmpackc.low %vm4414_vm10, %vm4412_vm9  ;;  %vm4420_vm5 = vcmp.eq.s32.totalorder %v10105_v8, %v12044_v57  ;;  %vm4422_vm6 = vcmp.eq.s32.totalorder %v10108_v9, %v12044_v57  ;;  %vm4425_vm7 = vcmp.eq.s32.totalorder %v10111_v10, %v12042_v56 }
 0xd45   : > { %vm7530_vm14 = vmpackc.low %vm4419_vm12, %vm4417_vm11  ;;  %vm4427_vm8 = vcmp.eq.s32.totalorder %v10114_v11, %v12042_v56  ;;  %vm4424_vm11 = vcmp.eq.s32.totalorder %v10111_v10, %v12044_v57  ;;  %vm4426_vm12 = vcmp.eq.s32.totalorder %v10114_v11, %v12044_v57 }
 0xd46   : > { %vm7532_vm3 = vmpackc.low %vm4418_vm0, %vm4416_vm15 }
 0xd47   : > { %vm7534_vm4 = vmpackc.low %vm4423_vm2, %vm4421_vm1  ;;  %vm4428_vm1 = vcmp.eq.s32.totalorder %v10117_v12, %v12044_v57  ;;  %vm4430_vm2 = vcmp.eq.s32.totalorder %v10120_v13, %v12044_v57 }
 0xd48   : > { %vm7536_vm9 = vmpackc.low %vm4422_vm6, %vm4420_vm5 }
 0xd49   : > { %vm7538_vm10 = vmpackc.low %vm4427_vm8, %vm4425_vm7  ;;  %vm4432_vm7 = vcmp.eq.s32.totalorder %v10123_v14, %v12044_v57  ;;  %vm4434_vm8 = vcmp.eq.s32.totalorder %v10128_v15, %v12044_v57 }
 0xd4a   : > { %vm7540_vm15 = vmpackc.low %vm4426_vm12, %vm4424_vm11 }
 0xd4b   : > { %7529 = vmatpush1.bf16.xpose.msk.msra.mxu0 %vm7528_vm13, %v9288_v59  ;;  %8277 = vmatpush1.bf16.xpose.msk.msra.mxu1 %vm7528_vm13, %v9288_v59  ;;  %vm4429_vm13 = vcmp.eq.s32.totalorder %v10117_v12, %v12042_v56  ;;  %vm7544_vm5 = vmpackc.low %vm4430_vm2, %vm4428_vm1 }
 0xd4c   : > { %7531 = vmatprep.subr.msk.bf16.mxu0 %vm7530_vm14, %v9288_v59  ;;  %8262 = vmatprep.subr.msk.bf16.mxu1 %vm7530_vm14, %v9288_v59  ;;  %vm4431_vm14 = vcmp.eq.s32.totalorder %v10120_v13, %v12042_v56  ;;  %vm7548_vm11 = vmpackc.low %vm4434_vm8, %vm4432_vm7 }
 0xd4d   : > { %vm7542_vm0 = vmpackc.low %vm4431_vm14, %vm4429_vm13  ;;  %vm4436_vm13 = vcmp.eq.s32.totalorder %v10131_v16, %v12044_v57  ;;  %vm4438_vm14 = vcmp.eq.s32.totalorder %v10134_v17, %v12044_v57 }
 0xd4e   : > { %vm7552_vm1 = vmpackc.low %vm4438_vm14, %vm4436_vm13 }
 0xd53   : > { %7533 = vmatpush1.bf16.xpose.msk.msra.mxu0 %vm7532_vm3, %v9288_v59  ;;  %8278 = vmatpush1.bf16.xpose.msk.msra.mxu1 %vm7532_vm3, %v9288_v59  ;;  %vm4433_vm3 = vcmp.eq.s32.totalorder %v10123_v14, %v12042_v56 }
 0xd54   : > { %7535 = vmatprep.subr.msk.bf16.mxu0 %vm7534_vm4, %v9288_v59  ;;  %8263 = vmatprep.subr.msk.bf16.mxu1 %vm7534_vm4, %v9288_v59  ;;  %vm4435_vm4 = vcmp.eq.s32.totalorder %v10128_v15, %v12042_v56 }
 0xd55   : > { %vm7546_vm6 = vmpackc.low %vm4435_vm4, %vm4433_vm3  ;;  %vm4440_vm3 = vcmp.eq.s32.totalorder %v10137_v18, %v12044_v57  ;;  %vm4442_vm4 = vcmp.eq.s32.totalorder %v10142_v19, %v12044_v57 }
 0xd56   : > { %vm7556_vm7 = vmpackc.low %vm4442_vm4, %vm4440_vm3 }
 0xd5b   : > { %7537 = vmatpush1.bf16.xpose.msk.msra.mxu0 %vm7536_vm9, %v9288_v59  ;;  %8279 = vmatpush1.bf16.xpose.msk.msra.mxu1 %vm7536_vm9, %v9288_v59  ;;  %vm4437_vm9 = vcmp.eq.s32.totalorder %v10131_v16, %v12042_v56 }
 0xd5c   : > { %7539 = vmatprep.subr.msk.bf16.mxu0 %vm7538_vm10, %v9288_v59  ;;  %8264 = vmatprep.subr.msk.bf16.mxu1 %vm7538_vm10, %v9288_v59  ;;  %vm4439_vm10 = vcmp.eq.s32.totalorder %v10134_v17, %v12042_v56 }
 0xd5d   : > { %vm7550_vm12 = vmpackc.low %vm4439_vm10, %vm4437_vm9  ;;  %vm4444_vm9 = vcmp.eq.s32.totalorder %v10145_v20, %v12044_v57  ;;  %vm4446_vm10 = vcmp.eq.s32.totalorder %v10148_v21, %v12044_v57 }
 0xd5e   : > { %vm7560_vm13 = vmpackc.low %vm4446_vm10, %vm4444_vm9 }
 0xd63   : > { %7541 = vmatpush1.bf16.xpose.msk.msra.mxu0 %vm7540_vm15, %v9288_v59  ;;  %8280 = vmatpush1.bf16.xpose.msk.msra.mxu1 %vm7540_vm15, %v9288_v59  ;;  %vm4441_vm15 = vcmp.eq.s32.totalorder %v10137_v18, %v12042_v56 }
 0xd64   : > { %7543 = vmatprep.subr.msk.bf16.mxu0 %vm7542_vm0, %v9288_v59  ;;  %8265 = vmatprep.subr.msk.bf16.mxu1 %vm7542_vm0, %v9288_v59  ;;  %vm4443_vm0 = vcmp.eq.s32.totalorder %v10142_v19, %v12042_v56 }
 0xd65   : > { %vm7554_vm2 = vmpackc.low %vm4443_vm0, %vm4441_vm15  ;;  %vm4448_vm15 = vcmp.eq.s32.totalorder %v10151_v22, %v12044_v57  ;;  %vm4450_vm0 = vcmp.eq.s32.totalorder %v10155_v23, %v12044_v57 }
 0xd66   : > { %vm7564_vm3 = vmpackc.low %vm4450_vm0, %vm4448_vm15 }
 0xd6b   : > { %7545 = vmatpush1.bf16.xpose.msk.msra.mxu0 %vm7544_vm5, %v9288_v59  ;;  %8281 = vmatpush1.bf16.xpose.msk.msra.mxu1 %vm7544_vm5, %v9288_v59  ;;  %vm4445_vm5 = vcmp.eq.s32.totalorder %v10145_v20, %v12042_v56 }
 0xd6c   : > { %7547 = vmatprep.subr.msk.bf16.mxu0 %vm7546_vm6, %v9288_v59  ;;  %8266 = vmatprep.subr.msk.bf16.mxu1 %vm7546_vm6, %v9288_v59  ;;  %vm4447_vm6 = vcmp.eq.s32.totalorder %v10148_v21, %v12042_v56 }
 0xd6d   : > { %vm7558_vm8 = vmpackc.low %vm4447_vm6, %vm4445_vm5  ;;  %vm4452_vm5 = vcmp.eq.s32.totalorder %v10158_v24, %v12044_v57  ;;  %vm4454_vm6 = vcmp.eq.s32.totalorder %v10161_v25, %v12044_v57 }
 0xd6e   : > { %vm7568_vm9 = vmpackc.low %vm4454_vm6, %vm4452_vm5 }
 0xd73   : > { %7549 = vmatpush1.bf16.xpose.msk.msra.mxu0 %vm7548_vm11, %v9288_v59  ;;  %8282 = vmatpush1.bf16.xpose.msk.msra.mxu1 %vm7548_vm11, %v9288_v59  ;;  %vm4449_vm11 = vcmp.eq.s32.totalorder %v10151_v22, %v12042_v56 }
 0xd74   : > { %7551 = vmatprep.subr.msk.bf16.mxu0 %vm7550_vm12, %v9288_v59  ;;  %8267 = vmatprep.subr.msk.bf16.mxu1 %vm7550_vm12, %v9288_v59  ;;  %vm4451_vm12 = vcmp.eq.s32.totalorder %v10155_v23, %v12042_v56 }
 0xd75   : > { %vm7562_vm14 = vmpackc.low %vm4451_vm12, %vm4449_vm11  ;;  %vm4456_vm11 = vcmp.eq.s32.totalorder %v10164_v26, %v12044_v57  ;;  %vm4458_vm12 = vcmp.eq.s32.totalorder %v10167_v27, %v12044_v57 }
 0xd76   : > { %vm7572_vm15 = vmpackc.low %vm4458_vm12, %vm4456_vm11 }
 0xd7b   : > { %7553 = vmatpush1.bf16.xpose.msk.msra.mxu0 %vm7552_vm1, %v9288_v59  ;;  %8283 = vmatpush1.bf16.xpose.msk.msra.mxu1 %vm7552_vm1, %v9288_v59  ;;  %vm4453_vm1 = vcmp.eq.s32.totalorder %v10158_v24, %v12042_v56 }
 0xd7c   : > { %7555 = vmatprep.subr.msk.bf16.mxu0 %vm7554_vm2, %v9288_v59  ;;  %8268 = vmatprep.subr.msk.bf16.mxu1 %vm7554_vm2, %v9288_v59  ;;  %vm4455_vm2 = vcmp.eq.s32.totalorder %v10161_v25, %v12042_v56 }
 0xd7d   : > { %vm7566_vm4 = vmpackc.low %vm4455_vm2, %vm4453_vm1  ;;  %vm4460_vm1 = vcmp.eq.s32.totalorder %v10170_v28, %v12044_v57  ;;  %vm4462_vm2 = vcmp.eq.s32.totalorder %v10173_v29, %v12044_v57 }
 0xd7e   : > { %vm7576_vm5 = vmpackc.low %vm4462_vm2, %vm4460_vm1 }
 0xd83   : > { %7557 = vmatpush1.bf16.xpose.msk.msra.mxu0 %vm7556_vm7, %v9288_v59  ;;  %8284 = vmatpush1.bf16.xpose.msk.msra.mxu1 %vm7556_vm7, %v9288_v59  ;;  %vm4457_vm7 = vcmp.eq.s32.totalorder %v10164_v26, %v12042_v56 }
 0xd84   : > { %7559 = vmatprep.subr.msk.bf16.mxu0 %vm7558_vm8, %v9288_v59  ;;  %8269 = vmatprep.subr.msk.bf16.mxu1 %vm7558_vm8, %v9288_v59  ;;  %vm4459_vm8 = vcmp.eq.s32.totalorder %v10167_v27, %v12042_v56 }
 0xd85   : > { %vm7570_vm10 = vmpackc.low %vm4459_vm8, %vm4457_vm7  ;;  %vm4464_vm7 = vcmp.eq.s32.totalorder %v10176_v30, %v12044_v57  ;;  %vm4466_vm8 = vcmp.eq.s32.totalorder %v10181_v31, %v12044_v57 }
 0xd86   : > { %vm7580_vm11 = vmpackc.low %vm4466_vm8, %vm4464_vm7 }
 0xd8b   : > { %7561 = vmatpush1.bf16.xpose.msk.msra.mxu0 %vm7560_vm13, %v9288_v59  ;;  %8285 = vmatpush1.bf16.xpose.msk.msra.mxu1 %vm7560_vm13, %v9288_v59  ;;  %vm4461_vm13 = vcmp.eq.s32.totalorder %v10170_v28, %v12042_v56 }
 0xd8c   : > { %7563 = vmatprep.subr.msk.bf16.mxu0 %vm7562_vm14, %v9288_v59  ;;  %8270 = vmatprep.subr.msk.bf16.mxu1 %vm7562_vm14, %v9288_v59  ;;  %vm4463_vm14 = vcmp.eq.s32.totalorder %v10173_v29, %v12042_v56 }
 0xd8d   : > { %vm7574_vm0 = vmpackc.low %vm4463_vm14, %vm4461_vm13  ;;  %vm4468_vm13 = vcmp.eq.s32.totalorder %v10184_v32, %v12044_v57  ;;  %vm4470_vm14 = vcmp.eq.s32.totalorder %v10187_v33, %v12044_v57 }
 0xd93   : > { %7565 = vmatpush1.bf16.xpose.msk.msra.mxu0 %vm7564_vm3, %v9288_v59  ;;  %8286 = vmatpush1.bf16.xpose.msk.msra.mxu1 %vm7564_vm3, %v9288_v59  ;;  %vm4465_vm3 = vcmp.eq.s32.totalorder %v10176_v30, %v12042_v56 }
 0xd94   : > { %7567 = vmatprep.subr.msk.bf16.mxu0 %vm7566_vm4, %v9288_v59  ;;  %8271 = vmatprep.subr.msk.bf16.mxu1 %vm7566_vm4, %v9288_v59  ;;  %vm4467_vm4 = vcmp.eq.s32.totalorder %v10181_v31, %v12042_v56 }
 0xd95   : > { %vm7578_vm6 = vmpackc.low %vm4467_vm4, %vm4465_vm3 }
 0xd9b   : > { %7569 = vmatpush1.bf16.xpose.msk.msra.mxu0 %vm7568_vm9, %v9288_v59  ;;  %8287 = vmatpush1.bf16.xpose.msk.msra.mxu1 %vm7568_vm9, %v9288_v59  ;;  %vm4469_vm9 = vcmp.eq.s32.totalorder %v10184_v32, %v12042_v56 }
 0xd9c   : > { %7571 = vmatprep.subr.msk.bf16.mxu0 %vm7570_vm10, %v9288_v59  ;;  %8272 = vmatprep.subr.msk.bf16.mxu1 %vm7570_vm10, %v9288_v59  ;;  %vm4471_vm10 = vcmp.eq.s32.totalorder %v10187_v33, %v12042_v56 }
 0xd9d   : > { %vm7582_vm12 = vmpackc.low %vm4471_vm10, %vm4469_vm9 }
 0xda3   : > { %7573 = vmatpush1.bf16.xpose.msk.msra.mxu0 %vm7572_vm15, %v9288_v59  ;;  %8288 = vmatpush1.bf16.xpose.msk.msra.mxu1 %vm7572_vm15, %v9288_v59  ;;  %vm7584_vm15 = vmpackc.low %vm4470_vm14, %vm4468_vm13 }
 0xda4   : > { %7575 = vmatprep.subr.msk.bf16.mxu0 %vm7574_vm0, %v9288_v59  ;;  %8273 = vmatprep.subr.msk.bf16.mxu1 %vm7574_vm0, %v9288_v59 }
 0xdab   : > { %7577 = vmatpush1.bf16.xpose.msk.msra.mxu0 %vm7576_vm5, %v9288_v59  ;;  %8289 = vmatpush1.bf16.xpose.msk.msra.mxu1 %vm7576_vm5, %v9288_v59 }
 0xdac   : > { %7579 = vmatprep.subr.msk.bf16.mxu0 %vm7578_vm6, %v9288_v59  ;;  %8274 = vmatprep.subr.msk.bf16.mxu1 %vm7578_vm6, %v9288_v59 }
 0xdb3   : > { %7581 = vmatpush1.bf16.xpose.msk.msra.mxu0 %vm7580_vm11, %v9288_v59  ;;  %8290 = vmatpush1.bf16.xpose.msk.msra.mxu1 %vm7580_vm11, %v9288_v59 }
 0xdb4   : > { %7583 = vmatprep.subr.msk.bf16.mxu0 %vm7582_vm12, %v9288_v59  ;;  %8275 = vmatprep.subr.msk.bf16.mxu1 %vm7582_vm12, %v9288_v59 }
 0xdbb   : > { %7585 = vmatpush1.bf16.xpose.msk.msra.mxu0 %vm7584_vm15, %v9288_v59  ;;  %8291 = vmatpush1.bf16.xpose.msk.msra.mxu1 %vm7584_vm15, %v9288_v59  ;;  %v4644_v59 = vld [vmem:[#allocation2 + $0x60] sm:$0xff] }
 0xdc2   : > { %4729 = vmatmul.mubr.bf16.vlgmr.msra.gmra.mrb[0].mxu0 %v8761_v60  ;;  %4749 = vmatmul.mubr.bf16.vlgmr.msra.gmra.mrb[0].mxu1 %v8764_v61  ;;  %v4637_v60 = vld [vmem:[#allocation2 + $0x28] sm:$0xff] }
 0xdc3   : > { %4738 = vmatprep.mubr.bf16.mxu0 %v8767_v62  ;;  %4758 = vmatprep.mubr.bf16.mxu1 %v8769_v63  ;;  %v4645_v61 = vld [vmem:[#allocation2 + $0x68] sm:$0xff] }
 0xdca   : > { %4739 = vmatmul.mubr.bf16.gmra.mrb[4].mxu0 %v8771_v0  ;;  %4759 = vmatmul.mubr.bf16.gmra.mrb[4].mxu1 %v8772_v34  ;;  %v4638_v0 = vld [vmem:[#allocation2 + $0x30] sm:$0xff] }
 0xdcb   : > { %v4646_v34 = vld [vmem:[#allocation2 + $0x70] sm:$0xff] }
 0xe95   : > { %v4730_v39 = vpop.f32.mrb[0].mxu0  ;;  %v4750_v40 = vpop.f32.mrb[0].mxu1 }
 0xe96   : > { %v4769_v43 = vadd.f32 %v4730_v39, %v4632_v35  ;;  %v4777_v44 = vadd.f32 %v4750_v40, %v4640_v36  ;;  %v4732_v45 = vpop.f32.mrb[1].mxu0  ;;  %v4752_v46 = vpop.f32.mrb[1].mxu1  ;;  %v4639_v39 = vld [vmem:[#allocation2 + $0x38] sm:$0xff] }
 0xe97   : > { %v4770_v49 = vadd.f32 %v4732_v45, %v4633_v37  ;;  %v4778_v50 = vadd.f32 %v4752_v46, %v4641_v38  ;;  %v4734_v51 = vpop.f32.mrb[2].mxu0  ;;  %v4754_v52 = vpop.f32.mrb[2].mxu1  ;;  %v4647_v40 = vld [vmem:[#allocation2 + $0x78] sm:$0xff] }
 0xe98   : > { %4785 = vst [vmem:[#allocation2] sm:$0xff] %v4769_v43  ;;  %4793 = vst [vmem:[#allocation2 + $0x40] sm:$0xff] %v4777_v44  ;;  %v4771_v53 = vadd.f32 %v4734_v51, %v4634_v41  ;;  %v4779_v54 = vadd.f32 %v4754_v52, %v4642_v42  ;;  %v4736_v55 = vpop.f32.mrb[3].mxu0  ;;  %v4756_v1 = vpop.f32.mrb[3].mxu1 }
 0xe99   : > { %4786 = vst [vmem:[#allocation2 + $0x8] sm:$0xff] %v4770_v49  ;;  %4794 = vst [vmem:[#allocation2 + $0x48] sm:$0xff] %v4778_v50  ;;  %v4772_v56 = vadd.f32 %v4736_v55, %v4635_v47  ;;  %v4780_v57 = vadd.f32 %v4756_v1, %v4643_v48 }
 0xe9a   : > { %4787 = vst [vmem:[#allocation2 + $0x10] sm:$0xff] %v4771_v53  ;;  %4795 = vst [vmem:[#allocation2 + $0x50] sm:$0xff] %v4779_v54 }
 0xe9b   : > { %4788 = vst [vmem:[#allocation2 + $0x18] sm:$0xff] %v4772_v56  ;;  %4796 = vst [vmem:[#allocation2 + $0x58] sm:$0xff] %v4780_v57 }
 0xe9d   : > { %v4740_v62 = vpop.f32.mrb[4].mxu0  ;;  %v4760_v63 = vpop.f32.mrb[4].mxu1 }
 0xe9e   : > { %v4773_v35 = vadd.f32 %v4740_v62, %v4636_v58  ;;  %v4781_v36 = vadd.f32 %v4760_v63, %v4644_v59  ;;  %v4742_v37 = vpop.f32.mrb[5].mxu0  ;;  %v4762_v38 = vpop.f32.mrb[5].mxu1 }
 0xe9f   : > { %v4774_v41 = vadd.f32 %v4742_v37, %v4637_v60  ;;  %v4782_v42 = vadd.f32 %v4762_v38, %v4645_v61  ;;  %v4744_v43 = vpop.f32.mrb[6].mxu0  ;;  %v4764_v44 = vpop.f32.mrb[6].mxu1 }
 0xea0   : > { %4789 = vst [vmem:[#allocation2 + $0x20] sm:$0xff] %v4773_v35  ;;  %4797 = vst [vmem:[#allocation2 + $0x60] sm:$0xff] %v4781_v36  ;;  %v4775_v45 = vadd.f32 %v4744_v43, %v4638_v0  ;;  %v4783_v46 = vadd.f32 %v4764_v44, %v4646_v34  ;;  %v4746_v47 = vpop.f32.mrb[7].mxu0  ;;  %v4766_v48 = vpop.f32.mrb[7].mxu1 }
 0xea1   : > { %4790 = vst [vmem:[#allocation2 + $0x28] sm:$0xff] %v4774_v41  ;;  %4798 = vst [vmem:[#allocation2 + $0x68] sm:$0xff] %v4782_v42  ;;  %v4776_v49 = vadd.f32 %v4746_v47, %v4639_v39  ;;  %v4784_v50 = vadd.f32 %v4766_v48, %v4647_v40 }
 0xea2   : > { %4791 = vst [vmem:[#allocation2 + $0x30] sm:$0xff] %v4775_v45  ;;  %4799 = vst [vmem:[#allocation2 + $0x70] sm:$0xff] %v4783_v46 }
 0xea3   : > { %4792 = vst [vmem:[#allocation2 + $0x38] sm:$0xff] %v4776_v49  ;;  %4800 = vst [vmem:[#allocation2 + $0x78] sm:$0xff] %v4784_v50 }
 0xea4 PF: > { %p4801_p8 = scmp.lt.s32.totalorder %s10202_s7, %s11997_s15  ;;  %p4804_p6 = scmp.gt.s32.totalorder %s10423_s24, %s11988_s11 }
 0xea6   : > { %p4802_p12 = pnand %p4801_p8, %p4388_p0 }
 0xea8   : > { %p4803_p2 = pneg %p4802_p12 }
 0xeaa   : > { %p4805_p5 = pnand %p4804_p6, %p4803_p2 }
 0xeab   : > { %v4809_v51 = vld [vmem:[%s10005_s13] sm:$0x3] (!%p4805_p5)  ;;  %v4810_v52 = vstv (!%p4805_p5), %s12000_s12  ;;  %v4818_v53 = vsub.s32 (!%p4805_p5), 1, %v10074_v2  ;;  %v4814_v54 = vsub.s32 (!%p4805_p5), 0, %v10074_v2  ;;  %v8775_v1 = vld [vmem:[%s10027_s23 + $0x4] ss:$8 sps:$4 sm:$0xff] (!%p4805_p5)  }
 0xeac   : > { %4808 = sbr.rel (%p4805_p5) target bundleno = 4116 (0x1014), region = 116  ;;  %v4811_v55 = vsub.s32 (!%p4805_p5), %v4809_v51, %v4810_v52  ;;  %v8778_v58 = vld [vmem:[%s10027_s23 + $0x24] ss:$8 sps:$4 sm:$0xff] (!%p4805_p5)   ;;  %5140 = vmatprep.mubr.bf16.mxu0 (!%p4805_p5), %v8775_v1  ;;  %v9289_v59 = vmov (!%p4805_p5), 1.0|1.0   ;;  %v5044_v35 = vld [vmem:[#allocation2] sm:$0xff] (!%p4805_p5) }
 0xead   : > { %5160 = vmatprep.mubr.bf16.mxu1 (!%p4805_p5), %v8778_v58  ;;  %v8773_v60 = vld [vmem:[%s10027_s23] ss:$8 sps:$4 sm:$0xff] (!%p4805_p5)   ;;  %v8779_v62 = vld [vmem:[%s10027_s23 + $0x14] ss:$8 sps:$4 sm:$0xff] (!%p4805_p5)   ;;  %v8783_v0 = vld [vmem:[%s10027_s23 + $0x10] ss:$8 sps:$4 sm:$0xff] (!%p4805_p5)  }
 0xeae   : > { %v12257_v56 = vrot.slane (!%p4805_p5), %v4811_v55, %v4818_v53  ;;  %v12259_v57 = vrot.slane (!%p4805_p5), %v4811_v55, %v4814_v54  ;;  %v8776_v61 = vld [vmem:[%s10027_s23 + $0x20] ss:$8 sps:$4 sm:$0xff] (!%p4805_p5)   ;;  %v8781_v63 = vld [vmem:[%s10027_s23 + $0x34] ss:$8 sps:$4 sm:$0xff] (!%p4805_p5)   ;;  %v8784_v34 = vld [vmem:[%s10027_s23 + $0x30] ss:$8 sps:$4 sm:$0xff] (!%p4805_p5)  }
 0xeaf   : > { %v5052_v36 = vld [vmem:[#allocation2 + $0x40] sm:$0xff] (!%p4805_p5)  ;;  %v5045_v37 = vld [vmem:[#allocation2 + $0x8] sm:$0xff] (!%p4805_p5)  ;;  %v5046_v41 = vld [vmem:[#allocation2 + $0x10] sm:$0xff] (!%p4805_p5) }
 0xeb0   : > { %vm4821_vm0 = vcmp.eq.s32.totalorder (!%p4805_p5), %v10074_v2, %v12257_v56  ;;  %vm4823_vm1 = vcmp.eq.s32.totalorder (!%p4805_p5), %v10087_v3, %v12257_v56  ;;  %vm4820_vm2 = vcmp.eq.s32.totalorder (!%p4805_p5), %v10074_v2, %v12259_v57  ;;  %vm4822_vm3 = vcmp.eq.s32.totalorder (!%p4805_p5), %v10087_v3, %v12259_v57  ;;  %v5053_v38 = vld [vmem:[#allocation2 + $0x48] sm:$0xff] (!%p4805_p5)  ;;  %v5054_v42 = vld [vmem:[#allocation2 + $0x50] sm:$0xff] (!%p4805_p5)  ;;  %v5047_v47 = vld [vmem:[#allocation2 + $0x18] sm:$0xff] (!%p4805_p5) }
 0xeb1   : > { %vm7658_vm4 = vmpackc.low (!%p4805_p5), %vm4823_vm1, %vm4821_vm0  ;;  %vm4825_vm5 = vcmp.eq.s32.totalorder (!%p4805_p5), %v10090_v4, %v12257_v56  ;;  %vm4827_vm6 = vcmp.eq.s32.totalorder (!%p4805_p5), %v10093_v5, %v12257_v56  ;;  %vm4824_vm9 = vcmp.eq.s32.totalorder (!%p4805_p5), %v10090_v4, %v12259_v57  ;;  %vm4826_vm10 = vcmp.eq.s32.totalorder (!%p4805_p5), %v10093_v5, %v12259_v57  ;;  %v5055_v48 = vld [vmem:[#allocation2 + $0x58] sm:$0xff] (!%p4805_p5)  ;;  %v5048_v58 = vld [vmem:[#allocation2 + $0x20] sm:$0xff] (!%p4805_p5) }
 0xeb2   : > { %7659 = vmatprep.subr.msk.bf16.mxu0 (!%p4805_p5), %vm7658_vm4, %v9289_v59  ;;  %8292 = vmatprep.subr.msk.bf16.mxu1 (!%p4805_p5), %vm7658_vm4, %v9289_v59  ;;  %vm7660_vm7 = vmpackc.low (!%p4805_p5), %vm4822_vm3, %vm4820_vm2  ;;  %vm4829_vm11 = vcmp.eq.s32.totalorder (!%p4805_p5), %v10096_v6, %v12257_v56  ;;  %vm4831_vm12 = vcmp.eq.s32.totalorder (!%p4805_p5), %v10102_v7, %v12257_v56  ;;  %vm4828_vm15 = vcmp.eq.s32.totalorder (!%p4805_p5), %v10096_v6, %v12259_v57 }
 0xeb3   : > { %7661 = vmatpush1.bf16.xpose.msk.msra.mxu0 %vm7660_vm7, %v9289_v59  ;;  %8308 = vmatpush1.bf16.xpose.msk.msra.mxu1 %vm7660_vm7, %v9289_v59  ;;  %vm7662_vm8 = vmpackc.low %vm4827_vm6, %vm4825_vm5  ;;  %vm4830_vm0 = vcmp.eq.s32.totalorder %v10102_v7, %v12259_v57  ;;  %vm4833_vm1 = vcmp.eq.s32.totalorder %v10105_v8, %v12257_v56  ;;  %vm4835_vm2 = vcmp.eq.s32.totalorder %v10108_v9, %v12257_v56 }
 0xeb4   : > { %7663 = vmatprep.subr.msk.bf16.mxu0 %vm7662_vm8, %v9289_v59  ;;  %8293 = vmatprep.subr.msk.bf16.mxu1 %vm7662_vm8, %v9289_v59  ;;  %vm7664_vm13 = vmpackc.low %vm4826_vm10, %vm4824_vm9  ;;  %vm4832_vm5 = vcmp.eq.s32.totalorder %v10105_v8, %v12259_v57  ;;  %vm4834_vm6 = vcmp.eq.s32.totalorder %v10108_v9, %v12259_v57  ;;  %vm4837_vm7 = vcmp.eq.s32.totalorder %v10111_v10, %v12257_v56 }
 0xeb5   : > { %vm7666_vm14 = vmpackc.low %vm4831_vm12, %vm4829_vm11  ;;  %vm4839_vm8 = vcmp.eq.s32.totalorder %v10114_v11, %v12257_v56  ;;  %vm4836_vm11 = vcmp.eq.s32.totalorder %v10111_v10, %v12259_v57  ;;  %vm4838_vm12 = vcmp.eq.s32.totalorder %v10114_v11, %v12259_v57 }
 0xeb6   : > { %vm7668_vm3 = vmpackc.low %vm4830_vm0, %vm4828_vm15 }
 0xeb7   : > { %vm7670_vm4 = vmpackc.low %vm4835_vm2, %vm4833_vm1  ;;  %vm4840_vm1 = vcmp.eq.s32.totalorder %v10117_v12, %v12259_v57  ;;  %vm4842_vm2 = vcmp.eq.s32.totalorder %v10120_v13, %v12259_v57 }
 0xeb8   : > { %vm7672_vm9 = vmpackc.low %vm4834_vm6, %vm4832_vm5 }
 0xeb9   : > { %vm7674_vm10 = vmpackc.low %vm4839_vm8, %vm4837_vm7  ;;  %vm4844_vm7 = vcmp.eq.s32.totalorder %v10123_v14, %v12259_v57  ;;  %vm4846_vm8 = vcmp.eq.s32.totalorder %v10128_v15, %v12259_v57 }
 0xeba   : > { %vm7676_vm15 = vmpackc.low %vm4838_vm12, %vm4836_vm11 }
 0xebb   : > { %7665 = vmatpush1.bf16.xpose.msk.msra.mxu0 %vm7664_vm13, %v9289_v59  ;;  %8309 = vmatpush1.bf16.xpose.msk.msra.mxu1 %vm7664_vm13, %v9289_v59  ;;  %vm4841_vm13 = vcmp.eq.s32.totalorder %v10117_v12, %v12257_v56  ;;  %vm7680_vm5 = vmpackc.low %vm4842_vm2, %vm4840_vm1 }
 0xebc   : > { %7667 = vmatprep.subr.msk.bf16.mxu0 %vm7666_vm14, %v9289_v59  ;;  %8294 = vmatprep.subr.msk.bf16.mxu1 %vm7666_vm14, %v9289_v59  ;;  %vm4843_vm14 = vcmp.eq.s32.totalorder %v10120_v13, %v12257_v56  ;;  %vm7684_vm11 = vmpackc.low %vm4846_vm8, %vm4844_vm7 }
 0xebd   : > { %vm7678_vm0 = vmpackc.low %vm4843_vm14, %vm4841_vm13  ;;  %vm4848_vm13 = vcmp.eq.s32.totalorder %v10131_v16, %v12259_v57  ;;  %vm4850_vm14 = vcmp.eq.s32.totalorder %v10134_v17, %v12259_v57 }
 0xebe   : > { %vm7688_vm1 = vmpackc.low %vm4850_vm14, %vm4848_vm13 }
 0xec3   : > { %7669 = vmatpush1.bf16.xpose.msk.msra.mxu0 %vm7668_vm3, %v9289_v59  ;;  %8310 = vmatpush1.bf16.xpose.msk.msra.mxu1 %vm7668_vm3, %v9289_v59  ;;  %vm4845_vm3 = vcmp.eq.s32.totalorder %v10123_v14, %v12257_v56 }
 0xec4   : > { %7671 = vmatprep.subr.msk.bf16.mxu0 %vm7670_vm4, %v9289_v59  ;;  %8295 = vmatprep.subr.msk.bf16.mxu1 %vm7670_vm4, %v9289_v59  ;;  %vm4847_vm4 = vcmp.eq.s32.totalorder %v10128_v15, %v12257_v56 }
 0xec5   : > { %vm7682_vm6 = vmpackc.low %vm4847_vm4, %vm4845_vm3  ;;  %vm4852_vm3 = vcmp.eq.s32.totalorder %v10137_v18, %v12259_v57  ;;  %vm4854_vm4 = vcmp.eq.s32.totalorder %v10142_v19, %v12259_v57 }
 0xec6   : > { %vm7692_vm7 = vmpackc.low %vm4854_vm4, %vm4852_vm3 }
 0xecb   : > { %7673 = vmatpush1.bf16.xpose.msk.msra.mxu0 %vm7672_vm9, %v9289_v59  ;;  %8311 = vmatpush1.bf16.xpose.msk.msra.mxu1 %vm7672_vm9, %v9289_v59  ;;  %vm4849_vm9 = vcmp.eq.s32.totalorder %v10131_v16, %v12257_v56 }
 0xecc   : > { %7675 = vmatprep.subr.msk.bf16.mxu0 %vm7674_vm10, %v9289_v59  ;;  %8296 = vmatprep.subr.msk.bf16.mxu1 %vm7674_vm10, %v9289_v59  ;;  %vm4851_vm10 = vcmp.eq.s32.totalorder %v10134_v17, %v12257_v56 }
 0xecd   : > { %vm7686_vm12 = vmpackc.low %vm4851_vm10, %vm4849_vm9  ;;  %vm4856_vm9 = vcmp.eq.s32.totalorder %v10145_v20, %v12259_v57  ;;  %vm4858_vm10 = vcmp.eq.s32.totalorder %v10148_v21, %v12259_v57 }
 0xece   : > { %vm7696_vm13 = vmpackc.low %vm4858_vm10, %vm4856_vm9 }
 0xed3   : > { %7677 = vmatpush1.bf16.xpose.msk.msra.mxu0 %vm7676_vm15, %v9289_v59  ;;  %8312 = vmatpush1.bf16.xpose.msk.msra.mxu1 %vm7676_vm15, %v9289_v59  ;;  %vm4853_vm15 = vcmp.eq.s32.totalorder %v10137_v18, %v12257_v56 }
 0xed4   : > { %7679 = vmatprep.subr.msk.bf16.mxu0 %vm7678_vm0, %v9289_v59  ;;  %8297 = vmatprep.subr.msk.bf16.mxu1 %vm7678_vm0, %v9289_v59  ;;  %vm4855_vm0 = vcmp.eq.s32.totalorder %v10142_v19, %v12257_v56 }
 0xed5   : > { %vm7690_vm2 = vmpackc.low %vm4855_vm0, %vm4853_vm15  ;;  %vm4860_vm15 = vcmp.eq.s32.totalorder %v10151_v22, %v12259_v57  ;;  %vm4862_vm0 = vcmp.eq.s32.totalorder %v10155_v23, %v12259_v57 }
 0xed6   : > { %vm7700_vm3 = vmpackc.low %vm4862_vm0, %vm4860_vm15 }
 0xedb   : > { %7681 = vmatpush1.bf16.xpose.msk.msra.mxu0 %vm7680_vm5, %v9289_v59  ;;  %8313 = vmatpush1.bf16.xpose.msk.msra.mxu1 %vm7680_vm5, %v9289_v59  ;;  %vm4857_vm5 = vcmp.eq.s32.totalorder %v10145_v20, %v12257_v56 }
 0xedc   : > { %7683 = vmatprep.subr.msk.bf16.mxu0 %vm7682_vm6, %v9289_v59  ;;  %8298 = vmatprep.subr.msk.bf16.mxu1 %vm7682_vm6, %v9289_v59  ;;  %vm4859_vm6 = vcmp.eq.s32.totalorder %v10148_v21, %v12257_v56 }
 0xedd   : > { %vm7694_vm8 = vmpackc.low %vm4859_vm6, %vm4857_vm5  ;;  %vm4864_vm5 = vcmp.eq.s32.totalorder %v10158_v24, %v12259_v57  ;;  %vm4866_vm6 = vcmp.eq.s32.totalorder %v10161_v25, %v12259_v57 }
 0xede   : > { %vm7704_vm9 = vmpackc.low %vm4866_vm6, %vm4864_vm5 }
 0xee3   : > { %7685 = vmatpush1.bf16.xpose.msk.msra.mxu0 %vm7684_vm11, %v9289_v59  ;;  %8314 = vmatpush1.bf16.xpose.msk.msra.mxu1 %vm7684_vm11, %v9289_v59  ;;  %vm4861_vm11 = vcmp.eq.s32.totalorder %v10151_v22, %v12257_v56 }
 0xee4   : > { %7687 = vmatprep.subr.msk.bf16.mxu0 %vm7686_vm12, %v9289_v59  ;;  %8299 = vmatprep.subr.msk.bf16.mxu1 %vm7686_vm12, %v9289_v59  ;;  %vm4863_vm12 = vcmp.eq.s32.totalorder %v10155_v23, %v12257_v56 }
 0xee5   : > { %vm7698_vm14 = vmpackc.low %vm4863_vm12, %vm4861_vm11  ;;  %vm4868_vm11 = vcmp.eq.s32.totalorder %v10164_v26, %v12259_v57  ;;  %vm4870_vm12 = vcmp.eq.s32.totalorder %v10167_v27, %v12259_v57 }
 0xee6   : > { %vm7708_vm15 = vmpackc.low %vm4870_vm12, %vm4868_vm11 }
 0xeeb   : > { %7689 = vmatpush1.bf16.xpose.msk.msra.mxu0 %vm7688_vm1, %v9289_v59  ;;  %8315 = vmatpush1.bf16.xpose.msk.msra.mxu1 %vm7688_vm1, %v9289_v59  ;;  %vm4865_vm1 = vcmp.eq.s32.totalorder %v10158_v24, %v12257_v56 }
 0xeec   : > { %7691 = vmatprep.subr.msk.bf16.mxu0 %vm7690_vm2, %v9289_v59  ;;  %8300 = vmatprep.subr.msk.bf16.mxu1 %vm7690_vm2, %v9289_v59  ;;  %vm4867_vm2 = vcmp.eq.s32.totalorder %v10161_v25, %v12257_v56 }
 0xeed   : > { %vm7702_vm4 = vmpackc.low %vm4867_vm2, %vm4865_vm1  ;;  %vm4872_vm1 = vcmp.eq.s32.totalorder %v10170_v28, %v12259_v57  ;;  %vm4874_vm2 = vcmp.eq.s32.totalorder %v10173_v29, %v12259_v57 }
 0xeee   : > { %vm7712_vm5 = vmpackc.low %vm4874_vm2, %vm4872_vm1 }
 0xef3   : > { %7693 = vmatpush1.bf16.xpose.msk.msra.mxu0 %vm7692_vm7, %v9289_v59  ;;  %8316 = vmatpush1.bf16.xpose.msk.msra.mxu1 %vm7692_vm7, %v9289_v59  ;;  %vm4869_vm7 = vcmp.eq.s32.totalorder %v10164_v26, %v12257_v56 }
 0xef4   : > { %7695 = vmatprep.subr.msk.bf16.mxu0 %vm7694_vm8, %v9289_v59  ;;  %8301 = vmatprep.subr.msk.bf16.mxu1 %vm7694_vm8, %v9289_v59  ;;  %vm4871_vm8 = vcmp.eq.s32.totalorder %v10167_v27, %v12257_v56 }
 0xef5   : > { %vm7706_vm10 = vmpackc.low %vm4871_vm8, %vm4869_vm7  ;;  %vm4876_vm7 = vcmp.eq.s32.totalorder %v10176_v30, %v12259_v57  ;;  %vm4878_vm8 = vcmp.eq.s32.totalorder %v10181_v31, %v12259_v57 }
 0xef6   : > { %vm7716_vm11 = vmpackc.low %vm4878_vm8, %vm4876_vm7 }
 0xefb   : > { %7697 = vmatpush1.bf16.xpose.msk.msra.mxu0 %vm7696_vm13, %v9289_v59  ;;  %8317 = vmatpush1.bf16.xpose.msk.msra.mxu1 %vm7696_vm13, %v9289_v59  ;;  %vm4873_vm13 = vcmp.eq.s32.totalorder %v10170_v28, %v12257_v56 }
 0xefc   : > { %7699 = vmatprep.subr.msk.bf16.mxu0 %vm7698_vm14, %v9289_v59  ;;  %8302 = vmatprep.subr.msk.bf16.mxu1 %vm7698_vm14, %v9289_v59  ;;  %vm4875_vm14 = vcmp.eq.s32.totalorder %v10173_v29, %v12257_v56 }
 0xefd   : > { %vm7710_vm0 = vmpackc.low %vm4875_vm14, %vm4873_vm13  ;;  %vm4880_vm13 = vcmp.eq.s32.totalorder %v10184_v32, %v12259_v57  ;;  %vm4882_vm14 = vcmp.eq.s32.totalorder %v10187_v33, %v12259_v57 }
 0xf03   : > { %7701 = vmatpush1.bf16.xpose.msk.msra.mxu0 %vm7700_vm3, %v9289_v59  ;;  %8318 = vmatpush1.bf16.xpose.msk.msra.mxu1 %vm7700_vm3, %v9289_v59  ;;  %vm4877_vm3 = vcmp.eq.s32.totalorder %v10176_v30, %v12257_v56 }
 0xf04   : > { %7703 = vmatprep.subr.msk.bf16.mxu0 %vm7702_vm4, %v9289_v59  ;;  %8303 = vmatprep.subr.msk.bf16.mxu1 %vm7702_vm4, %v9289_v59  ;;  %vm4879_vm4 = vcmp.eq.s32.totalorder %v10181_v31, %v12257_v56 }
 0xf05   : > { %vm7714_vm6 = vmpackc.low %vm4879_vm4, %vm4877_vm3 }
 0xf0b   : > { %7705 = vmatpush1.bf16.xpose.msk.msra.mxu0 %vm7704_vm9, %v9289_v59  ;;  %8319 = vmatpush1.bf16.xpose.msk.msra.mxu1 %vm7704_vm9, %v9289_v59  ;;  %vm4881_vm9 = vcmp.eq.s32.totalorder %v10184_v32, %v12257_v56 }
 0xf0c   : > { %7707 = vmatprep.subr.msk.bf16.mxu0 %vm7706_vm10, %v9289_v59  ;;  %8304 = vmatprep.subr.msk.bf16.mxu1 %vm7706_vm10, %v9289_v59  ;;  %vm4883_vm10 = vcmp.eq.s32.totalorder %v10187_v33, %v12257_v56 }
 0xf0d   : > { %vm7718_vm12 = vmpackc.low %vm4883_vm10, %vm4881_vm9 }
 0xf13   : > { %7709 = vmatpush1.bf16.xpose.msk.msra.mxu0 %vm7708_vm15, %v9289_v59  ;;  %8320 = vmatpush1.bf16.xpose.msk.msra.mxu1 %vm7708_vm15, %v9289_v59  ;;  %vm7720_vm15 = vmpackc.low %vm4882_vm14, %vm4880_vm13 }
 0xf14   : > { %7711 = vmatprep.subr.msk.bf16.mxu0 %vm7710_vm0, %v9289_v59  ;;  %8305 = vmatprep.subr.msk.bf16.mxu1 %vm7710_vm0, %v9289_v59 }
 0xf1b   : > { %7713 = vmatpush1.bf16.xpose.msk.msra.mxu0 %vm7712_vm5, %v9289_v59  ;;  %8321 = vmatpush1.bf16.xpose.msk.msra.mxu1 %vm7712_vm5, %v9289_v59 }
 0xf1c   : > { %7715 = vmatprep.subr.msk.bf16.mxu0 %vm7714_vm6, %v9289_v59  ;;  %8306 = vmatprep.subr.msk.bf16.mxu1 %vm7714_vm6, %v9289_v59 }
 0xf23   : > { %7717 = vmatpush1.bf16.xpose.msk.msra.mxu0 %vm7716_vm11, %v9289_v59  ;;  %8322 = vmatpush1.bf16.xpose.msk.msra.mxu1 %vm7716_vm11, %v9289_v59 }
 0xf24   : > { %7719 = vmatprep.subr.msk.bf16.mxu0 %vm7718_vm12, %v9289_v59  ;;  %8307 = vmatprep.subr.msk.bf16.mxu1 %vm7718_vm12, %v9289_v59 }
 0xf2b   : > { %7721 = vmatpush1.bf16.xpose.msk.msra.mxu0 %vm7720_vm15, %v9289_v59  ;;  %8323 = vmatpush1.bf16.xpose.msk.msra.mxu1 %vm7720_vm15, %v9289_v59  ;;  %v5056_v59 = vld [vmem:[#allocation2 + $0x60] sm:$0xff] }
 0xf32   : > { %5141 = vmatmul.mubr.bf16.vlgmr.msra.gmra.mrb[0].mxu0 %v8773_v60  ;;  %5161 = vmatmul.mubr.bf16.vlgmr.msra.gmra.mrb[0].mxu1 %v8776_v61  ;;  %v5049_v60 = vld [vmem:[#allocation2 + $0x28] sm:$0xff] }
 0xf33   : > { %5150 = vmatprep.mubr.bf16.mxu0 %v8779_v62  ;;  %5170 = vmatprep.mubr.bf16.mxu1 %v8781_v63  ;;  %v5057_v61 = vld [vmem:[#allocation2 + $0x68] sm:$0xff] }
 0xf3a   : > { %5151 = vmatmul.mubr.bf16.gmra.mrb[4].mxu0 %v8783_v0  ;;  %5171 = vmatmul.mubr.bf16.gmra.mrb[4].mxu1 %v8784_v34  ;;  %v5050_v0 = vld [vmem:[#allocation2 + $0x30] sm:$0xff] }
 0xf3b   : > { %v5058_v34 = vld [vmem:[#allocation2 + $0x70] sm:$0xff] }
0x1005   : > { %v5142_v39 = vpop.f32.mrb[0].mxu0  ;;  %v5162_v40 = vpop.f32.mrb[0].mxu1 }
0x1006   : > { %v5181_v43 = vadd.f32 %v5142_v39, %v5044_v35  ;;  %v5189_v44 = vadd.f32 %v5162_v40, %v5052_v36  ;;  %v5144_v45 = vpop.f32.mrb[1].mxu0  ;;  %v5164_v46 = vpop.f32.mrb[1].mxu1  ;;  %v5051_v39 = vld [vmem:[#allocation2 + $0x38] sm:$0xff] }
0x1007   : > { %v5182_v49 = vadd.f32 %v5144_v45, %v5045_v37  ;;  %v5190_v50 = vadd.f32 %v5164_v46, %v5053_v38  ;;  %v5146_v51 = vpop.f32.mrb[2].mxu0  ;;  %v5166_v52 = vpop.f32.mrb[2].mxu1  ;;  %v5059_v40 = vld [vmem:[#allocation2 + $0x78] sm:$0xff] }
0x1008   : > { %5197 = vst [vmem:[#allocation2] sm:$0xff] %v5181_v43  ;;  %5205 = vst [vmem:[#allocation2 + $0x40] sm:$0xff] %v5189_v44  ;;  %v5183_v53 = vadd.f32 %v5146_v51, %v5046_v41  ;;  %v5191_v54 = vadd.f32 %v5166_v52, %v5054_v42  ;;  %v5148_v55 = vpop.f32.mrb[3].mxu0  ;;  %v5168_v1 = vpop.f32.mrb[3].mxu1 }
0x1009   : > { %5198 = vst [vmem:[#allocation2 + $0x8] sm:$0xff] %v5182_v49  ;;  %5206 = vst [vmem:[#allocation2 + $0x48] sm:$0xff] %v5190_v50  ;;  %v5184_v56 = vadd.f32 %v5148_v55, %v5047_v47  ;;  %v5192_v57 = vadd.f32 %v5168_v1, %v5055_v48 }
0x100a   : > { %5199 = vst [vmem:[#allocation2 + $0x10] sm:$0xff] %v5183_v53  ;;  %5207 = vst [vmem:[#allocation2 + $0x50] sm:$0xff] %v5191_v54 }
0x100b   : > { %5200 = vst [vmem:[#allocation2 + $0x18] sm:$0xff] %v5184_v56  ;;  %5208 = vst [vmem:[#allocation2 + $0x58] sm:$0xff] %v5192_v57 }
0x100d   : > { %v5152_v62 = vpop.f32.mrb[4].mxu0  ;;  %v5172_v63 = vpop.f32.mrb[4].mxu1 }
0x100e   : > { %v5185_v35 = vadd.f32 %v5152_v62, %v5048_v58  ;;  %v5193_v36 = vadd.f32 %v5172_v63, %v5056_v59  ;;  %v5154_v37 = vpop.f32.mrb[5].mxu0  ;;  %v5174_v38 = vpop.f32.mrb[5].mxu1 }
0x100f   : > { %v5186_v41 = vadd.f32 %v5154_v37, %v5049_v60  ;;  %v5194_v42 = vadd.f32 %v5174_v38, %v5057_v61  ;;  %v5156_v43 = vpop.f32.mrb[6].mxu0  ;;  %v5176_v44 = vpop.f32.mrb[6].mxu1 }
0x1010   : > { %5201 = vst [vmem:[#allocation2 + $0x20] sm:$0xff] %v5185_v35  ;;  %5209 = vst [vmem:[#allocation2 + $0x60] sm:$0xff] %v5193_v36  ;;  %v5187_v45 = vadd.f32 %v5156_v43, %v5050_v0  ;;  %v5195_v46 = vadd.f32 %v5176_v44, %v5058_v34  ;;  %v5158_v47 = vpop.f32.mrb[7].mxu0  ;;  %v5178_v48 = vpop.f32.mrb[7].mxu1 }
0x1011   : > { %5202 = vst [vmem:[#allocation2 + $0x28] sm:$0xff] %v5186_v41  ;;  %5210 = vst [vmem:[#allocation2 + $0x68] sm:$0xff] %v5194_v42  ;;  %v5188_v49 = vadd.f32 %v5158_v47, %v5051_v39  ;;  %v5196_v50 = vadd.f32 %v5178_v48, %v5059_v40 }
0x1012   : > { %5203 = vst [vmem:[#allocation2 + $0x30] sm:$0xff] %v5187_v45  ;;  %5211 = vst [vmem:[#allocation2 + $0x70] sm:$0xff] %v5195_v46 }
0x1013   : > { %5204 = vst [vmem:[#allocation2 + $0x38] sm:$0xff] %v5188_v49  ;;  %5212 = vst [vmem:[#allocation2 + $0x78] sm:$0xff] %v5196_v50 }
0x1014 PF: > { %p5213_p11 = scmp.lt.s32.totalorder %s10639_s3, %s11997_s15  ;;  %p5216_p10 = scmp.gt.s32.totalorder %s10644_s0, %s11988_s11 }
0x1016   : > { %p5214_p3 = pnand %p5213_p11, %p4388_p0 }
0x1018   : > { %p5215_p9 = pneg %p5214_p3 }
0x101a   : > { %p5217_p13 = pnand %p5216_p10, %p5215_p9 }
0x101b   : > { %v5221_v51 = vld [vmem:[%s10013_s19] sm:$0x3] (!%p5217_p13)  ;;  %v5222_v52 = vstv (!%p5217_p13), %s12000_s12  ;;  %v5230_v53 = vsub.s32 (!%p5217_p13), 1, %v10074_v2  ;;  %v5226_v54 = vsub.s32 (!%p5217_p13), 0, %v10074_v2  ;;  %v8787_v1 = vld [vmem:[%s10034_s28 + $0x4] ss:$8 sps:$4 sm:$0xff] (!%p5217_p13)  }
0x101c   : > { %5220 = sbr.rel (%p5217_p13) target bundleno = 4484 (0x1184), region = 120  ;;  %v5223_v55 = vsub.s32 (!%p5217_p13), %v5221_v51, %v5222_v52  ;;  %v8790_v58 = vld [vmem:[%s10034_s28 + $0x24] ss:$8 sps:$4 sm:$0xff] (!%p5217_p13)   ;;  %5552 = vmatprep.mubr.bf16.mxu0 (!%p5217_p13), %v8787_v1  ;;  %v9290_v59 = vmov (!%p5217_p13), 1.0|1.0   ;;  %v5456_v35 = vld [vmem:[#allocation2] sm:$0xff] (!%p5217_p13) }
0x101d   : > { %5572 = vmatprep.mubr.bf16.mxu1 (!%p5217_p13), %v8790_v58  ;;  %v8785_v60 = vld [vmem:[%s10034_s28] ss:$8 sps:$4 sm:$0xff] (!%p5217_p13)   ;;  %v8791_v62 = vld [vmem:[%s10034_s28 + $0x14] ss:$8 sps:$4 sm:$0xff] (!%p5217_p13)   ;;  %v8795_v0 = vld [vmem:[%s10034_s28 + $0x10] ss:$8 sps:$4 sm:$0xff] (!%p5217_p13)  }
0x101e   : > { %v12472_v56 = vrot.slane (!%p5217_p13), %v5223_v55, %v5230_v53  ;;  %v12474_v57 = vrot.slane (!%p5217_p13), %v5223_v55, %v5226_v54  ;;  %v8788_v61 = vld [vmem:[%s10034_s28 + $0x20] ss:$8 sps:$4 sm:$0xff] (!%p5217_p13)   ;;  %v8793_v63 = vld [vmem:[%s10034_s28 + $0x34] ss:$8 sps:$4 sm:$0xff] (!%p5217_p13)   ;;  %v8796_v34 = vld [vmem:[%s10034_s28 + $0x30] ss:$8 sps:$4 sm:$0xff] (!%p5217_p13)  }
0x101f   : > { %v5464_v36 = vld [vmem:[#allocation2 + $0x40] sm:$0xff] (!%p5217_p13)  ;;  %v5457_v37 = vld [vmem:[#allocation2 + $0x8] sm:$0xff] (!%p5217_p13)  ;;  %v5458_v41 = vld [vmem:[#allocation2 + $0x10] sm:$0xff] (!%p5217_p13) }
0x1020   : > { %vm5233_vm0 = vcmp.eq.s32.totalorder (!%p5217_p13), %v10074_v2, %v12472_v56  ;;  %vm5235_vm1 = vcmp.eq.s32.totalorder (!%p5217_p13), %v10087_v3, %v12472_v56  ;;  %vm5232_vm2 = vcmp.eq.s32.totalorder (!%p5217_p13), %v10074_v2, %v12474_v57  ;;  %vm5234_vm3 = vcmp.eq.s32.totalorder (!%p5217_p13), %v10087_v3, %v12474_v57  ;;  %v5465_v38 = vld [vmem:[#allocation2 + $0x48] sm:$0xff] (!%p5217_p13)  ;;  %v5466_v42 = vld [vmem:[#allocation2 + $0x50] sm:$0xff] (!%p5217_p13)  ;;  %v5459_v47 = vld [vmem:[#allocation2 + $0x18] sm:$0xff] (!%p5217_p13) }
0x1021   : > { %vm7794_vm4 = vmpackc.low (!%p5217_p13), %vm5235_vm1, %vm5233_vm0  ;;  %vm5237_vm5 = vcmp.eq.s32.totalorder (!%p5217_p13), %v10090_v4, %v12472_v56  ;;  %vm5239_vm6 = vcmp.eq.s32.totalorder (!%p5217_p13), %v10093_v5, %v12472_v56  ;;  %vm5236_vm9 = vcmp.eq.s32.totalorder (!%p5217_p13), %v10090_v4, %v12474_v57  ;;  %vm5238_vm10 = vcmp.eq.s32.totalorder (!%p5217_p13), %v10093_v5, %v12474_v57  ;;  %v5467_v48 = vld [vmem:[#allocation2 + $0x58] sm:$0xff] (!%p5217_p13)  ;;  %v5460_v58 = vld [vmem:[#allocation2 + $0x20] sm:$0xff] (!%p5217_p13) }
0x1022   : > { %7795 = vmatprep.subr.msk.bf16.mxu0 (!%p5217_p13), %vm7794_vm4, %v9290_v59  ;;  %8324 = vmatprep.subr.msk.bf16.mxu1 (!%p5217_p13), %vm7794_vm4, %v9290_v59  ;;  %vm7796_vm7 = vmpackc.low (!%p5217_p13), %vm5234_vm3, %vm5232_vm2  ;;  %vm5241_vm11 = vcmp.eq.s32.totalorder (!%p5217_p13), %v10096_v6, %v12472_v56  ;;  %vm5243_vm12 = vcmp.eq.s32.totalorder (!%p5217_p13), %v10102_v7, %v12472_v56  ;;  %vm5240_vm15 = vcmp.eq.s32.totalorder (!%p5217_p13), %v10096_v6, %v12474_v57 }
0x1023   : > { %7797 = vmatpush1.bf16.xpose.msk.msra.mxu0 %vm7796_vm7, %v9290_v59  ;;  %8340 = vmatpush1.bf16.xpose.msk.msra.mxu1 %vm7796_vm7, %v9290_v59  ;;  %vm7798_vm8 = vmpackc.low %vm5239_vm6, %vm5237_vm5  ;;  %vm5242_vm0 = vcmp.eq.s32.totalorder %v10102_v7, %v12474_v57  ;;  %vm5245_vm1 = vcmp.eq.s32.totalorder %v10105_v8, %v12472_v56  ;;  %vm5247_vm2 = vcmp.eq.s32.totalorder %v10108_v9, %v12472_v56 }
0x1024   : > { %7799 = vmatprep.subr.msk.bf16.mxu0 %vm7798_vm8, %v9290_v59  ;;  %8325 = vmatprep.subr.msk.bf16.mxu1 %vm7798_vm8, %v9290_v59  ;;  %vm7800_vm13 = vmpackc.low %vm5238_vm10, %vm5236_vm9  ;;  %vm5244_vm5 = vcmp.eq.s32.totalorder %v10105_v8, %v12474_v57  ;;  %vm5246_vm6 = vcmp.eq.s32.totalorder %v10108_v9, %v12474_v57  ;;  %vm5249_vm7 = vcmp.eq.s32.totalorder %v10111_v10, %v12472_v56 }
0x1025   : > { %vm7802_vm14 = vmpackc.low %vm5243_vm12, %vm5241_vm11  ;;  %vm5251_vm8 = vcmp.eq.s32.totalorder %v10114_v11, %v12472_v56  ;;  %vm5248_vm11 = vcmp.eq.s32.totalorder %v10111_v10, %v12474_v57  ;;  %vm5250_vm12 = vcmp.eq.s32.totalorder %v10114_v11, %v12474_v57 }
0x1026   : > { %vm7804_vm3 = vmpackc.low %vm5242_vm0, %vm5240_vm15 }
0x1027   : > { %vm7806_vm4 = vmpackc.low %vm5247_vm2, %vm5245_vm1  ;;  %vm5252_vm1 = vcmp.eq.s32.totalorder %v10117_v12, %v12474_v57  ;;  %vm5254_vm2 = vcmp.eq.s32.totalorder %v10120_v13, %v12474_v57 }
0x1028   : > { %vm7808_vm9 = vmpackc.low %vm5246_vm6, %vm5244_vm5 }
0x1029   : > { %vm7810_vm10 = vmpackc.low %vm5251_vm8, %vm5249_vm7  ;;  %vm5256_vm7 = vcmp.eq.s32.totalorder %v10123_v14, %v12474_v57  ;;  %vm5258_vm8 = vcmp.eq.s32.totalorder %v10128_v15, %v12474_v57 }
0x102a   : > { %vm7812_vm15 = vmpackc.low %vm5250_vm12, %vm5248_vm11 }
0x102b   : > { %7801 = vmatpush1.bf16.xpose.msk.msra.mxu0 %vm7800_vm13, %v9290_v59  ;;  %8341 = vmatpush1.bf16.xpose.msk.msra.mxu1 %vm7800_vm13, %v9290_v59  ;;  %vm5253_vm13 = vcmp.eq.s32.totalorder %v10117_v12, %v12472_v56  ;;  %vm7816_vm5 = vmpackc.low %vm5254_vm2, %vm5252_vm1 }
0x102c   : > { %7803 = vmatprep.subr.msk.bf16.mxu0 %vm7802_vm14, %v9290_v59  ;;  %8326 = vmatprep.subr.msk.bf16.mxu1 %vm7802_vm14, %v9290_v59  ;;  %vm5255_vm14 = vcmp.eq.s32.totalorder %v10120_v13, %v12472_v56  ;;  %vm7820_vm11 = vmpackc.low %vm5258_vm8, %vm5256_vm7 }
0x102d   : > { %vm7814_vm0 = vmpackc.low %vm5255_vm14, %vm5253_vm13  ;;  %vm5260_vm13 = vcmp.eq.s32.totalorder %v10131_v16, %v12474_v57  ;;  %vm5262_vm14 = vcmp.eq.s32.totalorder %v10134_v17, %v12474_v57 }
0x102e   : > { %vm7824_vm1 = vmpackc.low %vm5262_vm14, %vm5260_vm13 }
0x1033   : > { %7805 = vmatpush1.bf16.xpose.msk.msra.mxu0 %vm7804_vm3, %v9290_v59  ;;  %8342 = vmatpush1.bf16.xpose.msk.msra.mxu1 %vm7804_vm3, %v9290_v59  ;;  %vm5257_vm3 = vcmp.eq.s32.totalorder %v10123_v14, %v12472_v56 }
0x1034   : > { %7807 = vmatprep.subr.msk.bf16.mxu0 %vm7806_vm4, %v9290_v59  ;;  %8327 = vmatprep.subr.msk.bf16.mxu1 %vm7806_vm4, %v9290_v59  ;;  %vm5259_vm4 = vcmp.eq.s32.totalorder %v10128_v15, %v12472_v56 }
0x1035   : > { %vm7818_vm6 = vmpackc.low %vm5259_vm4, %vm5257_vm3  ;;  %vm5264_vm3 = vcmp.eq.s32.totalorder %v10137_v18, %v12474_v57  ;;  %vm5266_vm4 = vcmp.eq.s32.totalorder %v10142_v19, %v12474_v57 }
0x1036   : > { %vm7828_vm7 = vmpackc.low %vm5266_vm4, %vm5264_vm3 }
0x103b   : > { %7809 = vmatpush1.bf16.xpose.msk.msra.mxu0 %vm7808_vm9, %v9290_v59  ;;  %8343 = vmatpush1.bf16.xpose.msk.msra.mxu1 %vm7808_vm9, %v9290_v59  ;;  %vm5261_vm9 = vcmp.eq.s32.totalorder %v10131_v16, %v12472_v56 }
0x103c   : > { %7811 = vmatprep.subr.msk.bf16.mxu0 %vm7810_vm10, %v9290_v59  ;;  %8328 = vmatprep.subr.msk.bf16.mxu1 %vm7810_vm10, %v9290_v59  ;;  %vm5263_vm10 = vcmp.eq.s32.totalorder %v10134_v17, %v12472_v56 }
0x103d   : > { %vm7822_vm12 = vmpackc.low %vm5263_vm10, %vm5261_vm9  ;;  %vm5268_vm9 = vcmp.eq.s32.totalorder %v10145_v20, %v12474_v57  ;;  %vm5270_vm10 = vcmp.eq.s32.totalorder %v10148_v21, %v12474_v57 }
0x103e   : > { %vm7832_vm13 = vmpackc.low %vm5270_vm10, %vm5268_vm9 }
0x1043   : > { %7813 = vmatpush1.bf16.xpose.msk.msra.mxu0 %vm7812_vm15, %v9290_v59  ;;  %8344 = vmatpush1.bf16.xpose.msk.msra.mxu1 %vm7812_vm15, %v9290_v59  ;;  %vm5265_vm15 = vcmp.eq.s32.totalorder %v10137_v18, %v12472_v56 }
0x1044   : > { %7815 = vmatprep.subr.msk.bf16.mxu0 %vm7814_vm0, %v9290_v59  ;;  %8329 = vmatprep.subr.msk.bf16.mxu1 %vm7814_vm0, %v9290_v59  ;;  %vm5267_vm0 = vcmp.eq.s32.totalorder %v10142_v19, %v12472_v56 }
0x1045   : > { %vm7826_vm2 = vmpackc.low %vm5267_vm0, %vm5265_vm15  ;;  %vm5272_vm15 = vcmp.eq.s32.totalorder %v10151_v22, %v12474_v57  ;;  %vm5274_vm0 = vcmp.eq.s32.totalorder %v10155_v23, %v12474_v57 }
0x1046   : > { %vm7836_vm3 = vmpackc.low %vm5274_vm0, %vm5272_vm15 }
0x104b   : > { %7817 = vmatpush1.bf16.xpose.msk.msra.mxu0 %vm7816_vm5, %v9290_v59  ;;  %8345 = vmatpush1.bf16.xpose.msk.msra.mxu1 %vm7816_vm5, %v9290_v59  ;;  %vm5269_vm5 = vcmp.eq.s32.totalorder %v10145_v20, %v12472_v56 }
0x104c   : > { %7819 = vmatprep.subr.msk.bf16.mxu0 %vm7818_vm6, %v9290_v59  ;;  %8330 = vmatprep.subr.msk.bf16.mxu1 %vm7818_vm6, %v9290_v59  ;;  %vm5271_vm6 = vcmp.eq.s32.totalorder %v10148_v21, %v12472_v56 }
0x104d   : > { %vm7830_vm8 = vmpackc.low %vm5271_vm6, %vm5269_vm5  ;;  %vm5276_vm5 = vcmp.eq.s32.totalorder %v10158_v24, %v12474_v57  ;;  %vm5278_vm6 = vcmp.eq.s32.totalorder %v10161_v25, %v12474_v57 }
0x104e   : > { %vm7840_vm9 = vmpackc.low %vm5278_vm6, %vm5276_vm5 }
0x1053   : > { %7821 = vmatpush1.bf16.xpose.msk.msra.mxu0 %vm7820_vm11, %v9290_v59  ;;  %8346 = vmatpush1.bf16.xpose.msk.msra.mxu1 %vm7820_vm11, %v9290_v59  ;;  %vm5273_vm11 = vcmp.eq.s32.totalorder %v10151_v22, %v12472_v56 }
0x1054   : > { %7823 = vmatprep.subr.msk.bf16.mxu0 %vm7822_vm12, %v9290_v59  ;;  %8331 = vmatprep.subr.msk.bf16.mxu1 %vm7822_vm12, %v9290_v59  ;;  %vm5275_vm12 = vcmp.eq.s32.totalorder %v10155_v23, %v12472_v56 }
0x1055   : > { %vm7834_vm14 = vmpackc.low %vm5275_vm12, %vm5273_vm11  ;;  %vm5280_vm11 = vcmp.eq.s32.totalorder %v10164_v26, %v12474_v57  ;;  %vm5282_vm12 = vcmp.eq.s32.totalorder %v10167_v27, %v12474_v57 }
0x1056   : > { %vm7844_vm15 = vmpackc.low %vm5282_vm12, %vm5280_vm11 }
0x105b   : > { %7825 = vmatpush1.bf16.xpose.msk.msra.mxu0 %vm7824_vm1, %v9290_v59  ;;  %8347 = vmatpush1.bf16.xpose.msk.msra.mxu1 %vm7824_vm1, %v9290_v59  ;;  %vm5277_vm1 = vcmp.eq.s32.totalorder %v10158_v24, %v12472_v56 }
0x105c   : > { %7827 = vmatprep.subr.msk.bf16.mxu0 %vm7826_vm2, %v9290_v59  ;;  %8332 = vmatprep.subr.msk.bf16.mxu1 %vm7826_vm2, %v9290_v59  ;;  %vm5279_vm2 = vcmp.eq.s32.totalorder %v10161_v25, %v12472_v56 }
0x105d   : > { %vm7838_vm4 = vmpackc.low %vm5279_vm2, %vm5277_vm1  ;;  %vm5284_vm1 = vcmp.eq.s32.totalorder %v10170_v28, %v12474_v57  ;;  %vm5286_vm2 = vcmp.eq.s32.totalorder %v10173_v29, %v12474_v57 }
0x105e   : > { %vm7848_vm5 = vmpackc.low %vm5286_vm2, %vm5284_vm1 }
0x1063   : > { %7829 = vmatpush1.bf16.xpose.msk.msra.mxu0 %vm7828_vm7, %v9290_v59  ;;  %8348 = vmatpush1.bf16.xpose.msk.msra.mxu1 %vm7828_vm7, %v9290_v59  ;;  %vm5281_vm7 = vcmp.eq.s32.totalorder %v10164_v26, %v12472_v56 }
0x1064   : > { %7831 = vmatprep.subr.msk.bf16.mxu0 %vm7830_vm8, %v9290_v59  ;;  %8333 = vmatprep.subr.msk.bf16.mxu1 %vm7830_vm8, %v9290_v59  ;;  %vm5283_vm8 = vcmp.eq.s32.totalorder %v10167_v27, %v12472_v56 }
0x1065   : > { %vm7842_vm10 = vmpackc.low %vm5283_vm8, %vm5281_vm7  ;;  %vm5288_vm7 = vcmp.eq.s32.totalorder %v10176_v30, %v12474_v57  ;;  %vm5290_vm8 = vcmp.eq.s32.totalorder %v10181_v31, %v12474_v57 }
0x1066   : > { %vm7852_vm11 = vmpackc.low %vm5290_vm8, %vm5288_vm7 }
0x106b   : > { %7833 = vmatpush1.bf16.xpose.msk.msra.mxu0 %vm7832_vm13, %v9290_v59  ;;  %8349 = vmatpush1.bf16.xpose.msk.msra.mxu1 %vm7832_vm13, %v9290_v59  ;;  %vm5285_vm13 = vcmp.eq.s32.totalorder %v10170_v28, %v12472_v56 }
0x106c   : > { %7835 = vmatprep.subr.msk.bf16.mxu0 %vm7834_vm14, %v9290_v59  ;;  %8334 = vmatprep.subr.msk.bf16.mxu1 %vm7834_vm14, %v9290_v59  ;;  %vm5287_vm14 = vcmp.eq.s32.totalorder %v10173_v29, %v12472_v56 }
0x106d   : > { %vm7846_vm0 = vmpackc.low %vm5287_vm14, %vm5285_vm13  ;;  %vm5292_vm13 = vcmp.eq.s32.totalorder %v10184_v32, %v12474_v57  ;;  %vm5294_vm14 = vcmp.eq.s32.totalorder %v10187_v33, %v12474_v57 }
0x1073   : > { %7837 = vmatpush1.bf16.xpose.msk.msra.mxu0 %vm7836_vm3, %v9290_v59  ;;  %8350 = vmatpush1.bf16.xpose.msk.msra.mxu1 %vm7836_vm3, %v9290_v59  ;;  %vm5289_vm3 = vcmp.eq.s32.totalorder %v10176_v30, %v12472_v56 }
0x1074   : > { %7839 = vmatprep.subr.msk.bf16.mxu0 %vm7838_vm4, %v9290_v59  ;;  %8335 = vmatprep.subr.msk.bf16.mxu1 %vm7838_vm4, %v9290_v59  ;;  %vm5291_vm4 = vcmp.eq.s32.totalorder %v10181_v31, %v12472_v56 }
0x1075   : > { %vm7850_vm6 = vmpackc.low %vm5291_vm4, %vm5289_vm3 }
0x107b   : > { %7841 = vmatpush1.bf16.xpose.msk.msra.mxu0 %vm7840_vm9, %v9290_v59  ;;  %8351 = vmatpush1.bf16.xpose.msk.msra.mxu1 %vm7840_vm9, %v9290_v59  ;;  %vm5293_vm9 = vcmp.eq.s32.totalorder %v10184_v32, %v12472_v56 }
0x107c   : > { %7843 = vmatprep.subr.msk.bf16.mxu0 %vm7842_vm10, %v9290_v59  ;;  %8336 = vmatprep.subr.msk.bf16.mxu1 %vm7842_vm10, %v9290_v59  ;;  %vm5295_vm10 = vcmp.eq.s32.totalorder %v10187_v33, %v12472_v56 }
0x107d   : > { %vm7854_vm12 = vmpackc.low %vm5295_vm10, %vm5293_vm9 }
0x1083   : > { %7845 = vmatpush1.bf16.xpose.msk.msra.mxu0 %vm7844_vm15, %v9290_v59  ;;  %8352 = vmatpush1.bf16.xpose.msk.msra.mxu1 %vm7844_vm15, %v9290_v59  ;;  %vm7856_vm15 = vmpackc.low %vm5294_vm14, %vm5292_vm13 }
0x1084   : > { %7847 = vmatprep.subr.msk.bf16.mxu0 %vm7846_vm0, %v9290_v59  ;;  %8337 = vmatprep.subr.msk.bf16.mxu1 %vm7846_vm0, %v9290_v59 }
0x108b   : > { %7849 = vmatpush1.bf16.xpose.msk.msra.mxu0 %vm7848_vm5, %v9290_v59  ;;  %8353 = vmatpush1.bf16.xpose.msk.msra.mxu1 %vm7848_vm5, %v9290_v59 }
0x108c   : > { %7851 = vmatprep.subr.msk.bf16.mxu0 %vm7850_vm6, %v9290_v59  ;;  %8338 = vmatprep.subr.msk.bf16.mxu1 %vm7850_vm6, %v9290_v59 }
0x1093   : > { %7853 = vmatpush1.bf16.xpose.msk.msra.mxu0 %vm7852_vm11, %v9290_v59  ;;  %8354 = vmatpush1.bf16.xpose.msk.msra.mxu1 %vm7852_vm11, %v9290_v59 }
0x1094   : > { %7855 = vmatprep.subr.msk.bf16.mxu0 %vm7854_vm12, %v9290_v59  ;;  %8339 = vmatprep.subr.msk.bf16.mxu1 %vm7854_vm12, %v9290_v59 }
0x109b   : > { %7857 = vmatpush1.bf16.xpose.msk.msra.mxu0 %vm7856_vm15, %v9290_v59  ;;  %8355 = vmatpush1.bf16.xpose.msk.msra.mxu1 %vm7856_vm15, %v9290_v59  ;;  %v5468_v59 = vld [vmem:[#allocation2 + $0x60] sm:$0xff] }
0x10a2   : > { %5553 = vmatmul.mubr.bf16.vlgmr.msra.gmra.mrb[0].mxu0 %v8785_v60  ;;  %5573 = vmatmul.mubr.bf16.vlgmr.msra.gmra.mrb[0].mxu1 %v8788_v61  ;;  %v5461_v60 = vld [vmem:[#allocation2 + $0x28] sm:$0xff] }
0x10a3   : > { %5562 = vmatprep.mubr.bf16.mxu0 %v8791_v62  ;;  %5582 = vmatprep.mubr.bf16.mxu1 %v8793_v63  ;;  %v5469_v61 = vld [vmem:[#allocation2 + $0x68] sm:$0xff] }
0x10aa   : > { %5563 = vmatmul.mubr.bf16.gmra.mrb[4].mxu0 %v8795_v0  ;;  %5583 = vmatmul.mubr.bf16.gmra.mrb[4].mxu1 %v8796_v34  ;;  %v5462_v0 = vld [vmem:[#allocation2 + $0x30] sm:$0xff] }
0x10ab   : > { %v5470_v34 = vld [vmem:[#allocation2 + $0x70] sm:$0xff] }
0x1175   : > { %v5554_v39 = vpop.f32.mrb[0].mxu0  ;;  %v5574_v40 = vpop.f32.mrb[0].mxu1 }
0x1176   : > { %v5593_v43 = vadd.f32 %v5554_v39, %v5456_v35  ;;  %v5601_v44 = vadd.f32 %v5574_v40, %v5464_v36  ;;  %v5556_v45 = vpop.f32.mrb[1].mxu0  ;;  %v5576_v46 = vpop.f32.mrb[1].mxu1  ;;  %v5463_v39 = vld [vmem:[#allocation2 + $0x38] sm:$0xff] }
0x1177   : > { %v5594_v49 = vadd.f32 %v5556_v45, %v5457_v37  ;;  %v5602_v50 = vadd.f32 %v5576_v46, %v5465_v38  ;;  %v5558_v51 = vpop.f32.mrb[2].mxu0  ;;  %v5578_v52 = vpop.f32.mrb[2].mxu1  ;;  %v5471_v40 = vld [vmem:[#allocation2 + $0x78] sm:$0xff] }
0x1178   : > { %5609 = vst [vmem:[#allocation2] sm:$0xff] %v5593_v43  ;;  %5617 = vst [vmem:[#allocation2 + $0x40] sm:$0xff] %v5601_v44  ;;  %v5595_v53 = vadd.f32 %v5558_v51, %v5458_v41  ;;  %v5603_v54 = vadd.f32 %v5578_v52, %v5466_v42  ;;  %v5560_v55 = vpop.f32.mrb[3].mxu0  ;;  %v5580_v1 = vpop.f32.mrb[3].mxu1 }
0x1179   : > { %5610 = vst [vmem:[#allocation2 + $0x8] sm:$0xff] %v5594_v49  ;;  %5618 = vst [vmem:[#allocation2 + $0x48] sm:$0xff] %v5602_v50  ;;  %v5596_v56 = vadd.f32 %v5560_v55, %v5459_v47  ;;  %v5604_v57 = vadd.f32 %v5580_v1, %v5467_v48 }
0x117a   : > { %5611 = vst [vmem:[#allocation2 + $0x10] sm:$0xff] %v5595_v53  ;;  %5619 = vst [vmem:[#allocation2 + $0x50] sm:$0xff] %v5603_v54 }
0x117b   : > { %5612 = vst [vmem:[#allocation2 + $0x18] sm:$0xff] %v5596_v56  ;;  %5620 = vst [vmem:[#allocation2 + $0x58] sm:$0xff] %v5604_v57 }
0x117d   : > { %v5564_v62 = vpop.f32.mrb[4].mxu0  ;;  %v5584_v63 = vpop.f32.mrb[4].mxu1 }
0x117e   : > { %v5597_v35 = vadd.f32 %v5564_v62, %v5460_v58  ;;  %v5605_v36 = vadd.f32 %v5584_v63, %v5468_v59  ;;  %v5566_v37 = vpop.f32.mrb[5].mxu0  ;;  %v5586_v38 = vpop.f32.mrb[5].mxu1 }
0x117f   : > { %v5598_v41 = vadd.f32 %v5566_v37, %v5461_v60  ;;  %v5606_v42 = vadd.f32 %v5586_v38, %v5469_v61  ;;  %v5568_v43 = vpop.f32.mrb[6].mxu0  ;;  %v5588_v44 = vpop.f32.mrb[6].mxu1 }
0x1180   : > { %5613 = vst [vmem:[#allocation2 + $0x20] sm:$0xff] %v5597_v35  ;;  %5621 = vst [vmem:[#allocation2 + $0x60] sm:$0xff] %v5605_v36  ;;  %v5599_v45 = vadd.f32 %v5568_v43, %v5462_v0  ;;  %v5607_v46 = vadd.f32 %v5588_v44, %v5470_v34  ;;  %v5570_v47 = vpop.f32.mrb[7].mxu0  ;;  %v5590_v48 = vpop.f32.mrb[7].mxu1 }
0x1181   : > { %5614 = vst [vmem:[#allocation2 + $0x28] sm:$0xff] %v5598_v41  ;;  %5622 = vst [vmem:[#allocation2 + $0x68] sm:$0xff] %v5606_v42  ;;  %v5600_v49 = vadd.f32 %v5570_v47, %v5463_v39  ;;  %v5608_v50 = vadd.f32 %v5590_v48, %v5471_v40 }
0x1182   : > { %5615 = vst [vmem:[#allocation2 + $0x30] sm:$0xff] %v5599_v45  ;;  %5623 = vst [vmem:[#allocation2 + $0x70] sm:$0xff] %v5607_v46 }
0x1183   : > { %5616 = vst [vmem:[#allocation2 + $0x38] sm:$0xff] %v5600_v49  ;;  %5624 = vst [vmem:[#allocation2 + $0x78] sm:$0xff] %v5608_v50 }
0x1184 PF: > { %p5625_p7 = scmp.lt.s32.totalorder %s10860_s22, %s11997_s15  ;;  %p5628_p1 = scmp.gt.s32.totalorder %s10865_s1, %s11988_s11 }
0x1186   : > { %p5626_p4 = pnand %p5625_p7, %p4388_p0 }
0x1188   : > { %p5627_p8 = pneg %p5626_p4 }
0x118a   : > { %p5629_p12 = pnand %p5628_p1, %p5627_p8 }
0x118b   : > { %v5633_v51 = vld [vmem:[%s10197_s10] sm:$0x3] (!%p5629_p12)  ;;  %v5634_v52 = vstv (!%p5629_p12), %s12000_s12  ;;  %v5642_v53 = vsub.s32 (!%p5629_p12), 1, %v10074_v2  ;;  %v5638_v54 = vsub.s32 (!%p5629_p12), 0, %v10074_v2  ;;  %v8799_v1 = vld [vmem:[%s10041_s8 + $0x4] ss:$8 sps:$4 sm:$0xff] (!%p5629_p12)  }
0x118c   : > { %5632 = sbr.rel (%p5629_p12) target bundleno = 4852 (0x12f4), region = 124  ;;  %v5635_v55 = vsub.s32 (!%p5629_p12), %v5633_v51, %v5634_v52  ;;  %v8802_v58 = vld [vmem:[%s10041_s8 + $0x24] ss:$8 sps:$4 sm:$0xff] (!%p5629_p12)   ;;  %5964 = vmatprep.mubr.bf16.mxu0 (!%p5629_p12), %v8799_v1  ;;  %v9291_v59 = vmov (!%p5629_p12), 1.0|1.0   ;;  %v5875_v39 = vld [vmem:[#allocation2 + $0x38] sm:$0xff] (!%p5629_p12) }
0x118d   : > { %5984 = vmatprep.mubr.bf16.mxu1 (!%p5629_p12), %v8802_v58  ;;  %v5873_v60 = vld [vmem:[#allocation2 + $0x28] sm:$0xff] (!%p5629_p12)  ;;  %v5874_v0 = vld [vmem:[#allocation2 + $0x30] sm:$0xff] (!%p5629_p12)  ;;  %v5883_v40 = vld [vmem:[#allocation2 + $0x78] sm:$0xff] (!%p5629_p12) }
0x118e   : > { %v12687_v56 = vrot.slane (!%p5629_p12), %v5635_v55, %v5642_v53  ;;  %v12689_v57 = vrot.slane (!%p5629_p12), %v5635_v55, %v5638_v54  ;;  %v5881_v61 = vld [vmem:[#allocation2 + $0x68] sm:$0xff] (!%p5629_p12)  ;;  %v5882_v34 = vld [vmem:[#allocation2 + $0x70] sm:$0xff] (!%p5629_p12) }
0x1190   : > { %vm5645_vm0 = vcmp.eq.s32.totalorder (!%p5629_p12), %v10074_v2, %v12687_v56  ;;  %vm5647_vm1 = vcmp.eq.s32.totalorder (!%p5629_p12), %v10087_v3, %v12687_v56  ;;  %vm5644_vm2 = vcmp.eq.s32.totalorder (!%p5629_p12), %v10074_v2, %v12689_v57  ;;  %vm5646_vm3 = vcmp.eq.s32.totalorder (!%p5629_p12), %v10087_v3, %v12689_v57  ;;  %v8797_v2 = vld [vmem:[%s10041_s8] ss:$8 sps:$4 sm:$0xff] (!%p5629_p12)  }
0x1191   : > { %vm7930_vm4 = vmpackc.low (!%p5629_p12), %vm5647_vm1, %vm5645_vm0  ;;  %vm5649_vm5 = vcmp.eq.s32.totalorder (!%p5629_p12), %v10090_v4, %v12687_v56  ;;  %vm5651_vm6 = vcmp.eq.s32.totalorder (!%p5629_p12), %v10093_v5, %v12687_v56  ;;  %vm5648_vm9 = vcmp.eq.s32.totalorder (!%p5629_p12), %v10090_v4, %v12689_v57  ;;  %vm5650_vm10 = vcmp.eq.s32.totalorder (!%p5629_p12), %v10093_v5, %v12689_v57  ;;  %v8800_v3 = vld [vmem:[%s10041_s8 + $0x20] ss:$8 sps:$4 sm:$0xff] (!%p5629_p12)   ;;  %v8803_v4 = vld [vmem:[%s10041_s8 + $0x14] ss:$8 sps:$4 sm:$0xff] (!%p5629_p12)  }
0x1192   : > { %7931 = vmatprep.subr.msk.bf16.mxu0 (!%p5629_p12), %vm7930_vm4, %v9291_v59  ;;  %8356 = vmatprep.subr.msk.bf16.mxu1 (!%p5629_p12), %vm7930_vm4, %v9291_v59  ;;  %vm7932_vm7 = vmpackc.low (!%p5629_p12), %vm5646_vm3, %vm5644_vm2  ;;  %vm5653_vm11 = vcmp.eq.s32.totalorder (!%p5629_p12), %v10096_v6, %v12687_v56  ;;  %vm5655_vm12 = vcmp.eq.s32.totalorder (!%p5629_p12), %v10102_v7, %v12687_v56  ;;  %vm5652_vm15 = vcmp.eq.s32.totalorder (!%p5629_p12), %v10096_v6, %v12689_v57  ;;  %v8805_v5 = vld [vmem:[%s10041_s8 + $0x34] ss:$8 sps:$4 sm:$0xff] (!%p5629_p12)   ;;  %v8807_v6 = vld [vmem:[%s10041_s8 + $0x10] ss:$8 sps:$4 sm:$0xff] (!%p5629_p12)  }
0x1193   : > { %7933 = vmatpush1.bf16.xpose.msk.msra.mxu0 %vm7932_vm7, %v9291_v59  ;;  %8372 = vmatpush1.bf16.xpose.msk.msra.mxu1 %vm7932_vm7, %v9291_v59  ;;  %vm7934_vm8 = vmpackc.low %vm5651_vm6, %vm5649_vm5  ;;  %vm5654_vm0 = vcmp.eq.s32.totalorder %v10102_v7, %v12689_v57  ;;  %vm5657_vm1 = vcmp.eq.s32.totalorder %v10105_v8, %v12687_v56  ;;  %vm5659_vm2 = vcmp.eq.s32.totalorder %v10108_v9, %v12687_v56  ;;  %v8808_v7 = vld [vmem:[%s10041_s8 + $0x30] ss:$8 sps:$4 sm:$0xff]  }
0x1194   : > { %7935 = vmatprep.subr.msk.bf16.mxu0 %vm7934_vm8, %v9291_v59  ;;  %8357 = vmatprep.subr.msk.bf16.mxu1 %vm7934_vm8, %v9291_v59  ;;  %vm7936_vm13 = vmpackc.low %vm5650_vm10, %vm5648_vm9  ;;  %vm5656_vm5 = vcmp.eq.s32.totalorder %v10105_v8, %v12689_v57  ;;  %vm5658_vm6 = vcmp.eq.s32.totalorder %v10108_v9, %v12689_v57  ;;  %vm5661_vm7 = vcmp.eq.s32.totalorder %v10111_v10, %v12687_v56  ;;  %v5868_v8 = vld [vmem:[#allocation2] sm:$0xff] }
0x1195   : > { %vm7938_vm14 = vmpackc.low %vm5655_vm12, %vm5653_vm11  ;;  %vm5663_vm8 = vcmp.eq.s32.totalorder %v10114_v11, %v12687_v56  ;;  %vm5660_vm11 = vcmp.eq.s32.totalorder %v10111_v10, %v12689_v57  ;;  %vm5662_vm12 = vcmp.eq.s32.totalorder %v10114_v11, %v12689_v57  ;;  %v5876_v9 = vld [vmem:[#allocation2 + $0x40] sm:$0xff]  ;;  %v5869_v10 = vld [vmem:[#allocation2 + $0x8] sm:$0xff] }
0x1196   : > { %vm7940_vm3 = vmpackc.low %vm5654_vm0, %vm5652_vm15  ;;  %v5877_v11 = vld [vmem:[#allocation2 + $0x48] sm:$0xff] }
0x1197   : > { %vm7942_vm4 = vmpackc.low %vm5659_vm2, %vm5657_vm1  ;;  %vm5664_vm1 = vcmp.eq.s32.totalorder %v10117_v12, %v12689_v57  ;;  %vm5666_vm2 = vcmp.eq.s32.totalorder %v10120_v13, %v12689_v57 }
0x1198   : > { %vm7944_vm9 = vmpackc.low %vm5658_vm6, %vm5656_vm5 }
0x1199   : > { %vm7946_vm10 = vmpackc.low %vm5663_vm8, %vm5661_vm7  ;;  %vm5668_vm7 = vcmp.eq.s32.totalorder %v10123_v14, %v12689_v57  ;;  %vm5670_vm8 = vcmp.eq.s32.totalorder %v10128_v15, %v12689_v57 }
0x119a   : > { %vm7948_vm15 = vmpackc.low %vm5662_vm12, %vm5660_vm11 }
0x119b   : > { %7937 = vmatpush1.bf16.xpose.msk.msra.mxu0 %vm7936_vm13, %v9291_v59  ;;  %8373 = vmatpush1.bf16.xpose.msk.msra.mxu1 %vm7936_vm13, %v9291_v59  ;;  %vm5665_vm13 = vcmp.eq.s32.totalorder %v10117_v12, %v12687_v56  ;;  %vm7952_vm5 = vmpackc.low %vm5666_vm2, %vm5664_vm1 }
0x119c   : > { %7939 = vmatprep.subr.msk.bf16.mxu0 %vm7938_vm14, %v9291_v59  ;;  %8358 = vmatprep.subr.msk.bf16.mxu1 %vm7938_vm14, %v9291_v59  ;;  %vm5667_vm14 = vcmp.eq.s32.totalorder %v10120_v13, %v12687_v56  ;;  %vm7956_vm11 = vmpackc.low %vm5670_vm8, %vm5668_vm7 }
0x119d   : > { %vm7950_vm0 = vmpackc.low %vm5667_vm14, %vm5665_vm13  ;;  %vm5672_vm13 = vcmp.eq.s32.totalorder %v10131_v16, %v12689_v57  ;;  %vm5674_vm14 = vcmp.eq.s32.totalorder %v10134_v17, %v12689_v57 }
0x119e   : > { %vm7960_vm1 = vmpackc.low %vm5674_vm14, %vm5672_vm13 }
0x11a3   : > { %7941 = vmatpush1.bf16.xpose.msk.msra.mxu0 %vm7940_vm3, %v9291_v59  ;;  %8374 = vmatpush1.bf16.xpose.msk.msra.mxu1 %vm7940_vm3, %v9291_v59  ;;  %vm5669_vm3 = vcmp.eq.s32.totalorder %v10123_v14, %v12687_v56  ;;  %v5870_v14 = vld [vmem:[#allocation2 + $0x10] sm:$0xff] }
0x11a4   : > { %7943 = vmatprep.subr.msk.bf16.mxu0 %vm7942_vm4, %v9291_v59  ;;  %8359 = vmatprep.subr.msk.bf16.mxu1 %vm7942_vm4, %v9291_v59  ;;  %vm5671_vm4 = vcmp.eq.s32.totalorder %v10128_v15, %v12687_v56  ;;  %v5878_v15 = vld [vmem:[#allocation2 + $0x50] sm:$0xff] }
0x11a5   : > { %vm7954_vm6 = vmpackc.low %vm5671_vm4, %vm5669_vm3  ;;  %vm5676_vm3 = vcmp.eq.s32.totalorder %v10137_v18, %v12689_v57  ;;  %vm5678_vm4 = vcmp.eq.s32.totalorder %v10142_v19, %v12689_v57 }
0x11a6   : > { %vm7964_vm7 = vmpackc.low %vm5678_vm4, %vm5676_vm3 }
0x11ab   : > { %7945 = vmatpush1.bf16.xpose.msk.msra.mxu0 %vm7944_vm9, %v9291_v59  ;;  %8375 = vmatpush1.bf16.xpose.msk.msra.mxu1 %vm7944_vm9, %v9291_v59  ;;  %vm5673_vm9 = vcmp.eq.s32.totalorder %v10131_v16, %v12687_v56 }
0x11ac   : > { %7947 = vmatprep.subr.msk.bf16.mxu0 %vm7946_vm10, %v9291_v59  ;;  %8360 = vmatprep.subr.msk.bf16.mxu1 %vm7946_vm10, %v9291_v59  ;;  %vm5675_vm10 = vcmp.eq.s32.totalorder %v10134_v17, %v12687_v56 }
0x11ad   : > { %vm7958_vm12 = vmpackc.low %vm5675_vm10, %vm5673_vm9  ;;  %vm5680_vm9 = vcmp.eq.s32.totalorder %v10145_v20, %v12689_v57  ;;  %vm5682_vm10 = vcmp.eq.s32.totalorder %v10148_v21, %v12689_v57 }
0x11ae   : > { %vm7968_vm13 = vmpackc.low %vm5682_vm10, %vm5680_vm9 }
0x11b3   : > { %7949 = vmatpush1.bf16.xpose.msk.msra.mxu0 %vm7948_vm15, %v9291_v59  ;;  %8376 = vmatpush1.bf16.xpose.msk.msra.mxu1 %vm7948_vm15, %v9291_v59  ;;  %vm5677_vm15 = vcmp.eq.s32.totalorder %v10137_v18, %v12687_v56 }
0x11b4   : > { %7951 = vmatprep.subr.msk.bf16.mxu0 %vm7950_vm0, %v9291_v59  ;;  %8361 = vmatprep.subr.msk.bf16.mxu1 %vm7950_vm0, %v9291_v59  ;;  %vm5679_vm0 = vcmp.eq.s32.totalorder %v10142_v19, %v12687_v56 }
0x11b5   : > { %vm7962_vm2 = vmpackc.low %vm5679_vm0, %vm5677_vm15  ;;  %vm5684_vm15 = vcmp.eq.s32.totalorder %v10151_v22, %v12689_v57  ;;  %vm5686_vm0 = vcmp.eq.s32.totalorder %v10155_v23, %v12689_v57 }
0x11b6   : > { %vm7972_vm3 = vmpackc.low %vm5686_vm0, %vm5684_vm15 }
0x11bb   : > { %7953 = vmatpush1.bf16.xpose.msk.msra.mxu0 %vm7952_vm5, %v9291_v59  ;;  %8377 = vmatpush1.bf16.xpose.msk.msra.mxu1 %vm7952_vm5, %v9291_v59  ;;  %vm5681_vm5 = vcmp.eq.s32.totalorder %v10145_v20, %v12687_v56  ;;  %v5871_v20 = vld [vmem:[#allocation2 + $0x18] sm:$0xff] }
0x11bc   : > { %7955 = vmatprep.subr.msk.bf16.mxu0 %vm7954_vm6, %v9291_v59  ;;  %8362 = vmatprep.subr.msk.bf16.mxu1 %vm7954_vm6, %v9291_v59  ;;  %vm5683_vm6 = vcmp.eq.s32.totalorder %v10148_v21, %v12687_v56  ;;  %v5879_v21 = vld [vmem:[#allocation2 + $0x58] sm:$0xff] }
0x11bd   : > { %vm7966_vm8 = vmpackc.low %vm5683_vm6, %vm5681_vm5  ;;  %vm5688_vm5 = vcmp.eq.s32.totalorder %v10158_v24, %v12689_v57  ;;  %vm5690_vm6 = vcmp.eq.s32.totalorder %v10161_v25, %v12689_v57 }
0x11be   : > { %vm7976_vm9 = vmpackc.low %vm5690_vm6, %vm5688_vm5 }
0x11c3   : > { %7957 = vmatpush1.bf16.xpose.msk.msra.mxu0 %vm7956_vm11, %v9291_v59  ;;  %8378 = vmatpush1.bf16.xpose.msk.msra.mxu1 %vm7956_vm11, %v9291_v59  ;;  %vm5685_vm11 = vcmp.eq.s32.totalorder %v10151_v22, %v12687_v56 }
0x11c4   : > { %7959 = vmatprep.subr.msk.bf16.mxu0 %vm7958_vm12, %v9291_v59  ;;  %8363 = vmatprep.subr.msk.bf16.mxu1 %vm7958_vm12, %v9291_v59  ;;  %vm5687_vm12 = vcmp.eq.s32.totalorder %v10155_v23, %v12687_v56 }
0x11c5   : > { %vm7970_vm14 = vmpackc.low %vm5687_vm12, %vm5685_vm11  ;;  %vm5692_vm11 = vcmp.eq.s32.totalorder %v10164_v26, %v12689_v57  ;;  %vm5694_vm12 = vcmp.eq.s32.totalorder %v10167_v27, %v12689_v57 }
0x11c6   : > { %vm7980_vm15 = vmpackc.low %vm5694_vm12, %vm5692_vm11 }
0x11cb   : > { %7961 = vmatpush1.bf16.xpose.msk.msra.mxu0 %vm7960_vm1, %v9291_v59  ;;  %8379 = vmatpush1.bf16.xpose.msk.msra.mxu1 %vm7960_vm1, %v9291_v59  ;;  %vm5689_vm1 = vcmp.eq.s32.totalorder %v10158_v24, %v12687_v56 }
0x11cc   : > { %7963 = vmatprep.subr.msk.bf16.mxu0 %vm7962_vm2, %v9291_v59  ;;  %8364 = vmatprep.subr.msk.bf16.mxu1 %vm7962_vm2, %v9291_v59  ;;  %vm5691_vm2 = vcmp.eq.s32.totalorder %v10161_v25, %v12687_v56 }
0x11cd   : > { %vm7974_vm4 = vmpackc.low %vm5691_vm2, %vm5689_vm1  ;;  %vm5696_vm1 = vcmp.eq.s32.totalorder %v10170_v28, %v12689_v57  ;;  %vm5698_vm2 = vcmp.eq.s32.totalorder %v10173_v29, %v12689_v57 }
0x11ce   : > { %vm7984_vm5 = vmpackc.low %vm5698_vm2, %vm5696_vm1 }
0x11d3   : > { %7965 = vmatpush1.bf16.xpose.msk.msra.mxu0 %vm7964_vm7, %v9291_v59  ;;  %8380 = vmatpush1.bf16.xpose.msk.msra.mxu1 %vm7964_vm7, %v9291_v59  ;;  %vm5693_vm7 = vcmp.eq.s32.totalorder %v10164_v26, %v12687_v56 }
0x11d4   : > { %7967 = vmatprep.subr.msk.bf16.mxu0 %vm7966_vm8, %v9291_v59  ;;  %8365 = vmatprep.subr.msk.bf16.mxu1 %vm7966_vm8, %v9291_v59  ;;  %vm5695_vm8 = vcmp.eq.s32.totalorder %v10167_v27, %v12687_v56 }
0x11d5   : > { %vm7978_vm10 = vmpackc.low %vm5695_vm8, %vm5693_vm7  ;;  %vm5700_vm7 = vcmp.eq.s32.totalorder %v10176_v30, %v12689_v57  ;;  %vm5702_vm8 = vcmp.eq.s32.totalorder %v10181_v31, %v12689_v57 }
0x11d6   : > { %vm7988_vm11 = vmpackc.low %vm5702_vm8, %vm5700_vm7 }
0x11db   : > { %7969 = vmatpush1.bf16.xpose.msk.msra.mxu0 %vm7968_vm13, %v9291_v59  ;;  %8381 = vmatpush1.bf16.xpose.msk.msra.mxu1 %vm7968_vm13, %v9291_v59  ;;  %vm5697_vm13 = vcmp.eq.s32.totalorder %v10170_v28, %v12687_v56 }
0x11dc   : > { %7971 = vmatprep.subr.msk.bf16.mxu0 %vm7970_vm14, %v9291_v59  ;;  %8366 = vmatprep.subr.msk.bf16.mxu1 %vm7970_vm14, %v9291_v59  ;;  %vm5699_vm14 = vcmp.eq.s32.totalorder %v10173_v29, %v12687_v56 }
0x11dd   : > { %vm7982_vm0 = vmpackc.low %vm5699_vm14, %vm5697_vm13  ;;  %vm5704_vm13 = vcmp.eq.s32.totalorder %v10184_v32, %v12689_v57  ;;  %vm5706_vm14 = vcmp.eq.s32.totalorder %v10187_v33, %v12689_v57 }
0x11e3   : > { %7973 = vmatpush1.bf16.xpose.msk.msra.mxu0 %vm7972_vm3, %v9291_v59  ;;  %8382 = vmatpush1.bf16.xpose.msk.msra.mxu1 %vm7972_vm3, %v9291_v59  ;;  %vm5701_vm3 = vcmp.eq.s32.totalorder %v10176_v30, %v12687_v56 }
0x11e4   : > { %7975 = vmatprep.subr.msk.bf16.mxu0 %vm7974_vm4, %v9291_v59  ;;  %8367 = vmatprep.subr.msk.bf16.mxu1 %vm7974_vm4, %v9291_v59  ;;  %vm5703_vm4 = vcmp.eq.s32.totalorder %v10181_v31, %v12687_v56 }
0x11e5   : > { %vm7986_vm6 = vmpackc.low %vm5703_vm4, %vm5701_vm3 }
0x11eb   : > { %7977 = vmatpush1.bf16.xpose.msk.msra.mxu0 %vm7976_vm9, %v9291_v59  ;;  %8383 = vmatpush1.bf16.xpose.msk.msra.mxu1 %vm7976_vm9, %v9291_v59  ;;  %vm5705_vm9 = vcmp.eq.s32.totalorder %v10184_v32, %v12687_v56  ;;  %v5872_v32 = vld [vmem:[#allocation2 + $0x20] sm:$0xff] }
0x11ec   : > { %7979 = vmatprep.subr.msk.bf16.mxu0 %vm7978_vm10, %v9291_v59  ;;  %8368 = vmatprep.subr.msk.bf16.mxu1 %vm7978_vm10, %v9291_v59  ;;  %vm5707_vm10 = vcmp.eq.s32.totalorder %v10187_v33, %v12687_v56  ;;  %v5880_v33 = vld [vmem:[#allocation2 + $0x60] sm:$0xff] }
0x11ed   : > { %vm7990_vm12 = vmpackc.low %vm5707_vm10, %vm5705_vm9 }
0x11f3   : > { %7981 = vmatpush1.bf16.xpose.msk.msra.mxu0 %vm7980_vm15, %v9291_v59  ;;  %8384 = vmatpush1.bf16.xpose.msk.msra.mxu1 %vm7980_vm15, %v9291_v59  ;;  %vm7992_vm15 = vmpackc.low %vm5706_vm14, %vm5704_vm13 }
0x11f4   : > { %7983 = vmatprep.subr.msk.bf16.mxu0 %vm7982_vm0, %v9291_v59  ;;  %8369 = vmatprep.subr.msk.bf16.mxu1 %vm7982_vm0, %v9291_v59 }
0x11fb   : > { %7985 = vmatpush1.bf16.xpose.msk.msra.mxu0 %vm7984_vm5, %v9291_v59  ;;  %8385 = vmatpush1.bf16.xpose.msk.msra.mxu1 %vm7984_vm5, %v9291_v59 }
0x11fc   : > { %7987 = vmatprep.subr.msk.bf16.mxu0 %vm7986_vm6, %v9291_v59  ;;  %8370 = vmatprep.subr.msk.bf16.mxu1 %vm7986_vm6, %v9291_v59 }
0x1203   : > { %7989 = vmatpush1.bf16.xpose.msk.msra.mxu0 %vm7988_vm11, %v9291_v59  ;;  %8386 = vmatpush1.bf16.xpose.msk.msra.mxu1 %vm7988_vm11, %v9291_v59 }
0x1204   : > { %7991 = vmatprep.subr.msk.bf16.mxu0 %vm7990_vm12, %v9291_v59  ;;  %8371 = vmatprep.subr.msk.bf16.mxu1 %vm7990_vm12, %v9291_v59 }
0x120b   : > { %7993 = vmatpush1.bf16.xpose.msk.msra.mxu0 %vm7992_vm15, %v9291_v59  ;;  %8387 = vmatpush1.bf16.xpose.msk.msra.mxu1 %vm7992_vm15, %v9291_v59 }
0x1212   : > { %5965 = vmatmul.mubr.bf16.vlgmr.msra.gmra.mrb[0].mxu0 %v8797_v2  ;;  %5985 = vmatmul.mubr.bf16.vlgmr.msra.gmra.mrb[0].mxu1 %v8800_v3 }
0x1213   : > { %5974 = vmatprep.mubr.bf16.mxu0 %v8803_v4  ;;  %5994 = vmatprep.mubr.bf16.mxu1 %v8805_v5 }
0x121a   : > { %5975 = vmatmul.mubr.bf16.gmra.mrb[4].mxu0 %v8807_v6  ;;  %5995 = vmatmul.mubr.bf16.gmra.mrb[4].mxu1 %v8808_v7 }
0x12e5   : > { %v5966_v12 = vpop.f32.mrb[0].mxu0  ;;  %v5986_v13 = vpop.f32.mrb[0].mxu1 }
0x12e6   : > { %v6005_v16 = vadd.f32 %v5966_v12, %v5868_v8  ;;  %v6013_v17 = vadd.f32 %v5986_v13, %v5876_v9  ;;  %v5968_v18 = vpop.f32.mrb[1].mxu0  ;;  %v5988_v19 = vpop.f32.mrb[1].mxu1 }
0x12e7   : > { %v6006_v22 = vadd.f32 %v5968_v18, %v5869_v10  ;;  %v6014_v23 = vadd.f32 %v5988_v19, %v5877_v11  ;;  %v5970_v24 = vpop.f32.mrb[2].mxu0  ;;  %v5990_v25 = vpop.f32.mrb[2].mxu1 }
0x12e8   : > { %6021 = vst [vmem:[#allocation2] sm:$0xff] %v6005_v16  ;;  %6029 = vst [vmem:[#allocation2 + $0x40] sm:$0xff] %v6013_v17  ;;  %v6007_v26 = vadd.f32 %v5970_v24, %v5870_v14  ;;  %v6015_v27 = vadd.f32 %v5990_v25, %v5878_v15  ;;  %v5972_v28 = vpop.f32.mrb[3].mxu0  ;;  %v5992_v29 = vpop.f32.mrb[3].mxu1 }
0x12e9   : > { %6022 = vst [vmem:[#allocation2 + $0x8] sm:$0xff] %v6006_v22  ;;  %6030 = vst [vmem:[#allocation2 + $0x48] sm:$0xff] %v6014_v23  ;;  %v6008_v30 = vadd.f32 %v5972_v28, %v5871_v20  ;;  %v6016_v31 = vadd.f32 %v5992_v29, %v5879_v21 }
0x12ea   : > { %6023 = vst [vmem:[#allocation2 + $0x10] sm:$0xff] %v6007_v26  ;;  %6031 = vst [vmem:[#allocation2 + $0x50] sm:$0xff] %v6015_v27 }
0x12eb   : > { %6024 = vst [vmem:[#allocation2 + $0x18] sm:$0xff] %v6008_v30  ;;  %6032 = vst [vmem:[#allocation2 + $0x58] sm:$0xff] %v6016_v31 }
0x12ed   : > { %v5976_v62 = vpop.f32.mrb[4].mxu0  ;;  %v5996_v63 = vpop.f32.mrb[4].mxu1 }
0x12ee   : > { %v6009_v35 = vadd.f32 %v5976_v62, %v5872_v32  ;;  %v6017_v36 = vadd.f32 %v5996_v63, %v5880_v33  ;;  %v5978_v37 = vpop.f32.mrb[5].mxu0  ;;  %v5998_v38 = vpop.f32.mrb[5].mxu1 }
0x12ef   : > { %v6010_v41 = vadd.f32 %v5978_v37, %v5873_v60  ;;  %v6018_v42 = vadd.f32 %v5998_v38, %v5881_v61  ;;  %v5980_v43 = vpop.f32.mrb[6].mxu0  ;;  %v6000_v44 = vpop.f32.mrb[6].mxu1 }
0x12f0   : > { %6025 = vst [vmem:[#allocation2 + $0x20] sm:$0xff] %v6009_v35  ;;  %6033 = vst [vmem:[#allocation2 + $0x60] sm:$0xff] %v6017_v36  ;;  %v6011_v45 = vadd.f32 %v5980_v43, %v5874_v0  ;;  %v6019_v46 = vadd.f32 %v6000_v44, %v5882_v34  ;;  %v5982_v47 = vpop.f32.mrb[7].mxu0  ;;  %v6002_v48 = vpop.f32.mrb[7].mxu1 }
0x12f1   : > { %6026 = vst [vmem:[#allocation2 + $0x28] sm:$0xff] %v6010_v41  ;;  %6034 = vst [vmem:[#allocation2 + $0x68] sm:$0xff] %v6018_v42  ;;  %v6012_v49 = vadd.f32 %v5982_v47, %v5875_v39  ;;  %v6020_v50 = vadd.f32 %v6002_v48, %v5883_v40 }
0x12f2   : > { %6027 = vst [vmem:[#allocation2 + $0x30] sm:$0xff] %v6011_v45  ;;  %6035 = vst [vmem:[#allocation2 + $0x70] sm:$0xff] %v6019_v46 }
0x12f3   : > { %6028 = vst [vmem:[#allocation2 + $0x38] sm:$0xff] %v6012_v49  ;;  %6036 = vst [vmem:[#allocation2 + $0x78] sm:$0xff] %v6020_v50 }
0x12f4 PF: > { %v6037_v51 = vld [vmem:[#allocation2] sm:$0xff]  ;;  %s13221_s13 = sld [smem:[#allocation53_spill]]  ;;  %v6038_v52 = vld [vmem:[#allocation2 + $0x8] sm:$0xff]  ;;  %v6039_v53 = vld [vmem:[#allocation2 + $0x10] sm:$0xff]  ;;  %s6085_s9 = sshll.u32 %s10210_s21, 4  ;;  %s12909_s9 = int_to_ptr.vmem [resolvable:$true] %s6085_s9 }
0x12f5   : > { %6053 = vst [vmem:[%s10210_s21 + $0x20] sm:$0xff] %v6037_v51  ;;  %6054 = vst [vmem:[%s10210_s21 + $0x28] sm:$0xff] %v6038_v52  ;;  %v6040_v54 = vld [vmem:[#allocation2 + $0x18] sm:$0xff]  ;;  %v6045_v58 = vld [vmem:[#allocation2 + $0x40] sm:$0xff]  ;;  %s13222_s23 = sld [smem:[#allocation39_spill]]  ;;  %s13223_s16 = sld [smem:[#allocation76_spill]] }
0x12f6   : > { %6055 = vst [vmem:[%s10210_s21 + $0x50] sm:$0xff] %v6039_v53  ;;  %6056 = vst [vmem:[%s10210_s21 + $0x58] sm:$0xff] %v6040_v54  ;;  %v6046_v59 = vld [vmem:[#allocation2 + $0x48] sm:$0xff]  ;;  %v6047_v2 = vld [vmem:[#allocation2 + $0x50] sm:$0xff]  ;;  %s13225_s30 = sld [smem:[#allocation59_spill]]  ;;  %s9018_s24 = scalar_lea.vmem %s12909_s9, 6144 }
0x12f7   : > { %v6041_v55 = vld [vmem:[#allocation2 + $0x20] sm:$0xff]  ;;  %6061 = vst [vmem:[%s10210_s21 + $0xe0] sm:$0xff] %v6045_v58  ;;  %v6048_v3 = vld [vmem:[#allocation2 + $0x58] sm:$0xff]  ;;  %6062 = vst [vmem:[%s10210_s21 + $0xe8] sm:$0xff] %v6046_v59  ;;  %p9019_p0 = scmp.ne.s32.totalorder %s12909_s9, %s9018_s24  ;;  %s9292_s3 = smov [#allocation17]  }
0x12f8   : > { %v6042_v1 = vld [vmem:[#allocation2 + $0x28] sm:$0xff]  ;;  %6057 = vst [vmem:[%s10210_s21 + $0x80] sm:$0xff] %v6041_v55  ;;  %6063 = vst [vmem:[%s10210_s21 + $0x110] sm:$0xff] %v6047_v2  ;;  %v6049_v4 = vld [vmem:[#allocation2 + $0x60] sm:$0xff]  ;;  %s9022_s0 = sshll.u32 %s9292_s3, 4  ;;  %s9023_s0 = int_to_ptr.vmem [resolvable:$false] %s9022_s0 }
0x12f9   : > { %6058 = vst [vmem:[%s10210_s21 + $0x88] sm:$0xff] %v6042_v1  ;;  %v6043_v56 = vld [vmem:[#allocation2 + $0x30] sm:$0xff]  ;;  %6064 = vst [vmem:[%s10210_s21 + $0x118] sm:$0xff] %v6048_v3  ;;  %v6050_v5 = vld [vmem:[#allocation2 + $0x68] sm:$0xff]  ;;  %s9024_s22 = scalar_lea.vmem %s9023_s0, 12288  ;;  %p9025_p11 = scmp.lt.s32.totalorder %s12909_s9, %s9023_s0 }
0x12fa   : > { %s8389_s19 = smul.u32 6144, %s13221_s13  ;;  %v6044_v57 = vld [vmem:[#allocation2 + $0x38] sm:$0xff]  ;;  %6059 = vst [vmem:[%s10210_s21 + $0xb0] sm:$0xff] %v6043_v56  ;;  %v6051_v6 = vld [vmem:[#allocation2 + $0x70] sm:$0xff]  ;;  %6065 = vst [vmem:[%s10210_s21 + $0x140] sm:$0xff] %v6049_v4  ;;  %p9026_p3 = scmp.lt.s32.totalorder %s9024_s22, %s9018_s24 }
0x12fb   : > { %6060 = vst [vmem:[%s10210_s21 + $0xb8] sm:$0xff] %v6044_v57  ;;  %s13224_s7 = smov %s13223_s16  ;;  %6066 = vst [vmem:[%s10210_s21 + $0x148] sm:$0xff] %v6050_v5  ;;  %v6052_v7 = vld [vmem:[#allocation2 + $0x78] sm:$0xff]  ;;  %s13226_s29 = sand.u32 1, %s13222_s23  }
0x12fc   : > { %s12904_s17 = scalar_lea.hbm %s13223_s16, %s8389_s19  ;;  %6067 = vst [vmem:[%s10210_s21 + $0x170] sm:$0xff] %v6051_v6  ;;  %6068 = vst [vmem:[%s10210_s21 + $0x178] sm:$0xff] %v6052_v7  ;;  %s12917_s10 = scalar_lea.sflag [#allocation8], %s13226_s29 }
0x12fd   : > { %p13227_p6 = scmp.ne.s32.totalorder %s13225_s30, 0  ;;  %p9027_p10 = por %p9026_p3, %p9025_p11 }
0x12ff   : > { %p9020_p2 = pnand %p9019_p0, %p13227_p6 }
0x1301   : > { %p9021_p5 = pneg %p9020_p2 }
0x1303   : > { %p9028_p9 = pnand %p9027_p10, %p9021_p5 }
0x1305   : > { %9031 = shalt.err (!%p9028_p9)
}
0x1306   : > { %s9032_s21 = scalar_lea.hbm %s12904_s17, 6144  ;;  %s9036_s18 = scalar_lea.hbm %s13224_s7, 12288 }
0x1307   : > { %p9033_p13 = scmp.ne.s32.totalorder %s12904_s17, %s9032_s21  ;;  %p9037_p1 = scmp.lt.u32.totalorder %s12904_s17, %s13224_s7 }
0x1308   : > { %p9038_p8 = scmp.lt.u32.totalorder %s9036_s18, %s9032_s21  ;;  %p9040_p0 = scmp.lt.u32.totalorder %s9032_s21, %s12904_s17 }
0x1309   : > { %p9034_p7 = pnand %p9033_p13, %p13227_p6 }
0x130a   : > { %p9039_p12 = por %p9038_p8, %p9037_p1 }
0x130b   : > { %p9035_p4 = pneg %p9034_p7 }
0x130c   : > { %p9041_p2 = por %p9040_p0, %p9039_p12 }
0x130e   : > { %p9042_p5 = pnand %p9041_p2, %p9035_p4 }
0x1310   : > { %9045 = shalt.err (!%p9042_p5)
}
0x1311   : > { %s9293_s26 = smov 768   ;;  %s9294_s15 = smov 48  }
0x1312   : > { %8414 = dma.vmem_to_hbm [thread:$0]  (%p13227_p6), %s12909_s9, 6144, %s12904_s17, %s12917_s10, %s9293_s26, %s9293_s26, %s9294_s15  }
0x1313 PF: > { %s13228_s12 = sld [smem:[#allocation38_spill]]  ;;  %s13229_s13 = sld [smem:[#allocation60_spill]] }
0x1314   : > { %p13231_p3 = scmp.ge.s32.totalorder %s9266_s5, 2 }
0x1319   : > { %s6100_s19 = sand.u32 1, %s13228_s12   ;;  %p13230_p11 = scmp.ne.s32.totalorder %s13229_s13, 0 }
0x131a   : > { %s6101_s23 = scalar_lea.sflag [#allocation8], %s6100_s19 }
0x131b   : > { %p8448_p10 = pnand %p13231_p3, %p13230_p11 }
0x131d   : > { %9169 = dma.done.wait (!%p8448_p10), %s6101_s23, 6144  }
0x131e   : > { %9171 = vsyncadd (!%p8448_p10), %s6101_s23, 4294961152  ;;  %s45_s5 = sadd.s32 1, %s9266_s5   ;;  %s13234_s1 = sld [smem:[#allocation39_spill]] }
0x131f   : > { %p12947_p9 = scmp.ge.s32.totalorder %s45_s5, 4   ;;  %s13235_s22 = sld [smem:[#allocation40_spill]] }
0x1320   : > { %s13236_s23 = sld [smem:[#allocation58_spill]]  ;;  %s13237_s24 = sld [smem:[#allocation42_spill]] }
0x1321   : > { %s13238_s25 = sld [smem:[#allocation43_spill]]  ;;  %s13239_s9 = sld [smem:[#allocation45_spill]] }
0x1322   : > { %s13240_s28 = sld [smem:[#allocation46_spill]]  ;;  %s13241_s29 = sld [smem:[#allocation67_spill]] }
0x1323   : > { %s13242_s30 = sld [smem:[#allocation47_spill]]  ;;  %s13243_s11 = sld [smem:[#allocation48_spill]] }
0x1324   : > { %s13244_s12 = sld [smem:[#allocation63_spill]]  ;;  %s13246_s15 = sld [smem:[#allocation66_spill]] }
0x1325   : > { %s13245_s16 = sld [smem:[#allocation49_spill]]  ;;  %s13247_s17 = sld [smem:[#allocation50_spill]] }
0x1326   : > { %s13248_s10 = sld [smem:[#allocation51_spill]]  ;;  %s13249_s18 = sld [smem:[#allocation61_spill]] }
0x1327   : > { %s13250_s3 = sld [smem:[#allocation52_spill]]  ;;  %s13251_s21 = sld [smem:[#allocation65_spill]] }
0x1328   : > { %s13252_s26 = smov %s13288_s27  ;;  %s13253_s0 = sld [smem:[#allocation54_spill]] }
0x1329   : > { %s13254_s27 = smov %s13239_s9  ;;  %s13255_s6 = sld [smem:[#allocation56_spill]] }
0x132a   : > { %s13256_s13 = smov %s9226_s14  ;;  %s13260_s19 = smov %s9250_s20 }
0x132b   : > { %s13257_s14 = smov %s13245_s16  ;;  %s13258_s16 = smov %s13247_s17 }
0x132c   : > { %s13259_s17 = smov %s13248_s10  ;;  %44 = sbr.rel (!%p12947_p9) target bundleno = 49 (0x31), region = 212 }
0x132d   : > { %s13261_s20 = smov %s13250_s3 }
0x132f   : > { %s13262_s10 = smov %s13255_s6 }
0x1333   :  { %6106 = vsyncpa [#allocation7], 1 }
0x1334   :  { %6108 = vsyncpa [#allocation7 + $0x1], 1 }
0x1335   :  { %6109 = vsyncpa [#allocation10], 1 }
0x1336   :  { %6111 = vsyncpa [#allocation10 + $0x1], 1 }
0x1337   :  { %6112 = vsyncpa [#allocation13], 1 }
0x1338   :  { %6114 = vsyncpa [#allocation13 + $0x1], 1 }
0x1339   :  { %6115 = vsyncpa [#allocation16], 1 }
0x133a   :  { %6117 = vsyncpa [#allocation16 + $0x1], 1 }
0x133b   :  { %6118 = vsyncpa [#allocation8], 1 }
0x133c   :  { %6120 = vsyncpa [#allocation8 + $0x1], 1 }

</bundles_post_ra>
